<compile_context>
chip_gen: v7x
topology: tpu7x:2x2x1
jax: 0.10.0
libtpu: 0.0.40
codegen_flags: <defaults>
</compile_context>

<pallas_src>
import functools

import numpy as np
import jax
import jax.numpy as jnp
from jax import lax
from jax.experimental import pallas as pl
from jax.experimental.pallas import tpu as pltpu

BN_EPS = 1e-5
K = 4  # conv-transpose kernel size (stride 2, pad 1 throughout)

_VMEM = pl.BlockSpec(memory_space=pltpu.MemorySpace.VMEM)

# Polyphase tap table for ConvTranspose2d(k=4, s=2, p=1):
#   output parity 0: input offset  0 -> kernel idx 1, offset -1 -> kernel idx 3
#   output parity 1: input offset  0 -> kernel idx 2, offset +1 -> kernel idx 0
_TAPS = {0: ((0, 1), (-1, 3)), 1: ((0, 2), (1, 0))}

# (H_in, W_in, C_in, C_out) per ConvTranspose layer.
_LAYERS = ((2, 2, 128, 64), (4, 4, 64, 32), (8, 8, 32, 16), (16, 16, 16, 1))


# ----------------------------- in-kernel helpers -----------------------------

def _shift_rows(a, s, n_rows, n_cols):
    """T[i, :] = a[i + s, :] if 0 <= i + s < n_rows else 0 (s is a static int)."""
    if s == 0:
        return a
    z = jnp.zeros((abs(s), n_cols), a.dtype)
    if s > 0:
        return jnp.concatenate([a[s:, :], z], axis=0)
    return jnp.concatenate([z, a[:n_rows + s, :]], axis=0)


def _convt_phases(a, w_ref, h, w):
    """Polyphase ConvTranspose2d(k=4, s=2, p=1), no bias / activation.

    a:     (h*w, cin) f32, channels-last, spatial rows in row-major (h, w) order.
    w_ref: (16, cin, cout) bf16 ref; tap t = kh*4 + kw holds weight[:, :, kh, kw].
    Returns 4 phase slabs [(0,0), (0,1), (1,0), (1,1)], each (h*w, cout) f32.
    """
    n, cin = a.shape
    col = lax.broadcasted_iota(jnp.int32, (n, 1), 0) % w
    shifted = {}
    for dh in (-1, 0, 1):
        for dw in (-1, 0, 1):
            t = _shift_rows(a, dh * w + dw, n, cin)
            if dw == 1:        # drop neighbours that wrap past the right edge
                t = jnp.where(col < (w - 1), t, 0.0)
            elif dw == -1:     # drop neighbours that wrap past the left edge
                t = jnp.where(col >= 1, t, 0.0)
            shifted[(dh, dw)] = t.astype(jnp.bfloat16)   # MXU operands in bf16
    outs = []
    for pr in (0, 1):
        for pc in (0, 1):
            acc = None
            for dh, kh in _TAPS[pr]:
                for dw, kw in _TAPS[pc]:
                    part = jnp.dot(shifted[(dh, dw)], w_ref[kh * K + kw],
                                   preferred_element_type=jnp.float32)
                    acc = part if acc is None else acc + part
            outs.append(acc)
    return outs


# ------------------------------- fused kernel --------------------------------

def _generator_kernel(z_ref, lw_ref, lb_ref,
                      w0_ref, b0_ref, g0_ref, be0_ref, p0_ref,
                      w1_ref, b1_ref, g1_ref, be1_ref, p1_ref,
                      w2_ref, b2_ref, g2_ref, be2_ref, p2_ref,
                      w3_ref, b3_ref,
                      out_ref):
    # ---- MLP: Linear(z_dim, 512) + ReLU.  The linear weight columns are
    #      pre-permuted so the (1, 512) result is directly a (4, 128) channels-last
    #      slab of the 2x2 feature map (no NCHW transpose needed). ----
    hvec = jnp.dot(z_ref[...].astype(jnp.bfloat16), lw_ref[...],
                   preferred_element_type=jnp.float32)
    hvec = jnp.maximum(hvec + lb_ref[...], 0.0)                         # (1, 512)
    a = jnp.concatenate([hvec[:, 128 * s:128 * (s + 1)] for s in range(4)],
                        axis=0)                                         # (4, 128)

    # ---- three ConvT + ReLU + BatchNorm blocks ----
    blocks = ((0, w0_ref, b0_ref, g0_ref, be0_ref, p0_ref),
              (1, w1_ref, b1_ref, g1_ref, be1_ref, p1_ref),
              (2, w2_ref, b2_ref, g2_ref, be2_ref, p2_ref))
    for i, w_r, b_r, g_r, be_r, p_r in blocks:
        hh, ww, _, _ = _LAYERS[i]
        ys = _convt_phases(a, w_r, hh, ww)
        y = jnp.concatenate(ys, axis=0) + b_r[...]                      # (4*h*w, cout)
        y = jnp.maximum(y, 0.0)                                         # ReLU
        # BatchNorm2d (training mode): biased stats over all N*H*W positions.
        mean = jnp.mean(y, axis=0, keepdims=True)
        var = jnp.maximum(
            jnp.mean(y * y, axis=0, keepdims=True) - mean * mean, 0.0)
        y = g_r[...] * (y - mean) * lax.rsqrt(var + BN_EPS) + be_r[...]
        # Exact 0/1 permutation: phase-major rows -> spatial row-major rows (MXU).
        a = jnp.dot(p_r[...], y.astype(jnp.bfloat16),
                    preferred_element_type=jnp.float32)                 # (4*h*w, cout)

    # ---- last ConvT(16 -> out_channels) + Tanh; phases stored as lane columns ----
    hh, ww, _, _ = _LAYERS[3]
    cout = w3_ref.shape[2]
    ys = _convt_phases(a, w3_ref, hh, ww)
    outs = [jnp.tanh(y + b3_ref[...]) for y in ys]                      # 4 x (256, cout)
    out_ref[...] = jnp.concatenate(outs, axis=1)                        # (256, 4*cout)


# ------------------------------ host-side glue --------------------------------

@functools.lru_cache(maxsize=None)
def _phase_perm_np(h, w):
    """(4hw, 4hw) 0/1 matrix: phase-major rows [p, a, b] -> row-major (oh, ow) rows."""
    idx = np.arange(4 * h * w)
    oh, ow = idx // (2 * w), idx % (2 * w)
    src = ((oh % 2) * 2 + (ow % 2)) * (h * w) + (oh // 2) * w + (ow // 2)
    p = np.zeros((4 * h * w, 4 * h * w), np.float32)
    p[idx, src] = 1.0
    return p


def _prepare_inputs(params):
    """Re-pack PyTorch-layout parameters into the kernel's MXU-friendly layouts."""
    # Permute linear output columns: column s*128 + c <- feature (c, s//2, s%2) of the
    # (128, 2, 2) view, so the MLP output is already a (H*W, C) channels-last slab.
    perm = (np.arange(128)[None, :] * 4 + np.arange(4)[:, None]).reshape(-1)
    inputs = [params["lin_w"][:, perm].astype(jnp.bfloat16),
              params["lin_b"][:, perm]]
    for i, (h, w, _, _) in enumerate(_LAYERS):
        wconv = params[f"conv{i}_w"]                      # (cin, cout, 4, 4)
        cin, cout = wconv.shape[0], wconv.shape[1]
        wt = jnp.transpose(wconv, (2, 3, 0, 1)).reshape(K * K, cin, cout)
        inputs.append(wt.astype(jnp.bfloat16))
        inputs.append(params[f"conv{i}_b"])
        if i < 3:
            inputs.append(params[f"bn{i}_g"])
            inputs.append(params[f"bn{i}_b"])
            inputs.append(jnp.asarray(_phase_perm_np(h, w), dtype=jnp.bfloat16))
    return inputs


def generator_forward(params, z):
    """z: (1, z_dim) float32 -> image (1, out_channels, 32, 32). One fused Pallas call."""
    inputs = _prepare_inputs(params)
    cout = params["conv3_w"].shape[1]
    y = pl.pallas_call(
        _generator_kernel,
        out_shape=jax.ShapeDtypeStruct((16 * 16, 4 * cout), jnp.float32),
        in_specs=[_VMEM] * (1 + len(inputs)),
        out_specs=_VMEM,
    )(z, *inputs)
    # Tiny (4 KiB) phase -> NCHW rearrangement of the final image (outside the kernel).
    img = (y.reshape(16, 16, 2, 2, cout)
             .transpose(4, 0, 2, 1, 3)
             .reshape(cout, 32, 32))
    return img[None]


def wgan_gp_forward(params, z):
    # WGAN_GP.forward() == self.Generator(1)
    return generator_forward(params, z)


# --------------------------- parameter initialization -------------------------

def init_params(key, z_dim=100, out_channels=1):
    ks = jax.random.split(key, 16)
    p = {}
    hidden = 8 * 16 * 2 * 2  # 512
    # Linear: kaiming_normal weight (fan_in = z_dim), zero bias.
    p["lin_w"] = (jax.random.normal(ks[0], (z_dim, hidden), jnp.float32)
                  * jnp.sqrt(2.0 / z_dim))
    p["lin_b"] = jnp.zeros((1, hidden), jnp.float32)

    chans = [8 * 16, 4 * 16, 2 * 16, 16, out_channels]  # 128, 64, 32, 16, 1
    for i in range(4):
        cin, cout = chans[i], chans[i + 1]
        # ConvTranspose2d weight (C_in, C_out, kH, kW) ~ N(0, 0.02); default-ish bias.
        p[f"conv{i}_w"] = 0.02 * jax.random.normal(
            ks[1 + 3 * i], (cin, cout, K, K), jnp.float32)
        bound = 1.0 / float(np.sqrt(cin * K * K))
        p[f"conv{i}_b"] = jax.random.uniform(
            ks[2 + 3 * i], (1, cout), jnp.float32, -bound, bound)
        if i < 3:  # BatchNorm2d after the first three blocks
            p[f"bn{i}_g"] = (1.0 + 0.02 * jax.random.normal(
                ks[3 + 3 * i], (1, cout), jnp.float32))
            p[f"bn{i}_b"] = jnp.zeros((1, cout), jnp.float32)
    return p


if __name__ == "__main__":
    key = jax.random.PRNGKey(0)
    pkey, zkey = jax.random.split(key)
    params = init_params(pkey, z_dim=100, out_channels=1)
    # Generator.sample(1): z ~ N(0, 1) of shape (1, z_dim)
    z = jax.random.normal(zkey, (1, 100), jnp.float32)

    out = jax.jit(wgan_gp_forward)(params, z)
    out = jax.block_until_ready(out)
    assert out.shape == (1, 1, 32, 32), out.shape
    assert bool(jnp.all(jnp.isfinite(out)))
    assert bool(jnp.all(jnp.abs(out) <= 1.0))  # tanh output range
    print("KERNEL_OK")
</pallas_src>

<mosaic_0001>
module attributes {stable_mosaic.version = 11 : i64} {
  func.func @_generator_kernel(%arg0: memref<1x100xf32, #tpu.memory_space<vmem>>, %arg1: memref<100x512xbf16, #tpu.memory_space<vmem>>, %arg2: memref<1x512xf32, #tpu.memory_space<vmem>>, %arg3: memref<16x128x64xbf16, #tpu.memory_space<vmem>>, %arg4: memref<1x64xf32, #tpu.memory_space<vmem>>, %arg5: memref<1x64xf32, #tpu.memory_space<vmem>>, %arg6: memref<1x64xf32, #tpu.memory_space<vmem>>, %arg7: memref<16x16xbf16, #tpu.memory_space<vmem>>, %arg8: memref<16x64x32xbf16, #tpu.memory_space<vmem>>, %arg9: memref<1x32xf32, #tpu.memory_space<vmem>>, %arg10: memref<1x32xf32, #tpu.memory_space<vmem>>, %arg11: memref<1x32xf32, #tpu.memory_space<vmem>>, %arg12: memref<64x64xbf16, #tpu.memory_space<vmem>>, %arg13: memref<16x32x16xbf16, #tpu.memory_space<vmem>>, %arg14: memref<1x16xf32, #tpu.memory_space<vmem>>, %arg15: memref<1x16xf32, #tpu.memory_space<vmem>>, %arg16: memref<1x16xf32, #tpu.memory_space<vmem>>, %arg17: memref<256x256xbf16, #tpu.memory_space<vmem>>, %arg18: memref<16x16x1xbf16, #tpu.memory_space<vmem>>, %arg19: memref<1x1xf32, #tpu.memory_space<vmem>>, %arg20: memref<256x4xf32, #tpu.memory_space<vmem>>) attributes {dimension_semantics = [], scalar_prefetch = 0 : i64, scratch_operands = 0 : i64, tpu.core_type = #tpu.core_type<tc>} {
    %c0 = arith.constant 0 : index
    %c0_0 = arith.constant 0 : index
    %0 = vector.load %arg0[%c0, %c0_0] : memref<1x100xf32, #tpu.memory_space<vmem>>, vector<1x100xf32>
    %1 = arith.truncf %0 : vector<1x100xf32> to vector<1x100xbf16>
    %c0_1 = arith.constant 0 : index
    %c0_2 = arith.constant 0 : index
    %2 = vector.load %arg1[%c0_1, %c0_2] : memref<100x512xbf16, #tpu.memory_space<vmem>>, vector<100x512xbf16>
    %cst = arith.constant dense<0.000000e+00> : vector<1x512xf32>
    %3 = tpu.matmul %1, %2, %cst {dimension_numbers = #tpu.dot_dimension_numbers<[1], [0], [0], [1], [0, 0, 1, 1], [], []>} : vector<1x100xbf16>, vector<100x512xbf16>, vector<1x512xf32> -> vector<1x512xf32>
    %c0_3 = arith.constant 0 : index
    %c0_4 = arith.constant 0 : index
    %4 = vector.load %arg2[%c0_3, %c0_4] : memref<1x512xf32, #tpu.memory_space<vmem>>, vector<1x512xf32>
    %5 = arith.addf %3, %4 : vector<1x512xf32>
    %cst_5 = arith.constant 0.000000e+00 : f32
    %6 = vector.broadcast %cst_5 : f32 to vector<1x512xf32>
    %7 = arith.maximumf %5, %6 : vector<1x512xf32>
    %8 = vector.extract_strided_slice %7 {offsets = [0, 0], sizes = [1, 128], strides = [1, 1]} : vector<1x512xf32> to vector<1x128xf32>
    %9 = vector.extract_strided_slice %7 {offsets = [0, 128], sizes = [1, 128], strides = [1, 1]} : vector<1x512xf32> to vector<1x128xf32>
    %10 = vector.extract_strided_slice %7 {offsets = [0, 256], sizes = [1, 128], strides = [1, 1]} : vector<1x512xf32> to vector<1x128xf32>
    %11 = vector.extract_strided_slice %7 {offsets = [0, 384], sizes = [1, 128], strides = [1, 1]} : vector<1x512xf32> to vector<1x128xf32>
    %12 = tpu.concatenate %8, %9, %10, %11 in 0 : vector<1x128xf32>, vector<1x128xf32>, vector<1x128xf32>, vector<1x128xf32> -> vector<4x128xf32>
    %13 = tpu.iota {dimensions = array<i32: 0>} : vector<4x1xi32>
    %c2_i32 = arith.constant 2 : i32
    %c0_i32 = arith.constant 0 : i32
    %14 = arith.cmpi eq, %c2_i32, %c0_i32 : i32
    %c1_i32 = arith.constant 1 : i32
    %15 = arith.select %14, %c1_i32, %c2_i32 : i32
    %16 = vector.broadcast %15 : i32 to vector<4x1xi32>
    %17 = arith.remsi %13, %16 : vector<4x1xi32>
    %c0_i32_6 = arith.constant 0 : i32
    %18 = vector.broadcast %c0_i32_6 : i32 to vector<4x1xi32>
    %19 = arith.cmpi ne, %17, %18 : vector<4x1xi32>
    %c0_i32_7 = arith.constant 0 : i32
    %20 = vector.broadcast %c0_i32_7 : i32 to vector<4x1xi32>
    %21 = arith.cmpi slt, %17, %20 : vector<4x1xi32>
    %c0_i32_8 = arith.constant 0 : i32
    %22 = arith.cmpi slt, %15, %c0_i32_8 : i32
    %23 = vector.broadcast %22 : i1 to vector<4x1xi1>
    %24 = vector.broadcast %23 : vector<4x1xi1> to vector<4x1xi1>
    %25 = arith.xori %21, %24 : vector<4x1xi1>
    %26 = arith.andi %25, %19 : vector<4x1xi1>
    %27 = vector.broadcast %15 : i32 to vector<4x1xi32>
    %28 = arith.addi %17, %27 : vector<4x1xi32>
    %29 = arith.select %26, %28, %17 : vector<4x1xi1>, vector<4x1xi32>
    %cst_9 = arith.constant 0.000000e+00 : f32
    %30 = vector.broadcast %cst_9 : f32 to vector<3x128xf32>
    %31 = vector.extract_strided_slice %12 {offsets = [0, 0], sizes = [1, 128], strides = [1, 1]} : vector<4x128xf32> to vector<1x128xf32>
    %32 = tpu.concatenate %30, %31 in 0 : vector<3x128xf32>, vector<1x128xf32> -> vector<4x128xf32>
    %c1_i32_10 = arith.constant 1 : i32
    %33 = vector.broadcast %c1_i32_10 : i32 to vector<4x1xi32>
    %34 = arith.cmpi sge, %29, %33 : vector<4x1xi32>
    %cst_11 = arith.constant 0.000000e+00 : f32
    %35 = vector.shape_cast %34 : vector<4x1xi1> to vector<4x1xi1>
    %36 = vector.broadcast %35 : vector<4x1xi1> to vector<4x128xi1>
    %37 = vector.broadcast %cst_11 : f32 to vector<4x128xf32>
    %38 = arith.select %36, %32, %37 : vector<4x128xi1>, vector<4x128xf32>
    %39 = arith.truncf %38 : vector<4x128xf32> to vector<4x128xbf16>
    %cst_12 = arith.constant 0.000000e+00 : f32
    %40 = vector.broadcast %cst_12 : f32 to vector<2x128xf32>
    %41 = vector.extract_strided_slice %12 {offsets = [0, 0], sizes = [2, 128], strides = [1, 1]} : vector<4x128xf32> to vector<2x128xf32>
    %42 = tpu.concatenate %40, %41 in 0 : vector<2x128xf32>, vector<2x128xf32> -> vector<4x128xf32>
    %43 = arith.truncf %42 : vector<4x128xf32> to vector<4x128xbf16>
    %cst_13 = arith.constant 0.000000e+00 : f32
    %44 = vector.broadcast %cst_13 : f32 to vector<1x128xf32>
    %45 = vector.extract_strided_slice %12 {offsets = [0, 0], sizes = [3, 128], strides = [1, 1]} : vector<4x128xf32> to vector<3x128xf32>
    %46 = tpu.concatenate %44, %45 in 0 : vector<1x128xf32>, vector<3x128xf32> -> vector<4x128xf32>
    %c1_i32_14 = arith.constant 1 : i32
    %47 = vector.broadcast %c1_i32_14 : i32 to vector<4x1xi32>
    %48 = arith.cmpi slt, %29, %47 : vector<4x1xi32>
    %cst_15 = arith.constant 0.000000e+00 : f32
    %49 = vector.shape_cast %48 : vector<4x1xi1> to vector<4x1xi1>
    %50 = vector.broadcast %49 : vector<4x1xi1> to vector<4x128xi1>
    %51 = vector.broadcast %cst_15 : f32 to vector<4x128xf32>
    %52 = arith.select %50, %46, %51 : vector<4x128xi1>, vector<4x128xf32>
    %53 = arith.truncf %52 : vector<4x128xf32> to vector<4x128xbf16>
    %cst_16 = arith.constant 0.000000e+00 : f32
    %54 = vector.broadcast %cst_16 : f32 to vector<1x128xf32>
    %55 = vector.extract_strided_slice %12 {offsets = [0, 0], sizes = [3, 128], strides = [1, 1]} : vector<4x128xf32> to vector<3x128xf32>
    %56 = tpu.concatenate %54, %55 in 0 : vector<1x128xf32>, vector<3x128xf32> -> vector<4x128xf32>
    %c1_i32_17 = arith.constant 1 : i32
    %57 = vector.broadcast %c1_i32_17 : i32 to vector<4x1xi32>
    %58 = arith.cmpi sge, %29, %57 : vector<4x1xi32>
    %cst_18 = arith.constant 0.000000e+00 : f32
    %59 = vector.shape_cast %58 : vector<4x1xi1> to vector<4x1xi1>
    %60 = vector.broadcast %59 : vector<4x1xi1> to vector<4x128xi1>
    %61 = vector.broadcast %cst_18 : f32 to vector<4x128xf32>
    %62 = arith.select %60, %56, %61 : vector<4x128xi1>, vector<4x128xf32>
    %63 = arith.truncf %62 : vector<4x128xf32> to vector<4x128xbf16>
    %64 = arith.truncf %12 : vector<4x128xf32> to vector<4x128xbf16>
    %cst_19 = arith.constant 0.000000e+00 : f32
    %65 = vector.broadcast %cst_19 : f32 to vector<1x128xf32>
    %66 = vector.extract_strided_slice %12 {offsets = [1, 0], sizes = [3, 128], strides = [1, 1]} : vector<4x128xf32> to vector<3x128xf32>
    %67 = tpu.concatenate %66, %65 in 0 : vector<3x128xf32>, vector<1x128xf32> -> vector<4x128xf32>
    %c1_i32_20 = arith.constant 1 : i32
    %68 = vector.broadcast %c1_i32_20 : i32 to vector<4x1xi32>
    %69 = arith.cmpi slt, %29, %68 : vector<4x1xi32>
    %cst_21 = arith.constant 0.000000e+00 : f32
    %70 = vector.shape_cast %69 : vector<4x1xi1> to vector<4x1xi1>
    %71 = vector.broadcast %70 : vector<4x1xi1> to vector<4x128xi1>
    %72 = vector.broadcast %cst_21 : f32 to vector<4x128xf32>
    %73 = arith.select %71, %67, %72 : vector<4x128xi1>, vector<4x128xf32>
    %74 = arith.truncf %73 : vector<4x128xf32> to vector<4x128xbf16>
    %cst_22 = arith.constant 0.000000e+00 : f32
    %75 = vector.broadcast %cst_22 : f32 to vector<1x128xf32>
    %76 = vector.extract_strided_slice %12 {offsets = [1, 0], sizes = [3, 128], strides = [1, 1]} : vector<4x128xf32> to vector<3x128xf32>
    %77 = tpu.concatenate %76, %75 in 0 : vector<3x128xf32>, vector<1x128xf32> -> vector<4x128xf32>
    %c1_i32_23 = arith.constant 1 : i32
    %78 = vector.broadcast %c1_i32_23 : i32 to vector<4x1xi32>
    %79 = arith.cmpi sge, %29, %78 : vector<4x1xi32>
    %cst_24 = arith.constant 0.000000e+00 : f32
    %80 = vector.shape_cast %79 : vector<4x1xi1> to vector<4x1xi1>
    %81 = vector.broadcast %80 : vector<4x1xi1> to vector<4x128xi1>
    %82 = vector.broadcast %cst_24 : f32 to vector<4x128xf32>
    %83 = arith.select %81, %77, %82 : vector<4x128xi1>, vector<4x128xf32>
    %84 = arith.truncf %83 : vector<4x128xf32> to vector<4x128xbf16>
    %cst_25 = arith.constant 0.000000e+00 : f32
    %85 = vector.broadcast %cst_25 : f32 to vector<2x128xf32>
    %86 = vector.extract_strided_slice %12 {offsets = [2, 0], sizes = [2, 128], strides = [1, 1]} : vector<4x128xf32> to vector<2x128xf32>
    %87 = tpu.concatenate %86, %85 in 0 : vector<2x128xf32>, vector<2x128xf32> -> vector<4x128xf32>
    %88 = arith.truncf %87 : vector<4x128xf32> to vector<4x128xbf16>
    %cst_26 = arith.constant 0.000000e+00 : f32
    %89 = vector.broadcast %cst_26 : f32 to vector<3x128xf32>
    %90 = vector.extract_strided_slice %12 {offsets = [3, 0], sizes = [1, 128], strides = [1, 1]} : vector<4x128xf32> to vector<1x128xf32>
    %91 = tpu.concatenate %90, %89 in 0 : vector<1x128xf32>, vector<3x128xf32> -> vector<4x128xf32>
    %c1_i32_27 = arith.constant 1 : i32
    %92 = vector.broadcast %c1_i32_27 : i32 to vector<4x1xi32>
    %93 = arith.cmpi slt, %29, %92 : vector<4x1xi32>
    %cst_28 = arith.constant 0.000000e+00 : f32
    %94 = vector.shape_cast %93 : vector<4x1xi1> to vector<4x1xi1>
    %95 = vector.broadcast %94 : vector<4x1xi1> to vector<4x128xi1>
    %96 = vector.broadcast %cst_28 : f32 to vector<4x128xf32>
    %97 = arith.select %95, %91, %96 : vector<4x128xi1>, vector<4x128xf32>
    %98 = arith.truncf %97 : vector<4x128xf32> to vector<4x128xbf16>
    %c5 = arith.constant 5 : index
    %c0_29 = arith.constant 0 : index
    %c0_30 = arith.constant 0 : index
    %99 = vector.load %arg3[%c5, %c0_29, %c0_30] : memref<16x128x64xbf16, #tpu.memory_space<vmem>>, vector<1x128x64xbf16>
    %100 = vector.shape_cast %99 : vector<1x128x64xbf16> to vector<128x64xbf16>
    %cst_31 = arith.constant dense<0.000000e+00> : vector<4x64xf32>
    %101 = tpu.matmul %64, %100, %cst_31 {dimension_numbers = #tpu.dot_dimension_numbers<[1], [0], [0], [1], [0, 0, 1, 1], [], []>} : vector<4x128xbf16>, vector<128x64xbf16>, vector<4x64xf32> -> vector<4x64xf32>
    %c7 = arith.constant 7 : index
    %c0_32 = arith.constant 0 : index
    %c0_33 = arith.constant 0 : index
    %102 = vector.load %arg3[%c7, %c0_32, %c0_33] : memref<16x128x64xbf16, #tpu.memory_space<vmem>>, vector<1x128x64xbf16>
    %103 = vector.shape_cast %102 : vector<1x128x64xbf16> to vector<128x64xbf16>
    %cst_34 = arith.constant dense<0.000000e+00> : vector<4x64xf32>
    %104 = tpu.matmul %63, %103, %cst_34 {dimension_numbers = #tpu.dot_dimension_numbers<[1], [0], [0], [1], [0, 0, 1, 1], [], []>} : vector<4x128xbf16>, vector<128x64xbf16>, vector<4x64xf32> -> vector<4x64xf32>
    %105 = arith.addf %101, %104 : vector<4x64xf32>
    %c13 = arith.constant 13 : index
    %c0_35 = arith.constant 0 : index
    %c0_36 = arith.constant 0 : index
    %106 = vector.load %arg3[%c13, %c0_35, %c0_36] : memref<16x128x64xbf16, #tpu.memory_space<vmem>>, vector<1x128x64xbf16>
    %107 = vector.shape_cast %106 : vector<1x128x64xbf16> to vector<128x64xbf16>
    %cst_37 = arith.constant dense<0.000000e+00> : vector<4x64xf32>
    %108 = tpu.matmul %43, %107, %cst_37 {dimension_numbers = #tpu.dot_dimension_numbers<[1], [0], [0], [1], [0, 0, 1, 1], [], []>} : vector<4x128xbf16>, vector<128x64xbf16>, vector<4x64xf32> -> vector<4x64xf32>
    %109 = arith.addf %105, %108 : vector<4x64xf32>
    %c15 = arith.constant 15 : index
    %c0_38 = arith.constant 0 : index
    %c0_39 = arith.constant 0 : index
    %110 = vector.load %arg3[%c15, %c0_38, %c0_39] : memref<16x128x64xbf16, #tpu.memory_space<vmem>>, vector<1x128x64xbf16>
    %111 = vector.shape_cast %110 : vector<1x128x64xbf16> to vector<128x64xbf16>
    %cst_40 = arith.constant dense<0.000000e+00> : vector<4x64xf32>
    %112 = tpu.matmul %39, %111, %cst_40 {dimension_numbers = #tpu.dot_dimension_numbers<[1], [0], [0], [1], [0, 0, 1, 1], [], []>} : vector<4x128xbf16>, vector<128x64xbf16>, vector<4x64xf32> -> vector<4x64xf32>
    %113 = arith.addf %109, %112 : vector<4x64xf32>
    %c6 = arith.constant 6 : index
    %c0_41 = arith.constant 0 : index
    %c0_42 = arith.constant 0 : index
    %114 = vector.load %arg3[%c6, %c0_41, %c0_42] : memref<16x128x64xbf16, #tpu.memory_space<vmem>>, vector<1x128x64xbf16>
    %115 = vector.shape_cast %114 : vector<1x128x64xbf16> to vector<128x64xbf16>
    %cst_43 = arith.constant dense<0.000000e+00> : vector<4x64xf32>
    %116 = tpu.matmul %64, %115, %cst_43 {dimension_numbers = #tpu.dot_dimension_numbers<[1], [0], [0], [1], [0, 0, 1, 1], [], []>} : vector<4x128xbf16>, vector<128x64xbf16>, vector<4x64xf32> -> vector<4x64xf32>
    %c4 = arith.constant 4 : index
    %c0_44 = arith.constant 0 : index
    %c0_45 = arith.constant 0 : index
    %117 = vector.load %arg3[%c4, %c0_44, %c0_45] : memref<16x128x64xbf16, #tpu.memory_space<vmem>>, vector<1x128x64xbf16>
    %118 = vector.shape_cast %117 : vector<1x128x64xbf16> to vector<128x64xbf16>
    %cst_46 = arith.constant dense<0.000000e+00> : vector<4x64xf32>
    %119 = tpu.matmul %74, %118, %cst_46 {dimension_numbers = #tpu.dot_dimension_numbers<[1], [0], [0], [1], [0, 0, 1, 1], [], []>} : vector<4x128xbf16>, vector<128x64xbf16>, vector<4x64xf32> -> vector<4x64xf32>
    %120 = arith.addf %116, %119 : vector<4x64xf32>
    %c14 = arith.constant 14 : index
    %c0_47 = arith.constant 0 : index
    %c0_48 = arith.constant 0 : index
    %121 = vector.load %arg3[%c14, %c0_47, %c0_48] : memref<16x128x64xbf16, #tpu.memory_space<vmem>>, vector<1x128x64xbf16>
    %122 = vector.shape_cast %121 : vector<1x128x64xbf16> to vector<128x64xbf16>
    %cst_49 = arith.constant dense<0.000000e+00> : vector<4x64xf32>
    %123 = tpu.matmul %43, %122, %cst_49 {dimension_numbers = #tpu.dot_dimension_numbers<[1], [0], [0], [1], [0, 0, 1, 1], [], []>} : vector<4x128xbf16>, vector<128x64xbf16>, vector<4x64xf32> -> vector<4x64xf32>
    %124 = arith.addf %120, %123 : vector<4x64xf32>
    %c12 = arith.constant 12 : index
    %c0_50 = arith.constant 0 : index
    %c0_51 = arith.constant 0 : index
    %125 = vector.load %arg3[%c12, %c0_50, %c0_51] : memref<16x128x64xbf16, #tpu.memory_space<vmem>>, vector<1x128x64xbf16>
    %126 = vector.shape_cast %125 : vector<1x128x64xbf16> to vector<128x64xbf16>
    %cst_52 = arith.constant dense<0.000000e+00> : vector<4x64xf32>
    %127 = tpu.matmul %53, %126, %cst_52 {dimension_numbers = #tpu.dot_dimension_numbers<[1], [0], [0], [1], [0, 0, 1, 1], [], []>} : vector<4x128xbf16>, vector<128x64xbf16>, vector<4x64xf32> -> vector<4x64xf32>
    %128 = arith.addf %124, %127 : vector<4x64xf32>
    %c9 = arith.constant 9 : index
    %c0_53 = arith.constant 0 : index
    %c0_54 = arith.constant 0 : index
    %129 = vector.load %arg3[%c9, %c0_53, %c0_54] : memref<16x128x64xbf16, #tpu.memory_space<vmem>>, vector<1x128x64xbf16>
    %130 = vector.shape_cast %129 : vector<1x128x64xbf16> to vector<128x64xbf16>
    %cst_55 = arith.constant dense<0.000000e+00> : vector<4x64xf32>
    %131 = tpu.matmul %64, %130, %cst_55 {dimension_numbers = #tpu.dot_dimension_numbers<[1], [0], [0], [1], [0, 0, 1, 1], [], []>} : vector<4x128xbf16>, vector<128x64xbf16>, vector<4x64xf32> -> vector<4x64xf32>
    %c11 = arith.constant 11 : index
    %c0_56 = arith.constant 0 : index
    %c0_57 = arith.constant 0 : index
    %132 = vector.load %arg3[%c11, %c0_56, %c0_57] : memref<16x128x64xbf16, #tpu.memory_space<vmem>>, vector<1x128x64xbf16>
    %133 = vector.shape_cast %132 : vector<1x128x64xbf16> to vector<128x64xbf16>
    %cst_58 = arith.constant dense<0.000000e+00> : vector<4x64xf32>
    %134 = tpu.matmul %63, %133, %cst_58 {dimension_numbers = #tpu.dot_dimension_numbers<[1], [0], [0], [1], [0, 0, 1, 1], [], []>} : vector<4x128xbf16>, vector<128x64xbf16>, vector<4x64xf32> -> vector<4x64xf32>
    %135 = arith.addf %131, %134 : vector<4x64xf32>
    %c1 = arith.constant 1 : index
    %c0_59 = arith.constant 0 : index
    %c0_60 = arith.constant 0 : index
    %136 = vector.load %arg3[%c1, %c0_59, %c0_60] : memref<16x128x64xbf16, #tpu.memory_space<vmem>>, vector<1x128x64xbf16>
    %137 = vector.shape_cast %136 : vector<1x128x64xbf16> to vector<128x64xbf16>
    %cst_61 = arith.constant dense<0.000000e+00> : vector<4x64xf32>
    %138 = tpu.matmul %88, %137, %cst_61 {dimension_numbers = #tpu.dot_dimension_numbers<[1], [0], [0], [1], [0, 0, 1, 1], [], []>} : vector<4x128xbf16>, vector<128x64xbf16>, vector<4x64xf32> -> vector<4x64xf32>
    %139 = arith.addf %135, %138 : vector<4x64xf32>
    %c3 = arith.constant 3 : index
    %c0_62 = arith.constant 0 : index
    %c0_63 = arith.constant 0 : index
    %140 = vector.load %arg3[%c3, %c0_62, %c0_63] : memref<16x128x64xbf16, #tpu.memory_space<vmem>>, vector<1x128x64xbf16>
    %141 = vector.shape_cast %140 : vector<1x128x64xbf16> to vector<128x64xbf16>
    %cst_64 = arith.constant dense<0.000000e+00> : vector<4x64xf32>
    %142 = tpu.matmul %84, %141, %cst_64 {dimension_numbers = #tpu.dot_dimension_numbers<[1], [0], [0], [1], [0, 0, 1, 1], [], []>} : vector<4x128xbf16>, vector<128x64xbf16>, vector<4x64xf32> -> vector<4x64xf32>
    %143 = arith.addf %139, %142 : vector<4x64xf32>
    %c10 = arith.constant 10 : index
    %c0_65 = arith.constant 0 : index
    %c0_66 = arith.constant 0 : index
    %144 = vector.load %arg3[%c10, %c0_65, %c0_66] : memref<16x128x64xbf16, #tpu.memory_space<vmem>>, vector<1x128x64xbf16>
    %145 = vector.shape_cast %144 : vector<1x128x64xbf16> to vector<128x64xbf16>
    %cst_67 = arith.constant dense<0.000000e+00> : vector<4x64xf32>
    %146 = tpu.matmul %64, %145, %cst_67 {dimension_numbers = #tpu.dot_dimension_numbers<[1], [0], [0], [1], [0, 0, 1, 1], [], []>} : vector<4x128xbf16>, vector<128x64xbf16>, vector<4x64xf32> -> vector<4x64xf32>
    %c8 = arith.constant 8 : index
    %c0_68 = arith.constant 0 : index
    %c0_69 = arith.constant 0 : index
    %147 = vector.load %arg3[%c8, %c0_68, %c0_69] : memref<16x128x64xbf16, #tpu.memory_space<vmem>>, vector<1x128x64xbf16>
    %148 = vector.shape_cast %147 : vector<1x128x64xbf16> to vector<128x64xbf16>
    %cst_70 = arith.constant dense<0.000000e+00> : vector<4x64xf32>
    %149 = tpu.matmul %74, %148, %cst_70 {dimension_numbers = #tpu.dot_dimension_numbers<[1], [0], [0], [1], [0, 0, 1, 1], [], []>} : vector<4x128xbf16>, vector<128x64xbf16>, vector<4x64xf32> -> vector<4x64xf32>
    %150 = arith.addf %146, %149 : vector<4x64xf32>
    %c2 = arith.constant 2 : index
    %c0_71 = arith.constant 0 : index
    %c0_72 = arith.constant 0 : index
    %151 = vector.load %arg3[%c2, %c0_71, %c0_72] : memref<16x128x64xbf16, #tpu.memory_space<vmem>>, vector<1x128x64xbf16>
    %152 = vector.shape_cast %151 : vector<1x128x64xbf16> to vector<128x64xbf16>
    %cst_73 = arith.constant dense<0.000000e+00> : vector<4x64xf32>
    %153 = tpu.matmul %88, %152, %cst_73 {dimension_numbers = #tpu.dot_dimension_numbers<[1], [0], [0], [1], [0, 0, 1, 1], [], []>} : vector<4x128xbf16>, vector<128x64xbf16>, vector<4x64xf32> -> vector<4x64xf32>
    %154 = arith.addf %150, %153 : vector<4x64xf32>
    %c0_74 = arith.constant 0 : index
    %c0_75 = arith.constant 0 : index
    %c0_76 = arith.constant 0 : index
    %155 = vector.load %arg3[%c0_74, %c0_75, %c0_76] : memref<16x128x64xbf16, #tpu.memory_space<vmem>>, vector<1x128x64xbf16>
    %156 = vector.shape_cast %155 : vector<1x128x64xbf16> to vector<128x64xbf16>
    %cst_77 = arith.constant dense<0.000000e+00> : vector<4x64xf32>
    %157 = tpu.matmul %98, %156, %cst_77 {dimension_numbers = #tpu.dot_dimension_numbers<[1], [0], [0], [1], [0, 0, 1, 1], [], []>} : vector<4x128xbf16>, vector<128x64xbf16>, vector<4x64xf32> -> vector<4x64xf32>
    %158 = arith.addf %154, %157 : vector<4x64xf32>
    %159 = tpu.concatenate %113, %128, %143, %158 in 0 : vector<4x64xf32>, vector<4x64xf32>, vector<4x64xf32>, vector<4x64xf32> -> vector<16x64xf32>
    %c0_78 = arith.constant 0 : index
    %c0_79 = arith.constant 0 : index
    %160 = vector.load %arg4[%c0_78, %c0_79] : memref<1x64xf32, #tpu.memory_space<vmem>>, vector<1x64xf32>
    %161 = vector.broadcast %160 : vector<1x64xf32> to vector<16x64xf32>
    %162 = arith.addf %159, %161 : vector<16x64xf32>
    %cst_80 = arith.constant 0.000000e+00 : f32
    %163 = vector.broadcast %cst_80 : f32 to vector<16x64xf32>
    %164 = arith.maximumf %162, %163 : vector<16x64xf32>
    %cst_81 = arith.constant dense<0.000000e+00> : vector<64xf32>
    %165 = vector.multi_reduction <add>, %164, %cst_81 [0] : vector<16x64xf32> to vector<64xf32>
    %166 = vector.shape_cast %165 : vector<64xf32> to vector<1x64xf32>
    %cst_82 = arith.constant 1.600000e+01 : f32
    %167 = vector.broadcast %cst_82 : f32 to vector<1x64xf32>
    %168 = arith.divf %166, %167 : vector<1x64xf32>
    %169 = arith.mulf %164, %164 : vector<16x64xf32>
    %cst_83 = arith.constant dense<0.000000e+00> : vector<64xf32>
    %170 = vector.multi_reduction <add>, %169, %cst_83 [0] : vector<16x64xf32> to vector<64xf32>
    %171 = vector.shape_cast %170 : vector<64xf32> to vector<1x64xf32>
    %cst_84 = arith.constant 1.600000e+01 : f32
    %172 = vector.broadcast %cst_84 : f32 to vector<1x64xf32>
    %173 = arith.divf %171, %172 : vector<1x64xf32>
    %174 = arith.mulf %168, %168 : vector<1x64xf32>
    %175 = arith.subf %173, %174 : vector<1x64xf32>
    %cst_85 = arith.constant 0.000000e+00 : f32
    %176 = vector.broadcast %cst_85 : f32 to vector<1x64xf32>
    %177 = arith.maximumf %175, %176 : vector<1x64xf32>
    %c0_86 = arith.constant 0 : index
    %c0_87 = arith.constant 0 : index
    %178 = vector.load %arg5[%c0_86, %c0_87] : memref<1x64xf32, #tpu.memory_space<vmem>>, vector<1x64xf32>
    %179 = vector.broadcast %168 : vector<1x64xf32> to vector<16x64xf32>
    %180 = arith.subf %164, %179 : vector<16x64xf32>
    %181 = vector.broadcast %178 : vector<1x64xf32> to vector<16x64xf32>
    %182 = arith.mulf %181, %180 : vector<16x64xf32>
    %cst_88 = arith.constant 9.99999974E-6 : f32
    %183 = vector.broadcast %cst_88 : f32 to vector<1x64xf32>
    %184 = arith.addf %177, %183 : vector<1x64xf32>
    %185 = math.rsqrt %184 : vector<1x64xf32>
    %186 = vector.broadcast %185 : vector<1x64xf32> to vector<16x64xf32>
    %187 = arith.mulf %182, %186 : vector<16x64xf32>
    %c0_89 = arith.constant 0 : index
    %c0_90 = arith.constant 0 : index
    %188 = vector.load %arg6[%c0_89, %c0_90] : memref<1x64xf32, #tpu.memory_space<vmem>>, vector<1x64xf32>
    %189 = vector.broadcast %188 : vector<1x64xf32> to vector<16x64xf32>
    %190 = arith.addf %187, %189 : vector<16x64xf32>
    %c0_91 = arith.constant 0 : index
    %c0_92 = arith.constant 0 : index
    %191 = vector.load %arg7[%c0_91, %c0_92] : memref<16x16xbf16, #tpu.memory_space<vmem>>, vector<16x16xbf16>
    %192 = arith.truncf %190 : vector<16x64xf32> to vector<16x64xbf16>
    %cst_93 = arith.constant dense<0.000000e+00> : vector<16x64xf32>
    %193 = tpu.matmul %191, %192, %cst_93 {dimension_numbers = #tpu.dot_dimension_numbers<[1], [0], [0], [1], [0, 0, 1, 1], [], []>} : vector<16x16xbf16>, vector<16x64xbf16>, vector<16x64xf32> -> vector<16x64xf32>
    %194 = tpu.iota {dimensions = array<i32: 0>} : vector<16x1xi32>
    %c4_i32 = arith.constant 4 : i32
    %c0_i32_94 = arith.constant 0 : i32
    %195 = arith.cmpi eq, %c4_i32, %c0_i32_94 : i32
    %c1_i32_95 = arith.constant 1 : i32
    %196 = arith.select %195, %c1_i32_95, %c4_i32 : i32
    %197 = vector.broadcast %196 : i32 to vector<16x1xi32>
    %198 = arith.remsi %194, %197 : vector<16x1xi32>
    %c0_i32_96 = arith.constant 0 : i32
    %199 = vector.broadcast %c0_i32_96 : i32 to vector<16x1xi32>
    %200 = arith.cmpi ne, %198, %199 : vector<16x1xi32>
    %c0_i32_97 = arith.constant 0 : i32
    %201 = vector.broadcast %c0_i32_97 : i32 to vector<16x1xi32>
    %202 = arith.cmpi slt, %198, %201 : vector<16x1xi32>
    %c0_i32_98 = arith.constant 0 : i32
    %203 = arith.cmpi slt, %196, %c0_i32_98 : i32
    %204 = vector.broadcast %203 : i1 to vector<16x1xi1>
    %205 = vector.broadcast %204 : vector<16x1xi1> to vector<16x1xi1>
    %206 = arith.xori %202, %205 : vector<16x1xi1>
    %207 = arith.andi %206, %200 : vector<16x1xi1>
    %208 = vector.broadcast %196 : i32 to vector<16x1xi32>
    %209 = arith.addi %198, %208 : vector<16x1xi32>
    %210 = arith.select %207, %209, %198 : vector<16x1xi1>, vector<16x1xi32>
    %cst_99 = arith.constant 0.000000e+00 : f32
    %211 = vector.broadcast %cst_99 : f32 to vector<5x64xf32>
    %212 = vector.extract_strided_slice %193 {offsets = [0, 0], sizes = [11, 64], strides = [1, 1]} : vector<16x64xf32> to vector<11x64xf32>
    %213 = tpu.concatenate %211, %212 in 0 : vector<5x64xf32>, vector<11x64xf32> -> vector<16x64xf32>
    %c1_i32_100 = arith.constant 1 : i32
    %214 = vector.broadcast %c1_i32_100 : i32 to vector<16x1xi32>
    %215 = arith.cmpi sge, %210, %214 : vector<16x1xi32>
    %cst_101 = arith.constant 0.000000e+00 : f32
    %216 = vector.shape_cast %215 : vector<16x1xi1> to vector<16x1xi1>
    %217 = vector.broadcast %216 : vector<16x1xi1> to vector<16x64xi1>
    %218 = vector.broadcast %cst_101 : f32 to vector<16x64xf32>
    %219 = arith.select %217, %213, %218 : vector<16x64xi1>, vector<16x64xf32>
    %220 = arith.truncf %219 : vector<16x64xf32> to vector<16x64xbf16>
    %cst_102 = arith.constant 0.000000e+00 : f32
    %221 = vector.broadcast %cst_102 : f32 to vector<4x64xf32>
    %222 = vector.extract_strided_slice %193 {offsets = [0, 0], sizes = [12, 64], strides = [1, 1]} : vector<16x64xf32> to vector<12x64xf32>
    %223 = tpu.concatenate %221, %222 in 0 : vector<4x64xf32>, vector<12x64xf32> -> vector<16x64xf32>
    %224 = arith.truncf %223 : vector<16x64xf32> to vector<16x64xbf16>
    %cst_103 = arith.constant 0.000000e+00 : f32
    %225 = vector.broadcast %cst_103 : f32 to vector<3x64xf32>
    %226 = vector.extract_strided_slice %193 {offsets = [0, 0], sizes = [13, 64], strides = [1, 1]} : vector<16x64xf32> to vector<13x64xf32>
    %227 = tpu.concatenate %225, %226 in 0 : vector<3x64xf32>, vector<13x64xf32> -> vector<16x64xf32>
    %c3_i32 = arith.constant 3 : i32
    %228 = vector.broadcast %c3_i32 : i32 to vector<16x1xi32>
    %229 = arith.cmpi slt, %210, %228 : vector<16x1xi32>
    %cst_104 = arith.constant 0.000000e+00 : f32
    %230 = vector.shape_cast %229 : vector<16x1xi1> to vector<16x1xi1>
    %231 = vector.broadcast %230 : vector<16x1xi1> to vector<16x64xi1>
    %232 = vector.broadcast %cst_104 : f32 to vector<16x64xf32>
    %233 = arith.select %231, %227, %232 : vector<16x64xi1>, vector<16x64xf32>
    %234 = arith.truncf %233 : vector<16x64xf32> to vector<16x64xbf16>
    %cst_105 = arith.constant 0.000000e+00 : f32
    %235 = vector.broadcast %cst_105 : f32 to vector<1x64xf32>
    %236 = vector.extract_strided_slice %193 {offsets = [0, 0], sizes = [15, 64], strides = [1, 1]} : vector<16x64xf32> to vector<15x64xf32>
    %237 = tpu.concatenate %235, %236 in 0 : vector<1x64xf32>, vector<15x64xf32> -> vector<16x64xf32>
    %c1_i32_106 = arith.constant 1 : i32
    %238 = vector.broadcast %c1_i32_106 : i32 to vector<16x1xi32>
    %239 = arith.cmpi sge, %210, %238 : vector<16x1xi32>
    %cst_107 = arith.constant 0.000000e+00 : f32
    %240 = vector.shape_cast %239 : vector<16x1xi1> to vector<16x1xi1>
    %241 = vector.broadcast %240 : vector<16x1xi1> to vector<16x64xi1>
    %242 = vector.broadcast %cst_107 : f32 to vector<16x64xf32>
    %243 = arith.select %241, %237, %242 : vector<16x64xi1>, vector<16x64xf32>
    %244 = arith.truncf %243 : vector<16x64xf32> to vector<16x64xbf16>
    %245 = arith.truncf %193 : vector<16x64xf32> to vector<16x64xbf16>
    %cst_108 = arith.constant 0.000000e+00 : f32
    %246 = vector.broadcast %cst_108 : f32 to vector<1x64xf32>
    %247 = vector.extract_strided_slice %193 {offsets = [1, 0], sizes = [15, 64], strides = [1, 1]} : vector<16x64xf32> to vector<15x64xf32>
    %248 = tpu.concatenate %247, %246 in 0 : vector<15x64xf32>, vector<1x64xf32> -> vector<16x64xf32>
    %c3_i32_109 = arith.constant 3 : i32
    %249 = vector.broadcast %c3_i32_109 : i32 to vector<16x1xi32>
    %250 = arith.cmpi slt, %210, %249 : vector<16x1xi32>
    %cst_110 = arith.constant 0.000000e+00 : f32
    %251 = vector.shape_cast %250 : vector<16x1xi1> to vector<16x1xi1>
    %252 = vector.broadcast %251 : vector<16x1xi1> to vector<16x64xi1>
    %253 = vector.broadcast %cst_110 : f32 to vector<16x64xf32>
    %254 = arith.select %252, %248, %253 : vector<16x64xi1>, vector<16x64xf32>
    %255 = arith.truncf %254 : vector<16x64xf32> to vector<16x64xbf16>
    %cst_111 = arith.constant 0.000000e+00 : f32
    %256 = vector.broadcast %cst_111 : f32 to vector<3x64xf32>
    %257 = vector.extract_strided_slice %193 {offsets = [3, 0], sizes = [13, 64], strides = [1, 1]} : vector<16x64xf32> to vector<13x64xf32>
    %258 = tpu.concatenate %257, %256 in 0 : vector<13x64xf32>, vector<3x64xf32> -> vector<16x64xf32>
    %c1_i32_112 = arith.constant 1 : i32
    %259 = vector.broadcast %c1_i32_112 : i32 to vector<16x1xi32>
    %260 = arith.cmpi sge, %210, %259 : vector<16x1xi32>
    %cst_113 = arith.constant 0.000000e+00 : f32
    %261 = vector.shape_cast %260 : vector<16x1xi1> to vector<16x1xi1>
    %262 = vector.broadcast %261 : vector<16x1xi1> to vector<16x64xi1>
    %263 = vector.broadcast %cst_113 : f32 to vector<16x64xf32>
    %264 = arith.select %262, %258, %263 : vector<16x64xi1>, vector<16x64xf32>
    %265 = arith.truncf %264 : vector<16x64xf32> to vector<16x64xbf16>
    %cst_114 = arith.constant 0.000000e+00 : f32
    %266 = vector.broadcast %cst_114 : f32 to vector<4x64xf32>
    %267 = vector.extract_strided_slice %193 {offsets = [4, 0], sizes = [12, 64], strides = [1, 1]} : vector<16x64xf32> to vector<12x64xf32>
    %268 = tpu.concatenate %267, %266 in 0 : vector<12x64xf32>, vector<4x64xf32> -> vector<16x64xf32>
    %269 = arith.truncf %268 : vector<16x64xf32> to vector<16x64xbf16>
    %cst_115 = arith.constant 0.000000e+00 : f32
    %270 = vector.broadcast %cst_115 : f32 to vector<5x64xf32>
    %271 = vector.extract_strided_slice %193 {offsets = [5, 0], sizes = [11, 64], strides = [1, 1]} : vector<16x64xf32> to vector<11x64xf32>
    %272 = tpu.concatenate %271, %270 in 0 : vector<11x64xf32>, vector<5x64xf32> -> vector<16x64xf32>
    %c3_i32_116 = arith.constant 3 : i32
    %273 = vector.broadcast %c3_i32_116 : i32 to vector<16x1xi32>
    %274 = arith.cmpi slt, %210, %273 : vector<16x1xi32>
    %cst_117 = arith.constant 0.000000e+00 : f32
    %275 = vector.shape_cast %274 : vector<16x1xi1> to vector<16x1xi1>
    %276 = vector.broadcast %275 : vector<16x1xi1> to vector<16x64xi1>
    %277 = vector.broadcast %cst_117 : f32 to vector<16x64xf32>
    %278 = arith.select %276, %272, %277 : vector<16x64xi1>, vector<16x64xf32>
    %279 = arith.truncf %278 : vector<16x64xf32> to vector<16x64xbf16>
    %c5_118 = arith.constant 5 : index
    %c0_119 = arith.constant 0 : index
    %c0_120 = arith.constant 0 : index
    %280 = vector.load %arg8[%c5_118, %c0_119, %c0_120] : memref<16x64x32xbf16, #tpu.memory_space<vmem>>, vector<1x64x32xbf16>
    %281 = vector.shape_cast %280 : vector<1x64x32xbf16> to vector<64x32xbf16>
    %cst_121 = arith.constant dense<0.000000e+00> : vector<16x32xf32>
    %282 = tpu.matmul %245, %281, %cst_121 {dimension_numbers = #tpu.dot_dimension_numbers<[1], [0], [0], [1], [0, 0, 1, 1], [], []>} : vector<16x64xbf16>, vector<64x32xbf16>, vector<16x32xf32> -> vector<16x32xf32>
    %c7_122 = arith.constant 7 : index
    %c0_123 = arith.constant 0 : index
    %c0_124 = arith.constant 0 : index
    %283 = vector.load %arg8[%c7_122, %c0_123, %c0_124] : memref<16x64x32xbf16, #tpu.memory_space<vmem>>, vector<1x64x32xbf16>
    %284 = vector.shape_cast %283 : vector<1x64x32xbf16> to vector<64x32xbf16>
    %cst_125 = arith.constant dense<0.000000e+00> : vector<16x32xf32>
    %285 = tpu.matmul %244, %284, %cst_125 {dimension_numbers = #tpu.dot_dimension_numbers<[1], [0], [0], [1], [0, 0, 1, 1], [], []>} : vector<16x64xbf16>, vector<64x32xbf16>, vector<16x32xf32> -> vector<16x32xf32>
    %286 = arith.addf %282, %285 : vector<16x32xf32>
    %c13_126 = arith.constant 13 : index
    %c0_127 = arith.constant 0 : index
    %c0_128 = arith.constant 0 : index
    %287 = vector.load %arg8[%c13_126, %c0_127, %c0_128] : memref<16x64x32xbf16, #tpu.memory_space<vmem>>, vector<1x64x32xbf16>
    %288 = vector.shape_cast %287 : vector<1x64x32xbf16> to vector<64x32xbf16>
    %cst_129 = arith.constant dense<0.000000e+00> : vector<16x32xf32>
    %289 = tpu.matmul %224, %288, %cst_129 {dimension_numbers = #tpu.dot_dimension_numbers<[1], [0], [0], [1], [0, 0, 1, 1], [], []>} : vector<16x64xbf16>, vector<64x32xbf16>, vector<16x32xf32> -> vector<16x32xf32>
    %290 = arith.addf %286, %289 : vector<16x32xf32>
    %c15_130 = arith.constant 15 : index
    %c0_131 = arith.constant 0 : index
    %c0_132 = arith.constant 0 : index
    %291 = vector.load %arg8[%c15_130, %c0_131, %c0_132] : memref<16x64x32xbf16, #tpu.memory_space<vmem>>, vector<1x64x32xbf16>
    %292 = vector.shape_cast %291 : vector<1x64x32xbf16> to vector<64x32xbf16>
    %cst_133 = arith.constant dense<0.000000e+00> : vector<16x32xf32>
    %293 = tpu.matmul %220, %292, %cst_133 {dimension_numbers = #tpu.dot_dimension_numbers<[1], [0], [0], [1], [0, 0, 1, 1], [], []>} : vector<16x64xbf16>, vector<64x32xbf16>, vector<16x32xf32> -> vector<16x32xf32>
    %294 = arith.addf %290, %293 : vector<16x32xf32>
    %c6_134 = arith.constant 6 : index
    %c0_135 = arith.constant 0 : index
    %c0_136 = arith.constant 0 : index
    %295 = vector.load %arg8[%c6_134, %c0_135, %c0_136] : memref<16x64x32xbf16, #tpu.memory_space<vmem>>, vector<1x64x32xbf16>
    %296 = vector.shape_cast %295 : vector<1x64x32xbf16> to vector<64x32xbf16>
    %cst_137 = arith.constant dense<0.000000e+00> : vector<16x32xf32>
    %297 = tpu.matmul %245, %296, %cst_137 {dimension_numbers = #tpu.dot_dimension_numbers<[1], [0], [0], [1], [0, 0, 1, 1], [], []>} : vector<16x64xbf16>, vector<64x32xbf16>, vector<16x32xf32> -> vector<16x32xf32>
    %c4_138 = arith.constant 4 : index
    %c0_139 = arith.constant 0 : index
    %c0_140 = arith.constant 0 : index
    %298 = vector.load %arg8[%c4_138, %c0_139, %c0_140] : memref<16x64x32xbf16, #tpu.memory_space<vmem>>, vector<1x64x32xbf16>
    %299 = vector.shape_cast %298 : vector<1x64x32xbf16> to vector<64x32xbf16>
    %cst_141 = arith.constant dense<0.000000e+00> : vector<16x32xf32>
    %300 = tpu.matmul %255, %299, %cst_141 {dimension_numbers = #tpu.dot_dimension_numbers<[1], [0], [0], [1], [0, 0, 1, 1], [], []>} : vector<16x64xbf16>, vector<64x32xbf16>, vector<16x32xf32> -> vector<16x32xf32>
    %301 = arith.addf %297, %300 : vector<16x32xf32>
    %c14_142 = arith.constant 14 : index
    %c0_143 = arith.constant 0 : index
    %c0_144 = arith.constant 0 : index
    %302 = vector.load %arg8[%c14_142, %c0_143, %c0_144] : memref<16x64x32xbf16, #tpu.memory_space<vmem>>, vector<1x64x32xbf16>
    %303 = vector.shape_cast %302 : vector<1x64x32xbf16> to vector<64x32xbf16>
    %cst_145 = arith.constant dense<0.000000e+00> : vector<16x32xf32>
    %304 = tpu.matmul %224, %303, %cst_145 {dimension_numbers = #tpu.dot_dimension_numbers<[1], [0], [0], [1], [0, 0, 1, 1], [], []>} : vector<16x64xbf16>, vector<64x32xbf16>, vector<16x32xf32> -> vector<16x32xf32>
    %305 = arith.addf %301, %304 : vector<16x32xf32>
    %c12_146 = arith.constant 12 : index
    %c0_147 = arith.constant 0 : index
    %c0_148 = arith.constant 0 : index
    %306 = vector.load %arg8[%c12_146, %c0_147, %c0_148] : memref<16x64x32xbf16, #tpu.memory_space<vmem>>, vector<1x64x32xbf16>
    %307 = vector.shape_cast %306 : vector<1x64x32xbf16> to vector<64x32xbf16>
    %cst_149 = arith.constant dense<0.000000e+00> : vector<16x32xf32>
    %308 = tpu.matmul %234, %307, %cst_149 {dimension_numbers = #tpu.dot_dimension_numbers<[1], [0], [0], [1], [0, 0, 1, 1], [], []>} : vector<16x64xbf16>, vector<64x32xbf16>, vector<16x32xf32> -> vector<16x32xf32>
    %309 = arith.addf %305, %308 : vector<16x32xf32>
    %c9_150 = arith.constant 9 : index
    %c0_151 = arith.constant 0 : index
    %c0_152 = arith.constant 0 : index
    %310 = vector.load %arg8[%c9_150, %c0_151, %c0_152] : memref<16x64x32xbf16, #tpu.memory_space<vmem>>, vector<1x64x32xbf16>
    %311 = vector.shape_cast %310 : vector<1x64x32xbf16> to vector<64x32xbf16>
    %cst_153 = arith.constant dense<0.000000e+00> : vector<16x32xf32>
    %312 = tpu.matmul %245, %311, %cst_153 {dimension_numbers = #tpu.dot_dimension_numbers<[1], [0], [0], [1], [0, 0, 1, 1], [], []>} : vector<16x64xbf16>, vector<64x32xbf16>, vector<16x32xf32> -> vector<16x32xf32>
    %c11_154 = arith.constant 11 : index
    %c0_155 = arith.constant 0 : index
    %c0_156 = arith.constant 0 : index
    %313 = vector.load %arg8[%c11_154, %c0_155, %c0_156] : memref<16x64x32xbf16, #tpu.memory_space<vmem>>, vector<1x64x32xbf16>
    %314 = vector.shape_cast %313 : vector<1x64x32xbf16> to vector<64x32xbf16>
    %cst_157 = arith.constant dense<0.000000e+00> : vector<16x32xf32>
    %315 = tpu.matmul %244, %314, %cst_157 {dimension_numbers = #tpu.dot_dimension_numbers<[1], [0], [0], [1], [0, 0, 1, 1], [], []>} : vector<16x64xbf16>, vector<64x32xbf16>, vector<16x32xf32> -> vector<16x32xf32>
    %316 = arith.addf %312, %315 : vector<16x32xf32>
    %c1_158 = arith.constant 1 : index
    %c0_159 = arith.constant 0 : index
    %c0_160 = arith.constant 0 : index
    %317 = vector.load %arg8[%c1_158, %c0_159, %c0_160] : memref<16x64x32xbf16, #tpu.memory_space<vmem>>, vector<1x64x32xbf16>
    %318 = vector.shape_cast %317 : vector<1x64x32xbf16> to vector<64x32xbf16>
    %cst_161 = arith.constant dense<0.000000e+00> : vector<16x32xf32>
    %319 = tpu.matmul %269, %318, %cst_161 {dimension_numbers = #tpu.dot_dimension_numbers<[1], [0], [0], [1], [0, 0, 1, 1], [], []>} : vector<16x64xbf16>, vector<64x32xbf16>, vector<16x32xf32> -> vector<16x32xf32>
    %320 = arith.addf %316, %319 : vector<16x32xf32>
    %c3_162 = arith.constant 3 : index
    %c0_163 = arith.constant 0 : index
    %c0_164 = arith.constant 0 : index
    %321 = vector.load %arg8[%c3_162, %c0_163, %c0_164] : memref<16x64x32xbf16, #tpu.memory_space<vmem>>, vector<1x64x32xbf16>
    %322 = vector.shape_cast %321 : vector<1x64x32xbf16> to vector<64x32xbf16>
    %cst_165 = arith.constant dense<0.000000e+00> : vector<16x32xf32>
    %323 = tpu.matmul %265, %322, %cst_165 {dimension_numbers = #tpu.dot_dimension_numbers<[1], [0], [0], [1], [0, 0, 1, 1], [], []>} : vector<16x64xbf16>, vector<64x32xbf16>, vector<16x32xf32> -> vector<16x32xf32>
    %324 = arith.addf %320, %323 : vector<16x32xf32>
    %c10_166 = arith.constant 10 : index
    %c0_167 = arith.constant 0 : index
    %c0_168 = arith.constant 0 : index
    %325 = vector.load %arg8[%c10_166, %c0_167, %c0_168] : memref<16x64x32xbf16, #tpu.memory_space<vmem>>, vector<1x64x32xbf16>
    %326 = vector.shape_cast %325 : vector<1x64x32xbf16> to vector<64x32xbf16>
    %cst_169 = arith.constant dense<0.000000e+00> : vector<16x32xf32>
    %327 = tpu.matmul %245, %326, %cst_169 {dimension_numbers = #tpu.dot_dimension_numbers<[1], [0], [0], [1], [0, 0, 1, 1], [], []>} : vector<16x64xbf16>, vector<64x32xbf16>, vector<16x32xf32> -> vector<16x32xf32>
    %c8_170 = arith.constant 8 : index
    %c0_171 = arith.constant 0 : index
    %c0_172 = arith.constant 0 : index
    %328 = vector.load %arg8[%c8_170, %c0_171, %c0_172] : memref<16x64x32xbf16, #tpu.memory_space<vmem>>, vector<1x64x32xbf16>
    %329 = vector.shape_cast %328 : vector<1x64x32xbf16> to vector<64x32xbf16>
    %cst_173 = arith.constant dense<0.000000e+00> : vector<16x32xf32>
    %330 = tpu.matmul %255, %329, %cst_173 {dimension_numbers = #tpu.dot_dimension_numbers<[1], [0], [0], [1], [0, 0, 1, 1], [], []>} : vector<16x64xbf16>, vector<64x32xbf16>, vector<16x32xf32> -> vector<16x32xf32>
    %331 = arith.addf %327, %330 : vector<16x32xf32>
    %c2_174 = arith.constant 2 : index
    %c0_175 = arith.constant 0 : index
    %c0_176 = arith.constant 0 : index
    %332 = vector.load %arg8[%c2_174, %c0_175, %c0_176] : memref<16x64x32xbf16, #tpu.memory_space<vmem>>, vector<1x64x32xbf16>
    %333 = vector.shape_cast %332 : vector<1x64x32xbf16> to vector<64x32xbf16>
    %cst_177 = arith.constant dense<0.000000e+00> : vector<16x32xf32>
    %334 = tpu.matmul %269, %333, %cst_177 {dimension_numbers = #tpu.dot_dimension_numbers<[1], [0], [0], [1], [0, 0, 1, 1], [], []>} : vector<16x64xbf16>, vector<64x32xbf16>, vector<16x32xf32> -> vector<16x32xf32>
    %335 = arith.addf %331, %334 : vector<16x32xf32>
    %c0_178 = arith.constant 0 : index
    %c0_179 = arith.constant 0 : index
    %c0_180 = arith.constant 0 : index
    %336 = vector.load %arg8[%c0_178, %c0_179, %c0_180] : memref<16x64x32xbf16, #tpu.memory_space<vmem>>, vector<1x64x32xbf16>
    %337 = vector.shape_cast %336 : vector<1x64x32xbf16> to vector<64x32xbf16>
    %cst_181 = arith.constant dense<0.000000e+00> : vector<16x32xf32>
    %338 = tpu.matmul %279, %337, %cst_181 {dimension_numbers = #tpu.dot_dimension_numbers<[1], [0], [0], [1], [0, 0, 1, 1], [], []>} : vector<16x64xbf16>, vector<64x32xbf16>, vector<16x32xf32> -> vector<16x32xf32>
    %339 = arith.addf %335, %338 : vector<16x32xf32>
    %340 = tpu.concatenate %294, %309, %324, %339 in 0 : vector<16x32xf32>, vector<16x32xf32>, vector<16x32xf32>, vector<16x32xf32> -> vector<64x32xf32>
    %c0_182 = arith.constant 0 : index
    %c0_183 = arith.constant 0 : index
    %341 = vector.load %arg9[%c0_182, %c0_183] : memref<1x32xf32, #tpu.memory_space<vmem>>, vector<1x32xf32>
    %342 = vector.broadcast %341 : vector<1x32xf32> to vector<64x32xf32>
    %343 = arith.addf %340, %342 : vector<64x32xf32>
    %cst_184 = arith.constant 0.000000e+00 : f32
    %344 = vector.broadcast %cst_184 : f32 to vector<64x32xf32>
    %345 = arith.maximumf %343, %344 : vector<64x32xf32>
    %cst_185 = arith.constant dense<0.000000e+00> : vector<32xf32>
    %346 = vector.multi_reduction <add>, %345, %cst_185 [0] : vector<64x32xf32> to vector<32xf32>
    %347 = vector.shape_cast %346 : vector<32xf32> to vector<1x32xf32>
    %cst_186 = arith.constant 6.400000e+01 : f32
    %348 = vector.broadcast %cst_186 : f32 to vector<1x32xf32>
    %349 = arith.divf %347, %348 : vector<1x32xf32>
    %350 = arith.mulf %345, %345 : vector<64x32xf32>
    %cst_187 = arith.constant dense<0.000000e+00> : vector<32xf32>
    %351 = vector.multi_reduction <add>, %350, %cst_187 [0] : vector<64x32xf32> to vector<32xf32>
    %352 = vector.shape_cast %351 : vector<32xf32> to vector<1x32xf32>
    %cst_188 = arith.constant 6.400000e+01 : f32
    %353 = vector.broadcast %cst_188 : f32 to vector<1x32xf32>
    %354 = arith.divf %352, %353 : vector<1x32xf32>
    %355 = arith.mulf %349, %349 : vector<1x32xf32>
    %356 = arith.subf %354, %355 : vector<1x32xf32>
    %cst_189 = arith.constant 0.000000e+00 : f32
    %357 = vector.broadcast %cst_189 : f32 to vector<1x32xf32>
    %358 = arith.maximumf %356, %357 : vector<1x32xf32>
    %c0_190 = arith.constant 0 : index
    %c0_191 = arith.constant 0 : index
    %359 = vector.load %arg10[%c0_190, %c0_191] : memref<1x32xf32, #tpu.memory_space<vmem>>, vector<1x32xf32>
    %360 = vector.broadcast %349 : vector<1x32xf32> to vector<64x32xf32>
    %361 = arith.subf %345, %360 : vector<64x32xf32>
    %362 = vector.broadcast %359 : vector<1x32xf32> to vector<64x32xf32>
    %363 = arith.mulf %362, %361 : vector<64x32xf32>
    %cst_192 = arith.constant 9.99999974E-6 : f32
    %364 = vector.broadcast %cst_192 : f32 to vector<1x32xf32>
    %365 = arith.addf %358, %364 : vector<1x32xf32>
    %366 = math.rsqrt %365 : vector<1x32xf32>
    %367 = vector.broadcast %366 : vector<1x32xf32> to vector<64x32xf32>
    %368 = arith.mulf %363, %367 : vector<64x32xf32>
    %c0_193 = arith.constant 0 : index
    %c0_194 = arith.constant 0 : index
    %369 = vector.load %arg11[%c0_193, %c0_194] : memref<1x32xf32, #tpu.memory_space<vmem>>, vector<1x32xf32>
    %370 = vector.broadcast %369 : vector<1x32xf32> to vector<64x32xf32>
    %371 = arith.addf %368, %370 : vector<64x32xf32>
    %c0_195 = arith.constant 0 : index
    %c0_196 = arith.constant 0 : index
    %372 = vector.load %arg12[%c0_195, %c0_196] : memref<64x64xbf16, #tpu.memory_space<vmem>>, vector<64x64xbf16>
    %373 = arith.truncf %371 : vector<64x32xf32> to vector<64x32xbf16>
    %cst_197 = arith.constant dense<0.000000e+00> : vector<64x32xf32>
    %374 = tpu.matmul %372, %373, %cst_197 {dimension_numbers = #tpu.dot_dimension_numbers<[1], [0], [0], [1], [0, 0, 1, 1], [], []>} : vector<64x64xbf16>, vector<64x32xbf16>, vector<64x32xf32> -> vector<64x32xf32>
    %375 = tpu.iota {dimensions = array<i32: 0>} : vector<64x1xi32>
    %c8_i32 = arith.constant 8 : i32
    %c0_i32_198 = arith.constant 0 : i32
    %376 = arith.cmpi eq, %c8_i32, %c0_i32_198 : i32
    %c1_i32_199 = arith.constant 1 : i32
    %377 = arith.select %376, %c1_i32_199, %c8_i32 : i32
    %378 = vector.broadcast %377 : i32 to vector<64x1xi32>
    %379 = arith.remsi %375, %378 : vector<64x1xi32>
    %c0_i32_200 = arith.constant 0 : i32
    %380 = vector.broadcast %c0_i32_200 : i32 to vector<64x1xi32>
    %381 = arith.cmpi ne, %379, %380 : vector<64x1xi32>
    %c0_i32_201 = arith.constant 0 : i32
    %382 = vector.broadcast %c0_i32_201 : i32 to vector<64x1xi32>
    %383 = arith.cmpi slt, %379, %382 : vector<64x1xi32>
    %c0_i32_202 = arith.constant 0 : i32
    %384 = arith.cmpi slt, %377, %c0_i32_202 : i32
    %385 = vector.broadcast %384 : i1 to vector<64x1xi1>
    %386 = vector.broadcast %385 : vector<64x1xi1> to vector<64x1xi1>
    %387 = arith.xori %383, %386 : vector<64x1xi1>
    %388 = arith.andi %387, %381 : vector<64x1xi1>
    %389 = vector.broadcast %377 : i32 to vector<64x1xi32>
    %390 = arith.addi %379, %389 : vector<64x1xi32>
    %391 = arith.select %388, %390, %379 : vector<64x1xi1>, vector<64x1xi32>
    %cst_203 = arith.constant 0.000000e+00 : f32
    %392 = vector.broadcast %cst_203 : f32 to vector<9x32xf32>
    %393 = vector.extract_strided_slice %374 {offsets = [0, 0], sizes = [55, 32], strides = [1, 1]} : vector<64x32xf32> to vector<55x32xf32>
    %394 = tpu.concatenate %392, %393 in 0 : vector<9x32xf32>, vector<55x32xf32> -> vector<64x32xf32>
    %c1_i32_204 = arith.constant 1 : i32
    %395 = vector.broadcast %c1_i32_204 : i32 to vector<64x1xi32>
    %396 = arith.cmpi sge, %391, %395 : vector<64x1xi32>
    %cst_205 = arith.constant 0.000000e+00 : f32
    %397 = vector.shape_cast %396 : vector<64x1xi1> to vector<64x1xi1>
    %398 = vector.broadcast %397 : vector<64x1xi1> to vector<64x32xi1>
    %399 = vector.broadcast %cst_205 : f32 to vector<64x32xf32>
    %400 = arith.select %398, %394, %399 : vector<64x32xi1>, vector<64x32xf32>
    %401 = arith.truncf %400 : vector<64x32xf32> to vector<64x32xbf16>
    %cst_206 = arith.constant 0.000000e+00 : f32
    %402 = vector.broadcast %cst_206 : f32 to vector<8x32xf32>
    %403 = vector.extract_strided_slice %374 {offsets = [0, 0], sizes = [56, 32], strides = [1, 1]} : vector<64x32xf32> to vector<56x32xf32>
    %404 = tpu.concatenate %402, %403 in 0 : vector<8x32xf32>, vector<56x32xf32> -> vector<64x32xf32>
    %405 = arith.truncf %404 : vector<64x32xf32> to vector<64x32xbf16>
    %cst_207 = arith.constant 0.000000e+00 : f32
    %406 = vector.broadcast %cst_207 : f32 to vector<7x32xf32>
    %407 = vector.extract_strided_slice %374 {offsets = [0, 0], sizes = [57, 32], strides = [1, 1]} : vector<64x32xf32> to vector<57x32xf32>
    %408 = tpu.concatenate %406, %407 in 0 : vector<7x32xf32>, vector<57x32xf32> -> vector<64x32xf32>
    %c7_i32 = arith.constant 7 : i32
    %409 = vector.broadcast %c7_i32 : i32 to vector<64x1xi32>
    %410 = arith.cmpi slt, %391, %409 : vector<64x1xi32>
    %cst_208 = arith.constant 0.000000e+00 : f32
    %411 = vector.shape_cast %410 : vector<64x1xi1> to vector<64x1xi1>
    %412 = vector.broadcast %411 : vector<64x1xi1> to vector<64x32xi1>
    %413 = vector.broadcast %cst_208 : f32 to vector<64x32xf32>
    %414 = arith.select %412, %408, %413 : vector<64x32xi1>, vector<64x32xf32>
    %415 = arith.truncf %414 : vector<64x32xf32> to vector<64x32xbf16>
    %cst_209 = arith.constant 0.000000e+00 : f32
    %416 = vector.broadcast %cst_209 : f32 to vector<1x32xf32>
    %417 = vector.extract_strided_slice %374 {offsets = [0, 0], sizes = [63, 32], strides = [1, 1]} : vector<64x32xf32> to vector<63x32xf32>
    %418 = tpu.concatenate %416, %417 in 0 : vector<1x32xf32>, vector<63x32xf32> -> vector<64x32xf32>
    %c1_i32_210 = arith.constant 1 : i32
    %419 = vector.broadcast %c1_i32_210 : i32 to vector<64x1xi32>
    %420 = arith.cmpi sge, %391, %419 : vector<64x1xi32>
    %cst_211 = arith.constant 0.000000e+00 : f32
    %421 = vector.shape_cast %420 : vector<64x1xi1> to vector<64x1xi1>
    %422 = vector.broadcast %421 : vector<64x1xi1> to vector<64x32xi1>
    %423 = vector.broadcast %cst_211 : f32 to vector<64x32xf32>
    %424 = arith.select %422, %418, %423 : vector<64x32xi1>, vector<64x32xf32>
    %425 = arith.truncf %424 : vector<64x32xf32> to vector<64x32xbf16>
    %426 = arith.truncf %374 : vector<64x32xf32> to vector<64x32xbf16>
    %cst_212 = arith.constant 0.000000e+00 : f32
    %427 = vector.broadcast %cst_212 : f32 to vector<1x32xf32>
    %428 = vector.extract_strided_slice %374 {offsets = [1, 0], sizes = [63, 32], strides = [1, 1]} : vector<64x32xf32> to vector<63x32xf32>
    %429 = tpu.concatenate %428, %427 in 0 : vector<63x32xf32>, vector<1x32xf32> -> vector<64x32xf32>
    %c7_i32_213 = arith.constant 7 : i32
    %430 = vector.broadcast %c7_i32_213 : i32 to vector<64x1xi32>
    %431 = arith.cmpi slt, %391, %430 : vector<64x1xi32>
    %cst_214 = arith.constant 0.000000e+00 : f32
    %432 = vector.shape_cast %431 : vector<64x1xi1> to vector<64x1xi1>
    %433 = vector.broadcast %432 : vector<64x1xi1> to vector<64x32xi1>
    %434 = vector.broadcast %cst_214 : f32 to vector<64x32xf32>
    %435 = arith.select %433, %429, %434 : vector<64x32xi1>, vector<64x32xf32>
    %436 = arith.truncf %435 : vector<64x32xf32> to vector<64x32xbf16>
    %cst_215 = arith.constant 0.000000e+00 : f32
    %437 = vector.broadcast %cst_215 : f32 to vector<7x32xf32>
    %438 = vector.extract_strided_slice %374 {offsets = [7, 0], sizes = [57, 32], strides = [1, 1]} : vector<64x32xf32> to vector<57x32xf32>
    %439 = tpu.concatenate %438, %437 in 0 : vector<57x32xf32>, vector<7x32xf32> -> vector<64x32xf32>
    %c1_i32_216 = arith.constant 1 : i32
    %440 = vector.broadcast %c1_i32_216 : i32 to vector<64x1xi32>
    %441 = arith.cmpi sge, %391, %440 : vector<64x1xi32>
    %cst_217 = arith.constant 0.000000e+00 : f32
    %442 = vector.shape_cast %441 : vector<64x1xi1> to vector<64x1xi1>
    %443 = vector.broadcast %442 : vector<64x1xi1> to vector<64x32xi1>
    %444 = vector.broadcast %cst_217 : f32 to vector<64x32xf32>
    %445 = arith.select %443, %439, %444 : vector<64x32xi1>, vector<64x32xf32>
    %446 = arith.truncf %445 : vector<64x32xf32> to vector<64x32xbf16>
    %cst_218 = arith.constant 0.000000e+00 : f32
    %447 = vector.broadcast %cst_218 : f32 to vector<8x32xf32>
    %448 = vector.extract_strided_slice %374 {offsets = [8, 0], sizes = [56, 32], strides = [1, 1]} : vector<64x32xf32> to vector<56x32xf32>
    %449 = tpu.concatenate %448, %447 in 0 : vector<56x32xf32>, vector<8x32xf32> -> vector<64x32xf32>
    %450 = arith.truncf %449 : vector<64x32xf32> to vector<64x32xbf16>
    %cst_219 = arith.constant 0.000000e+00 : f32
    %451 = vector.broadcast %cst_219 : f32 to vector<9x32xf32>
    %452 = vector.extract_strided_slice %374 {offsets = [9, 0], sizes = [55, 32], strides = [1, 1]} : vector<64x32xf32> to vector<55x32xf32>
    %453 = tpu.concatenate %452, %451 in 0 : vector<55x32xf32>, vector<9x32xf32> -> vector<64x32xf32>
    %c7_i32_220 = arith.constant 7 : i32
    %454 = vector.broadcast %c7_i32_220 : i32 to vector<64x1xi32>
    %455 = arith.cmpi slt, %391, %454 : vector<64x1xi32>
    %cst_221 = arith.constant 0.000000e+00 : f32
    %456 = vector.shape_cast %455 : vector<64x1xi1> to vector<64x1xi1>
    %457 = vector.broadcast %456 : vector<64x1xi1> to vector<64x32xi1>
    %458 = vector.broadcast %cst_221 : f32 to vector<64x32xf32>
    %459 = arith.select %457, %453, %458 : vector<64x32xi1>, vector<64x32xf32>
    %460 = arith.truncf %459 : vector<64x32xf32> to vector<64x32xbf16>
    %c5_222 = arith.constant 5 : index
    %c0_223 = arith.constant 0 : index
    %c0_224 = arith.constant 0 : index
    %461 = vector.load %arg13[%c5_222, %c0_223, %c0_224] : memref<16x32x16xbf16, #tpu.memory_space<vmem>>, vector<1x32x16xbf16>
    %462 = vector.shape_cast %461 : vector<1x32x16xbf16> to vector<32x16xbf16>
    %cst_225 = arith.constant dense<0.000000e+00> : vector<64x16xf32>
    %463 = tpu.matmul %426, %462, %cst_225 {dimension_numbers = #tpu.dot_dimension_numbers<[1], [0], [0], [1], [0, 0, 1, 1], [], []>} : vector<64x32xbf16>, vector<32x16xbf16>, vector<64x16xf32> -> vector<64x16xf32>
    %c7_226 = arith.constant 7 : index
    %c0_227 = arith.constant 0 : index
    %c0_228 = arith.constant 0 : index
    %464 = vector.load %arg13[%c7_226, %c0_227, %c0_228] : memref<16x32x16xbf16, #tpu.memory_space<vmem>>, vector<1x32x16xbf16>
    %465 = vector.shape_cast %464 : vector<1x32x16xbf16> to vector<32x16xbf16>
    %cst_229 = arith.constant dense<0.000000e+00> : vector<64x16xf32>
    %466 = tpu.matmul %425, %465, %cst_229 {dimension_numbers = #tpu.dot_dimension_numbers<[1], [0], [0], [1], [0, 0, 1, 1], [], []>} : vector<64x32xbf16>, vector<32x16xbf16>, vector<64x16xf32> -> vector<64x16xf32>
    %467 = arith.addf %463, %466 : vector<64x16xf32>
    %c13_230 = arith.constant 13 : index
    %c0_231 = arith.constant 0 : index
    %c0_232 = arith.constant 0 : index
    %468 = vector.load %arg13[%c13_230, %c0_231, %c0_232] : memref<16x32x16xbf16, #tpu.memory_space<vmem>>, vector<1x32x16xbf16>
    %469 = vector.shape_cast %468 : vector<1x32x16xbf16> to vector<32x16xbf16>
    %cst_233 = arith.constant dense<0.000000e+00> : vector<64x16xf32>
    %470 = tpu.matmul %405, %469, %cst_233 {dimension_numbers = #tpu.dot_dimension_numbers<[1], [0], [0], [1], [0, 0, 1, 1], [], []>} : vector<64x32xbf16>, vector<32x16xbf16>, vector<64x16xf32> -> vector<64x16xf32>
    %471 = arith.addf %467, %470 : vector<64x16xf32>
    %c15_234 = arith.constant 15 : index
    %c0_235 = arith.constant 0 : index
    %c0_236 = arith.constant 0 : index
    %472 = vector.load %arg13[%c15_234, %c0_235, %c0_236] : memref<16x32x16xbf16, #tpu.memory_space<vmem>>, vector<1x32x16xbf16>
    %473 = vector.shape_cast %472 : vector<1x32x16xbf16> to vector<32x16xbf16>
    %cst_237 = arith.constant dense<0.000000e+00> : vector<64x16xf32>
    %474 = tpu.matmul %401, %473, %cst_237 {dimension_numbers = #tpu.dot_dimension_numbers<[1], [0], [0], [1], [0, 0, 1, 1], [], []>} : vector<64x32xbf16>, vector<32x16xbf16>, vector<64x16xf32> -> vector<64x16xf32>
    %475 = arith.addf %471, %474 : vector<64x16xf32>
    %c6_238 = arith.constant 6 : index
    %c0_239 = arith.constant 0 : index
    %c0_240 = arith.constant 0 : index
    %476 = vector.load %arg13[%c6_238, %c0_239, %c0_240] : memref<16x32x16xbf16, #tpu.memory_space<vmem>>, vector<1x32x16xbf16>
    %477 = vector.shape_cast %476 : vector<1x32x16xbf16> to vector<32x16xbf16>
    %cst_241 = arith.constant dense<0.000000e+00> : vector<64x16xf32>
    %478 = tpu.matmul %426, %477, %cst_241 {dimension_numbers = #tpu.dot_dimension_numbers<[1], [0], [0], [1], [0, 0, 1, 1], [], []>} : vector<64x32xbf16>, vector<32x16xbf16>, vector<64x16xf32> -> vector<64x16xf32>
    %c4_242 = arith.constant 4 : index
    %c0_243 = arith.constant 0 : index
    %c0_244 = arith.constant 0 : index
    %479 = vector.load %arg13[%c4_242, %c0_243, %c0_244] : memref<16x32x16xbf16, #tpu.memory_space<vmem>>, vector<1x32x16xbf16>
    %480 = vector.shape_cast %479 : vector<1x32x16xbf16> to vector<32x16xbf16>
    %cst_245 = arith.constant dense<0.000000e+00> : vector<64x16xf32>
    %481 = tpu.matmul %436, %480, %cst_245 {dimension_numbers = #tpu.dot_dimension_numbers<[1], [0], [0], [1], [0, 0, 1, 1], [], []>} : vector<64x32xbf16>, vector<32x16xbf16>, vector<64x16xf32> -> vector<64x16xf32>
    %482 = arith.addf %478, %481 : vector<64x16xf32>
    %c14_246 = arith.constant 14 : index
    %c0_247 = arith.constant 0 : index
    %c0_248 = arith.constant 0 : index
    %483 = vector.load %arg13[%c14_246, %c0_247, %c0_248] : memref<16x32x16xbf16, #tpu.memory_space<vmem>>, vector<1x32x16xbf16>
    %484 = vector.shape_cast %483 : vector<1x32x16xbf16> to vector<32x16xbf16>
    %cst_249 = arith.constant dense<0.000000e+00> : vector<64x16xf32>
    %485 = tpu.matmul %405, %484, %cst_249 {dimension_numbers = #tpu.dot_dimension_numbers<[1], [0], [0], [1], [0, 0, 1, 1], [], []>} : vector<64x32xbf16>, vector<32x16xbf16>, vector<64x16xf32> -> vector<64x16xf32>
    %486 = arith.addf %482, %485 : vector<64x16xf32>
    %c12_250 = arith.constant 12 : index
    %c0_251 = arith.constant 0 : index
    %c0_252 = arith.constant 0 : index
    %487 = vector.load %arg13[%c12_250, %c0_251, %c0_252] : memref<16x32x16xbf16, #tpu.memory_space<vmem>>, vector<1x32x16xbf16>
    %488 = vector.shape_cast %487 : vector<1x32x16xbf16> to vector<32x16xbf16>
    %cst_253 = arith.constant dense<0.000000e+00> : vector<64x16xf32>
    %489 = tpu.matmul %415, %488, %cst_253 {dimension_numbers = #tpu.dot_dimension_numbers<[1], [0], [0], [1], [0, 0, 1, 1], [], []>} : vector<64x32xbf16>, vector<32x16xbf16>, vector<64x16xf32> -> vector<64x16xf32>
    %490 = arith.addf %486, %489 : vector<64x16xf32>
    %c9_254 = arith.constant 9 : index
    %c0_255 = arith.constant 0 : index
    %c0_256 = arith.constant 0 : index
    %491 = vector.load %arg13[%c9_254, %c0_255, %c0_256] : memref<16x32x16xbf16, #tpu.memory_space<vmem>>, vector<1x32x16xbf16>
    %492 = vector.shape_cast %491 : vector<1x32x16xbf16> to vector<32x16xbf16>
    %cst_257 = arith.constant dense<0.000000e+00> : vector<64x16xf32>
    %493 = tpu.matmul %426, %492, %cst_257 {dimension_numbers = #tpu.dot_dimension_numbers<[1], [0], [0], [1], [0, 0, 1, 1], [], []>} : vector<64x32xbf16>, vector<32x16xbf16>, vector<64x16xf32> -> vector<64x16xf32>
    %c11_258 = arith.constant 11 : index
    %c0_259 = arith.constant 0 : index
    %c0_260 = arith.constant 0 : index
    %494 = vector.load %arg13[%c11_258, %c0_259, %c0_260] : memref<16x32x16xbf16, #tpu.memory_space<vmem>>, vector<1x32x16xbf16>
    %495 = vector.shape_cast %494 : vector<1x32x16xbf16> to vector<32x16xbf16>
    %cst_261 = arith.constant dense<0.000000e+00> : vector<64x16xf32>
    %496 = tpu.matmul %425, %495, %cst_261 {dimension_numbers = #tpu.dot_dimension_numbers<[1], [0], [0], [1], [0, 0, 1, 1], [], []>} : vector<64x32xbf16>, vector<32x16xbf16>, vector<64x16xf32> -> vector<64x16xf32>
    %497 = arith.addf %493, %496 : vector<64x16xf32>
    %c1_262 = arith.constant 1 : index
    %c0_263 = arith.constant 0 : index
    %c0_264 = arith.constant 0 : index
    %498 = vector.load %arg13[%c1_262, %c0_263, %c0_264] : memref<16x32x16xbf16, #tpu.memory_space<vmem>>, vector<1x32x16xbf16>
    %499 = vector.shape_cast %498 : vector<1x32x16xbf16> to vector<32x16xbf16>
    %cst_265 = arith.constant dense<0.000000e+00> : vector<64x16xf32>
    %500 = tpu.matmul %450, %499, %cst_265 {dimension_numbers = #tpu.dot_dimension_numbers<[1], [0], [0], [1], [0, 0, 1, 1], [], []>} : vector<64x32xbf16>, vector<32x16xbf16>, vector<64x16xf32> -> vector<64x16xf32>
    %501 = arith.addf %497, %500 : vector<64x16xf32>
    %c3_266 = arith.constant 3 : index
    %c0_267 = arith.constant 0 : index
    %c0_268 = arith.constant 0 : index
    %502 = vector.load %arg13[%c3_266, %c0_267, %c0_268] : memref<16x32x16xbf16, #tpu.memory_space<vmem>>, vector<1x32x16xbf16>
    %503 = vector.shape_cast %502 : vector<1x32x16xbf16> to vector<32x16xbf16>
    %cst_269 = arith.constant dense<0.000000e+00> : vector<64x16xf32>
    %504 = tpu.matmul %446, %503, %cst_269 {dimension_numbers = #tpu.dot_dimension_numbers<[1], [0], [0], [1], [0, 0, 1, 1], [], []>} : vector<64x32xbf16>, vector<32x16xbf16>, vector<64x16xf32> -> vector<64x16xf32>
    %505 = arith.addf %501, %504 : vector<64x16xf32>
    %c10_270 = arith.constant 10 : index
    %c0_271 = arith.constant 0 : index
    %c0_272 = arith.constant 0 : index
    %506 = vector.load %arg13[%c10_270, %c0_271, %c0_272] : memref<16x32x16xbf16, #tpu.memory_space<vmem>>, vector<1x32x16xbf16>
    %507 = vector.shape_cast %506 : vector<1x32x16xbf16> to vector<32x16xbf16>
    %cst_273 = arith.constant dense<0.000000e+00> : vector<64x16xf32>
    %508 = tpu.matmul %426, %507, %cst_273 {dimension_numbers = #tpu.dot_dimension_numbers<[1], [0], [0], [1], [0, 0, 1, 1], [], []>} : vector<64x32xbf16>, vector<32x16xbf16>, vector<64x16xf32> -> vector<64x16xf32>
    %c8_274 = arith.constant 8 : index
    %c0_275 = arith.constant 0 : index
    %c0_276 = arith.constant 0 : index
    %509 = vector.load %arg13[%c8_274, %c0_275, %c0_276] : memref<16x32x16xbf16, #tpu.memory_space<vmem>>, vector<1x32x16xbf16>
    %510 = vector.shape_cast %509 : vector<1x32x16xbf16> to vector<32x16xbf16>
    %cst_277 = arith.constant dense<0.000000e+00> : vector<64x16xf32>
    %511 = tpu.matmul %436, %510, %cst_277 {dimension_numbers = #tpu.dot_dimension_numbers<[1], [0], [0], [1], [0, 0, 1, 1], [], []>} : vector<64x32xbf16>, vector<32x16xbf16>, vector<64x16xf32> -> vector<64x16xf32>
    %512 = arith.addf %508, %511 : vector<64x16xf32>
    %c2_278 = arith.constant 2 : index
    %c0_279 = arith.constant 0 : index
    %c0_280 = arith.constant 0 : index
    %513 = vector.load %arg13[%c2_278, %c0_279, %c0_280] : memref<16x32x16xbf16, #tpu.memory_space<vmem>>, vector<1x32x16xbf16>
    %514 = vector.shape_cast %513 : vector<1x32x16xbf16> to vector<32x16xbf16>
    %cst_281 = arith.constant dense<0.000000e+00> : vector<64x16xf32>
    %515 = tpu.matmul %450, %514, %cst_281 {dimension_numbers = #tpu.dot_dimension_numbers<[1], [0], [0], [1], [0, 0, 1, 1], [], []>} : vector<64x32xbf16>, vector<32x16xbf16>, vector<64x16xf32> -> vector<64x16xf32>
    %516 = arith.addf %512, %515 : vector<64x16xf32>
    %c0_282 = arith.constant 0 : index
    %c0_283 = arith.constant 0 : index
    %c0_284 = arith.constant 0 : index
    %517 = vector.load %arg13[%c0_282, %c0_283, %c0_284] : memref<16x32x16xbf16, #tpu.memory_space<vmem>>, vector<1x32x16xbf16>
    %518 = vector.shape_cast %517 : vector<1x32x16xbf16> to vector<32x16xbf16>
    %cst_285 = arith.constant dense<0.000000e+00> : vector<64x16xf32>
    %519 = tpu.matmul %460, %518, %cst_285 {dimension_numbers = #tpu.dot_dimension_numbers<[1], [0], [0], [1], [0, 0, 1, 1], [], []>} : vector<64x32xbf16>, vector<32x16xbf16>, vector<64x16xf32> -> vector<64x16xf32>
    %520 = arith.addf %516, %519 : vector<64x16xf32>
    %521 = tpu.concatenate %475, %490, %505, %520 in 0 : vector<64x16xf32>, vector<64x16xf32>, vector<64x16xf32>, vector<64x16xf32> -> vector<256x16xf32>
    %c0_286 = arith.constant 0 : index
    %c0_287 = arith.constant 0 : index
    %522 = vector.load %arg14[%c0_286, %c0_287] : memref<1x16xf32, #tpu.memory_space<vmem>>, vector<1x16xf32>
    %523 = vector.broadcast %522 : vector<1x16xf32> to vector<256x16xf32>
    %524 = arith.addf %521, %523 : vector<256x16xf32>
    %cst_288 = arith.constant 0.000000e+00 : f32
    %525 = vector.broadcast %cst_288 : f32 to vector<256x16xf32>
    %526 = arith.maximumf %524, %525 : vector<256x16xf32>
    %cst_289 = arith.constant dense<0.000000e+00> : vector<16xf32>
    %527 = vector.multi_reduction <add>, %526, %cst_289 [0] : vector<256x16xf32> to vector<16xf32>
    %528 = vector.shape_cast %527 : vector<16xf32> to vector<1x16xf32>
    %cst_290 = arith.constant 2.560000e+02 : f32
    %529 = vector.broadcast %cst_290 : f32 to vector<1x16xf32>
    %530 = arith.divf %528, %529 : vector<1x16xf32>
    %531 = arith.mulf %526, %526 : vector<256x16xf32>
    %cst_291 = arith.constant dense<0.000000e+00> : vector<16xf32>
    %532 = vector.multi_reduction <add>, %531, %cst_291 [0] : vector<256x16xf32> to vector<16xf32>
    %533 = vector.shape_cast %532 : vector<16xf32> to vector<1x16xf32>
    %cst_292 = arith.constant 2.560000e+02 : f32
    %534 = vector.broadcast %cst_292 : f32 to vector<1x16xf32>
    %535 = arith.divf %533, %534 : vector<1x16xf32>
    %536 = arith.mulf %530, %530 : vector<1x16xf32>
    %537 = arith.subf %535, %536 : vector<1x16xf32>
    %cst_293 = arith.constant 0.000000e+00 : f32
    %538 = vector.broadcast %cst_293 : f32 to vector<1x16xf32>
    %539 = arith.maximumf %537, %538 : vector<1x16xf32>
    %c0_294 = arith.constant 0 : index
    %c0_295 = arith.constant 0 : index
    %540 = vector.load %arg15[%c0_294, %c0_295] : memref<1x16xf32, #tpu.memory_space<vmem>>, vector<1x16xf32>
    %541 = vector.broadcast %530 : vector<1x16xf32> to vector<256x16xf32>
    %542 = arith.subf %526, %541 : vector<256x16xf32>
    %543 = vector.broadcast %540 : vector<1x16xf32> to vector<256x16xf32>
    %544 = arith.mulf %543, %542 : vector<256x16xf32>
    %cst_296 = arith.constant 9.99999974E-6 : f32
    %545 = vector.broadcast %cst_296 : f32 to vector<1x16xf32>
    %546 = arith.addf %539, %545 : vector<1x16xf32>
    %547 = math.rsqrt %546 : vector<1x16xf32>
    %548 = vector.broadcast %547 : vector<1x16xf32> to vector<256x16xf32>
    %549 = arith.mulf %544, %548 : vector<256x16xf32>
    %c0_297 = arith.constant 0 : index
    %c0_298 = arith.constant 0 : index
    %550 = vector.load %arg16[%c0_297, %c0_298] : memref<1x16xf32, #tpu.memory_space<vmem>>, vector<1x16xf32>
    %551 = vector.broadcast %550 : vector<1x16xf32> to vector<256x16xf32>
    %552 = arith.addf %549, %551 : vector<256x16xf32>
    %c0_299 = arith.constant 0 : index
    %c0_300 = arith.constant 0 : index
    %553 = vector.load %arg17[%c0_299, %c0_300] : memref<256x256xbf16, #tpu.memory_space<vmem>>, vector<256x256xbf16>
    %554 = arith.truncf %552 : vector<256x16xf32> to vector<256x16xbf16>
    %cst_301 = arith.constant dense<0.000000e+00> : vector<256x16xf32>
    %555 = tpu.matmul %553, %554, %cst_301 {dimension_numbers = #tpu.dot_dimension_numbers<[1], [0], [0], [1], [0, 0, 1, 1], [], []>} : vector<256x256xbf16>, vector<256x16xbf16>, vector<256x16xf32> -> vector<256x16xf32>
    %556 = tpu.iota {dimensions = array<i32: 0>} : vector<256x1xi32>
    %c16_i32 = arith.constant 16 : i32
    %c0_i32_302 = arith.constant 0 : i32
    %557 = arith.cmpi eq, %c16_i32, %c0_i32_302 : i32
    %c1_i32_303 = arith.constant 1 : i32
    %558 = arith.select %557, %c1_i32_303, %c16_i32 : i32
    %559 = vector.broadcast %558 : i32 to vector<256x1xi32>
    %560 = arith.remsi %556, %559 : vector<256x1xi32>
    %c0_i32_304 = arith.constant 0 : i32
    %561 = vector.broadcast %c0_i32_304 : i32 to vector<256x1xi32>
    %562 = arith.cmpi ne, %560, %561 : vector<256x1xi32>
    %c0_i32_305 = arith.constant 0 : i32
    %563 = vector.broadcast %c0_i32_305 : i32 to vector<256x1xi32>
    %564 = arith.cmpi slt, %560, %563 : vector<256x1xi32>
    %c0_i32_306 = arith.constant 0 : i32
    %565 = arith.cmpi slt, %558, %c0_i32_306 : i32
    %566 = vector.broadcast %565 : i1 to vector<256x1xi1>
    %567 = vector.broadcast %566 : vector<256x1xi1> to vector<256x1xi1>
    %568 = arith.xori %564, %567 : vector<256x1xi1>
    %569 = arith.andi %568, %562 : vector<256x1xi1>
    %570 = vector.broadcast %558 : i32 to vector<256x1xi32>
    %571 = arith.addi %560, %570 : vector<256x1xi32>
    %572 = arith.select %569, %571, %560 : vector<256x1xi1>, vector<256x1xi32>
    %cst_307 = arith.constant 0.000000e+00 : f32
    %573 = vector.broadcast %cst_307 : f32 to vector<17x16xf32>
    %574 = vector.extract_strided_slice %555 {offsets = [0, 0], sizes = [239, 16], strides = [1, 1]} : vector<256x16xf32> to vector<239x16xf32>
    %575 = tpu.concatenate %573, %574 in 0 : vector<17x16xf32>, vector<239x16xf32> -> vector<256x16xf32>
    %c1_i32_308 = arith.constant 1 : i32
    %576 = vector.broadcast %c1_i32_308 : i32 to vector<256x1xi32>
    %577 = arith.cmpi sge, %572, %576 : vector<256x1xi32>
    %cst_309 = arith.constant 0.000000e+00 : f32
    %578 = vector.shape_cast %577 : vector<256x1xi1> to vector<256x1xi1>
    %579 = vector.broadcast %578 : vector<256x1xi1> to vector<256x16xi1>
    %580 = vector.broadcast %cst_309 : f32 to vector<256x16xf32>
    %581 = arith.select %579, %575, %580 : vector<256x16xi1>, vector<256x16xf32>
    %582 = arith.truncf %581 : vector<256x16xf32> to vector<256x16xbf16>
    %cst_310 = arith.constant 0.000000e+00 : f32
    %583 = vector.broadcast %cst_310 : f32 to vector<16x16xf32>
    %584 = vector.extract_strided_slice %555 {offsets = [0, 0], sizes = [240, 16], strides = [1, 1]} : vector<256x16xf32> to vector<240x16xf32>
    %585 = tpu.concatenate %583, %584 in 0 : vector<16x16xf32>, vector<240x16xf32> -> vector<256x16xf32>
    %586 = arith.truncf %585 : vector<256x16xf32> to vector<256x16xbf16>
    %cst_311 = arith.constant 0.000000e+00 : f32
    %587 = vector.broadcast %cst_311 : f32 to vector<15x16xf32>
    %588 = vector.extract_strided_slice %555 {offsets = [0, 0], sizes = [241, 16], strides = [1, 1]} : vector<256x16xf32> to vector<241x16xf32>
    %589 = tpu.concatenate %587, %588 in 0 : vector<15x16xf32>, vector<241x16xf32> -> vector<256x16xf32>
    %c15_i32 = arith.constant 15 : i32
    %590 = vector.broadcast %c15_i32 : i32 to vector<256x1xi32>
    %591 = arith.cmpi slt, %572, %590 : vector<256x1xi32>
    %cst_312 = arith.constant 0.000000e+00 : f32
    %592 = vector.shape_cast %591 : vector<256x1xi1> to vector<256x1xi1>
    %593 = vector.broadcast %592 : vector<256x1xi1> to vector<256x16xi1>
    %594 = vector.broadcast %cst_312 : f32 to vector<256x16xf32>
    %595 = arith.select %593, %589, %594 : vector<256x16xi1>, vector<256x16xf32>
    %596 = arith.truncf %595 : vector<256x16xf32> to vector<256x16xbf16>
    %cst_313 = arith.constant 0.000000e+00 : f32
    %597 = vector.broadcast %cst_313 : f32 to vector<1x16xf32>
    %598 = vector.extract_strided_slice %555 {offsets = [0, 0], sizes = [255, 16], strides = [1, 1]} : vector<256x16xf32> to vector<255x16xf32>
    %599 = tpu.concatenate %597, %598 in 0 : vector<1x16xf32>, vector<255x16xf32> -> vector<256x16xf32>
    %c1_i32_314 = arith.constant 1 : i32
    %600 = vector.broadcast %c1_i32_314 : i32 to vector<256x1xi32>
    %601 = arith.cmpi sge, %572, %600 : vector<256x1xi32>
    %cst_315 = arith.constant 0.000000e+00 : f32
    %602 = vector.shape_cast %601 : vector<256x1xi1> to vector<256x1xi1>
    %603 = vector.broadcast %602 : vector<256x1xi1> to vector<256x16xi1>
    %604 = vector.broadcast %cst_315 : f32 to vector<256x16xf32>
    %605 = arith.select %603, %599, %604 : vector<256x16xi1>, vector<256x16xf32>
    %606 = arith.truncf %605 : vector<256x16xf32> to vector<256x16xbf16>
    %607 = arith.truncf %555 : vector<256x16xf32> to vector<256x16xbf16>
    %cst_316 = arith.constant 0.000000e+00 : f32
    %608 = vector.broadcast %cst_316 : f32 to vector<1x16xf32>
    %609 = vector.extract_strided_slice %555 {offsets = [1, 0], sizes = [255, 16], strides = [1, 1]} : vector<256x16xf32> to vector<255x16xf32>
    %610 = tpu.concatenate %609, %608 in 0 : vector<255x16xf32>, vector<1x16xf32> -> vector<256x16xf32>
    %c15_i32_317 = arith.constant 15 : i32
    %611 = vector.broadcast %c15_i32_317 : i32 to vector<256x1xi32>
    %612 = arith.cmpi slt, %572, %611 : vector<256x1xi32>
    %cst_318 = arith.constant 0.000000e+00 : f32
    %613 = vector.shape_cast %612 : vector<256x1xi1> to vector<256x1xi1>
    %614 = vector.broadcast %613 : vector<256x1xi1> to vector<256x16xi1>
    %615 = vector.broadcast %cst_318 : f32 to vector<256x16xf32>
    %616 = arith.select %614, %610, %615 : vector<256x16xi1>, vector<256x16xf32>
    %617 = arith.truncf %616 : vector<256x16xf32> to vector<256x16xbf16>
    %cst_319 = arith.constant 0.000000e+00 : f32
    %618 = vector.broadcast %cst_319 : f32 to vector<15x16xf32>
    %619 = vector.extract_strided_slice %555 {offsets = [15, 0], sizes = [241, 16], strides = [1, 1]} : vector<256x16xf32> to vector<241x16xf32>
    %620 = tpu.concatenate %619, %618 in 0 : vector<241x16xf32>, vector<15x16xf32> -> vector<256x16xf32>
    %c1_i32_320 = arith.constant 1 : i32
    %621 = vector.broadcast %c1_i32_320 : i32 to vector<256x1xi32>
    %622 = arith.cmpi sge, %572, %621 : vector<256x1xi32>
    %cst_321 = arith.constant 0.000000e+00 : f32
    %623 = vector.shape_cast %622 : vector<256x1xi1> to vector<256x1xi1>
    %624 = vector.broadcast %623 : vector<256x1xi1> to vector<256x16xi1>
    %625 = vector.broadcast %cst_321 : f32 to vector<256x16xf32>
    %626 = arith.select %624, %620, %625 : vector<256x16xi1>, vector<256x16xf32>
    %627 = arith.truncf %626 : vector<256x16xf32> to vector<256x16xbf16>
    %cst_322 = arith.constant 0.000000e+00 : f32
    %628 = vector.broadcast %cst_322 : f32 to vector<16x16xf32>
    %629 = vector.extract_strided_slice %555 {offsets = [16, 0], sizes = [240, 16], strides = [1, 1]} : vector<256x16xf32> to vector<240x16xf32>
    %630 = tpu.concatenate %629, %628 in 0 : vector<240x16xf32>, vector<16x16xf32> -> vector<256x16xf32>
    %631 = arith.truncf %630 : vector<256x16xf32> to vector<256x16xbf16>
    %cst_323 = arith.constant 0.000000e+00 : f32
    %632 = vector.broadcast %cst_323 : f32 to vector<17x16xf32>
    %633 = vector.extract_strided_slice %555 {offsets = [17, 0], sizes = [239, 16], strides = [1, 1]} : vector<256x16xf32> to vector<239x16xf32>
    %634 = tpu.concatenate %633, %632 in 0 : vector<239x16xf32>, vector<17x16xf32> -> vector<256x16xf32>
    %c15_i32_324 = arith.constant 15 : i32
    %635 = vector.broadcast %c15_i32_324 : i32 to vector<256x1xi32>
    %636 = arith.cmpi slt, %572, %635 : vector<256x1xi32>
    %cst_325 = arith.constant 0.000000e+00 : f32
    %637 = vector.shape_cast %636 : vector<256x1xi1> to vector<256x1xi1>
    %638 = vector.broadcast %637 : vector<256x1xi1> to vector<256x16xi1>
    %639 = vector.broadcast %cst_325 : f32 to vector<256x16xf32>
    %640 = arith.select %638, %634, %639 : vector<256x16xi1>, vector<256x16xf32>
    %641 = arith.truncf %640 : vector<256x16xf32> to vector<256x16xbf16>
    %c5_326 = arith.constant 5 : index
    %c0_327 = arith.constant 0 : index
    %c0_328 = arith.constant 0 : index
    %642 = vector.load %arg18[%c5_326, %c0_327, %c0_328] : memref<16x16x1xbf16, #tpu.memory_space<vmem>>, vector<1x16x1xbf16>
    %643 = vector.shape_cast %642 : vector<1x16x1xbf16> to vector<16x1xbf16>
    %cst_329 = arith.constant dense<0.000000e+00> : vector<256x1xf32>
    %644 = tpu.matmul %607, %643, %cst_329 {dimension_numbers = #tpu.dot_dimension_numbers<[1], [0], [0], [1], [0, 0, 1, 1], [], []>} : vector<256x16xbf16>, vector<16x1xbf16>, vector<256x1xf32> -> vector<256x1xf32>
    %c7_330 = arith.constant 7 : index
    %c0_331 = arith.constant 0 : index
    %c0_332 = arith.constant 0 : index
    %645 = vector.load %arg18[%c7_330, %c0_331, %c0_332] : memref<16x16x1xbf16, #tpu.memory_space<vmem>>, vector<1x16x1xbf16>
    %646 = vector.shape_cast %645 : vector<1x16x1xbf16> to vector<16x1xbf16>
    %cst_333 = arith.constant dense<0.000000e+00> : vector<256x1xf32>
    %647 = tpu.matmul %606, %646, %cst_333 {dimension_numbers = #tpu.dot_dimension_numbers<[1], [0], [0], [1], [0, 0, 1, 1], [], []>} : vector<256x16xbf16>, vector<16x1xbf16>, vector<256x1xf32> -> vector<256x1xf32>
    %648 = arith.addf %644, %647 : vector<256x1xf32>
    %c13_334 = arith.constant 13 : index
    %c0_335 = arith.constant 0 : index
    %c0_336 = arith.constant 0 : index
    %649 = vector.load %arg18[%c13_334, %c0_335, %c0_336] : memref<16x16x1xbf16, #tpu.memory_space<vmem>>, vector<1x16x1xbf16>
    %650 = vector.shape_cast %649 : vector<1x16x1xbf16> to vector<16x1xbf16>
    %cst_337 = arith.constant dense<0.000000e+00> : vector<256x1xf32>
    %651 = tpu.matmul %586, %650, %cst_337 {dimension_numbers = #tpu.dot_dimension_numbers<[1], [0], [0], [1], [0, 0, 1, 1], [], []>} : vector<256x16xbf16>, vector<16x1xbf16>, vector<256x1xf32> -> vector<256x1xf32>
    %652 = arith.addf %648, %651 : vector<256x1xf32>
    %c15_338 = arith.constant 15 : index
    %c0_339 = arith.constant 0 : index
    %c0_340 = arith.constant 0 : index
    %653 = vector.load %arg18[%c15_338, %c0_339, %c0_340] : memref<16x16x1xbf16, #tpu.memory_space<vmem>>, vector<1x16x1xbf16>
    %654 = vector.shape_cast %653 : vector<1x16x1xbf16> to vector<16x1xbf16>
    %cst_341 = arith.constant dense<0.000000e+00> : vector<256x1xf32>
    %655 = tpu.matmul %582, %654, %cst_341 {dimension_numbers = #tpu.dot_dimension_numbers<[1], [0], [0], [1], [0, 0, 1, 1], [], []>} : vector<256x16xbf16>, vector<16x1xbf16>, vector<256x1xf32> -> vector<256x1xf32>
    %656 = arith.addf %652, %655 : vector<256x1xf32>
    %c6_342 = arith.constant 6 : index
    %c0_343 = arith.constant 0 : index
    %c0_344 = arith.constant 0 : index
    %657 = vector.load %arg18[%c6_342, %c0_343, %c0_344] : memref<16x16x1xbf16, #tpu.memory_space<vmem>>, vector<1x16x1xbf16>
    %658 = vector.shape_cast %657 : vector<1x16x1xbf16> to vector<16x1xbf16>
    %cst_345 = arith.constant dense<0.000000e+00> : vector<256x1xf32>
    %659 = tpu.matmul %607, %658, %cst_345 {dimension_numbers = #tpu.dot_dimension_numbers<[1], [0], [0], [1], [0, 0, 1, 1], [], []>} : vector<256x16xbf16>, vector<16x1xbf16>, vector<256x1xf32> -> vector<256x1xf32>
    %c4_346 = arith.constant 4 : index
    %c0_347 = arith.constant 0 : index
    %c0_348 = arith.constant 0 : index
    %660 = vector.load %arg18[%c4_346, %c0_347, %c0_348] : memref<16x16x1xbf16, #tpu.memory_space<vmem>>, vector<1x16x1xbf16>
    %661 = vector.shape_cast %660 : vector<1x16x1xbf16> to vector<16x1xbf16>
    %cst_349 = arith.constant dense<0.000000e+00> : vector<256x1xf32>
    %662 = tpu.matmul %617, %661, %cst_349 {dimension_numbers = #tpu.dot_dimension_numbers<[1], [0], [0], [1], [0, 0, 1, 1], [], []>} : vector<256x16xbf16>, vector<16x1xbf16>, vector<256x1xf32> -> vector<256x1xf32>
    %663 = arith.addf %659, %662 : vector<256x1xf32>
    %c14_350 = arith.constant 14 : index
    %c0_351 = arith.constant 0 : index
    %c0_352 = arith.constant 0 : index
    %664 = vector.load %arg18[%c14_350, %c0_351, %c0_352] : memref<16x16x1xbf16, #tpu.memory_space<vmem>>, vector<1x16x1xbf16>
    %665 = vector.shape_cast %664 : vector<1x16x1xbf16> to vector<16x1xbf16>
    %cst_353 = arith.constant dense<0.000000e+00> : vector<256x1xf32>
    %666 = tpu.matmul %586, %665, %cst_353 {dimension_numbers = #tpu.dot_dimension_numbers<[1], [0], [0], [1], [0, 0, 1, 1], [], []>} : vector<256x16xbf16>, vector<16x1xbf16>, vector<256x1xf32> -> vector<256x1xf32>
    %667 = arith.addf %663, %666 : vector<256x1xf32>
    %c12_354 = arith.constant 12 : index
    %c0_355 = arith.constant 0 : index
    %c0_356 = arith.constant 0 : index
    %668 = vector.load %arg18[%c12_354, %c0_355, %c0_356] : memref<16x16x1xbf16, #tpu.memory_space<vmem>>, vector<1x16x1xbf16>
    %669 = vector.shape_cast %668 : vector<1x16x1xbf16> to vector<16x1xbf16>
    %cst_357 = arith.constant dense<0.000000e+00> : vector<256x1xf32>
    %670 = tpu.matmul %596, %669, %cst_357 {dimension_numbers = #tpu.dot_dimension_numbers<[1], [0], [0], [1], [0, 0, 1, 1], [], []>} : vector<256x16xbf16>, vector<16x1xbf16>, vector<256x1xf32> -> vector<256x1xf32>
    %671 = arith.addf %667, %670 : vector<256x1xf32>
    %c9_358 = arith.constant 9 : index
    %c0_359 = arith.constant 0 : index
    %c0_360 = arith.constant 0 : index
    %672 = vector.load %arg18[%c9_358, %c0_359, %c0_360] : memref<16x16x1xbf16, #tpu.memory_space<vmem>>, vector<1x16x1xbf16>
    %673 = vector.shape_cast %672 : vector<1x16x1xbf16> to vector<16x1xbf16>
    %cst_361 = arith.constant dense<0.000000e+00> : vector<256x1xf32>
    %674 = tpu.matmul %607, %673, %cst_361 {dimension_numbers = #tpu.dot_dimension_numbers<[1], [0], [0], [1], [0, 0, 1, 1], [], []>} : vector<256x16xbf16>, vector<16x1xbf16>, vector<256x1xf32> -> vector<256x1xf32>
    %c11_362 = arith.constant 11 : index
    %c0_363 = arith.constant 0 : index
    %c0_364 = arith.constant 0 : index
    %675 = vector.load %arg18[%c11_362, %c0_363, %c0_364] : memref<16x16x1xbf16, #tpu.memory_space<vmem>>, vector<1x16x1xbf16>
    %676 = vector.shape_cast %675 : vector<1x16x1xbf16> to vector<16x1xbf16>
    %cst_365 = arith.constant dense<0.000000e+00> : vector<256x1xf32>
    %677 = tpu.matmul %606, %676, %cst_365 {dimension_numbers = #tpu.dot_dimension_numbers<[1], [0], [0], [1], [0, 0, 1, 1], [], []>} : vector<256x16xbf16>, vector<16x1xbf16>, vector<256x1xf32> -> vector<256x1xf32>
    %678 = arith.addf %674, %677 : vector<256x1xf32>
    %c1_366 = arith.constant 1 : index
    %c0_367 = arith.constant 0 : index
    %c0_368 = arith.constant 0 : index
    %679 = vector.load %arg18[%c1_366, %c0_367, %c0_368] : memref<16x16x1xbf16, #tpu.memory_space<vmem>>, vector<1x16x1xbf16>
    %680 = vector.shape_cast %679 : vector<1x16x1xbf16> to vector<16x1xbf16>
    %cst_369 = arith.constant dense<0.000000e+00> : vector<256x1xf32>
    %681 = tpu.matmul %631, %680, %cst_369 {dimension_numbers = #tpu.dot_dimension_numbers<[1], [0], [0], [1], [0, 0, 1, 1], [], []>} : vector<256x16xbf16>, vector<16x1xbf16>, vector<256x1xf32> -> vector<256x1xf32>
    %682 = arith.addf %678, %681 : vector<256x1xf32>
    %c3_370 = arith.constant 3 : index
    %c0_371 = arith.constant 0 : index
    %c0_372 = arith.constant 0 : index
    %683 = vector.load %arg18[%c3_370, %c0_371, %c0_372] : memref<16x16x1xbf16, #tpu.memory_space<vmem>>, vector<1x16x1xbf16>
    %684 = vector.shape_cast %683 : vector<1x16x1xbf16> to vector<16x1xbf16>
    %cst_373 = arith.constant dense<0.000000e+00> : vector<256x1xf32>
    %685 = tpu.matmul %627, %684, %cst_373 {dimension_numbers = #tpu.dot_dimension_numbers<[1], [0], [0], [1], [0, 0, 1, 1], [], []>} : vector<256x16xbf16>, vector<16x1xbf16>, vector<256x1xf32> -> vector<256x1xf32>
    %686 = arith.addf %682, %685 : vector<256x1xf32>
    %c10_374 = arith.constant 10 : index
    %c0_375 = arith.constant 0 : index
    %c0_376 = arith.constant 0 : index
    %687 = vector.load %arg18[%c10_374, %c0_375, %c0_376] : memref<16x16x1xbf16, #tpu.memory_space<vmem>>, vector<1x16x1xbf16>
    %688 = vector.shape_cast %687 : vector<1x16x1xbf16> to vector<16x1xbf16>
    %cst_377 = arith.constant dense<0.000000e+00> : vector<256x1xf32>
    %689 = tpu.matmul %607, %688, %cst_377 {dimension_numbers = #tpu.dot_dimension_numbers<[1], [0], [0], [1], [0, 0, 1, 1], [], []>} : vector<256x16xbf16>, vector<16x1xbf16>, vector<256x1xf32> -> vector<256x1xf32>
    %c8_378 = arith.constant 8 : index
    %c0_379 = arith.constant 0 : index
    %c0_380 = arith.constant 0 : index
    %690 = vector.load %arg18[%c8_378, %c0_379, %c0_380] : memref<16x16x1xbf16, #tpu.memory_space<vmem>>, vector<1x16x1xbf16>
    %691 = vector.shape_cast %690 : vector<1x16x1xbf16> to vector<16x1xbf16>
    %cst_381 = arith.constant dense<0.000000e+00> : vector<256x1xf32>
    %692 = tpu.matmul %617, %691, %cst_381 {dimension_numbers = #tpu.dot_dimension_numbers<[1], [0], [0], [1], [0, 0, 1, 1], [], []>} : vector<256x16xbf16>, vector<16x1xbf16>, vector<256x1xf32> -> vector<256x1xf32>
    %693 = arith.addf %689, %692 : vector<256x1xf32>
    %c2_382 = arith.constant 2 : index
    %c0_383 = arith.constant 0 : index
    %c0_384 = arith.constant 0 : index
    %694 = vector.load %arg18[%c2_382, %c0_383, %c0_384] : memref<16x16x1xbf16, #tpu.memory_space<vmem>>, vector<1x16x1xbf16>
    %695 = vector.shape_cast %694 : vector<1x16x1xbf16> to vector<16x1xbf16>
    %cst_385 = arith.constant dense<0.000000e+00> : vector<256x1xf32>
    %696 = tpu.matmul %631, %695, %cst_385 {dimension_numbers = #tpu.dot_dimension_numbers<[1], [0], [0], [1], [0, 0, 1, 1], [], []>} : vector<256x16xbf16>, vector<16x1xbf16>, vector<256x1xf32> -> vector<256x1xf32>
    %697 = arith.addf %693, %696 : vector<256x1xf32>
    %c0_386 = arith.constant 0 : index
    %c0_387 = arith.constant 0 : index
    %c0_388 = arith.constant 0 : index
    %698 = vector.load %arg18[%c0_386, %c0_387, %c0_388] : memref<16x16x1xbf16, #tpu.memory_space<vmem>>, vector<1x16x1xbf16>
    %699 = vector.shape_cast %698 : vector<1x16x1xbf16> to vector<16x1xbf16>
    %cst_389 = arith.constant dense<0.000000e+00> : vector<256x1xf32>
    %700 = tpu.matmul %641, %699, %cst_389 {dimension_numbers = #tpu.dot_dimension_numbers<[1], [0], [0], [1], [0, 0, 1, 1], [], []>} : vector<256x16xbf16>, vector<16x1xbf16>, vector<256x1xf32> -> vector<256x1xf32>
    %701 = arith.addf %697, %700 : vector<256x1xf32>
    %c0_390 = arith.constant 0 : index
    %c0_391 = arith.constant 0 : index
    %702 = vector.load %arg19[%c0_390, %c0_391] : memref<1x1xf32, #tpu.memory_space<vmem>>, vector<1x1xf32>
    %703 = vector.broadcast %702 : vector<1x1xf32> to vector<256x1xf32>
    %704 = arith.addf %656, %703 : vector<256x1xf32>
    %705 = math.tanh %704 : vector<256x1xf32>
    %c0_392 = arith.constant 0 : index
    %c0_393 = arith.constant 0 : index
    %706 = vector.load %arg19[%c0_392, %c0_393] : memref<1x1xf32, #tpu.memory_space<vmem>>, vector<1x1xf32>
    %707 = vector.broadcast %706 : vector<1x1xf32> to vector<256x1xf32>
    %708 = arith.addf %671, %707 : vector<256x1xf32>
    %709 = math.tanh %708 : vector<256x1xf32>
    %c0_394 = arith.constant 0 : index
    %c0_395 = arith.constant 0 : index
    %710 = vector.load %arg19[%c0_394, %c0_395] : memref<1x1xf32, #tpu.memory_space<vmem>>, vector<1x1xf32>
    %711 = vector.broadcast %710 : vector<1x1xf32> to vector<256x1xf32>
    %712 = arith.addf %686, %711 : vector<256x1xf32>
    %713 = math.tanh %712 : vector<256x1xf32>
    %c0_396 = arith.constant 0 : index
    %c0_397 = arith.constant 0 : index
    %714 = vector.load %arg19[%c0_396, %c0_397] : memref<1x1xf32, #tpu.memory_space<vmem>>, vector<1x1xf32>
    %715 = vector.broadcast %714 : vector<1x1xf32> to vector<256x1xf32>
    %716 = arith.addf %701, %715 : vector<256x1xf32>
    %717 = math.tanh %716 : vector<256x1xf32>
    %718 = tpu.concatenate %705, %709, %713, %717 in 1 : vector<256x1xf32>, vector<256x1xf32>, vector<256x1xf32>, vector<256x1xf32> -> vector<256x4xf32>
    %c0_398 = arith.constant 0 : index
    %c0_399 = arith.constant 0 : index
    %719 = vector.load %arg20[%c0_398, %c0_399] : memref<256x4xf32, #tpu.memory_space<vmem>>, vector<256x4xf32>
    tpu.vector_store %arg20[%c0_398, %c0_399], %718 {strides = array<i32>} : memref<256x4xf32, #tpu.memory_space<vmem>>, vector<256x4xf32>,
    return
  }
}

</mosaic_0001>

<bundles_post_ra>
// kernel: wgan_gp_forward.1
= control target key start
LH: loop header
LB: loop body
LE: loop exit
PB: predicated region body
PF: predicated region fallthrough
CT: control target
= control target key end

     0   :  { %v15789_v1 = vmov 0   ;;  %vm252_vm0 = vcmask 1041408   ;;  %vm248_vm1 = vcmask 818176   ;;  %v20413_v37 = vmov 0.0   ;;  %s20385_s1 = inlined_call_operand.vmem [shape: bf16[100,512], index: 1, kind: input, shape index: {}]   ;;  %s20386_s3 = inlined_call_operand.vmem [shape: bf16[16,128,64], index: 3, kind: input, shape index: {}]   ;;  %s20387_s0 = inlined_call_operand.vmem [shape: f32[1,100], index: 0, kind: input, shape index: {}]   ;;  %s20388_s2 = inlined_call_operand.vmem [shape: f32[1,512], index: 2, kind: input, shape index: {}]   ;;  %s20389_s7 = inlined_call_operand.vmem [shape: bf16[16,16], index: 7, kind: input, shape index: {}]   ;;  %s20390_s8 = inlined_call_operand.vmem [shape: bf16[16,64,32], index: 8, kind: input, shape index: {}]   ;;  %s20391_s4 = inlined_call_operand.vmem [shape: f32[1,64], index: 4, kind: input, shape index: {}]   ;;  %s20392_s5 = inlined_call_operand.vmem [shape: f32[1,64], index: 5, kind: input, shape index: {}]   ;;  %s20393_s6 = inlined_call_operand.vmem [shape: f32[1,64], index: 6, kind: input, shape index: {}]   ;;  %s20394_s9 = inlined_call_operand.vmem [shape: f32[1,32], index: 9, kind: input, shape index: {}]   ;;  %s20395_s12 = inlined_call_operand.vmem [shape: bf16[64,64], index: 12, kind: input, shape index: {}]   ;;  %s20396_s10 = inlined_call_operand.vmem [shape: f32[1,32], index: 10, kind: input, shape index: {}]   ;;  %s20397_s11 = inlined_call_operand.vmem [shape: f32[1,32], index: 11, kind: input, shape index: {}]   ;;  %s20398_s13 = inlined_call_operand.vmem [shape: bf16[16,32,16], index: 13, kind: input, shape index: {}]   ;;  %s20399_s14 = inlined_call_operand.vmem [shape: f32[1,16], index: 14, kind: input, shape index: {}]   ;;  %s20400_s17 = inlined_call_operand.vmem [shape: bf16[256,256], index: 17, kind: input, shape index: {}]   ;;  %s20401_s15 = inlined_call_operand.vmem [shape: f32[1,16], index: 15, kind: input, shape index: {}]   ;;  %s20402_s16 = inlined_call_operand.vmem [shape: f32[1,16], index: 16, kind: input, shape index: {}]   ;;  %s20403_s18 = inlined_call_operand.vmem [shape: bf16[16,16,1], index: 18, kind: input, shape index: {}]   ;;  %s20404_s19 = inlined_call_operand.<no memory space> [shape: f32[1,1], index: 19, kind: input, shape index: {}]   ;;  %s20405_s20 = inlined_call_operand.vmem [shape: f32[256,4], index: 20, kind: output, shape index: {}]  }
   0x1   :  { %20453 = sst [smem:[#allocation69_spill]] %s20385_s1  ;;  %297 = vmatprep.mubr.bf16.mxu0 %v15789_v1  ;;  %338 = vmatprep.mubr.bf16.mxu1 %v15789_v1  ;;  %vm15791_vm2 = vmmov 0   ;;  %v228_v52 = vlaneseq  ;;  %vm20417_vm3 = vcmask 1040384   ;;  %vm363_vm4 = vcmask 1042432   ;;  %vm11637_vm9 = vmneg %vm252_vm0 }
   0x2   :  { %20454 = sst [smem:[#allocation70_spill]] %s20386_s3  ;;  %s20458_s23 = sld [smem:[#allocation69_spill]]  ;;  %vm11639_vm10 = vmpackc.low %vm11637_vm9, %vm11637_vm9  ;;  %vm2112_vm12 = vcmask 1043456   ;;  %vm2126_vm13 = vcmask 523264   ;;  %vm20408_vm14 = vcmask 130048   ;;  %vm2257_vm15 = vcmask 1044480  }
   0x3   :  { %20455 = sst [smem:[#allocation71_spill]] %s20387_s0  ;;  %s20460_s3 = sld [smem:[#allocation70_spill]]  ;;  %v16058_v53 = vshrl.u32 %v228_v52, 7  ;;  %vm11851_vm11 = vmpackc.low %vm252_vm0, %vm252_vm0 }
   0x4   :  { %20456 = sst [smem:[#allocation72_spill]] %s20388_s2  ;;  %s20459_s1 = sld [smem:[#allocation71_spill]] }
   0x5   :  { %20457 = sst [smem:[#allocation73_spill]] %s20389_s7  ;;  %v238_v54 = vsub.s32 2, %v16058_v53  ;;  %v230_v55 = vsub.s32 0, %v16058_v53  ;;  %v234_v56 = vsub.s32 1, %v16058_v53  ;;  %v242_v57 = vsub.s32 3, %v16058_v53  ;;  %s20461_s2 = sld [smem:[#allocation72_spill]] }
   0x6   :  { %s20466_s24 = sld [smem:[#allocation73_spill]] }
   0x8   :  { %v15193_v0 = vld [vmem:[%s20458_s23 + $0x4] ss:$16 sps:$4 sm:$0xff]   ;;  %v15195_v2 = vld [vmem:[%s20458_s23 + $0xc] ss:$16 sps:$4 sm:$0xff]   ;;  %v15197_v3 = vld [vmem:[%s20458_s23] ss:$16 sps:$4 sm:$0xff]  }
   0x9   :  { %265 = vmatprep.subr.bf16.mxu0 %v15193_v0  ;;  %v15198_v4 = vld [vmem:[%s20458_s23 + $0x8] ss:$16 sps:$4 sm:$0xff]   ;;  %306 = vmatprep.subr.bf16.mxu1 %v15195_v2  ;;  %v15199_v5 = vld [vmem:[%s20458_s23 + $0x24] ss:$16 sps:$4 sm:$0xff]   ;;  %v15201_v6 = vld [vmem:[%s20458_s23 + $0x2c] ss:$16 sps:$4 sm:$0xff]  }
   0xa   :  { %266 = vmatpush1.bf16.msra.mxu0 %v15197_v3  ;;  %307 = vmatpush1.bf16.msra.mxu1 %v15198_v4  ;;  %v15203_v7 = vld [vmem:[%s20458_s23 + $0x20] ss:$16 sps:$4 sm:$0xff]   ;;  %v15204_v8 = vld [vmem:[%s20458_s23 + $0x28] ss:$16 sps:$4 sm:$0xff]   ;;  %v15205_v9 = vld [vmem:[%s20458_s23 + $0x44] ss:$16 sps:$4 sm:$0xff]  }
   0xb   :  { %267 = vmatprep.subr.bf16.mxu0 %v15199_v5  ;;  %308 = vmatprep.subr.bf16.mxu1 %v15201_v6  ;;  %v15207_v10 = vld [vmem:[%s20458_s23 + $0x4c] ss:$16 sps:$4 sm:$0xff]   ;;  %v15209_v11 = vld [vmem:[%s20458_s23 + $0x40] ss:$16 sps:$4 sm:$0xff]   ;;  %v15210_v12 = vld [vmem:[%s20458_s23 + $0x48] ss:$16 sps:$4 sm:$0xff]  }
   0xc   :  { %v15211_v13 = vld [vmem:[%s20458_s23 + $0x64] ss:$16 sps:$4 sm:$0xff]   ;;  %v15213_v14 = vld [vmem:[%s20458_s23 + $0x6c] ss:$16 sps:$4 sm:$0xff]   ;;  %v15215_v15 = vld [vmem:[%s20458_s23 + $0x60] ss:$16 sps:$4 sm:$0xff]  }
   0xd   :  { %v15216_v16 = vld [vmem:[%s20458_s23 + $0x68] ss:$16 sps:$4 sm:$0xff]   ;;  %v15217_v17 = vld [vmem:[%s20458_s23 + $0x84] ss:$16 sps:$4 sm:$0xff]   ;;  %v15219_v18 = vld [vmem:[%s20458_s23 + $0x8c] ss:$16 sps:$4 sm:$0xff]  }
   0xe   :  { %268 = vmatpush1.bf16.msra.mxu0 %v15203_v7  ;;  %309 = vmatpush1.bf16.msra.mxu1 %v15204_v8  ;;  %v15221_v19 = vld [vmem:[%s20458_s23 + $0x80] ss:$16 sps:$4 sm:$0xff]   ;;  %v15222_v20 = vld [vmem:[%s20458_s23 + $0x88] ss:$16 sps:$4 sm:$0xff]   ;;  %v15223_v21 = vld [vmem:[%s20458_s23 + $0xa4] ss:$16 sps:$4 sm:$0xff]  }
   0xf   :  { %269 = vmatprep.subr.bf16.mxu0 %v15205_v9  ;;  %310 = vmatprep.subr.bf16.mxu1 %v15207_v10  ;;  %v15225_v22 = vld [vmem:[%s20458_s23 + $0xac] ss:$16 sps:$4 sm:$0xff]   ;;  %v94_v23 = vld [vmem:[%s20458_s23 + $0xc0] sm:$0x33]  ;;  %v15228_v26 = vld [vmem:[%s20458_s23 + $0xa8] ss:$16 sps:$4 sm:$0xff]  }
  0x10   :  { %v95_v24 = vld [vmem:[%s20458_s23 + $0xc8] sm:$0x33]  ;;  %v15227_v25 = vld [vmem:[%s20458_s23 + $0xa0] ss:$16 sps:$4 sm:$0xff]   ;;  %v11555_v27 = vcombine.high %v94_v23, %v94_v23  ;;  %v11554_v29 = vcombine.low %v94_v23, %v94_v23  ;;  %v15239_v42 = vld [vmem:[%s20460_s3 + $0x1d8] sm:$0xff]  }
  0x11   :  { %v11557_v28 = vcombine.high %v95_v24, %v95_v24  ;;  %v11556_v30 = vcombine.low %v95_v24, %v95_v24  ;;  %v68_v31 = vld [vmem:[%s20459_s1] sm:$0x1]  ;;  %v15235_v38 = vld [vmem:[%s20460_s3 + $0x1c8] sm:$0xff]   ;;  %v15237_v40 = vld [vmem:[%s20460_s3 + $0x1d0] sm:$0xff]  }
  0x12   :  { %270 = vmatpush1.bf16.msra.mxu0 %v15209_v11  ;;  %311 = vmatpush1.bf16.msra.mxu1 %v15210_v12  ;;  %v254_v32 = vsel %vm252_vm0, %v11554_v29, 0  ;;  %v15233_v34 = vld [vmem:[%s20460_s3 + $0x1c0] sm:$0xff]   ;;  %v69_v36 = vpack.c.bf16 %v68_v31, %v68_v31  ;;  %v15236_v39 = vld [vmem:[%s20460_s3 + $0x108] sm:$0xff]   ;;  %v15238_v41 = vld [vmem:[%s20460_s3 + $0x110] sm:$0xff]  }
  0x13   :  { %271 = vmatprep.subr.bf16.mxu0 %v15211_v13  ;;  %312 = vmatprep.subr.bf16.mxu1 %v15213_v14  ;;  %v260_v33 = vsel %vm252_vm0, %v11556_v30, 0  ;;  %v15234_v35 = vld [vmem:[%s20460_s3 + $0x100] sm:$0xff]   ;;  %v15240_v43 = vld [vmem:[%s20460_s3 + $0x118] sm:$0xff]   ;;  %v15243_v46 = vld [vmem:[%s20460_s3 + $0x1e8] sm:$0xff]  }
  0x14   :  { %v15241_v44 = vld [vmem:[%s20460_s3 + $0x1e0] sm:$0xff]   ;;  %v15244_v47 = vld [vmem:[%s20460_s3 + $0x128] sm:$0xff]   ;;  %v15245_v48 = vld [vmem:[%s20460_s3 + $0x1f0] sm:$0xff]  }
  0x15   :  { %v15242_v45 = vld [vmem:[%s20460_s3 + $0x120] sm:$0xff]   ;;  %v15246_v49 = vld [vmem:[%s20460_s3 + $0x130] sm:$0xff]   ;;  %v15247_v50 = vld [vmem:[%s20460_s3 + $0x1f8] sm:$0xff]  }
  0x16   :  { %272 = vmatpush1.bf16.msra.mxu0 %v15215_v15  ;;  %313 = vmatpush1.bf16.msra.mxu1 %v15216_v16  ;;  %v15248_v51 = vld [vmem:[%s20460_s3 + $0x138] sm:$0xff]   ;;  %v96_v58 = vld [vmem:[%s20461_s2] sm:$0xf]  ;;  %v371_v15 = vand.u32 1, %v16058_v53  ;;  %v15269_v52 = vld [vmem:[%s20460_s3 + $0x350] sm:$0xff]  }
  0x17   :  { %273 = vmatprep.subr.bf16.mxu0 %v15217_v17  ;;  %314 = vmatprep.subr.bf16.mxu1 %v15219_v18  ;;  %v239_v59 = vrot.slane %v96_v58, %v238_v54  ;;  %v231_v60 = vrot.slane %v96_v58, %v230_v55  ;;  %v235_v61 = vrot.slane %v96_v58, %v234_v56  ;;  %v15250_v29 = vld [vmem:[%s20460_s3 + $0x180] sm:$0xff]   ;;  %v15270_v54 = vld [vmem:[%s20460_s3 + $0x390] sm:$0xff]   ;;  %v15271_v55 = vld [vmem:[%s20460_s3 + $0x358] sm:$0xff]  }
  0x18   :  { %v243_v62 = vrot.slane %v96_v58, %v242_v57  ;;  %vm383_vm5 = vcmp.ge.s32.totalorder %v371_v15, 1  ;;  %vm395_vm6 = vcmp.lt.s32.totalorder %v371_v15, 1  ;;  %v15272_v56 = vld [vmem:[%s20460_s3 + $0x398] sm:$0xff]   ;;  %v15273_v57 = vld [vmem:[%s20460_s3 + $0x360] sm:$0xff]   ;;  %v15293_v15 = vld [vmem:[%s20460_s3 + $0x3f0] sm:$0xff]  }
  0x19   :  { %vm16075_vm7 = vmpackc.low %vm383_vm5, %vm383_vm5  ;;  %v15274_v58 = vld [vmem:[%s20460_s3 + $0x3a0] sm:$0xff]  }
  0x1a   :  { %274 = vmatpush1.bf16.msra.mxu0 %v15221_v19  ;;  %315 = vmatpush1.bf16.msra.mxu1 %v15222_v20  ;;  %vm16084_vm8 = vmpackc.low %vm395_vm6, %vm395_vm6 }
  0x1b   :  { %275 = vmatprep.subr.bf16.mxu0 %v15223_v21  ;;  %316 = vmatprep.subr.bf16.mxu1 %v15225_v22 }
  0x1e   :  { %276 = vmatpush1.bf16.msra.mxu0 %v15227_v25  ;;  %317 = vmatpush1.bf16.msra.mxu1 %v15228_v26  ;;  %v15249_v26 = vld [vmem:[%s20460_s3 + $0x140] sm:$0xff]  }
  0x1f   :  { %11558 = vmatprep.subr.msk.bf16.mxu0 %vm252_vm0, %v11555_v27  ;;  %11560 = vmatprep.subr.msk.bf16.mxu1 %vm252_vm0, %v11557_v28  ;;  %v15363_v28 = vld [vmem:[%s20390_s8 + $0xe0] sm:$0xff]  }
  0x22   :  { %278 = vmatpush1.bf16.msra.mxu0 %v254_v32  ;;  %319 = vmatpush1.bf16.msra.mxu1 %v260_v33  ;;  %v15251_v32 = vld [vmem:[%s20460_s3 + $0x148] sm:$0xff]  }
  0x23   :  { %13388 = vmatprep.subr.bf16.mxu0 %v20413_v37  ;;  %13468 = vmatprep.subr.bf16.mxu1 %v20413_v37  ;;  %v15252_v33 = vld [vmem:[%s20460_s3 + $0x188] sm:$0xff]  }
  0x25   :  { %11559 = vmatmul.mubr.msk.bf16.vlgmr.msra.gmra.mrb[0].mxu0 %vm248_vm1, %v69_v36  ;;  %11561 = vmatmul.mubr.msk.bf16.vlgmr.msra.gmra.mrb[0].mxu1 %vm248_vm1, %v69_v36  ;;  %v15255_v36 = vld [vmem:[%s20460_s3 + $0x158] sm:$0xff]  }
  0x26   :  { %13389 = vmatpush3.bf16.msra.mxu0 %v15233_v34  ;;  %13469 = vmatpush3.bf16.msra.mxu1 %v15234_v35  ;;  %v15253_v34 = vld [vmem:[%s20460_s3 + $0x150] sm:$0xff]  }
  0x27   :  { %13390 = vmatprep.subr.bf16.mxu0 %v20413_v37  ;;  %13470 = vmatprep.subr.bf16.mxu1 %v20413_v37  ;;  %v15254_v35 = vld [vmem:[%s20460_s3 + $0x190] sm:$0xff]  }
  0x28   :  { %13404 = vmatprep.mubr.msk.bf16.mxu0 %vm15791_vm2, %v20413_v37  ;;  %13484 = vmatprep.mubr.msk.bf16.mxu1 %vm15791_vm2, %v20413_v37 }
  0x2a   :  { %13391 = vmatpush3.bf16.msra.mxu0 %v15235_v38  ;;  %13471 = vmatpush3.bf16.msra.mxu1 %v15236_v39  ;;  %v15256_v38 = vld [vmem:[%s20460_s3 + $0x198] sm:$0xff]   ;;  %v15257_v39 = vld [vmem:[%s20460_s3 + $0x160] sm:$0xff]  }
  0x2b   :  { %13392 = vmatprep.subr.bf16.mxu0 %v20413_v37  ;;  %13472 = vmatprep.subr.bf16.mxu1 %v20413_v37 }
  0x2e   :  { %13393 = vmatpush3.bf16.msra.mxu0 %v15237_v40  ;;  %13473 = vmatpush3.bf16.msra.mxu1 %v15238_v41  ;;  %v15258_v40 = vld [vmem:[%s20460_s3 + $0x1a0] sm:$0xff]   ;;  %v15259_v41 = vld [vmem:[%s20460_s3 + $0x168] sm:$0xff]  }
  0x2f   :  { %13394 = vmatprep.subr.bf16.mxu0 %v20413_v37  ;;  %13474 = vmatprep.subr.bf16.mxu1 %v20413_v37 }
  0x32   :  { %13395 = vmatpush3.bf16.msra.mxu0 %v15239_v42  ;;  %13475 = vmatpush3.bf16.msra.mxu1 %v15240_v43  ;;  %v15260_v42 = vld [vmem:[%s20460_s3 + $0x1a8] sm:$0xff]   ;;  %v15261_v43 = vld [vmem:[%s20460_s3 + $0x170] sm:$0xff]  }
  0x33   :  { %13396 = vmatprep.subr.bf16.mxu0 %v20413_v37  ;;  %13476 = vmatprep.subr.bf16.mxu1 %v20413_v37 }
  0x36   :  { %13397 = vmatpush3.bf16.msra.mxu0 %v15241_v44  ;;  %13477 = vmatpush3.bf16.msra.mxu1 %v15242_v45  ;;  %v15262_v44 = vld [vmem:[%s20460_s3 + $0x1b0] sm:$0xff]   ;;  %v15263_v45 = vld [vmem:[%s20460_s3 + $0x178] sm:$0xff]  }
  0x37   :  { %13398 = vmatprep.subr.bf16.mxu0 %v20413_v37  ;;  %13478 = vmatprep.subr.bf16.mxu1 %v20413_v37 }
  0x3a   :  { %13399 = vmatpush3.bf16.msra.mxu0 %v15243_v46  ;;  %13479 = vmatpush3.bf16.msra.mxu1 %v15244_v47  ;;  %v15264_v46 = vld [vmem:[%s20460_s3 + $0x1b8] sm:$0xff]   ;;  %v15265_v47 = vld [vmem:[%s20460_s3 + $0x340] sm:$0xff]  }
  0x3b   :  { %13400 = vmatprep.subr.bf16.mxu0 %v20413_v37  ;;  %13480 = vmatprep.subr.bf16.mxu1 %v20413_v37 }
  0x3e   :  { %13401 = vmatpush3.bf16.msra.mxu0 %v15245_v48  ;;  %13481 = vmatpush3.bf16.msra.mxu1 %v15246_v49  ;;  %v15266_v48 = vld [vmem:[%s20460_s3 + $0x380] sm:$0xff]  }
  0x3f   :  { %13402 = vmatprep.subr.bf16.mxu0 %v20413_v37  ;;  %13482 = vmatprep.subr.bf16.mxu1 %v20413_v37 }
  0x42   :  { %13403 = vmatpush3.bf16.msra.mxu0 %v15247_v50  ;;  %13483 = vmatpush3.bf16.msra.mxu1 %v15248_v51  ;;  %v15267_v50 = vld [vmem:[%s20460_s3 + $0x348] sm:$0xff]  }
  0x43   :  { %13408 = vmatprep.subr.bf16.mxu0 %v20413_v37  ;;  %13488 = vmatprep.subr.bf16.mxu1 %v20413_v37  ;;  %v15268_v51 = vld [vmem:[%s20460_s3 + $0x388] sm:$0xff]  }
  0xf8   :  { %v299_v63 = vpop.f32.mrb[0].mxu0  ;;  %v340_v0 = vpop.f32.mrb[0].mxu1 }
  0xf9   :  { %v341_v1 = vadd.f32 %v340_v0, %v239_v59  ;;  %v301_v2 = vpop.f32.mrb[1].mxu0  ;;  %v342_v3 = vpop.f32.mrb[1].mxu1  ;;  %v300_v4 = vadd.f32 %v299_v63, %v231_v60  ;;  %v15275_v59 = vld [vmem:[%s20460_s3 + $0x368] sm:$0xff]   ;;  %v15279_v63 = vld [vmem:[%s20460_s3 + $0x378] sm:$0xff]  }
  0xfa   :  { %v302_v5 = vadd.f32 %v301_v2, %v235_v61  ;;  %v343_v6 = vadd.f32 %v342_v3, %v243_v62  ;;  %v303_v7 = vpop.f32.mrb[2].mxu0  ;;  %v344_v8 = vpop.f32.mrb[2].mxu1  ;;  %v15276_v60 = vld [vmem:[%s20460_s3 + $0x3a8] sm:$0xff]   ;;  %v15277_v61 = vld [vmem:[%s20460_s3 + $0x370] sm:$0xff]   ;;  %v15280_v0 = vld [vmem:[%s20460_s3 + $0x3b8] sm:$0xff]  }
  0xfb   :  { %v349_v9 = vmax.f32 %v341_v1, 0.0  ;;  %v304_v10 = vpop.f32.mrb[3].mxu0  ;;  %v345_v11 = vpop.f32.mrb[3].mxu1  ;;  %v347_v16 = vmax.f32 %v300_v4, 0.0  ;;  %v15278_v62 = vld [vmem:[%s20460_s3 + $0x3b0] sm:$0xff]   ;;  %v15281_v2 = vld [vmem:[%s20460_s3 + $0x3c0] sm:$0xff]  }
  0xfc   :  { %v348_v12 = vmax.f32 %v302_v5, 0.0  ;;  %v350_v13 = vmax.f32 %v343_v6, 0.0  ;;  %v15282_v3 = vld [vmem:[%s20460_s3 + $0x300] sm:$0xff]   ;;  %v15283_v5 = vld [vmem:[%s20460_s3 + $0x3c8] sm:$0xff]   ;;  %v15285_v7 = vld [vmem:[%s20460_s3 + $0x3d0] sm:$0xff]  }
  0xfd   :  { %v355_v14 = vrot.slane %v349_v9, 6  ;;  %v15284_v6 = vld [vmem:[%s20460_s3 + $0x308] sm:$0xff]   ;;  %v15286_v8 = vld [vmem:[%s20460_s3 + $0x310] sm:$0xff]   ;;  %v15287_v9 = vld [vmem:[%s20460_s3 + $0x3d8] sm:$0xff]  }
  0xfe   :  { %v352_v17 = vrot.slane %v348_v12, 7  ;;  %v358_v18 = vrot.slane %v350_v13, 5  ;;  %v15288_v10 = vld [vmem:[%s20460_s3 + $0x318] sm:$0xff]   ;;  %v15289_v11 = vld [vmem:[%s20460_s3 + $0x3e0] sm:$0xff]   ;;  %v15291_v13 = vld [vmem:[%s20460_s3 + $0x3e8] sm:$0xff]  }
  0xff   :  { %v15290_v12 = vld [vmem:[%s20460_s3 + $0x320] sm:$0xff]  }
 0x100   :  { %v361_v19 = vsel %vm20417_vm3, %v347_v16, %v352_v17  ;;  %v15294_v16 = vld [vmem:[%s20460_s3 + $0x330] sm:$0xff]  }
 0x101   :  { %v362_v20 = vsel %vm252_vm0, %v361_v19, %v355_v14  ;;  %v15292_v14 = vld [vmem:[%s20460_s3 + $0x328] sm:$0xff]   ;;  %v15296_v19 = vld [vmem:[%s20460_s3 + $0x338] sm:$0xff]   ;;  %vm20410_vm0 = vcmask 1046528  }
 0x102   :  { %v16071_v21 = vsel %vm363_vm4, %v362_v20, %v358_v18  ;;  %v15295_v18 = vld [vmem:[%s20460_s3 + $0x3f8] sm:$0xff]  }
 0x103   :  { %v392_v22 = vrot.slane %v16071_v21, 7  ;;  %v403_v23 = vrot.slane %v16071_v21, 1  ;;  %v16169_v49 = vpack.c.bf16 %v16071_v21, %v16071_v21  ;;  %v388_v1 = vrot.slane %v16071_v21, 6 }
 0x104   :  { %v380_v17 = vrot.slane %v16071_v21, 5 }
 0x105   :  { %v394_v25 = vsel %vm20417_vm3, 0.0, %v392_v22  ;;  %v405_v27 = vsel %vm363_vm4, %v403_v23, 0.0  ;;  %v11640_v4 = vpack.c.bf16 %v388_v1, %v388_v1  ;;  %v15297_v22 = vld [vmem:[%s20460_s3 + $0x2c0] sm:$0xff]   ;;  %v15334_v1 = vld [vmem:[%s20460_s3 + $0x90] sm:$0xff]  }
 0x106   :  { %v16091_v30 = vpack.c.bf16 %v394_v25, %v394_v25  ;;  %v16093_v31 = vpack.c.bf16 %v405_v27, %v405_v27  ;;  %v382_v20 = vsel %vm363_vm4, 0.0, %v380_v17  ;;  %v15298_v23 = vld [vmem:[%s20460_s3 + $0x200] sm:$0xff]   ;;  %v15300_v27 = vld [vmem:[%s20460_s3 + $0x208] sm:$0xff]  }
 0x107   :  { %v11667_v25 = vpack.c.bf16 %v382_v20, %v382_v20  ;;  %v15348_v17 = vld [vmem:[%s20460_s3 + $0x8] sm:$0xff]   ;;  %v15351_v20 = vld [vmem:[%s20460_s3 + $0xd8] sm:$0xff]  }
 0x108   :  { %13405 = vmatmul.mubr.msk.bf16.vlgmr.msra.gmra.mrb[4].mxu0 %vm16075_vm7, %v16091_v30  ;;  %13485 = vmatmul.mubr.msk.bf16.vlgmr.msra.gmra.mrb[4].mxu1 %vm16084_vm8, %v16093_v31 }
 0x109   :  { %13409 = vmatpush3.bf16.msra.mxu0 %v15249_v26  ;;  %13489 = vmatpush3.bf16.msra.mxu1 %v15250_v29  ;;  %v15299_v26 = vld [vmem:[%s20460_s3 + $0x2c8] sm:$0xff]   ;;  %v15301_v29 = vld [vmem:[%s20460_s3 + $0x2d0] sm:$0xff]  }
 0x10a   :  { %13410 = vmatprep.subr.bf16.mxu0 %v20413_v37  ;;  %13490 = vmatprep.subr.bf16.mxu1 %v20413_v37 }
 0x10b   :  { %13424 = vmatprep.mubr.msk.bf16.mxu0 %vm15791_vm2, %v20413_v37  ;;  %13504 = vmatprep.mubr.msk.bf16.mxu1 %vm15791_vm2, %v20413_v37 }
 0x10d   :  { %13411 = vmatpush3.bf16.msra.mxu0 %v15251_v32  ;;  %13491 = vmatpush3.bf16.msra.mxu1 %v15252_v33  ;;  %v15302_v32 = vld [vmem:[%s20460_s3 + $0x210] sm:$0xff]   ;;  %v15303_v33 = vld [vmem:[%s20460_s3 + $0x2d8] sm:$0xff]  }
 0x10e   :  { %13412 = vmatprep.subr.bf16.mxu0 %v20413_v37  ;;  %13492 = vmatprep.subr.bf16.mxu1 %v20413_v37 }
 0x111   :  { %13413 = vmatpush3.bf16.msra.mxu0 %v15253_v34  ;;  %13493 = vmatpush3.bf16.msra.mxu1 %v15254_v35  ;;  %v15304_v34 = vld [vmem:[%s20460_s3 + $0x218] sm:$0xff]   ;;  %v15305_v35 = vld [vmem:[%s20460_s3 + $0x2e0] sm:$0xff]  }
 0x112   :  { %13414 = vmatprep.subr.bf16.mxu0 %v20413_v37  ;;  %13494 = vmatprep.subr.bf16.mxu1 %v20413_v37 }
 0x115   :  { %13415 = vmatpush3.bf16.msra.mxu0 %v15255_v36  ;;  %13495 = vmatpush3.bf16.msra.mxu1 %v15256_v38  ;;  %v15306_v36 = vld [vmem:[%s20460_s3 + $0x220] sm:$0xff]   ;;  %v15307_v38 = vld [vmem:[%s20460_s3 + $0x2e8] sm:$0xff]  }
 0x116   :  { %13416 = vmatprep.subr.bf16.mxu0 %v20413_v37  ;;  %13496 = vmatprep.subr.bf16.mxu1 %v20413_v37 }
 0x119   :  { %13417 = vmatpush3.bf16.msra.mxu0 %v15257_v39  ;;  %13497 = vmatpush3.bf16.msra.mxu1 %v15258_v40  ;;  %v15308_v39 = vld [vmem:[%s20460_s3 + $0x228] sm:$0xff]   ;;  %v15309_v40 = vld [vmem:[%s20460_s3 + $0x2f0] sm:$0xff]  }
 0x11a   :  { %13418 = vmatprep.subr.bf16.mxu0 %v20413_v37  ;;  %13498 = vmatprep.subr.bf16.mxu1 %v20413_v37 }
 0x11d   :  { %13419 = vmatpush3.bf16.msra.mxu0 %v15259_v41  ;;  %13499 = vmatpush3.bf16.msra.mxu1 %v15260_v42  ;;  %v15310_v41 = vld [vmem:[%s20460_s3 + $0x230] sm:$0xff]   ;;  %v15311_v42 = vld [vmem:[%s20460_s3 + $0x2f8] sm:$0xff]  }
 0x11e   :  { %13420 = vmatprep.subr.bf16.mxu0 %v20413_v37  ;;  %13500 = vmatprep.subr.bf16.mxu1 %v20413_v37 }
 0x121   :  { %13421 = vmatpush3.bf16.msra.mxu0 %v15261_v43  ;;  %13501 = vmatpush3.bf16.msra.mxu1 %v15262_v44  ;;  %v15312_v43 = vld [vmem:[%s20460_s3 + $0x238] sm:$0xff]   ;;  %v15313_v44 = vld [vmem:[%s20460_s3 + $0x240] sm:$0xff]  }
 0x122   :  { %13422 = vmatprep.subr.bf16.mxu0 %v20413_v37  ;;  %13502 = vmatprep.subr.bf16.mxu1 %v20413_v37 }
 0x125   :  { %13423 = vmatpush3.bf16.msra.mxu0 %v15263_v45  ;;  %13503 = vmatpush3.bf16.msra.mxu1 %v15264_v46  ;;  %v15314_v45 = vld [vmem:[%s20460_s3 + $0x280] sm:$0xff]   ;;  %v15315_v46 = vld [vmem:[%s20460_s3 + $0x248] sm:$0xff]  }
 0x126   :  { %13428 = vmatprep.subr.bf16.mxu0 %v20413_v37  ;;  %13508 = vmatprep.subr.bf16.mxu1 %v20413_v37 }
 0x128   :  { %13425 = vmatmul.mubr.bf16.vlgmr.msra.gmra.mrb[4].mxu0 %v16169_v49  ;;  %13505 = vmatmul.mubr.bf16.vlgmr.msra.gmra.mrb[4].mxu1 %v16169_v49 }
 0x129   :  { %13429 = vmatpush3.bf16.msra.mxu0 %v15265_v47  ;;  %13509 = vmatpush3.bf16.msra.mxu1 %v15266_v48  ;;  %v15316_v47 = vld [vmem:[%s20460_s3 + $0x288] sm:$0xff]   ;;  %v15318_v48 = vld [vmem:[%s20460_s3 + $0x290] sm:$0xff]  }
 0x12a   :  { %13430 = vmatprep.subr.bf16.mxu0 %v20413_v37  ;;  %13510 = vmatprep.subr.bf16.mxu1 %v20413_v37 }
 0x12b   :  { %13444 = vmatprep.mubr.msk.bf16.mxu0 %vm15791_vm2, %v20413_v37  ;;  %13524 = vmatprep.mubr.msk.bf16.mxu1 %vm15791_vm2, %v20413_v37 }
 0x12d   :  { %13431 = vmatpush3.bf16.msra.mxu0 %v15267_v50  ;;  %13511 = vmatpush3.bf16.msra.mxu1 %v15268_v51  ;;  %v15319_v50 = vld [vmem:[%s20460_s3 + $0x258] sm:$0xff]  }
 0x12e   :  { %13432 = vmatprep.subr.bf16.mxu0 %v20413_v37  ;;  %13512 = vmatprep.subr.bf16.mxu1 %v20413_v37  ;;  %v15320_v51 = vld [vmem:[%s20460_s3 + $0x298] sm:$0xff]  }
 0x131   :  { %13433 = vmatpush3.bf16.msra.mxu0 %v15269_v52  ;;  %13513 = vmatpush3.bf16.msra.mxu1 %v15270_v54  ;;  %v15321_v52 = vld [vmem:[%s20460_s3 + $0x260] sm:$0xff]  }
 0x132   :  { %13434 = vmatprep.subr.bf16.mxu0 %v20413_v37  ;;  %13514 = vmatprep.subr.bf16.mxu1 %v20413_v37  ;;  %v15322_v54 = vld [vmem:[%s20460_s3 + $0x2a0] sm:$0xff]  }
 0x135   :  { %13435 = vmatpush3.bf16.msra.mxu0 %v15271_v55  ;;  %13515 = vmatpush3.bf16.msra.mxu1 %v15272_v56  ;;  %v15323_v55 = vld [vmem:[%s20460_s3 + $0x268] sm:$0xff]  }
 0x136   :  { %13436 = vmatprep.subr.bf16.mxu0 %v20413_v37  ;;  %13516 = vmatprep.subr.bf16.mxu1 %v20413_v37  ;;  %v15324_v56 = vld [vmem:[%s20460_s3 + $0x2a8] sm:$0xff]  }
 0x139   :  { %13437 = vmatpush3.bf16.msra.mxu0 %v15273_v57  ;;  %13517 = vmatpush3.bf16.msra.mxu1 %v15274_v58  ;;  %v15325_v57 = vld [vmem:[%s20460_s3 + $0x270] sm:$0xff]  }
 0x13a   :  { %13438 = vmatprep.subr.bf16.mxu0 %v20413_v37  ;;  %13518 = vmatprep.subr.bf16.mxu1 %v20413_v37  ;;  %v15326_v58 = vld [vmem:[%s20460_s3 + $0x2b0] sm:$0xff]  }
 0x13d   :  { %13439 = vmatpush3.bf16.msra.mxu0 %v15275_v59  ;;  %13519 = vmatpush3.bf16.msra.mxu1 %v15276_v60  ;;  %v15327_v59 = vld [vmem:[%s20460_s3 + $0x278] sm:$0xff]  }
 0x13e   :  { %13440 = vmatprep.subr.bf16.mxu0 %v20413_v37  ;;  %13520 = vmatprep.subr.bf16.mxu1 %v20413_v37  ;;  %v15328_v60 = vld [vmem:[%s20460_s3 + $0x2b8] sm:$0xff]  }
 0x141   :  { %13441 = vmatpush3.bf16.msra.mxu0 %v15277_v61  ;;  %13521 = vmatpush3.bf16.msra.mxu1 %v15278_v62  ;;  %v15329_v61 = vld [vmem:[%s20460_s3 + $0x40] sm:$0xff]  }
 0x142   :  { %13442 = vmatprep.subr.bf16.mxu0 %v20413_v37  ;;  %13522 = vmatprep.subr.bf16.mxu1 %v20413_v37  ;;  %v15330_v62 = vld [vmem:[%s20460_s3 + $0x80] sm:$0xff]  }
 0x145   :  { %13443 = vmatpush3.bf16.msra.mxu0 %v15279_v63  ;;  %13523 = vmatpush3.bf16.msra.mxu1 %v15280_v0  ;;  %v15331_v63 = vld [vmem:[%s20460_s3 + $0x48] sm:$0xff]  }
 0x146   :  { %13448 = vmatprep.subr.bf16.mxu0 %v20413_v37  ;;  %13528 = vmatprep.subr.bf16.mxu1 %v20413_v37  ;;  %v15332_v0 = vld [vmem:[%s20460_s3 + $0x88] sm:$0xff]  }
 0x148   :  { %13445 = vmatmul.mubr.msk.bf16.vlgmr.msra.gmra.mrb[4].mxu0 %vm11639_vm10, %v11640_v4  ;;  %13525 = vmatmul.mubr.msk.bf16.vlgmr.msra.gmra.mrb[4].mxu1 %vm11639_vm10, %v11640_v4  ;;  %v15337_v4 = vld [vmem:[%s20460_s3 + $0x60] sm:$0xff]  }
 0x149   :  { %13449 = vmatpush3.bf16.msra.mxu0 %v15281_v2  ;;  %13529 = vmatpush3.bf16.msra.mxu1 %v15282_v3  ;;  %v15335_v2 = vld [vmem:[%s20460_s3 + $0x58] sm:$0xff]  }
 0x14a   :  { %13450 = vmatprep.subr.bf16.mxu0 %v20413_v37  ;;  %13530 = vmatprep.subr.bf16.mxu1 %v20413_v37  ;;  %v15336_v3 = vld [vmem:[%s20460_s3 + $0x98] sm:$0xff]  }
 0x14b   :  { %13464 = vmatprep.mubr.msk.bf16.mxu0 %vm15791_vm2, %v20413_v37  ;;  %13544 = vmatprep.mubr.msk.bf16.mxu1 %vm15791_vm2, %v20413_v37 }
 0x14d   :  { %13451 = vmatpush3.bf16.msra.mxu0 %v15283_v5  ;;  %13531 = vmatpush3.bf16.msra.mxu1 %v15284_v6  ;;  %v15338_v5 = vld [vmem:[%s20460_s3 + $0xa0] sm:$0xff]   ;;  %v15339_v6 = vld [vmem:[%s20460_s3 + $0x68] sm:$0xff]  }
 0x14e   :  { %13452 = vmatprep.subr.bf16.mxu0 %v20413_v37  ;;  %13532 = vmatprep.subr.bf16.mxu1 %v20413_v37 }
 0x151   :  { %13453 = vmatpush3.bf16.msra.mxu0 %v15285_v7  ;;  %13533 = vmatpush3.bf16.msra.mxu1 %v15286_v8  ;;  %v15340_v7 = vld [vmem:[%s20460_s3 + $0xa8] sm:$0xff]   ;;  %v15341_v8 = vld [vmem:[%s20460_s3 + $0x70] sm:$0xff]  }
 0x152   :  { %13454 = vmatprep.subr.bf16.mxu0 %v20413_v37  ;;  %13534 = vmatprep.subr.bf16.mxu1 %v20413_v37 }
 0x155   :  { %13455 = vmatpush3.bf16.msra.mxu0 %v15287_v9  ;;  %13535 = vmatpush3.bf16.msra.mxu1 %v15288_v10  ;;  %v15342_v9 = vld [vmem:[%s20460_s3 + $0xb0] sm:$0xff]   ;;  %v15343_v10 = vld [vmem:[%s20460_s3 + $0x78] sm:$0xff]  }
 0x156   :  { %13456 = vmatprep.subr.bf16.mxu0 %v20413_v37  ;;  %13536 = vmatprep.subr.bf16.mxu1 %v20413_v37 }
 0x159   :  { %13457 = vmatpush3.bf16.msra.mxu0 %v15289_v11  ;;  %13537 = vmatpush3.bf16.msra.mxu1 %v15290_v12  ;;  %v15344_v11 = vld [vmem:[%s20460_s3 + $0xb8] sm:$0xff]   ;;  %v410_v12 = vrot.slane %v16071_v21, 2 }
 0x15a   :  { %13458 = vmatprep.subr.bf16.mxu0 %v20413_v37  ;;  %13538 = vmatprep.subr.bf16.mxu1 %v20413_v37 }
 0x15d   :  { %13459 = vmatpush3.bf16.msra.mxu0 %v15291_v13  ;;  %13539 = vmatpush3.bf16.msra.mxu1 %v15292_v14  ;;  %v15345_v13 = vld [vmem:[%s20460_s3 + $0xc0] sm:$0xff]  }
 0x15e   :  { %13460 = vmatprep.subr.bf16.mxu0 %v20413_v37  ;;  %13540 = vmatprep.subr.bf16.mxu1 %v20413_v37  ;;  %v15346_v14 = vld [vmem:[%s20460_s3] sm:$0xff]  }
 0x161   :  { %13461 = vmatpush3.bf16.msra.mxu0 %v15293_v15  ;;  %13541 = vmatpush3.bf16.msra.mxu1 %v15294_v16  ;;  %v11852_v15 = vpack.c.bf16 %v410_v12, %v410_v12  ;;  %v15347_v16 = vld [vmem:[%s20460_s3 + $0xc8] sm:$0xff]  }
 0x162   :  { %13462 = vmatprep.subr.bf16.mxu0 %v20413_v37  ;;  %13542 = vmatprep.subr.bf16.mxu1 %v20413_v37 }
 0x165   :  { %13463 = vmatpush3.bf16.msra.mxu0 %v15295_v18  ;;  %13543 = vmatpush3.bf16.msra.mxu1 %v15296_v19  ;;  %v15349_v18 = vld [vmem:[%s20460_s3 + $0xd0] sm:$0xff]  }
 0x166   :  { %13548 = vmatprep.subr.bf16.mxu0 %v20413_v37  ;;  %13628 = vmatprep.subr.bf16.mxu1 %v20413_v37  ;;  %v15350_v19 = vld [vmem:[%s20460_s3 + $0x10] sm:$0xff]  }
 0x168   :  { %13465 = vmatmul.mubr.msk.bf16.vlgmr.msra.gmra.mrb[4].mxu0 %vm16075_vm7, %v11667_v25  ;;  %13545 = vmatmul.mubr.msk.bf16.vlgmr.msra.gmra.mrb[4].mxu1 %vm16084_vm8, %v16091_v30  ;;  %v15354_v25 = vld [vmem:[%s20460_s3 + $0x20] sm:$0xff]  }
 0x169   :  { %13549 = vmatpush3.bf16.msra.mxu0 %v15297_v22  ;;  %13629 = vmatpush3.bf16.msra.mxu1 %v15298_v23  ;;  %v15352_v22 = vld [vmem:[%s20460_s3 + $0x18] sm:$0xff]   ;;  %v15353_v23 = vld [vmem:[%s20460_s3 + $0xe0] sm:$0xff]  }
 0x16a   :  { %13550 = vmatprep.subr.bf16.mxu0 %v20413_v37  ;;  %13630 = vmatprep.subr.bf16.mxu1 %v20413_v37 }
 0x16b   :  { %13564 = vmatprep.mubr.msk.bf16.mxu0 %vm15791_vm2, %v20413_v37  ;;  %13644 = vmatprep.mubr.msk.bf16.mxu1 %vm15791_vm2, %v20413_v37 }
 0x16d   :  { %13551 = vmatpush3.bf16.msra.mxu0 %v15299_v26  ;;  %13631 = vmatpush3.bf16.msra.mxu1 %v15300_v27  ;;  %v15355_v26 = vld [vmem:[%s20460_s3 + $0xe8] sm:$0xff]  }
 0x16e   :  { %13552 = vmatprep.subr.bf16.mxu0 %v20413_v37  ;;  %13632 = vmatprep.subr.bf16.mxu1 %v20413_v37  ;;  %v15356_v27 = vld [vmem:[%s20460_s3 + $0x28] sm:$0xff]  }
 0x171   :  { %13553 = vmatpush3.bf16.msra.mxu0 %v15301_v29  ;;  %13633 = vmatpush3.bf16.msra.mxu1 %v15302_v32  ;;  %v15357_v29 = vld [vmem:[%s20460_s3 + $0xf0] sm:$0xff]  }
 0x172   :  { %13554 = vmatprep.subr.bf16.mxu0 %v20413_v37  ;;  %13634 = vmatprep.subr.bf16.mxu1 %v20413_v37  ;;  %v15358_v32 = vld [vmem:[%s20460_s3 + $0x30] sm:$0xff]  }
 0x175   :  { %13555 = vmatpush3.bf16.msra.mxu0 %v15303_v33  ;;  %13635 = vmatpush3.bf16.msra.mxu1 %v15304_v34  ;;  %v414_v33 = vrot.slane %v16071_v21, 3  ;;  %v15359_v34 = vld [vmem:[%s20460_s3 + $0xf8] sm:$0xff]  }
 0x176   :  { %13556 = vmatprep.subr.bf16.mxu0 %v20413_v37  ;;  %13636 = vmatprep.subr.bf16.mxu1 %v20413_v37 }
 0x179   :  { %13557 = vmatpush3.bf16.msra.mxu0 %v15305_v35  ;;  %13637 = vmatpush3.bf16.msra.mxu1 %v15306_v36  ;;  %v15360_v35 = vld [vmem:[%s20460_s3 + $0x38] sm:$0xff]   ;;  %v416_v36 = vsel %vm20417_vm3, %v414_v33, 0.0 }
 0x17a   :  { %13558 = vmatprep.subr.bf16.mxu0 %v20413_v37  ;;  %13638 = vmatprep.subr.bf16.mxu1 %v20413_v37 }
 0x17d   :  { %13559 = vmatpush3.bf16.msra.mxu0 %v15307_v38  ;;  %13639 = vmatpush3.bf16.msra.mxu1 %v15308_v39  ;;  %v11968_v38 = vpack.c.bf16 %v416_v36, %v416_v36 }
 0x17e   :  { %13560 = vmatprep.subr.bf16.mxu0 %v20413_v37  ;;  %13640 = vmatprep.subr.bf16.mxu1 %v20413_v37 }
 0x181   :  { %13561 = vmatpush3.bf16.msra.mxu0 %v15309_v40  ;;  %13641 = vmatpush3.bf16.msra.mxu1 %v15310_v41 }
 0x182   :  { %13562 = vmatprep.subr.bf16.mxu0 %v20413_v37  ;;  %13642 = vmatprep.subr.bf16.mxu1 %v20413_v37 }
 0x185   :  { %13563 = vmatpush3.bf16.msra.mxu0 %v15311_v42  ;;  %13643 = vmatpush3.bf16.msra.mxu1 %v15312_v43 }
 0x186   :  { %13568 = vmatprep.subr.bf16.mxu0 %v20413_v37  ;;  %13648 = vmatprep.subr.bf16.mxu1 %v20413_v37 }
 0x188   :  { %13565 = vmatmul.mubr.msk.bf16.vlgmr.msra.gmra.mrb[8].mxu0 %vm16075_vm7, %v16091_v30  ;;  %13645 = vmatmul.mubr.msk.bf16.vlgmr.msra.gmra.mrb[8].mxu1 %vm16084_vm8, %v16093_v31  ;;  %v15317_v30 = vld [vmem:[%s20460_s3 + $0x250] sm:$0xff]  }
 0x189   :  { %13569 = vmatpush3.bf16.msra.mxu0 %v15313_v44  ;;  %13649 = vmatpush3.bf16.msra.mxu1 %v15314_v45 }
 0x18a   :  { %13570 = vmatprep.subr.bf16.mxu0 %v20413_v37  ;;  %13650 = vmatprep.subr.bf16.mxu1 %v20413_v37 }
 0x18b   :  { %13584 = vmatprep.mubr.msk.bf16.mxu0 %vm15791_vm2, %v20413_v37  ;;  %13664 = vmatprep.mubr.msk.bf16.mxu1 %vm15791_vm2, %v20413_v37 }
 0x18d   :  { %13571 = vmatpush3.bf16.msra.mxu0 %v15315_v46  ;;  %13651 = vmatpush3.bf16.msra.mxu1 %v15316_v47  ;;  %v15365_v46 = vld [vmem:[%s20390_s8 + $0xe8] sm:$0xff]   ;;  %v11970_v47 = vld [vmem:[%s20391_s4] ss:$0 sm:$0xff] }
 0x18e   :  { %13572 = vmatprep.subr.bf16.mxu0 %v20413_v37  ;;  %13652 = vmatprep.subr.bf16.mxu1 %v20413_v37 }
 0x191   :  { %13573 = vmatpush3.bf16.msra.mxu0 %v15317_v30  ;;  %13653 = vmatpush3.bf16.msra.mxu1 %v15318_v48 }
 0x192   :  { %13574 = vmatprep.subr.bf16.mxu0 %v20413_v37  ;;  %13654 = vmatprep.subr.bf16.mxu1 %v20413_v37 }
 0x195   :  { %13575 = vmatpush3.bf16.msra.mxu0 %v15319_v50  ;;  %13655 = vmatpush3.bf16.msra.mxu1 %v15320_v51 }
 0x196   :  { %13576 = vmatprep.subr.bf16.mxu0 %v20413_v37  ;;  %13656 = vmatprep.subr.bf16.mxu1 %v20413_v37 }
 0x199   :  { %13577 = vmatpush3.bf16.msra.mxu0 %v15321_v52  ;;  %13657 = vmatpush3.bf16.msra.mxu1 %v15322_v54 }
 0x19a   :  { %13578 = vmatprep.subr.bf16.mxu0 %v20413_v37  ;;  %13658 = vmatprep.subr.bf16.mxu1 %v20413_v37 }
 0x19d   :  { %13579 = vmatpush3.bf16.msra.mxu0 %v15323_v55  ;;  %13659 = vmatpush3.bf16.msra.mxu1 %v15324_v56 }
 0x19e   :  { %13580 = vmatprep.subr.bf16.mxu0 %v20413_v37  ;;  %13660 = vmatprep.subr.bf16.mxu1 %v20413_v37 }
 0x1a1   :  { %13581 = vmatpush3.bf16.msra.mxu0 %v15325_v57  ;;  %13661 = vmatpush3.bf16.msra.mxu1 %v15326_v58 }
 0x1a2   :  { %13582 = vmatprep.subr.bf16.mxu0 %v20413_v37  ;;  %13662 = vmatprep.subr.bf16.mxu1 %v20413_v37 }
 0x1a5   :  { %13583 = vmatpush3.bf16.msra.mxu0 %v15327_v59  ;;  %13663 = vmatpush3.bf16.msra.mxu1 %v15328_v60 }
 0x1a6   :  { %13588 = vmatprep.subr.bf16.mxu0 %v20413_v37  ;;  %13668 = vmatprep.subr.bf16.mxu1 %v20413_v37 }
 0x1a8   :  { %13585 = vmatmul.mubr.bf16.vlgmr.msra.gmra.mrb[8].mxu0 %v16169_v49  ;;  %13665 = vmatmul.mubr.bf16.vlgmr.msra.gmra.mrb[8].mxu1 %v16169_v49  ;;  %v15333_v49 = vld [vmem:[%s20460_s3 + $0x50] sm:$0xff]  }
 0x1a9   :  { %13589 = vmatpush3.bf16.msra.mxu0 %v15329_v61  ;;  %13669 = vmatpush3.bf16.msra.mxu1 %v15330_v62 }
 0x1aa   :  { %13590 = vmatprep.subr.bf16.mxu0 %v20413_v37  ;;  %13670 = vmatprep.subr.bf16.mxu1 %v20413_v37 }
 0x1ab   :  { %13604 = vmatprep.mubr.msk.bf16.mxu0 %vm15791_vm2, %v20413_v37  ;;  %13684 = vmatprep.mubr.msk.bf16.mxu1 %vm15791_vm2, %v20413_v37 }
 0x1ad   :  { %13591 = vmatpush3.bf16.msra.mxu0 %v15331_v63  ;;  %13671 = vmatpush3.bf16.msra.mxu1 %v15332_v0 }
 0x1ae   :  { %13592 = vmatprep.subr.bf16.mxu0 %v20413_v37  ;;  %13672 = vmatprep.subr.bf16.mxu1 %v20413_v37 }
 0x1b1   :  { %13593 = vmatpush3.bf16.msra.mxu0 %v15333_v49  ;;  %13673 = vmatpush3.bf16.msra.mxu1 %v15334_v1 }
 0x1b2   :  { %13594 = vmatprep.subr.bf16.mxu0 %v20413_v37  ;;  %13674 = vmatprep.subr.bf16.mxu1 %v20413_v37 }
 0x1b5   :  { %13595 = vmatpush3.bf16.msra.mxu0 %v15335_v2  ;;  %13675 = vmatpush3.bf16.msra.mxu1 %v15336_v3 }
 0x1b6   :  { %13596 = vmatprep.subr.bf16.mxu0 %v20413_v37  ;;  %13676 = vmatprep.subr.bf16.mxu1 %v20413_v37 }
 0x1b9   :  { %13597 = vmatpush3.bf16.msra.mxu0 %v15337_v4  ;;  %13677 = vmatpush3.bf16.msra.mxu1 %v15338_v5 }
 0x1ba   :  { %13598 = vmatprep.subr.bf16.mxu0 %v20413_v37  ;;  %13678 = vmatprep.subr.bf16.mxu1 %v20413_v37 }
 0x1bd   :  { %13599 = vmatpush3.bf16.msra.mxu0 %v15339_v6  ;;  %13679 = vmatpush3.bf16.msra.mxu1 %v15340_v7 }
 0x1be   :  { %13600 = vmatprep.subr.bf16.mxu0 %v20413_v37  ;;  %13680 = vmatprep.subr.bf16.mxu1 %v20413_v37 }
 0x1c1   :  { %13601 = vmatpush3.bf16.msra.mxu0 %v15341_v8  ;;  %13681 = vmatpush3.bf16.msra.mxu1 %v15342_v9 }
 0x1c2   :  { %13602 = vmatprep.subr.bf16.mxu0 %v20413_v37  ;;  %13682 = vmatprep.subr.bf16.mxu1 %v20413_v37 }
 0x1c5   :  { %13603 = vmatpush3.bf16.msra.mxu0 %v15343_v10  ;;  %13683 = vmatpush3.bf16.msra.mxu1 %v15344_v11 }
 0x1c6   :  { %13608 = vmatprep.subr.bf16.mxu0 %v20413_v37  ;;  %13688 = vmatprep.subr.bf16.mxu1 %v20413_v37 }
 0x1c8   :  { %13605 = vmatmul.mubr.msk.bf16.vlgmr.msra.gmra.mrb[8].mxu0 %vm11851_vm11, %v11852_v15  ;;  %13685 = vmatmul.mubr.msk.bf16.vlgmr.msra.gmra.mrb[8].mxu1 %vm11851_vm11, %v11852_v15 }
 0x1c9   :  { %13609 = vmatpush3.bf16.msra.mxu0 %v15345_v13  ;;  %13689 = vmatpush3.bf16.msra.mxu1 %v15346_v14 }
 0x1ca   :  { %13610 = vmatprep.subr.bf16.mxu0 %v20413_v37  ;;  %13690 = vmatprep.subr.bf16.mxu1 %v20413_v37 }
 0x1cb   :  { %13624 = vmatprep.mubr.msk.bf16.mxu0 %vm15791_vm2, %v20413_v37  ;;  %13704 = vmatprep.mubr.msk.bf16.mxu1 %vm15791_vm2, %v20413_v37 }
 0x1cd   :  { %13611 = vmatpush3.bf16.msra.mxu0 %v15347_v16  ;;  %13691 = vmatpush3.bf16.msra.mxu1 %v15348_v17 }
 0x1ce   :  { %13612 = vmatprep.subr.bf16.mxu0 %v20413_v37  ;;  %13692 = vmatprep.subr.bf16.mxu1 %v20413_v37 }
 0x1d1   :  { %13613 = vmatpush3.bf16.msra.mxu0 %v15349_v18  ;;  %13693 = vmatpush3.bf16.msra.mxu1 %v15350_v19 }
 0x1d2   :  { %13614 = vmatprep.subr.bf16.mxu0 %v20413_v37  ;;  %13694 = vmatprep.subr.bf16.mxu1 %v20413_v37 }
 0x1d5   :  { %13615 = vmatpush3.bf16.msra.mxu0 %v15351_v20  ;;  %13695 = vmatpush3.bf16.msra.mxu1 %v15352_v22 }
 0x1d6   :  { %13616 = vmatprep.subr.bf16.mxu0 %v20413_v37  ;;  %13696 = vmatprep.subr.bf16.mxu1 %v20413_v37 }
 0x1d9   :  { %13617 = vmatpush3.bf16.msra.mxu0 %v15353_v23  ;;  %13697 = vmatpush3.bf16.msra.mxu1 %v15354_v25 }
 0x1da   :  { %13618 = vmatprep.subr.bf16.mxu0 %v20413_v37  ;;  %13698 = vmatprep.subr.bf16.mxu1 %v20413_v37 }
 0x1dd   :  { %13619 = vmatpush3.bf16.msra.mxu0 %v15355_v26  ;;  %13699 = vmatpush3.bf16.msra.mxu1 %v15356_v27 }
 0x1de   :  { %13620 = vmatprep.subr.bf16.mxu0 %v20413_v37  ;;  %13700 = vmatprep.subr.bf16.mxu1 %v20413_v37 }
 0x1e1   :  { %13621 = vmatpush3.bf16.msra.mxu0 %v15357_v29  ;;  %13701 = vmatpush3.bf16.msra.mxu1 %v15358_v32  ;;  %v11971_v29 = vld [vmem:[%s20392_s5] ss:$0 sm:$0xff] }
 0x1e2   :  { %13622 = vmatprep.subr.bf16.mxu0 %v20413_v37  ;;  %13702 = vmatprep.subr.bf16.mxu1 %v20413_v37 }
 0x1e5   :  { %13623 = vmatpush3.bf16.msra.mxu0 %v15359_v34  ;;  %13703 = vmatpush3.bf16.msra.mxu1 %v15360_v35  ;;  %v11972_v35 = vld [vmem:[%s20393_s6] ss:$0 sm:$0xff] }
 0x1e6   :  { %13708 = vmatprep.subr.bf16.mxu0 %v20413_v37  ;;  %13714 = vmatprep.subr.bf16.mxu1 %v20413_v37 }
 0x1e8   :  { %13625 = vmatmul.mubr.msk.bf16.vlgmr.msra.gmra.mrb[8].mxu0 %vm16075_vm7, %v16093_v31  ;;  %13705 = vmatmul.mubr.msk.bf16.vlgmr.msra.gmra.mrb[8].mxu1 %vm16084_vm8, %v11968_v38 }
 0x1e9   :  { %13710 = vmatprep.mubr.msk.bf16.mxu0 %vm15791_vm2, %v20413_v37  ;;  %13722 = vmatprep.mubr.msk.bf16.mxu1 %vm15791_vm2, %v20413_v37 }
 0x1ea   :  { %13715 = vmatpush3.bf16.msra.mxu1 %v15363_v28  ;;  %v16663_v28 = vadd.s32 8, %v16058_v53 }
 0x1eb   :  { %13716 = vmatprep.subr.bf16.mxu1 %v20413_v37 }
 0x1ee   :  { %13717 = vmatpush3.bf16.msra.mxu1 %v15365_v46  ;;  %v2235_v46 = vand.u32 3, %v16058_v53 }
 0x1ef   :  { %13718 = vmatprep.subr.bf16.mxu1 %v20413_v37 }
 0x1f0   :  { %vm16667_vm1 = vcmp.ge.s32.totalorder %v2235_v46, 1  ;;  %vm16675_vm6 = vcmp.lt.s32.totalorder %v2235_v46, 3  ;;  %v15377_v46 = vld [vmem:[%s20390_s8 + $0x1b8] sm:$0xff]  }
 0x23b   :  { %v834_v21 = vpop.f32.mrb[4].mxu0  ;;  %v1256_v39 = vpop.f32.mrb[4].mxu1 }
 0x23c   :  { %v2107_v40 = vrot.slane %v1256_v39, 4  ;;  %v13466_v41 = vpop.f32.mrb[5].mxu0  ;;  %v13546_v42 = vpop.f32.mrb[5].mxu1 }
 0x23d   :  { %v837_v43 = vpop.f32.mrb[6].mxu0  ;;  %v1259_v44 = vpop.f32.mrb[6].mxu1  ;;  %v15361_v41 = vld [vmem:[%s20466_s24] sm:$0xff]   ;;  %s15794_s24 = smov 3  }
 0x23e   :  { %v2113_v24 = vsel %vm2112_vm12, %v834_v21, %v2107_v40  ;;  %v13467_v31 = vpop.f32.mrb[7].mxu0  ;;  %v13547_v45 = vpop.f32.mrb[7].mxu1  ;;  %v15362_v42 = vld [vmem:[%s20390_s8 + $0xa0] sm:$0xff]   ;;  %v15364_v43 = vld [vmem:[%s20390_s8 + $0xa8] sm:$0xff]   ;;  %v15366_v44 = vld [vmem:[%s20390_s8 + $0xb0] sm:$0xff]  }
 0x23f   :  { %v2122_v30 = vadd.f32 %v11970_v47, %v2113_v24  ;;  %v15367_v24 = vld [vmem:[%s20390_s8 + $0xf0] sm:$0xff]   ;;  %v15368_v31 = vld [vmem:[%s20390_s8 + $0xb8] sm:$0xff]  }
 0x240   :  { %13719 = vmatpush3.bf16.msra.mxu1 %v15367_v24  ;;  %v15369_v45 = vld [vmem:[%s20390_s8 + $0xf8] sm:$0xff]  }
 0x241   :  { %v2124_v55 = vmax.f32 %v2122_v30, 0.0  ;;  %13720 = vmatprep.subr.bf16.mxu1 %v20413_v37 }
 0x243   :  { %v2138_v62 = vmul.f32 %v2124_v55, %v2124_v55  ;;  %v2127_v0 = vsel %vm2126_vm13, %v2124_v55, 0.0 }
 0x244   :  { %13721 = vmatpush3.bf16.msra.mxu1 %v15369_v45  ;;  %v15376_v45 = vld [vmem:[%s20390_s8 + $0x1f8] sm:$0xff]  }
 0x245   :  { %v2140_v3 = vsel %vm2126_vm13, %v2138_v62, 0.0  ;;  %13738 = vmatprep.subr.bf16.mxu1 %v20413_v37 }
 0x2bb   :  { %v1678_v48 = vpop.f32.mrb[8].mxu0  ;;  %v2099_v50 = vpop.f32.mrb[8].mxu1 }
 0x2bc   :  { %v2110_v51 = vrot.slane %v2099_v50, 4  ;;  %v13626_v52 = vpop.f32.mrb[9].mxu0  ;;  %v13706_v54 = vpop.f32.mrb[9].mxu1 }
 0x2bd   :  { %v1681_v56 = vpop.f32.mrb[10].mxu0  ;;  %v2102_v57 = vpop.f32.mrb[10].mxu1 }
 0x2be   :  { %v2114_v58 = vsel %vm2112_vm12, %v1678_v48, %v2110_v51  ;;  %v13627_v59 = vpop.f32.mrb[11].mxu0  ;;  %v13707_v60 = vpop.f32.mrb[11].mxu1  ;;  %v15380_v48 = vld [vmem:[%s20390_s8 + $0xc8] sm:$0xff]  }
 0x2bf   :  { %v2123_v61 = vadd.f32 %v11970_v47, %v2114_v58  ;;  %v2242_v47 = vand.u32 3, %v16663_v28  ;;  %v15389_v59 = vld [vmem:[%s20390_s8 + $0x1c8] sm:$0xff]   ;;  %v15390_v60 = vld [vmem:[%s20390_s8 + $0x190] sm:$0xff]  }
 0x2c1   :  { %v2125_v63 = vmax.f32 %v2123_v61, 0.0  ;;  %vm16671_vm5 = vcmp.ge.s32.totalorder %v2242_v47, 1  ;;  %vm16679_vm7 = vcmp.lt.s32.totalorder %v2242_v47, 3  ;;  %v15378_v47 = vld [vmem:[%s20390_s8 + $0xc0] sm:$0xff]  }
 0x2c3   :  { %v2128_v49 = vsel %vm2126_vm13, %v2125_v63, 0.0  ;;  %v2139_v1 = vmul.f32 %v2125_v63, %v2125_v63 }
 0x2c4   :  { %v2129_v2 = vadd.f32 %v2128_v49, %v2127_v0 }
 0x2c5   :  { %v2141_v4 = vsel %vm2126_vm13, %v2139_v1, 0.0  ;;  %v15370_v1 = vld [vmem:[%s20390_s8 + $0x1e0] sm:$0xff]  }
 0x2c6   :  { %v2130_v5 = vrot.slane %v2129_v2, 4  ;;  %v2142_v6 = vadd.f32 %v2141_v4, %v2140_v3 }
 0x2c8   :  { %v2131_v7 = vadd.f32 %v2130_v5, %v2129_v2  ;;  %v2143_v8 = vrot.slane %v2142_v6, 4 }
 0x2ca   :  { %v2132_v9 = vrot.slane %v2131_v7, 2  ;;  %v2144_v10 = vadd.f32 %v2143_v8, %v2142_v6 }
 0x2cc   :  { %v2133_v11 = vadd.f32 %v2132_v9, %v2131_v7  ;;  %v2145_v12 = vrot.slane %v2144_v10, 2 }
 0x2ce   :  { %v2134_v13 = vrot.slane %v2133_v11, 1  ;;  %v2146_v14 = vadd.f32 %v2145_v12, %v2144_v10 }
 0x2d0   :  { %v2135_v15 = vadd.f32 %v2134_v13, %v2133_v11  ;;  %v2147_v16 = vrot.slane %v2146_v14, 1 }
 0x2d2   :  { %v2137_v17 = vmul.f32 0.0625, %v2135_v15  ;;  %v2148_v18 = vadd.f32 %v2147_v16, %v2146_v14  ;;  %v15371_v16 = vld [vmem:[%s20390_s8 + $0x1a0] sm:$0xff]  }
 0x2d4   :  { %v2149_v19 = vmul.f32 0.0625, %v2148_v18  ;;  %v2150_v20 = vmul.f32 %v2137_v17, %v2137_v17  ;;  %v2155_v22 = vsub.f32 %v2125_v63, %v2137_v17  ;;  %v2154_v23 = vsub.f32 %v2124_v55, %v2137_v17  ;;  %v15372_v17 = vld [vmem:[%s20390_s8 + $0x1e8] sm:$0xff]   ;;  %v15385_v55 = vld [vmem:[%s20390_s8 + $0x98] sm:$0xff]  }
 0x2d6   :  { %v2151_v25 = vsub.f32 %v2149_v19, %v2150_v20  ;;  %v2163_v32 = vmul.f32 %v11971_v29, %v2155_v22  ;;  %v2162_v33 = vmul.f32 %v11971_v29, %v2154_v23 }
 0x2d8   :  { %v2152_v26 = vmax.f32 %v2151_v25, 0.0 }
 0x2da   :  { %v2164_v27 = vadd.f32 1e-05, %v2152_v26 }
 0x2dc   :  { %15526 = vrsqrt.f32 %v2164_v27 }
 0x2e6   :  { %v15527_v34 = vpop.eup %15526 }
 0x2e7   :  { %v2166_v36 = vmul.f32 %v15527_v34, %v2162_v33  ;;  %v2167_v38 = vmul.f32 %v15527_v34, %v2163_v32 }
 0x2e9   :  { %v2175_v21 = vadd.f32 %v11972_v35, %v2166_v36  ;;  %v2176_v39 = vadd.f32 %v11972_v35, %v2167_v38  ;;  %v15373_v38 = vld [vmem:[%s20390_s8 + $0x1a8] sm:$0xff]  }
 0x2eb   :  { %v2179_v40 = vpack.c.bf16 %v2176_v39, %v2175_v21  ;;  %v15374_v21 = vld [vmem:[%s20390_s8 + $0x1f0] sm:$0xff]  }
 0x2ed   :  { %13709 = vmatpush3.bf16.msra.mxu0 %v2179_v40 }
 0x2ee   :  { %13726 = vmatprep.subr.bf16.mxu0 %v20413_v37 }
 0x2f0   :  { %13711 = vmatmul.mubr.msk.bf16.vlgmr.msra.gmra.mrb[12].mxu0 %vm20408_vm14, %v15361_v41 }
 0x2f1   :  { %13727 = vmatpush3.bf16.msra.mxu0 %v15362_v42  ;;  %13734 = vmatprep.mubr.msk.bf16.mxu0 %vm15791_vm2, %v20413_v37 }
 0x2f2   :  { %13728 = vmatprep.subr.bf16.mxu0 %v20413_v37 }
 0x2f5   :  { %13729 = vmatpush3.bf16.msra.mxu0 %v15364_v43 }
 0x2f6   :  { %13730 = vmatprep.subr.bf16.mxu0 %v20413_v37 }
 0x2f9   :  { %13731 = vmatpush3.bf16.msra.mxu0 %v15366_v44 }
 0x2fa   :  { %13732 = vmatprep.subr.bf16.mxu0 %v20413_v37 }
 0x2fd   :  { %13733 = vmatpush3.bf16.msra.mxu0 %v15368_v31  ;;  %v15375_v31 = vld [vmem:[%s20390_s8 + $0x1b0] sm:$0xff]  }
 0x2fe   :  { %13750 = vmatprep.subr.bf16.mxu0 %v20413_v37 }
 0x3c3   :  { %v2223_v30 = vpop.f32.mrb[12].mxu0 }
 0x3c4   :  { %v2258_v50 = vrot.slane %v2223_v30, 3  ;;  %v2280_v51 = vrot.slane %v2223_v30, 5  ;;  %v2295_v52 = vrot.slane %v2223_v30, 7  ;;  %v13712_v54 = vpop.f32.mrb[13].mxu0  ;;  %v2273_v56 = vrot.slane %v2223_v30, 4 }
 0x3c5   :  { %v2306_v57 = vrot.slane %v2223_v30, 1  ;;  %v2226_v58 = vpop.f32.mrb[14].mxu0  ;;  %v15384_v54 = vld [vmem:[%s20390_s8 + $0xd8] sm:$0xff]  }
 0x3c6   :  { %v2263_v61 = vsel %vm2257_vm15, 0.0, %v2258_v50  ;;  %v2285_v62 = vsel %vm363_vm4, 0.0, %v2280_v51  ;;  %v2300_v63 = vsel %vm20417_vm3, 0.0, %v2295_v52  ;;  %v2259_v0 = vrot.slane %v2226_v58, 3  ;;  %v13713_v49 = vpop.f32.mrb[15].mxu0 }
 0x3c7   :  { %v2274_v2 = vrot.slane %v2226_v58, 4  ;;  %v2281_v3 = vrot.slane %v2226_v58, 5  ;;  %v2296_v4 = vrot.slane %v2226_v58, 7  ;;  %v16689_v5 = vpack.c.bf16 %v2226_v58, %v2223_v30  ;;  %v15379_v30 = vld [vmem:[%s20390_s8 + $0x80] sm:$0xff]  }
 0x3c8   :  { %v2307_v6 = vrot.slane %v2226_v58, 1  ;;  %v2316_v7 = vsel %vm2257_vm15, %v2259_v0, 0.0  ;;  %v2301_v8 = vsel %vm16667_vm1, %v2300_v63, 0.0  ;;  %v2260_v9 = vsel %vm2257_vm15, %v2258_v50, %v2259_v0  ;;  %v15381_v50 = vld [vmem:[%s20390_s8 + $0x88] sm:$0xff]   ;;  %v15393_v63 = vld [vmem:[%s20390_s8 + $0x1d8] sm:$0xff]   ;;  %v15394_v0 = vld [vmem:[%s20390_s8 + $0x120] sm:$0xff]  }
 0x3c9   :  { %v2324_v10 = vsel %vm363_vm4, %v2281_v3, 0.0  ;;  %13735 = vmatmul.mubr.msk.bf16.vlgmr.msra.gmra.mrb[16].mxu0 %vm2126_vm13, %v16689_v5  ;;  %v2297_v11 = vsel %vm20417_vm3, %v2295_v52, %v2296_v4  ;;  %v2270_v12 = vsel %vm16667_vm1, %v2263_v61, 0.0  ;;  %v2271_v13 = vsel %vm16671_vm5, %v2260_v9, 0.0  ;;  %v15383_v52 = vld [vmem:[%s20390_s8 + $0x90] sm:$0xff]   ;;  %v15388_v58 = vld [vmem:[%s20390_s8 + $0x188] sm:$0xff]   ;;  %v15395_v49 = vld [vmem:[%s20390_s8 + $0x160] sm:$0xff]  }
 0x3ca   :  { %v2311_v14 = vsel %vm20410_vm0, %v2307_v6, 0.0  ;;  %13751 = vmatpush3.bf16.msra.mxu0 %v15370_v1  ;;  %v2302_v15 = vsel %vm16671_vm5, %v2297_v11, 0.0  ;;  %13758 = vmatprep.mubr.msk.bf16.mxu0 %vm15791_vm2, %v20413_v37  ;;  %v2272_v18 = vpack.c.bf16 %v2271_v13, %v2270_v12  ;;  %v2275_v19 = vsel %vm2112_vm12, %v2273_v56, %v2274_v2  ;;  %v15391_v61 = vld [vmem:[%s20390_s8 + $0x1d0] sm:$0xff]   ;;  %v15396_v1 = vld [vmem:[%s20390_s8 + $0x128] sm:$0xff]  }
 0x3cb   :  { %13752 = vmatprep.subr.bf16.mxu0 %v20413_v37  ;;  %v16716_v20 = vpack.c.bf16 %v2302_v15, %v2301_v8  ;;  %v2278_v22 = vsel %vm2112_vm12, 0.0, %v2273_v56  ;;  %v2308_v23 = vsel %vm20410_vm0, %v2306_v57, %v2307_v6  ;;  %v2313_v25 = vsel %vm16679_vm7, %v2311_v14, 0.0  ;;  %v15386_v56 = vld [vmem:[%s20390_s8 + $0x180] sm:$0xff]   ;;  %v15399_v4 = vld [vmem:[%s20390_s8 + $0x170] sm:$0xff]   ;;  %v15400_v6 = vld [vmem:[%s20390_s8 + $0x138] sm:$0xff]  }
 0x3cc   :  { %v16722_v26 = vpack.c.bf16 %v2275_v19, %v2278_v22  ;;  %v2312_v27 = vsel %vm16675_vm6, %v2308_v23, 0.0  ;;  %v2282_v29 = vsel %vm363_vm4, %v2280_v51, %v2281_v3  ;;  %v2292_v32 = vsel %vm16675_vm6, %v2285_v62, 0.0  ;;  %v15382_v51 = vld [vmem:[%s20390_s8 + $0xd0] sm:$0xff]   ;;  %v15387_v57 = vld [vmem:[%s20390_s8 + $0x1c0] sm:$0xff]   ;;  %v15392_v62 = vld [vmem:[%s20390_s8 + $0x198] sm:$0xff]  }
 0x3cd   :  { %13723 = vmatmul.mubr.msk.bf16.vlgmr.msra.gmra.mrb[12].mxu1 %vm2126_vm13, %v16716_v20  ;;  %v16731_v33 = vpack.c.bf16 %v2313_v25, %v2312_v27  ;;  %v2293_v34 = vsel %vm16679_vm7, %v2282_v29, 0.0  ;;  %v2317_v35 = vsel %vm16667_vm1, %v2260_v9, 0.0  ;;  %v2318_v36 = vsel %vm16671_vm5, %v2316_v7, 0.0  ;;  %v15398_v3 = vld [vmem:[%s20390_s8 + $0x130] sm:$0xff]   ;;  %v15401_v7 = vld [vmem:[%s20390_s8 + $0x178] sm:$0xff]   ;;  %v15402_v8 = vld [vmem:[%s20390_s8 + $0x60] sm:$0xff]  }
 0x3ce   :  { %13739 = vmatpush3.bf16.msra.mxu1 %v15371_v16  ;;  %13753 = vmatpush3.bf16.msra.mxu0 %v15372_v17  ;;  %v16745_v39 = vpack.c.bf16 %v2293_v34, %v2292_v32  ;;  %v16747_v40 = vpack.c.bf16 %v2318_v36, %v2317_v35  ;;  %v2321_v41 = vsel %vm2112_vm12, %v2274_v2, 0.0  ;;  %v2325_v42 = vsel %vm16675_vm6, %v2282_v29, 0.0  ;;  %v15397_v2 = vld [vmem:[%s20390_s8 + $0x168] sm:$0xff]   ;;  %v15403_v9 = vld [vmem:[%s20390_s8 + $0x20] sm:$0xff]   ;;  %v15406_v12 = vld [vmem:[%s20390_s8 + $0x70] sm:$0xff]  }
 0x3cf   :  { %13740 = vmatprep.subr.bf16.mxu1 %v20413_v37  ;;  %13754 = vmatprep.subr.bf16.mxu0 %v20413_v37  ;;  %v16754_v43 = vpack.c.bf16 %v2321_v41, %v2275_v19  ;;  %v2326_v44 = vsel %vm16679_vm7, %v2324_v10, 0.0  ;;  %v15404_v10 = vld [vmem:[%s20390_s8 + $0x68] sm:$0xff]   ;;  %v15407_v13 = vld [vmem:[%s20390_s8 + $0x30] sm:$0xff]   ;;  %v15408_v14 = vld [vmem:[%s20390_s8 + $0x78] sm:$0xff]  }
 0x3d0   :  { %13746 = vmatprep.mubr.msk.bf16.mxu1 %vm15791_vm2, %v20413_v37  ;;  %v16760_v24 = vpack.c.bf16 %v2326_v44, %v2325_v42  ;;  %v15405_v11 = vld [vmem:[%s20390_s8 + $0x28] sm:$0xff]   ;;  %v15409_v15 = vld [vmem:[%s20390_s8 + $0x38] sm:$0xff]   ;;  %v15410_v16 = vld [vmem:[%s20390_s8 + $0x140] sm:$0xff]  }
 0x3d1   :  { %v15411_v17 = vld [vmem:[%s20390_s8 + $0x100] sm:$0xff]   ;;  %v15413_v19 = vld [vmem:[%s20390_s8 + $0x108] sm:$0xff]   ;;  %v15415_v22 = vld [vmem:[%s20390_s8 + $0x110] sm:$0xff]  }
 0x3d2   :  { %13741 = vmatpush3.bf16.msra.mxu1 %v15373_v38  ;;  %13755 = vmatpush3.bf16.msra.mxu0 %v15374_v21  ;;  %v15416_v23 = vld [vmem:[%s20390_s8 + $0x158] sm:$0xff]   ;;  %v15419_v27 = vld [vmem:[%s20390_s8 + $0x40] sm:$0xff]   ;;  %v15420_v29 = vld [vmem:[%s20390_s8 + $0x8] sm:$0xff]  }
 0x3d3   :  { %13742 = vmatprep.subr.bf16.mxu1 %v20413_v37  ;;  %13756 = vmatprep.subr.bf16.mxu0 %v20413_v37  ;;  %v15417_v25 = vld [vmem:[%s20390_s8 + $0x118] sm:$0xff]   ;;  %v15422_v32 = vld [vmem:[%s20390_s8 + $0x10] sm:$0xff]  }
 0x3d4   :  { %v15424_v34 = vld [vmem:[%s20390_s8 + $0x18] sm:$0xff]  }
 0x3d5   :  { %v15425_v35 = vld [vmem:[%s20390_s8 + $0x58] sm:$0xff]  }
 0x3d6   :  { %13743 = vmatpush3.bf16.msra.mxu1 %v15375_v31  ;;  %13757 = vmatpush3.bf16.msra.mxu0 %v15376_v45 }
 0x3d7   :  { %13744 = vmatprep.subr.bf16.mxu1 %v20413_v37  ;;  %13774 = vmatprep.subr.bf16.mxu0 %v20413_v37 }
 0x3d9   :  { %13759 = vmatmul.mubr.msk.bf16.vlgmr.msra.gmra.mrb[20].mxu0 %vm2126_vm13, %v2272_v18  ;;  %v15412_v18 = vld [vmem:[%s20390_s8 + $0x148] sm:$0xff]  }
 0x3da   :  { %13745 = vmatpush3.bf16.msra.mxu1 %v15377_v46  ;;  %13775 = vmatpush3.bf16.msra.mxu0 %v15378_v47 }
 0x3db   :  { %13762 = vmatprep.subr.bf16.mxu1 %v20413_v37  ;;  %13776 = vmatprep.subr.bf16.mxu0 %v20413_v37 }
 0x3dc   :  { %13782 = vmatprep.mubr.msk.bf16.mxu0 %vm15791_vm2, %v20413_v37 }
 0x3dd   :  { %13747 = vmatmul.mubr.msk.bf16.vlgmr.msra.gmra.mrb[16].mxu1 %vm2126_vm13, %v16722_v26 }
 0x3de   :  { %13763 = vmatpush3.bf16.msra.mxu1 %v15379_v30  ;;  %13777 = vmatpush3.bf16.msra.mxu0 %v15380_v48 }
 0x3df   :  { %13764 = vmatprep.subr.bf16.mxu1 %v20413_v37  ;;  %13778 = vmatprep.subr.bf16.mxu0 %v20413_v37 }
 0x3e0   :  { %13770 = vmatprep.mubr.msk.bf16.mxu1 %vm15791_vm2, %v20413_v37 }
 0x3e2   :  { %13765 = vmatpush3.bf16.msra.mxu1 %v15381_v50  ;;  %13779 = vmatpush3.bf16.msra.mxu0 %v15382_v51 }
 0x3e3   :  { %13766 = vmatprep.subr.bf16.mxu1 %v20413_v37  ;;  %13780 = vmatprep.subr.bf16.mxu0 %v20413_v37 }
 0x3e6   :  { %13767 = vmatpush3.bf16.msra.mxu1 %v15383_v52  ;;  %13781 = vmatpush3.bf16.msra.mxu0 %v15384_v54 }
 0x3e7   :  { %13768 = vmatprep.subr.bf16.mxu1 %v20413_v37  ;;  %13798 = vmatprep.subr.bf16.mxu0 %v20413_v37 }
 0x3e9   :  { %13783 = vmatmul.mubr.msk.bf16.vlgmr.msra.gmra.mrb[24].mxu0 %vm2126_vm13, %v16689_v5 }
 0x3ea   :  { %13769 = vmatpush3.bf16.msra.mxu1 %v15385_v55  ;;  %13799 = vmatpush3.bf16.msra.mxu0 %v15386_v56 }
 0x3eb   :  { %13786 = vmatprep.subr.bf16.mxu1 %v20413_v37  ;;  %13800 = vmatprep.subr.bf16.mxu0 %v20413_v37 }
 0x3ec   :  { %13806 = vmatprep.mubr.msk.bf16.mxu0 %vm15791_vm2, %v20413_v37 }
 0x3ed   :  { %13771 = vmatmul.mubr.msk.bf16.vlgmr.msra.gmra.mrb[20].mxu1 %vm2126_vm13, %v16731_v33 }
 0x3ee   :  { %13787 = vmatpush3.bf16.msra.mxu1 %v15387_v57  ;;  %13801 = vmatpush3.bf16.msra.mxu0 %v15388_v58 }
 0x3ef   :  { %13788 = vmatprep.subr.bf16.mxu1 %v20413_v37  ;;  %13802 = vmatprep.subr.bf16.mxu0 %v20413_v37 }
 0x3f0   :  { %13794 = vmatprep.mubr.msk.bf16.mxu1 %vm15791_vm2, %v20413_v37 }
 0x3f2   :  { %13789 = vmatpush3.bf16.msra.mxu1 %v15389_v59  ;;  %13803 = vmatpush3.bf16.msra.mxu0 %v15390_v60 }
 0x3f3   :  { %13790 = vmatprep.subr.bf16.mxu1 %v20413_v37  ;;  %13804 = vmatprep.subr.bf16.mxu0 %v20413_v37 }
 0x3f6   :  { %13791 = vmatpush3.bf16.msra.mxu1 %v15391_v61  ;;  %13805 = vmatpush3.bf16.msra.mxu0 %v15392_v62 }
 0x3f7   :  { %13792 = vmatprep.subr.bf16.mxu1 %v20413_v37  ;;  %13822 = vmatprep.subr.bf16.mxu0 %v20413_v37 }
 0x3f9   :  { %13807 = vmatmul.mubr.msk.bf16.vlgmr.msra.gmra.mrb[28].mxu0 %vm2126_vm13, %v16745_v39 }
 0x3fa   :  { %13793 = vmatpush3.bf16.msra.mxu1 %v15393_v63  ;;  %13823 = vmatpush3.bf16.msra.mxu0 %v15394_v0 }
 0x3fb   :  { %13810 = vmatprep.subr.bf16.mxu1 %v20413_v37  ;;  %13824 = vmatprep.subr.bf16.mxu0 %v20413_v37 }
 0x3fc   :  { %13830 = vmatprep.mubr.msk.bf16.mxu0 %vm15791_vm2, %v20413_v37 }
 0x3fd   :  { %13795 = vmatmul.mubr.msk.bf16.vlgmr.msra.gmra.mrb[24].mxu1 %vm2126_vm13, %v16722_v26  ;;  %v15418_v26 = vld [vmem:[%s20390_s8] sm:$0xff]  }
 0x3fe   :  { %13811 = vmatpush3.bf16.msra.mxu1 %v15395_v49  ;;  %13825 = vmatpush3.bf16.msra.mxu0 %v15396_v1 }
 0x3ff   :  { %13812 = vmatprep.subr.bf16.mxu1 %v20413_v37  ;;  %13826 = vmatprep.subr.bf16.mxu0 %v20413_v37 }
 0x400   :  { %13818 = vmatprep.mubr.msk.bf16.mxu1 %vm15791_vm2, %v20413_v37 }
 0x402   :  { %13813 = vmatpush3.bf16.msra.mxu1 %v15397_v2  ;;  %13827 = vmatpush3.bf16.msra.mxu0 %v15398_v3 }
 0x403   :  { %13814 = vmatprep.subr.bf16.mxu1 %v20413_v37  ;;  %13828 = vmatprep.subr.bf16.mxu0 %v20413_v37 }
 0x406   :  { %13815 = vmatpush3.bf16.msra.mxu1 %v15399_v4  ;;  %13829 = vmatpush3.bf16.msra.mxu0 %v15400_v6 }
 0x407   :  { %13816 = vmatprep.subr.bf16.mxu1 %v20413_v37  ;;  %13846 = vmatprep.subr.bf16.mxu0 %v20413_v37 }
 0x409   :  { %13831 = vmatmul.mubr.msk.bf16.vlgmr.msra.gmra.mrb[32].mxu0 %vm2126_vm13, %v16689_v5 }
 0x40a   :  { %13817 = vmatpush3.bf16.msra.mxu1 %v15401_v7  ;;  %13847 = vmatpush3.bf16.msra.mxu0 %v15402_v8 }
 0x40b   :  { %13834 = vmatprep.subr.bf16.mxu1 %v20413_v37  ;;  %13848 = vmatprep.subr.bf16.mxu0 %v20413_v37 }
 0x40c   :  { %13854 = vmatprep.mubr.msk.bf16.mxu0 %vm15791_vm2, %v20413_v37 }
 0x40d   :  { %13819 = vmatmul.mubr.msk.bf16.vlgmr.msra.gmra.mrb[28].mxu1 %vm2126_vm13, %v16716_v20  ;;  %v15414_v20 = vld [vmem:[%s20390_s8 + $0x150] sm:$0xff]  }
 0x40e   :  { %13835 = vmatpush3.bf16.msra.mxu1 %v15403_v9  ;;  %13849 = vmatpush3.bf16.msra.mxu0 %v15404_v10 }
 0x40f   :  { %13836 = vmatprep.subr.bf16.mxu1 %v20413_v37  ;;  %13850 = vmatprep.subr.bf16.mxu0 %v20413_v37 }
 0x410   :  { %13842 = vmatprep.mubr.msk.bf16.mxu1 %vm15791_vm2, %v20413_v37 }
 0x412   :  { %13837 = vmatpush3.bf16.msra.mxu1 %v15405_v11  ;;  %13851 = vmatpush3.bf16.msra.mxu0 %v15406_v12 }
 0x413   :  { %13838 = vmatprep.subr.bf16.mxu1 %v20413_v37  ;;  %13852 = vmatprep.subr.bf16.mxu0 %v20413_v37 }
 0x416   :  { %13839 = vmatpush3.bf16.msra.mxu1 %v15407_v13  ;;  %13853 = vmatpush3.bf16.msra.mxu0 %v15408_v14 }
 0x417   :  { %13840 = vmatprep.subr.bf16.mxu1 %v20413_v37  ;;  %13870 = vmatprep.subr.bf16.mxu0 %v20413_v37 }
 0x419   :  { %13855 = vmatmul.mubr.msk.bf16.vlgmr.msra.gmra.mrb[36].mxu0 %vm2126_vm13, %v16747_v40 }
 0x41a   :  { %13841 = vmatpush3.bf16.msra.mxu1 %v15409_v15  ;;  %13871 = vmatpush3.bf16.msra.mxu0 %v15410_v16 }
 0x41b   :  { %13858 = vmatprep.subr.bf16.mxu1 %v20413_v37  ;;  %13872 = vmatprep.subr.bf16.mxu0 %v20413_v37 }
 0x41c   :  { %13878 = vmatprep.mubr.msk.bf16.mxu0 %vm15791_vm2, %v20413_v37 }
 0x41d   :  { %13843 = vmatmul.mubr.msk.bf16.vlgmr.msra.gmra.mrb[32].mxu1 %vm2126_vm13, %v16754_v43 }
 0x41e   :  { %13859 = vmatpush3.bf16.msra.mxu1 %v15411_v17  ;;  %13873 = vmatpush3.bf16.msra.mxu0 %v15412_v18 }
 0x41f   :  { %13860 = vmatprep.subr.bf16.mxu1 %v20413_v37  ;;  %13874 = vmatprep.subr.bf16.mxu0 %v20413_v37 }
 0x420   :  { %13866 = vmatprep.mubr.msk.bf16.mxu1 %vm15791_vm2, %v20413_v37 }
 0x422   :  { %13861 = vmatpush3.bf16.msra.mxu1 %v15413_v19  ;;  %13875 = vmatpush3.bf16.msra.mxu0 %v15414_v20 }
 0x423   :  { %13862 = vmatprep.subr.bf16.mxu1 %v20413_v37  ;;  %13876 = vmatprep.subr.bf16.mxu0 %v20413_v37 }
 0x426   :  { %13863 = vmatpush3.bf16.msra.mxu1 %v15415_v22  ;;  %13877 = vmatpush3.bf16.msra.mxu0 %v15416_v23 }
 0x427   :  { %13864 = vmatprep.subr.bf16.mxu1 %v20413_v37  ;;  %13894 = vmatprep.subr.bf16.mxu0 %v20413_v37 }
 0x429   :  { %13879 = vmatmul.mubr.msk.bf16.vlgmr.msra.gmra.mrb[40].mxu0 %vm2126_vm13, %v16689_v5  ;;  %v15421_v5 = vld [vmem:[%s20390_s8 + $0x48] sm:$0xff]  }
 0x42a   :  { %13865 = vmatpush3.bf16.msra.mxu1 %v15417_v25  ;;  %13895 = vmatpush3.bf16.msra.mxu0 %v15418_v26 }
 0x42b   :  { %13882 = vmatprep.subr.bf16.mxu1 %v20413_v37  ;;  %13896 = vmatprep.subr.bf16.mxu0 %v20413_v37 }
 0x42c   :  { %13902 = vmatprep.mubr.msk.bf16.mxu0 %vm15791_vm2, %v20413_v37 }
 0x42d   :  { %13867 = vmatmul.mubr.msk.bf16.vlgmr.msra.gmra.mrb[36].mxu1 %vm2126_vm13, %v16731_v33  ;;  %v15423_v33 = vld [vmem:[%s20390_s8 + $0x50] sm:$0xff]  }
 0x42e   :  { %13883 = vmatpush3.bf16.msra.mxu1 %v15419_v27  ;;  %13897 = vmatpush3.bf16.msra.mxu0 %v15420_v29 }
 0x42f   :  { %13884 = vmatprep.subr.bf16.mxu1 %v20413_v37  ;;  %13898 = vmatprep.subr.bf16.mxu0 %v20413_v37 }
 0x430   :  { %13890 = vmatprep.mubr.msk.bf16.mxu1 %vm15791_vm2, %v20413_v37  ;;  %vm20409_vm2 = vcmask 261120  }
 0x432   :  { %13885 = vmatpush3.bf16.msra.mxu1 %v15421_v5  ;;  %13899 = vmatpush3.bf16.msra.mxu0 %v15422_v32  ;;  %v15426_v5 = vld [vmem:[%s20395_s12] sm:$0xff]  }
 0x433   :  { %13886 = vmatprep.subr.bf16.mxu1 %v20413_v37  ;;  %13900 = vmatprep.subr.bf16.mxu0 %v20413_v37 }
 0x436   :  { %13887 = vmatpush3.bf16.msra.mxu1 %v15423_v33  ;;  %13901 = vmatpush3.bf16.msra.mxu0 %v15424_v34 }
 0x437   :  { %13888 = vmatprep.subr.bf16.mxu1 %v20413_v37 }
 0x439   :  { %13903 = vmatmul.mubr.msk.bf16.vlgmr.msra.gmra.mrb[44].mxu0 %vm2126_vm13, %v16760_v24 }
 0x43a   :  { %13889 = vmatpush3.bf16.msra.mxu1 %v15425_v35 }
 0x43d   :  { %13891 = vmatmul.mubr.msk.bf16.vlgmr.msra.gmra.mrb[40].mxu1 %vm2126_vm13, %v16754_v43  ;;  %v17020_v43 = vld [vmem:[%s20394_s9] ss:$0 sm:$0xff] }
 0x43e   :  { %13914 = vmatprep.mubr.msk.bf16.mxu1 %vm2126_vm13, %v15426_v5 }
 0x49c   :  { %v2475_v36 = vpop.f32.mrb[16].mxu0 }
 0x49d   :  { %v13736_v38 = vpop.f32.mrb[17].mxu0 }
 0x49e   :  { %v2478_v21 = vpop.f32.mrb[18].mxu0 }
 0x49f   :  { %v13737_v39 = vpop.f32.mrb[19].mxu0 }
 0x4a0   :  { %v2407_v40 = vpop.f32.mrb[12].mxu1 }
 0x4a1   :  { %v2476_v41 = vadd.f32 %v2475_v36, %v2407_v40  ;;  %v13724_v42 = vpop.f32.mrb[13].mxu1 }
 0x4a2   :  { %v2410_v44 = vpop.f32.mrb[14].mxu1 }
 0x4a3   :  { %v2479_v31 = vadd.f32 %v2478_v21, %v2410_v44  ;;  %v13725_v45 = vpop.f32.mrb[15].mxu1 }
 0x4ac   :  { %v2631_v46 = vpop.f32.mrb[20].mxu0 }
 0x4ad   :  { %v13760_v47 = vpop.f32.mrb[21].mxu0 }
 0x4ae   :  { %v2634_v30 = vpop.f32.mrb[22].mxu0 }
 0x4af   :  { %v13761_v48 = vpop.f32.mrb[23].mxu0 }
 0x4b0   :  { %v2552_v50 = vpop.f32.mrb[16].mxu1 }
 0x4b1   :  { %v2559_v24 = vadd.f32 %v2552_v50, %v2476_v41  ;;  %v13748_v51 = vpop.f32.mrb[17].mxu1 }
 0x4b2   :  { %v2555_v52 = vpop.f32.mrb[18].mxu1 }
 0x4b3   :  { %v2638_v54 = vadd.f32 %v2631_v46, %v2559_v24  ;;  %v2560_v55 = vadd.f32 %v2555_v52, %v2479_v31  ;;  %v13749_v56 = vpop.f32.mrb[19].mxu1 }
 0x4b5   :  { %v3561_v57 = vadd.f32 %v17020_v43, %v2638_v54  ;;  %v2639_v58 = vadd.f32 %v2634_v30, %v2560_v55 }
 0x4b7   :  { %v17023_v59 = vmax.f32 %v3561_v57, 0.0  ;;  %v3562_v60 = vadd.f32 %v17020_v43, %v2639_v58 }
 0x4b9   :  { %v3601_v61 = vmul.f32 %v17023_v59, %v17023_v59  ;;  %v17028_v62 = vmax.f32 %v3562_v60, 0.0  ;;  %v3578_v63 = vsel %vm20409_vm2, %v17023_v59, 0.0 }
 0x4bb   :  { %v3579_v0 = vsel %vm20409_vm2, %v17028_v62, 0.0  ;;  %v3602_v49 = vmul.f32 %v17028_v62, %v17028_v62  ;;  %v3609_v3 = vsel %vm20409_vm2, %v3601_v61, 0.0 }
 0x4bc   :  { %v3580_v1 = vadd.f32 %v3579_v0, %v3578_v63  ;;  %v2784_v2 = vpop.f32.mrb[24].mxu0 }
 0x4bd   :  { %v3610_v4 = vsel %vm20409_vm2, %v3602_v49, 0.0  ;;  %v13784_v6 = vpop.f32.mrb[25].mxu0 }
 0x4be   :  { %v3611_v7 = vadd.f32 %v3610_v4, %v3609_v3  ;;  %v2787_v8 = vpop.f32.mrb[26].mxu0 }
 0x4bf   :  { %v13785_v9 = vpop.f32.mrb[27].mxu0 }
 0x4c0   :  { %v2719_v10 = vpop.f32.mrb[20].mxu1 }
 0x4c1   :  { %v2785_v11 = vadd.f32 %v2784_v2, %v2719_v10  ;;  %v13772_v12 = vpop.f32.mrb[21].mxu1 }
 0x4c2   :  { %v2722_v13 = vpop.f32.mrb[22].mxu1 }
 0x4c3   :  { %v2788_v14 = vadd.f32 %v2787_v8, %v2722_v13  ;;  %v13773_v15 = vpop.f32.mrb[23].mxu1 }
 0x4cc   :  { %v2937_v16 = vpop.f32.mrb[28].mxu0 }
 0x4cd   :  { %v13808_v17 = vpop.f32.mrb[29].mxu0 }
 0x4ce   :  { %v2940_v18 = vpop.f32.mrb[30].mxu0 }
 0x4cf   :  { %v13809_v19 = vpop.f32.mrb[31].mxu0 }
 0x4d0   :  { %v2858_v20 = vpop.f32.mrb[24].mxu1 }
 0x4d1   :  { %v2865_v22 = vadd.f32 %v2858_v20, %v2785_v11  ;;  %v13796_v23 = vpop.f32.mrb[25].mxu1 }
 0x4d2   :  { %v2861_v25 = vpop.f32.mrb[26].mxu1 }
 0x4d3   :  { %v2944_v26 = vadd.f32 %v2937_v16, %v2865_v22  ;;  %v2866_v27 = vadd.f32 %v2861_v25, %v2788_v14  ;;  %v13797_v29 = vpop.f32.mrb[27].mxu1 }
 0x4d5   :  { %v3563_v32 = vadd.f32 %v17020_v43, %v2944_v26  ;;  %v2945_v33 = vadd.f32 %v2940_v18, %v2866_v27 }
 0x4d7   :  { %v17043_v34 = vmax.f32 %v3563_v32, 0.0  ;;  %v3564_v35 = vadd.f32 %v17020_v43, %v2945_v33 }
 0x4d9   :  { %v3581_v36 = vsel %vm20409_vm2, %v17043_v34, 0.0  ;;  %v3603_v38 = vmul.f32 %v17043_v34, %v17043_v34  ;;  %v17050_v21 = vmax.f32 %v3564_v35, 0.0 }
 0x4da   :  { %v3582_v39 = vadd.f32 %v3581_v36, %v3580_v1 }
 0x4db   :  { %v3612_v40 = vsel %vm20409_vm2, %v3603_v38, 0.0  ;;  %v3583_v41 = vsel %vm20409_vm2, %v17050_v21, 0.0  ;;  %v3604_v42 = vmul.f32 %v17050_v21, %v17050_v21 }
 0x4dc   :  { %v3613_v44 = vadd.f32 %v3612_v40, %v3611_v7  ;;  %v3584_v31 = vadd.f32 %v3583_v41, %v3582_v39  ;;  %v3087_v45 = vpop.f32.mrb[32].mxu0 }
 0x4dd   :  { %v3614_v46 = vsel %vm20409_vm2, %v3604_v42, 0.0  ;;  %v13832_v47 = vpop.f32.mrb[33].mxu0 }
 0x4de   :  { %v3615_v30 = vadd.f32 %v3614_v46, %v3613_v44  ;;  %v3090_v48 = vpop.f32.mrb[34].mxu0 }
 0x4df   :  { %v13833_v50 = vpop.f32.mrb[35].mxu0 }
 0x4e0   :  { %v3022_v24 = vpop.f32.mrb[28].mxu1 }
 0x4e1   :  { %v3088_v51 = vadd.f32 %v3087_v45, %v3022_v24  ;;  %v13820_v52 = vpop.f32.mrb[29].mxu1 }
 0x4e2   :  { %v3025_v54 = vpop.f32.mrb[30].mxu1 }
 0x4e3   :  { %v3091_v55 = vadd.f32 %v3090_v48, %v3025_v54  ;;  %v13821_v56 = vpop.f32.mrb[31].mxu1 }
 0x4ec   :  { %v3243_v57 = vpop.f32.mrb[36].mxu0 }
 0x4ed   :  { %v13856_v58 = vpop.f32.mrb[37].mxu0 }
 0x4ee   :  { %v3246_v60 = vpop.f32.mrb[38].mxu0 }
 0x4ef   :  { %v13857_v61 = vpop.f32.mrb[39].mxu0 }
 0x4f0   :  { %v3164_v63 = vpop.f32.mrb[32].mxu1 }
 0x4f1   :  { %v3171_v0 = vadd.f32 %v3164_v63, %v3088_v51  ;;  %v13844_v49 = vpop.f32.mrb[33].mxu1 }
 0x4f2   :  { %v3167_v1 = vpop.f32.mrb[34].mxu1 }
 0x4f3   :  { %v3250_v2 = vadd.f32 %v3243_v57, %v3171_v0  ;;  %v3172_v3 = vadd.f32 %v3167_v1, %v3091_v55  ;;  %v13845_v4 = vpop.f32.mrb[35].mxu1 }
 0x4f5   :  { %v3565_v6 = vadd.f32 %v17020_v43, %v3250_v2  ;;  %v3251_v7 = vadd.f32 %v3246_v60, %v3172_v3 }
 0x4f7   :  { %v17059_v8 = vmax.f32 %v3565_v6, 0.0  ;;  %v3566_v9 = vadd.f32 %v17020_v43, %v3251_v7 }
 0x4f9   :  { %v3585_v10 = vsel %vm20409_vm2, %v17059_v8, 0.0  ;;  %v3605_v11 = vmul.f32 %v17059_v8, %v17059_v8  ;;  %v17066_v12 = vmax.f32 %v3566_v9, 0.0 }
 0x4fa   :  { %v3586_v13 = vadd.f32 %v3585_v10, %v3584_v31 }
 0x4fb   :  { %v3616_v14 = vsel %vm20409_vm2, %v3605_v11, 0.0  ;;  %v3587_v15 = vsel %vm20409_vm2, %v17066_v12, 0.0  ;;  %v3606_v16 = vmul.f32 %v17066_v12, %v17066_v12 }
 0x4fc   :  { %v3617_v17 = vadd.f32 %v3616_v14, %v3615_v30  ;;  %v3588_v18 = vadd.f32 %v3587_v15, %v3586_v13  ;;  %v3393_v19 = vpop.f32.mrb[40].mxu0 }
 0x4fd   :  { %v3618_v20 = vsel %vm20409_vm2, %v3606_v16, 0.0  ;;  %v13880_v22 = vpop.f32.mrb[41].mxu0 }
 0x4fe   :  { %v3619_v23 = vadd.f32 %v3618_v20, %v3617_v17  ;;  %v3396_v25 = vpop.f32.mrb[42].mxu0 }
 0x4ff   :  { %v13881_v26 = vpop.f32.mrb[43].mxu0 }
 0x500   :  { %v3328_v27 = vpop.f32.mrb[36].mxu1 }
 0x501   :  { %v3394_v29 = vadd.f32 %v3393_v19, %v3328_v27  ;;  %v13868_v5 = vpop.f32.mrb[37].mxu1 }
 0x502   :  { %v3331_v32 = vpop.f32.mrb[38].mxu1 }
 0x503   :  { %v3397_v33 = vadd.f32 %v3396_v25, %v3331_v32  ;;  %v13869_v35 = vpop.f32.mrb[39].mxu1  ;;  %v12176_v32 = vld [vmem:[%s20396_s10] ss:$0 sm:$0xff] }
 0x50c   :  { %v3545_v36 = vpop.f32.mrb[44].mxu0 }
 0x50d   :  { %v13904_v38 = vpop.f32.mrb[45].mxu0 }
 0x50e   :  { %v3548_v39 = vpop.f32.mrb[46].mxu0 }
 0x50f   :  { %v13905_v40 = vpop.f32.mrb[47].mxu0 }
 0x510   :  { %v3467_v41 = vpop.f32.mrb[40].mxu1 }
 0x511   :  { %v3474_v42 = vadd.f32 %v3467_v41, %v3394_v29  ;;  %v13892_v44 = vpop.f32.mrb[41].mxu1 }
 0x512   :  { %v3470_v31 = vpop.f32.mrb[42].mxu1 }
 0x513   :  { %v3552_v45 = vadd.f32 %v3545_v36, %v3474_v42  ;;  %v3475_v46 = vadd.f32 %v3470_v31, %v3397_v33  ;;  %v13893_v47 = vpop.f32.mrb[43].mxu1 }
 0x515   :  { %v3567_v30 = vadd.f32 %v17020_v43, %v3552_v45  ;;  %v3553_v48 = vadd.f32 %v3548_v39, %v3475_v46 }
 0x517   :  { %v3575_v50 = vmax.f32 %v3567_v30, 0.0  ;;  %v3568_v24 = vadd.f32 %v17020_v43, %v3553_v48 }
 0x519   :  { %v3589_v51 = vsel %vm20409_vm2, %v3575_v50, 0.0  ;;  %v3607_v52 = vmul.f32 %v3575_v50, %v3575_v50  ;;  %v3576_v54 = vmax.f32 %v3568_v24, 0.0 }
 0x51a   :  { %v3590_v55 = vadd.f32 %v3589_v51, %v3588_v18 }
 0x51b   :  { %v3620_v56 = vsel %vm20409_vm2, %v3607_v52, 0.0  ;;  %v3591_v57 = vsel %vm20409_vm2, %v3576_v54, 0.0  ;;  %v3608_v58 = vmul.f32 %v3576_v54, %v3576_v54 }
 0x51c   :  { %v3621_v60 = vadd.f32 %v3620_v56, %v3619_v23  ;;  %v3592_v61 = vadd.f32 %v3591_v57, %v3590_v55 }
 0x51d   :  { %v3622_v63 = vsel %vm20409_vm2, %v3608_v58, 0.0 }
 0x51e   :  { %v3593_v0 = vrot.slane %v3592_v61, 4  ;;  %v3623_v49 = vadd.f32 %v3622_v63, %v3621_v60  ;;  %v15427_v60 = vld [vmem:[%s20395_s12 + $0x8] sm:$0xff]   ;;  %v15429_v63 = vld [vmem:[%s20395_s12 + $0x18] sm:$0xff]  }
 0x520   :  { %v3594_v1 = vadd.f32 %v3593_v0, %v3592_v61  ;;  %v3624_v2 = vrot.slane %v3623_v49, 4  ;;  %v15428_v61 = vld [vmem:[%s20395_s12 + $0x10] sm:$0xff]  }
 0x521   :  { %v15430_v0 = vld [vmem:[%s20398_s13 + $0x70] sm:$0xff]  }
 0x522   :  { %v3595_v3 = vrot.slane %v3594_v1, 2  ;;  %v3625_v43 = vadd.f32 %v3624_v2, %v3623_v49  ;;  %13922 = vmatprep.subr.bf16.mxu0 %v15430_v0  ;;  %v15431_v49 = vld [vmem:[%s20398_s13 + $0x78] sm:$0xff]   ;;  %v15433_v2 = vld [vmem:[%s20398_s13 + $0x48] sm:$0xff]  }
 0x523   :  { %13923 = vmatpush3.bf16.msra.mxu0 %v15430_v0 }
 0x524   :  { %v3596_v4 = vadd.f32 %v3595_v3, %v3594_v1  ;;  %v3626_v6 = vrot.slane %v3625_v43, 2  ;;  %v15432_v1 = vld [vmem:[%s20398_s13 + $0x40] sm:$0xff]   ;;  %13924 = vmatprep.subr.bf16.mxu0 %v15431_v49  ;;  %v17119_v3 = vld [vmem:[%s20398_s13 + $0x50] sm:$0xff]  }
 0x526   :  { %v3597_v7 = vrot.slane %v3596_v4, 1  ;;  %v3627_v9 = vadd.f32 %v3626_v6, %v3625_v43  ;;  %v17125_v43 = vld [vmem:[%s20398_s13 + $0x60] sm:$0xff]   ;;  %v17132_v6 = vadd.s32 24, %v16058_v53 }
 0x527   :  { %13925 = vmatpush3.bf16.msra.mxu0 %v15431_v49 }
 0x528   :  { %v3598_v10 = vadd.f32 %v3597_v7, %v3596_v4  ;;  %v3628_v11 = vrot.slane %v3627_v9, 1  ;;  %13934 = vmatprep.subr.bf16.mxu0 %v17119_v3  ;;  %v17129_v4 = vadd.s32 16, %v16058_v53  ;;  %20475 = vst [vmem:[#allocation3_spill] sm:$0xff] %v17132_v6 }
 0x52a   :  { %v3600_v13 = vmul.f32 0.015625, %v3598_v10  ;;  %v3629_v14 = vadd.f32 %v3628_v11, %v3627_v9  ;;  %v3815_v7 = vand.u32 7, %v17129_v4  ;;  %v3822_v9 = vand.u32 7, %v17132_v6 }
 0x52b   :  { %v3801_v10 = vand.u32 7, %v16058_v53  ;;  %v3808_v11 = vand.u32 7, %v16663_v28 }
 0x52c   :  { %v3630_v15 = vmul.f32 0.015625, %v3629_v14  ;;  %v3631_v16 = vmul.f32 %v3600_v13, %v3600_v13  ;;  %v3642_v17 = vsub.f32 %v3576_v54, %v3600_v13  ;;  %v3635_v18 = vsub.f32 %v17023_v59, %v3600_v13 }
 0x52d   :  { %v3636_v19 = vsub.f32 %v17028_v62, %v3600_v13  ;;  %v3637_v20 = vsub.f32 %v17043_v34, %v3600_v13  ;;  %v3638_v22 = vsub.f32 %v17050_v21, %v3600_v13  ;;  %v3639_v23 = vsub.f32 %v17059_v8, %v3600_v13  ;;  %v12177_v21 = vld [vmem:[%s20397_s11] ss:$0 sm:$0xff] }
 0x52e   :  { %v3632_v25 = vsub.f32 %v3630_v15, %v3631_v16  ;;  %v3640_v26 = vsub.f32 %v17066_v12, %v3600_v13  ;;  %v3641_v27 = vsub.f32 %v3575_v50, %v3600_v13  ;;  %v3649_v59 = vmul.f32 %v12176_v32, %v3635_v18 }
 0x52f   :  { %v3650_v33 = vmul.f32 %v12176_v32, %v3636_v19  ;;  %v3651_v62 = vmul.f32 %v12176_v32, %v3637_v20  ;;  %v3652_v35 = vmul.f32 %v12176_v32, %v3638_v22  ;;  %v3653_v8 = vmul.f32 %v12176_v32, %v3639_v23 }
 0x530   :  { %v3633_v29 = vmax.f32 %v3632_v25, 0.0  ;;  %v3654_v36 = vmul.f32 %v12176_v32, %v3640_v26  ;;  %v3655_v12 = vmul.f32 %v12176_v32, %v3641_v27  ;;  %v3656_v38 = vmul.f32 %v12176_v32, %v3642_v17 }
 0x531   :  { %v17139_v13 = vadd.s32 32, %v16058_v53  ;;  %v17142_v14 = vadd.s32 40, %v16058_v53  ;;  %vm17144_vm4 = vcmp.ge.s32.totalorder %v3815_v7, 1  ;;  %vm17148_vm8 = vcmp.ge.s32.totalorder %v3822_v9, 1 }
 0x532   :  { %v3657_v5 = vadd.f32 1e-05, %v3633_v29  ;;  %vm17152_vm9 = vcmp.lt.s32.totalorder %v3815_v7, 7  ;;  %v17157_v19 = vadd.s32 48, %v16058_v53  ;;  %v17160_v20 = vadd.s32 56, %v16058_v53 }
 0x533   :  { %20476 = vst [vmem:[#allocation4_spill] sm:$0xff] %v17139_v13  ;;  %20477 = vst [vmem:[#allocation5_spill] sm:$0xff] %v17142_v14  ;;  %vm17164_vm10 = vcmp.lt.s32.totalorder %v3822_v9, 7  ;;  %vm17168_vm11 = vcmp.ge.s32.totalorder %v3801_v10, 1  ;;  %v20488_v25 = vmov 0  ;;  %vm17172_vm12 = vcmp.ge.s32.totalorder %v3808_v11, 1 }
 0x534   :  { %15528 = vrsqrt.f32 %v3657_v5  ;;  %20484 = vst [vmem:[#allocation6_spill] sm:$0xff] %v17157_v19  ;;  %20485 = vst [vmem:[#allocation7_spill] sm:$0xff] %v17160_v20  ;;  %v20489_v25 = vsel %vm17168_vm11, 4294967295, %v20488_v25  ;;  %v20490_v26 = vmov 0  ;;  %v3829_v27 = vand.u32 7, %v17139_v13 }
 0x535   :  { %v20491_v26 = vsel %vm17172_vm12, 4294967295, %v20490_v26  ;;  %vm17243_vm15 = vcmp.lt.s32.totalorder %v3801_v10, 7 }
 0x536   :  { %vm17247_vm1 = vcmp.ge.s32.totalorder %v3829_v27, 1 }
 0x53e   :  { %v15529_v34 = vpop.eup %15528 }
 0x53f   :  { %v3659_v39 = vmul.f32 %v15529_v34, %v3649_v59  ;;  %v3660_v40 = vmul.f32 %v15529_v34, %v3650_v33  ;;  %v3661_v41 = vmul.f32 %v15529_v34, %v3651_v62  ;;  %v3662_v42 = vmul.f32 %v15529_v34, %v3652_v35 }
 0x540   :  { %v3663_v44 = vmul.f32 %v15529_v34, %v3653_v8  ;;  %v3664_v31 = vmul.f32 %v15529_v34, %v3654_v36  ;;  %v3665_v45 = vmul.f32 %v15529_v34, %v3655_v12  ;;  %v3666_v46 = vmul.f32 %v15529_v34, %v3656_v38 }
 0x541   :  { %v3674_v47 = vadd.f32 %v12177_v21, %v3659_v39  ;;  %v3675_v30 = vadd.f32 %v12177_v21, %v3660_v40  ;;  %v3676_v48 = vadd.f32 %v12177_v21, %v3661_v41  ;;  %v3677_v50 = vadd.f32 %v12177_v21, %v3662_v42 }
 0x542   :  { %v3678_v24 = vadd.f32 %v12177_v21, %v3663_v44  ;;  %v3679_v51 = vadd.f32 %v12177_v21, %v3664_v31  ;;  %v3680_v52 = vadd.f32 %v12177_v21, %v3665_v45  ;;  %v3681_v54 = vadd.f32 %v12177_v21, %v3666_v46 }
 0x543   :  { %v3690_v55 = vpack.c.bf16 %v3675_v30, %v3674_v47  ;;  %v3691_v56 = vpack.c.bf16 %v3677_v50, %v3676_v48  ;;  %v3836_v33 = vand.u32 7, %v17142_v14  ;;  %v3843_v38 = vand.u32 7, %v17157_v19 }
 0x544   :  { %v3692_v57 = vpack.c.bf16 %v3679_v51, %v3678_v24  ;;  %v3693_v58 = vpack.c.bf16 %v3681_v54, %v3680_v52  ;;  %v3850_v39 = vand.u32 7, %v17160_v20 }
 0x545   :  { %13906 = vmatprep.subr.bf16.mxu1 %v3690_v55  ;;  %vm17251_vm5 = vcmp.ge.s32.totalorder %v3843_v38, 1  ;;  %vm17269_vm7 = vcmp.ge.s32.totalorder %v3836_v33, 1  ;;  %vm17273_vm14 = vcmp.lt.s32.totalorder %v3836_v33, 7  ;;  %vm17277_vm2 = vcmp.lt.s32.totalorder %v3843_v38, 7 }
 0x546   :  { %13907 = vmatpush3.bf16.msra.mxu1 %v3690_v55  ;;  %vm17255_vm6 = vcmp.ge.s32.totalorder %v3850_v39, 1 }
 0x547   :  { %13908 = vmatprep.subr.bf16.mxu1 %v3691_v56 }
 0x54a   :  { %13909 = vmatpush3.bf16.msra.mxu1 %v3691_v56 }
 0x54b   :  { %13910 = vmatprep.subr.bf16.mxu1 %v3692_v57 }
 0x54e   :  { %13911 = vmatpush3.bf16.msra.mxu1 %v3692_v57 }
 0x54f   :  { %13912 = vmatprep.subr.bf16.mxu1 %v3693_v58 }
 0x552   :  { %13913 = vmatpush3.bf16.msra.mxu1 %v3693_v58 }
 0x553   :  { %13970 = vmatprep.subr.bf16.mxu1 %v15432_v1 }
 0x555   :  { %13915 = vmatmul.mubr.msk.bf16.vlgmr.msra.gmra.mrb[44].mxu1 %vm2126_vm13, %v15427_v60 }
 0x556   :  { %13918 = vmatprep.mubr.msk.bf16.mxu1 %vm2126_vm13, %v15428_v61  ;;  %13971 = vmatpush3.bf16.msra.mxu1 %v15432_v1  ;;  %v15439_v61 = vld [vmem:[%s20398_s13 + $0xd8] sm:$0xff]  }
 0x557   :  { %13972 = vmatprep.subr.bf16.mxu1 %v15433_v2 }
 0x55a   :  { %13973 = vmatpush3.bf16.msra.mxu1 %v15433_v2 }
 0x55b   :  { %13982 = vmatprep.subr.bf16.mxu1 %v17125_v43 }
 0x55d   :  { %13919 = vmatmul.mubr.msk.bf16.gmra.mrb[48].mxu1 %vm2126_vm13, %v15429_v63  ;;  %vm17201_vm13 = vcmp.lt.s32.totalorder %v3808_v11, 7  ;;  %v15441_v63 = vld [vmem:[%s20398_s13 + $0xe8] sm:$0xff]  }
 0x628   :  { %v13916_v16 = vpop.f32.mrb[44].mxu1 }
 0x629   :  { %v17162_v22 = vpop.f32.mrb[45].mxu1  ;;  %v3903_v29 = vrot.slane %v13916_v16, 7  ;;  %v3964_v62 = vrot.slane %v13916_v16, 1 }
 0x62a   :  { %v3900_v5 = vrot.slane %v17162_v22, 7  ;;  %v20415_v32 = vrot.slane %v17162_v22, 1  ;;  %v13917_v59 = vpop.f32.mrb[46].mxu1 }
 0x62b   :  { %v3905_v35 = vrot.slane %v13917_v59, 7  ;;  %v3966_v34 = vrot.slane %v13917_v59, 1  ;;  %v17180_v21 = vpack.c.bf16 %v13917_v59, %v13916_v16  ;;  %v17182_v8 = vpop.f32.mrb[47].mxu1 }
 0x62c   :  { %v3901_v36 = vrot.slane %v17182_v8, 7  ;;  %v17186_v12 = vpack.c.bf16 %v13916_v16, %v17182_v8  ;;  %v3962_v42 = vrot.slane %v17182_v8, 1  ;;  %v17199_v44 = vpack.c.bf16 %v17182_v8, %v17162_v22 }
 0x62d   :  { %v17191_v40 = vsel %vm20417_vm3, %v3903_v29, %v3905_v35  ;;  %v17194_v41 = vsel %vm20410_vm0, %v3964_v62, %v3966_v34  ;;  %v17206_v45 = vsel %vm20417_vm3, 0.0, %v3900_v5  ;;  %v17211_v46 = vsel %vm20410_vm0, 0.0, %v20415_v32 }
 0x62e   :  { %v4012_v47 = vsel %vm17164_vm10, %v17194_v41, 0.0  ;;  %v4058_v30 = vsel %vm17144_vm4, %v17191_v40, 0.0  ;;  %v4027_v48 = vsel %vm17148_vm8, %v17191_v40, 0.0  ;;  %v17223_v50 = vsel %vm20417_vm3, %v3900_v5, %v3901_v36 }
 0x62f   :  { %v17226_v24 = vsel %vm20417_vm3, %v3901_v36, %v3903_v29  ;;  %v17229_v51 = vsel %vm20410_vm0, %v3962_v42, %v3964_v62  ;;  %v4044_v52 = vsel %vm17152_vm9, %v17194_v41, 0.0  ;;  %v3946_v54 = vsel %vm17144_vm4, %v17223_v50, 0.0 }
 0x630   :  { %v3947_v55 = vsel %vm17148_vm8, %v17226_v24, 0.0  ;;  %v4011_v56 = vsel %vm17152_vm9, %v17229_v51, 0.0  ;;  %v13920_v57 = vpop.f32.mrb[48].mxu1  ;;  %v4026_v1 = vsel %vm17144_vm4, %v17226_v24, 0.0  ;;  %v4024_v7 = vsel %vm17168_vm11, %v17206_v45, 0.0 }
 0x631   :  { %v17259_v0 = vpack.c.bf16 %v3947_v55, %v3946_v54  ;;  %v17261_v49 = vpack.c.bf16 %v4012_v47, %v4011_v56  ;;  %v3776_v2 = vpop.f32.mrb[49].mxu1  ;;  %v4025_v62 = vsel %vm17172_vm12, %v17223_v50, 0.0  ;;  %vm17288_vm4 = vcmp.lt.s32.totalorder %v3850_v39, 7 }
 0x632   :  { %v3907_v16 = vrot.slane %v3776_v2, 7  ;;  %v17281_v15 = vpack.c.bf16 %v3776_v2, %v13917_v59  ;;  %v3968_v29 = vrot.slane %v3776_v2, 1  ;;  %v17283_v5 = vpop.f32.mrb[50].mxu1  ;;  %v20508_v8 = vmov 0 }
 0x633   :  { %v20509_v8 = vsel %vm17288_vm4, 4294967295, %v20508_v8  ;;  %v3911_v33 = vrot.slane %v13920_v57, 7  ;;  %v3972_v36 = vrot.slane %v13920_v57, 1  ;;  %v3974_v38 = vrot.slane %v17283_v5, 1  ;;  %v3779_v59 = vpop.f32.mrb[51].mxu1 }
 0x634   :  { %v17294_v47 = vpack.c.bf16 %v17283_v5, %v13920_v57  ;;  %vm17296_vm0 = vcmp.lt.s32.totalorder %v3829_v27, 7  ;;  %v17301_v55 = vsel %vm20417_vm3, %v3905_v35, %v3907_v16  ;;  %vm20512_vm12 = vcmask 1046528  }
 0x635   :  { %v17304_v39 = vsel %vm20512_vm12, %v3966_v34, %v3968_v29  ;;  %v17306_v56 = vpack.c.bf16 %v4025_v62, %v4024_v7  ;;  %v3909_v37 = vrot.slane %v3779_v59, 7  ;;  %v4059_v27 = vsel %vm17148_vm8, %v17301_v55, 0.0  ;;  %vm20513_vm3 = vmmov %vm20512_vm12 }
 0x636   :  { %v4045_v32 = vsel %vm17164_vm10, %v17304_v39, 0.0  ;;  %v4071_v20 = vsel %vm17152_vm9, %v17304_v39, 0.0  ;;  %v17318_v35 = vsel %vm20513_vm3, %v3972_v36, %v3974_v38  ;;  %v17322_v7 = vpack.c.bf16 %v4059_v27, %v4058_v30  ;;  %vm20514_vm12 = vmmov %vm20513_vm3 }
 0x637   :  { %v17320_v34 = vpack.c.bf16 %v4045_v32, %v4044_v52  ;;  %v4021_v62 = vrot.slane %v17283_v5, 7  ;;  %v17326_v14 = vsel %vm20514_vm12, %v3974_v38, 0.0  ;;  %vm20515_vm11 = vcmask 261120   ;;  %vm20519_vm9 = vmmov %vm20513_vm3 }
 0x638   :  { %13926 = vmatprep.mubr.msk.bf16.mxu0 %vm20515_vm11, %v17306_v56  ;;  %vm20516_vm8 = vcmask 1040384   ;;  %v17336_v19 = vpack.c.bf16 %v13920_v57, %v3779_v59  ;;  %v3970_v32 = vrot.slane %v3779_v59, 1  ;;  %v17338_v52 = vpack.c.bf16 %v3779_v59, %v3776_v2  ;;  %vm20520_vm11 = vmmov %vm20513_vm3 }
 0x639   :  { %v17331_v17 = vsel %vm20516_vm8, %v3907_v16, %v3909_v37  ;;  %vm20517_vm4 = vmmov %vm20516_vm8  ;;  %v17340_v30 = vpack.c.bf16 %v4027_v48, %v4026_v1  ;;  %v20518_v27 = vrot.slane %v17162_v22, 1  ;;  %v4043_v13 = vsel %vm17201_vm13, %v17229_v51, 0.0 }
 0x63a   :  { %v17334_v18 = vsel %vm20517_vm4, %v3909_v37, %v3911_v33  ;;  %v15435_v37 = vld [vmem:[%s20398_s13 + $0x58] sm:$0xff]   ;;  %v3971_v57 = vsel %vm20519_vm9, %v3968_v29, %v3970_v32  ;;  %v17353_v16 = vsel %vm20520_vm11, %v3970_v32, %v3972_v36  ;;  %vm20521_vm4 = vcmask 261120   ;;  %vm20522_vm12 = vmmov %vm20516_vm8 }
 0x63b   :  { %v3963_v38 = vsel %vm20513_vm3, %v20518_v27, %v3962_v42  ;;  %v4028_v42 = vsel %vm17247_vm1, %v17301_v55, 0.0  ;;  %v4072_v1 = vsel %vm17164_vm10, %v3971_v57, 0.0  ;;  %13927 = vmatmul.mubr.msk.bf16.vlgmr.msra.gmra.mrb[48].mxu0 %vm20521_vm4, %v17340_v30  ;;  %v4029_v29 = vsel %vm17269_vm7, %v17331_v17, 0.0  ;;  %vm20523_vm10 = vmmov %vm20521_vm4 }
 0x63c   :  { %v4042_v48 = vsel %vm17243_vm15, %v3963_v38, 0.0  ;;  %v17370_v36 = vsel %vm20522_vm12, %v3911_v33, %v4021_v62  ;;  %v17372_v59 = vpack.c.bf16 %v4072_v1, %v4071_v20  ;;  %13935 = vmatpush3.bf16.msra.mxu0 %v17119_v3  ;;  %v17375_v32 = vpack.c.bf16 %v4029_v29, %v4028_v42  ;;  %v15438_v42 = vld [vmem:[%s20398_s13 + $0xd0] sm:$0xff]   ;;  %vm20524_vm3 = vmmov %vm20521_vm4 }
 0x63d   :  { %v17364_v2 = vpack.c.bf16 %v4043_v13, %v4042_v48  ;;  %v4030_v23 = vsel %vm17251_vm5, %v17334_v18, 0.0  ;;  %v4031_v13 = vsel %vm17255_vm6, %v17370_v36, 0.0  ;;  %v4046_v20 = vsel %vm17296_vm0, %v3971_v57, 0.0  ;;  %13936 = vmatprep.subr.bf16.mxu0 %v15435_v37  ;;  %v15437_v48 = vld [vmem:[%s20398_s13 + $0x68] sm:$0xff]   ;;  %vm20525_vm9 = vmmov %vm20524_vm3 }
 0x63e   :  { %v17385_v27 = vpack.c.bf16 %v4031_v13, %v4030_v23  ;;  %v4047_v3 = vsel %vm17273_vm14, %v17353_v16, 0.0  ;;  %v4048_v33 = vsel %vm17277_vm2, %v17318_v35, 0.0  ;;  %v4055_v1 = vsel %vm20516_vm8, %v4021_v62, 0.0  ;;  %13930 = vmatprep.mubr.msk.bf16.mxu0 %vm20525_vm9, %v17375_v32  ;;  %vm20527_vm4 = vmmov %vm20524_vm3 }
 0x63f   :  { %13974 = vmatprep.mubr.msk.bf16.mxu1 %vm20523_vm10, %v17364_v2  ;;  %v17406_v29 = vpack.c.bf16 %v4047_v3, %v4046_v20  ;;  %vm20526_vm11 = vnez %v20509_v8  ;;  %v4009_v62 = vsel %vm17243_vm15, %v17211_v46, 0.0  ;;  %v4010_v6 = vsel %vm17201_vm13, %v3963_v38, 0.0  ;;  %v15440_v3 = vld [vmem:[%s20398_s13 + $0xe0] sm:$0xff]   ;;  %vm20529_vm10 = vmmov %vm20524_vm3 }
 0x640   :  { %13975 = vmatmul.mubr.msk.bf16.vlgmr.msra.gmra.mrb[52].mxu1 %vm20524_vm3, %v17320_v34  ;;  %v4049_v23 = vsel %vm20526_vm11, %v17326_v14, 0.0  ;;  %v3948_v20 = vsel %vm17247_vm1, %v17191_v40, 0.0  ;;  %13937 = vmatpush3.bf16.msra.mxu0 %v15435_v37  ;;  %v3949_v46 = vsel %vm17269_vm7, %v17301_v55, 0.0  ;;  %v4013_v38 = vsel %vm17296_vm0, %v17304_v39, 0.0 }
 0x641   :  { %v17411_v13 = vpack.c.bf16 %v4049_v23, %v4048_v33  ;;  %13983 = vmatpush3.bf16.msra.mxu1 %v17125_v43  ;;  %13978 = vmatprep.mubr.msk.bf16.mxu1 %vm20527_vm4, %v17406_v29  ;;  %v17427_v43 = vpack.c.bf16 %v4010_v6, %v4009_v62  ;;  %v4014_v40 = vsel %vm17273_vm14, %v3971_v57, 0.0  ;;  %v17437_v37 = vpack.c.bf16 %v3949_v46, %v3948_v20 }
 0x642   :  { %13984 = vmatprep.subr.bf16.mxu1 %v15437_v48  ;;  %13946 = vmatprep.subr.bf16.mxu0 %v15438_v42  ;;  %v17439_v33 = vpack.c.bf16 %v4014_v40, %v4013_v38  ;;  %v3950_v6 = vsel %vm17251_vm5, %v17331_v17, 0.0  ;;  %v3951_v55 = vsel %vm17255_vm6, %v17334_v18, 0.0  ;;  %v4015_v39 = vsel %vm17277_vm2, %v17353_v16, 0.0 }
 0x643   :  { %v17447_v23 = vpack.c.bf16 %v3951_v55, %v3950_v6  ;;  %v4016_v57 = vsel %vm20526_vm11, %v17318_v35, 0.0  ;;  %vm20528_vm12 = vnez %v20489_v25  ;;  %13931 = vmatmul.mubr.msk.bf16.gmra.mrb[52].mxu0 %vm20529_vm10, %v17385_v27  ;;  %vm20530_vm8 = vnez %v20491_v26  ;;  %v15447_v26 = vld [vmem:[%s20398_s13 + $0xb8] sm:$0xff]  }
 0x644   :  { %v4056_v62 = vsel %vm20528_vm12, %v17223_v50, 0.0  ;;  %v17460_v20 = vpack.c.bf16 %v4016_v57, %v4015_v39  ;;  %v4057_v46 = vsel %vm20530_vm8, %v17226_v24, 0.0  ;;  %v4069_v38 = vsel %vm17243_vm15, %v17229_v51, 0.0  ;;  %13938 = vmatprep.mubr.msk.bf16.mxu0 %vm20524_vm3, %v17199_v44 }
 0x645   :  { %13985 = vmatpush3.bf16.msra.mxu1 %v15437_v48  ;;  %v4070_v8 = vsel %vm17201_vm13, %v17194_v41, 0.0  ;;  %v17473_v25 = vpack.c.bf16 %v4057_v46, %v4056_v62  ;;  %v4060_v24 = vsel %vm17247_vm1, %v17331_v17, 0.0  ;;  %v4061_v51 = vsel %vm17269_vm7, %v17334_v18, 0.0  ;;  %vm20531_vm13 = vmmov %vm20524_vm3  ;;  %v15444_v17 = vld [vmem:[%s20398_s13 + $0xc0] sm:$0xff]  }
 0x646   :  { %13994 = vmatprep.subr.bf16.mxu1 %v15440_v3  ;;  %v17475_v50 = vpack.c.bf16 %v4070_v8, %v4069_v38  ;;  %v17483_v58 = vpack.c.bf16 %v4061_v51, %v4060_v24  ;;  %v4073_v41 = vsel %vm17296_vm0, %v17353_v16, 0.0  ;;  %v4074_v31 = vsel %vm17273_vm14, %v17318_v35, 0.0  ;;  %vm20532_vm0 = vmmov %vm20524_vm3  ;;  %v15442_v35 = vld [vmem:[%s20398_s13 + $0xf0] sm:$0xff]  }
 0x647   :  { %v4062_v48 = vsel %vm17251_vm5, %v17370_v36, 0.0  ;;  %v17496_v60 = vpack.c.bf16 %v4074_v31, %v4073_v41  ;;  %v4063_v9 = vsel %vm17255_vm6, %v4055_v1, 0.0  ;;  %v4075_v54 = vsel %vm17277_vm2, %v17326_v14, 0.0  ;;  %vm20533_vm14 = vmmov %vm20532_vm0  ;;  %v15443_v36 = vld [vmem:[%s20398_s13 + $0xf8] sm:$0xff]  }
 0x648   :  { %13979 = vmatmul.mubr.msk.bf16.gmra.mrb[56].mxu1 %vm20531_vm13, %v17411_v13  ;;  %v17505_v10 = vpack.c.bf16 %v4063_v9, %v4062_v48  ;;  %vm20534_vm15 = vmmov %vm20532_vm0  ;;  %v20537_v18 = vmov 0.0   ;;  %v3945_v1 = vsel %vm20530_vm8, %v17206_v45, 0.0  ;;  %v15449_v45 = vld [vmem:[%s20398_s13 + $0x88] sm:$0xff]   ;;  %vm20585_vm2 = vcmask 130048  }
 0x649   :  { %13986 = vmatprep.mubr.msk.bf16.mxu1 %vm20532_vm0, %v17199_v44  ;;  %vm20535_vm1 = vmmov %vm20532_vm0  ;;  %v3956_v16 = vpack.c.bf16 %v17162_v22, %v20537_v18  ;;  %v15445_v22 = vld [vmem:[%s20398_s13 + $0xc8] sm:$0xff]   ;;  %v3952_v40 = vpack.c.bf16 %v3945_v1, %v20537_v18 }
 0x64a   :  { %vm20536_vm5 = vmmov %vm20532_vm0 }
 0x64b   :  { %13939 = vmatmul.mubr.msk.bf16.vlgmr.msra.gmra.mrb[48].mxu0 %vm20533_vm14, %v17180_v21  ;;  %vm20538_vm6 = vmmov %vm20532_vm0 }
 0x64c   :  { %13942 = vmatprep.mubr.msk.bf16.mxu0 %vm20534_vm15, %v17338_v52  ;;  %13947 = vmatpush3.bf16.msra.mxu0 %v15438_v42  ;;  %vm20539_vm7 = vmmov %vm20532_vm0  ;;  %v15446_v42 = vld [vmem:[%s20398_s13 + $0xb0] sm:$0xff]  }
 0x64d   :  { %13948 = vmatprep.subr.bf16.mxu0 %v15439_v61  ;;  %vm20540_vm9 = vmmov %vm20532_vm0 }
 0x64e   :  { %vm20541_vm11 = vmmov %vm20532_vm0 }
 0x64f   :  { %vm20542_vm4 = vmmov %vm20532_vm0 }
 0x650   :  { %13987 = vmatmul.mubr.msk.bf16.vlgmr.msra.gmra.mrb[52].mxu1 %vm20535_vm1, %v17180_v21  ;;  %13949 = vmatpush3.bf16.msra.mxu0 %v15439_v61  ;;  %vm20543_vm12 = vmmov %vm20532_vm0 }
 0x651   :  { %13990 = vmatprep.mubr.msk.bf16.mxu1 %vm20536_vm5, %v17338_v52  ;;  %13995 = vmatpush3.bf16.msra.mxu1 %v15440_v3  ;;  %vm20544_vm10 = vmmov %vm20532_vm0  ;;  %v15448_v3 = vld [vmem:[%s20398_s13 + $0x80] sm:$0xff]  }
 0x652   :  { %13996 = vmatprep.subr.bf16.mxu1 %v15441_v63  ;;  %13958 = vmatprep.subr.bf16.mxu0 %v15442_v35  ;;  %vm20545_vm3 = vmmov %vm20532_vm0 }
 0x653   :  { %13943 = vmatmul.mubr.msk.bf16.gmra.mrb[52].mxu0 %vm20538_vm6, %v17294_v47  ;;  %vm20546_vm13 = vmmov %vm20532_vm0 }
 0x654   :  { %13950 = vmatprep.mubr.msk.bf16.mxu0 %vm20539_vm7, %v3956_v16  ;;  %vm20547_vm14 = vmmov %vm20532_vm0 }
 0x655   :  { %13997 = vmatpush3.bf16.msra.mxu1 %v15441_v63  ;;  %vm20548_vm8 = vmmov %vm20532_vm0 }
 0x656   :  { %14006 = vmatprep.subr.bf16.mxu1 %v15444_v17  ;;  %vm20549_vm15 = vmmov %vm20532_vm0 }
 0x657   :  { %vm20550_vm1 = vmmov %vm20532_vm0 }
 0x658   :  { %13991 = vmatmul.mubr.msk.bf16.gmra.mrb[56].mxu1 %vm20540_vm9, %v17294_v47  ;;  %vm20551_vm5 = vmmov %vm20532_vm0 }
 0x659   :  { %13998 = vmatprep.mubr.msk.bf16.mxu1 %vm20541_vm11, %v3956_v16  ;;  %vm20552_vm6 = vmmov %vm20532_vm0 }
 0x65a   :  { %vm20553_vm7 = vmmov %vm20532_vm0 }
 0x65b   :  { %13951 = vmatmul.mubr.msk.bf16.vlgmr.msra.gmra.mrb[48].mxu0 %vm20542_vm4, %v17186_v12  ;;  %vm20554_vm9 = vmmov %vm20532_vm0 }
 0x65c   :  { %13954 = vmatprep.mubr.msk.bf16.mxu0 %vm20543_vm12, %v17281_v15  ;;  %13959 = vmatpush3.bf16.msra.mxu0 %v15442_v35  ;;  %vm20555_vm11 = vmmov %vm20532_vm0 }
 0x65d   :  { %13960 = vmatprep.subr.bf16.mxu0 %v15443_v36  ;;  %vm20556_vm4 = vmmov %vm20532_vm0 }
 0x65e   :  { %vm20557_vm12 = vmmov %vm20532_vm0 }
 0x660   :  { %13999 = vmatmul.mubr.msk.bf16.vlgmr.msra.gmra.mrb[52].mxu1 %vm20544_vm10, %v17186_v12  ;;  %13961 = vmatpush3.bf16.msra.mxu0 %v15443_v36  ;;  %vm20558_vm10 = vmmov %vm20532_vm0 }
 0x661   :  { %14002 = vmatprep.mubr.msk.bf16.mxu1 %vm20545_vm3, %v17281_v15  ;;  %14007 = vmatpush3.bf16.msra.mxu1 %v15444_v17  ;;  %vm20559_vm3 = vmmov %vm20532_vm0 }
 0x662   :  { %14008 = vmatprep.subr.bf16.mxu1 %v15445_v22  ;;  %14018 = vmatprep.subr.bf16.mxu0 %v15446_v42 }
 0x663   :  { %13955 = vmatmul.mubr.msk.bf16.gmra.mrb[52].mxu0 %vm20546_vm13, %v17336_v19  ;;  %vm20560_vm13 = vmmov %vm20532_vm0 }
 0x664   :  { %13962 = vmatprep.mubr.msk.bf16.mxu0 %vm20532_vm0, %v3952_v40 }
 0x665   :  { %14009 = vmatpush3.bf16.msra.mxu1 %v15445_v22 }
 0x666   :  { %14066 = vmatprep.subr.bf16.mxu1 %v15448_v3 }
 0x668   :  { %14003 = vmatmul.mubr.msk.bf16.gmra.mrb[56].mxu1 %vm20547_vm14, %v17336_v19  ;;  %vm20561_vm14 = vmmov %vm20532_vm0 }
 0x669   :  { %14010 = vmatprep.mubr.msk.bf16.mxu1 %vm20548_vm8, %v17427_v43  ;;  %v15450_v43 = vld [vmem:[%s20398_s13 + $0x90] sm:$0xff]   ;;  %vm20562_vm8 = vmmov %vm20532_vm0 }
 0x66b   :  { %13963 = vmatmul.mubr.msk.bf16.vlgmr.msra.gmra.mrb[48].mxu0 %vm20549_vm15, %v17259_v0  ;;  %v15452_v0 = vld [vmem:[%s20398_s13 + $0xa0] sm:$0xff]   ;;  %vm20563_vm15 = vmmov %vm20532_vm0 }
 0x66c   :  { %13966 = vmatprep.mubr.msk.bf16.mxu0 %vm20550_vm1, %v17437_v37  ;;  %14019 = vmatpush3.bf16.msra.mxu0 %v15446_v42  ;;  %vm20564_vm1 = vmmov %vm20532_vm0 }
 0x66d   :  { %14020 = vmatprep.subr.bf16.mxu0 %v15447_v26 }
 0x670   :  { %14011 = vmatmul.mubr.msk.bf16.vlgmr.msra.gmra.mrb[52].mxu1 %vm20551_vm5, %v17261_v49  ;;  %14021 = vmatpush3.bf16.msra.mxu0 %v15447_v26  ;;  %v15451_v49 = vld [vmem:[%s20398_s13 + $0x98] sm:$0xff]   ;;  %vm20565_vm5 = vmmov %vm20532_vm0 }
 0x671   :  { %14014 = vmatprep.mubr.msk.bf16.mxu1 %vm20552_vm6, %v17439_v33  ;;  %14067 = vmatpush3.bf16.msra.mxu1 %v15448_v3  ;;  %vm20566_vm6 = vmmov %vm20532_vm0 }
 0x672   :  { %14068 = vmatprep.subr.bf16.mxu1 %v15449_v45  ;;  %14030 = vmatprep.subr.bf16.mxu0 %v15450_v43 }
 0x673   :  { %13967 = vmatmul.mubr.msk.bf16.gmra.mrb[52].mxu0 %vm20553_vm7, %v17447_v23  ;;  %vm20567_vm7 = vmmov %vm20532_vm0 }
 0x674   :  { %14022 = vmatprep.mubr.msk.bf16.mxu0 %vm20554_vm9, %v17306_v56  ;;  %v15453_v56 = vld [vmem:[%s20398_s13 + $0xa8] sm:$0xff]   ;;  %vm20568_vm9 = vmmov %vm20532_vm0 }
 0x675   :  { %14069 = vmatpush3.bf16.msra.mxu1 %v15449_v45 }
 0x676   :  { %14078 = vmatprep.subr.bf16.mxu1 %v15452_v0 }
 0x678   :  { %14015 = vmatmul.mubr.msk.bf16.gmra.mrb[56].mxu1 %vm20555_vm11, %v17460_v20  ;;  %vm20569_vm11 = vmmov %vm20532_vm0 }
 0x679   :  { %14070 = vmatprep.mubr.msk.bf16.mxu1 %vm20556_vm4, %v17364_v2  ;;  %v15454_v2 = vld [vmem:[%s20398_s13 + $0x10] sm:$0xff]   ;;  %vm20570_vm4 = vmmov %vm20532_vm0 }
 0x67b   :  { %14023 = vmatmul.mubr.msk.bf16.vlgmr.msra.gmra.mrb[56].mxu0 %vm20557_vm12, %v17340_v30  ;;  %v15456_v30 = vld [vmem:[%s20398_s13 + $0x20] sm:$0xff]   ;;  %vm20571_vm12 = vmmov %vm20532_vm0 }
 0x67c   :  { %14026 = vmatprep.mubr.msk.bf16.mxu0 %vm20558_vm10, %v17375_v32  ;;  %14031 = vmatpush3.bf16.msra.mxu0 %v15450_v43  ;;  %v15457_v32 = vld [vmem:[%s20398_s13 + $0x28] sm:$0xff]   ;;  %vm20572_vm10 = vmmov %vm20532_vm0 }
 0x67d   :  { %14032 = vmatprep.subr.bf16.mxu0 %v15451_v49 }
 0x680   :  { %14071 = vmatmul.mubr.msk.bf16.vlgmr.msra.gmra.mrb[60].mxu1 %vm20559_vm3, %v17320_v34  ;;  %14033 = vmatpush3.bf16.msra.mxu0 %v15451_v49  ;;  %v15455_v34 = vld [vmem:[%s20398_s13 + $0x18] sm:$0xff]   ;;  %vm20573_vm3 = vmmov %vm20532_vm0 }
 0x681   :  { %14074 = vmatprep.mubr.msk.bf16.mxu1 %vm20560_vm13, %v17406_v29  ;;  %14079 = vmatpush3.bf16.msra.mxu1 %v15452_v0  ;;  %vm20574_vm13 = vmmov %vm20532_vm0 }
 0x682   :  { %14080 = vmatprep.subr.bf16.mxu1 %v15453_v56  ;;  %14042 = vmatprep.subr.bf16.mxu0 %v15454_v2 }
 0x683   :  { %14027 = vmatmul.mubr.msk.bf16.gmra.mrb[60].mxu0 %vm20532_vm0, %v17385_v27  ;;  %v15460_v27 = vld [vmem:[%s20398_s13] sm:$0xff]  }
 0x684   :  { %14034 = vmatprep.mubr.msk.bf16.mxu0 %vm20561_vm14, %v17199_v44  ;;  %vm20575_vm14 = vmmov %vm20532_vm0 }
 0x685   :  { %14081 = vmatpush3.bf16.msra.mxu1 %v15453_v56 }
 0x686   :  { %14090 = vmatprep.subr.bf16.mxu1 %v15456_v30 }
 0x688   :  { %14075 = vmatmul.mubr.msk.bf16.gmra.mrb[64].mxu1 %vm20562_vm8, %v17411_v13  ;;  %vm20576_vm8 = vmmov %vm20532_vm0 }
 0x689   :  { %14082 = vmatprep.mubr.msk.bf16.mxu1 %vm20563_vm15, %v17199_v44  ;;  %v15458_v44 = vld [vmem:[%s20398_s13 + $0x30] sm:$0xff]   ;;  %vm20577_vm15 = vmmov %vm20532_vm0 }
 0x68b   :  { %14035 = vmatmul.mubr.msk.bf16.vlgmr.msra.gmra.mrb[56].mxu0 %vm20564_vm1, %v17180_v21  ;;  %vm20578_vm1 = vmmov %vm20532_vm0 }
 0x68c   :  { %14038 = vmatprep.mubr.msk.bf16.mxu0 %vm20565_vm5, %v17338_v52  ;;  %14043 = vmatpush3.bf16.msra.mxu0 %v15454_v2  ;;  %vm20579_vm5 = vmmov %vm20532_vm0 }
 0x68d   :  { %14044 = vmatprep.subr.bf16.mxu0 %v15455_v34 }
 0x690   :  { %14083 = vmatmul.mubr.msk.bf16.vlgmr.msra.gmra.mrb[60].mxu1 %vm20566_vm6, %v17180_v21  ;;  %14045 = vmatpush3.bf16.msra.mxu0 %v15455_v34  ;;  %v15459_v21 = vld [vmem:[%s20398_s13 + $0x38] sm:$0xff]   ;;  %vm20580_vm6 = vmmov %vm20532_vm0 }
 0x691   :  { %14086 = vmatprep.mubr.msk.bf16.mxu1 %vm20567_vm7, %v17338_v52  ;;  %14091 = vmatpush3.bf16.msra.mxu1 %v15456_v30  ;;  %v15461_v52 = vld [vmem:[%s20398_s13 + $0x8] sm:$0xff]   ;;  %vm20581_vm7 = vmmov %vm20532_vm0 }
 0x692   :  { %14092 = vmatprep.subr.bf16.mxu1 %v15457_v32  ;;  %14054 = vmatprep.subr.bf16.mxu0 %v15458_v44 }
 0x693   :  { %14039 = vmatmul.mubr.msk.bf16.gmra.mrb[60].mxu0 %vm20568_vm9, %v17294_v47  ;;  %vm20582_vm9 = vmmov %vm20532_vm0 }
 0x694   :  { %14046 = vmatprep.mubr.msk.bf16.mxu0 %vm20569_vm11, %v17186_v12  ;;  %vm20583_vm11 = vmmov %vm20532_vm0 }
 0x695   :  { %14093 = vmatpush3.bf16.msra.mxu1 %v15457_v32 }
 0x696   :  { %14102 = vmatprep.subr.bf16.mxu1 %v15460_v27 }
 0x698   :  { %14087 = vmatmul.mubr.msk.bf16.gmra.mrb[64].mxu1 %vm20570_vm4, %v17294_v47  ;;  %vm20584_vm4 = vmmov %vm20532_vm0 }
 0x699   :  { %14094 = vmatprep.mubr.msk.bf16.mxu1 %vm20571_vm12, %v17186_v12  ;;  %v4068_v12 = vpack.c.bf16 %v20537_v18, %v17283_v5  ;;  %vm20586_vm12 = vmmov %vm20585_vm2 }
 0x69b   :  { %14047 = vmatmul.mubr.msk.bf16.vlgmr.msra.gmra.mrb[56].mxu0 %vm20572_vm10, %v17281_v15  ;;  %vm20587_vm10 = vmmov %vm20585_vm2 }
 0x69c   :  { %14050 = vmatprep.mubr.msk.bf16.mxu0 %vm20573_vm3, %v17336_v19  ;;  %14055 = vmatpush3.bf16.msra.mxu0 %v15458_v44  ;;  %vm20588_vm3 = vmmov %vm20585_vm2 }
 0x69d   :  { %14056 = vmatprep.subr.bf16.mxu0 %v15459_v21 }
 0x6a0   :  { %14095 = vmatmul.mubr.msk.bf16.vlgmr.msra.gmra.mrb[60].mxu1 %vm20574_vm13, %v17281_v15  ;;  %14057 = vmatpush3.bf16.msra.mxu0 %v15459_v21  ;;  %v17691_v15 = vld [vmem:[%s20399_s14] ss:$0 sm:$0xff]  ;;  %vm20589_vm13 = vmmov %vm20585_vm2 }
 0x6a1   :  { %14098 = vmatprep.mubr.msk.bf16.mxu1 %vm20532_vm0, %v17336_v19  ;;  %14103 = vmatpush3.bf16.msra.mxu1 %v15460_v27  ;;  %v4079_v19 = vpack.c.bf16 %v20537_v18, %v4075_v54  ;;  %vm20590_vm0 = vmmov %vm20585_vm2 }
 0x6a2   :  { %14104 = vmatprep.subr.bf16.mxu1 %v15461_v52 }
 0x6a3   :  { %14051 = vmatmul.mubr.msk.bf16.gmra.mrb[60].mxu0 %vm20575_vm14, %v4068_v12  ;;  %vm20591_vm14 = vmmov %vm20590_vm0 }
 0x6a4   :  { %14058 = vmatprep.mubr.msk.bf16.mxu0 %vm20576_vm8, %v17473_v25  ;;  %vm20592_vm8 = vmmov %vm20590_vm0 }
 0x6a5   :  { %14105 = vmatpush3.bf16.msra.mxu1 %v15461_v52 }
 0x6a8   :  { %14099 = vmatmul.mubr.msk.bf16.gmra.mrb[64].mxu1 %vm20577_vm15, %v4068_v12  ;;  %vm20593_vm15 = vmmov %vm20590_vm0 }
 0x6a9   :  { %14106 = vmatprep.mubr.msk.bf16.mxu1 %vm20578_vm1, %v17475_v50  ;;  %vm20594_vm1 = vmmov %vm20590_vm0 }
 0x6ab   :  { %14059 = vmatmul.mubr.msk.bf16.vlgmr.msra.gmra.mrb[56].mxu0 %vm20579_vm5, %v17322_v7  ;;  %vm20595_vm5 = vmmov %vm20590_vm0 }
 0x6ac   :  { %14062 = vmatprep.mubr.msk.bf16.mxu0 %vm20580_vm6, %v17483_v58  ;;  %vm20596_vm6 = vmmov %vm20590_vm0 }
 0x6b0   :  { %14107 = vmatmul.mubr.msk.bf16.vlgmr.msra.gmra.mrb[60].mxu1 %vm20581_vm7, %v17372_v59  ;;  %vm20597_vm7 = vmmov %vm20590_vm0 }
 0x6b1   :  { %14110 = vmatprep.mubr.msk.bf16.mxu1 %vm20582_vm9, %v17496_v60  ;;  %vm20598_vm9 = vmmov %vm20590_vm0 }
 0x6b3   :  { %14063 = vmatmul.mubr.msk.bf16.gmra.mrb[60].mxu0 %vm20583_vm11, %v17505_v10  ;;  %vm20599_vm11 = vmmov %vm20590_vm0 }
 0x6b8   :  { %14111 = vmatmul.mubr.msk.bf16.gmra.mrb[64].mxu1 %vm20584_vm4, %v4079_v19  ;;  %vm20600_vm4 = vmmov %vm20590_vm0 }
 0x73e   :  { %v13964_v5 = vpop.f32.mrb[48].mxu0 }
 0x73f   :  { %v4433_v47 = vpop.f32.mrb[49].mxu0  ;;  %v5563_v33 = vadd.f32 %v13964_v5, %v17691_v15 }
 0x740   :  { %v5561_v7 = vadd.f32 %v17691_v15, %v4433_v47  ;;  %v13965_v59 = vpop.f32.mrb[50].mxu0 }
 0x741   :  { %v4436_v29 = vpop.f32.mrb[51].mxu0  ;;  %v17706_v20 = vmax.f32 %v5563_v33, 0.0  ;;  %v5564_v38 = vadd.f32 %v13965_v59, %v17691_v15 }
 0x742   :  { %v5562_v11 = vadd.f32 %v17691_v15, %v4436_v29  ;;  %v17700_v6 = vmax.f32 %v5561_v7, 0.0 }
 0x743   :  { %v17694_v13 = vpop.f32.mrb[52].mxu1  ;;  %v5698_v9 = vmul.f32 %v17706_v20, %v17706_v20  ;;  %v17724_v10 = vmax.f32 %v5564_v38, 0.0  ;;  %v5628_v35 = vsel %vm20589_vm13, %v17706_v20, 0.0  ;;  %vm20605_vm13 = vmmov %vm20590_vm0 }
 0x744   :  { %v4801_v14 = vpop.f32.mrb[53].mxu1  ;;  %v17702_v55 = vmax.f32 %v5562_v11, 0.0  ;;  %v5696_v46 = vmul.f32 %v17700_v6, %v17700_v6  ;;  %v5625_v51 = vsel %vm20586_vm12, %v17700_v6, 0.0  ;;  %v5571_v38 = vadd.f32 %v17694_v13, %v17691_v15  ;;  %vm20602_vm12 = vmmov %vm20590_vm0 }
 0x745   :  { %v17697_v37 = vpop.f32.mrb[54].mxu1  ;;  %v5731_v22 = vsel %vm20590_vm0, %v5698_v9, 0.0  ;;  %v5699_v42 = vmul.f32 %v17724_v10, %v17724_v10  ;;  %v5630_v3 = vsel %vm20591_vm14, %v17724_v10, 0.0  ;;  %v5569_v19 = vadd.f32 %v17691_v15, %v4801_v14  ;;  %vm20606_vm14 = vmmov %vm20590_vm0 }
 0x746   :  { %v4804_v23 = vpop.f32.mrb[55].mxu1  ;;  %v5697_v39 = vmul.f32 %v17702_v55, %v17702_v55  ;;  %v13968_v57 = vpop.f32.mrb[52].mxu0  ;;  %v5626_v8 = vsel %vm20585_vm2, %v17702_v55, 0.0  ;;  %v5728_v54 = vsel %vm20588_vm3, %v5696_v46, 0.0  ;;  %vm20601_vm2 = vmmov %vm20590_vm0  ;;  %v5572_v9 = vadd.f32 %v17697_v37, %v17691_v15 }
 0x747   :  { %v4449_v62 = vpop.f32.mrb[53].mxu0  ;;  %v5627_v48 = vadd.f32 %v5626_v8, %v5625_v51  ;;  %v5733_v43 = vsel %vm20592_vm8, %v5699_v42, 0.0  ;;  %v5567_v0 = vadd.f32 %v13968_v57, %v17691_v15  ;;  %v17762_v11 = vmax.f32 %v5569_v19, 0.0  ;;  %vm20604_vm3 = vmmov %vm20590_vm0 }
 0x748   :  { %v13969_v25 = vpop.f32.mrb[54].mxu0  ;;  %v5729_v58 = vsel %vm20587_vm10, %v5697_v39, 0.0  ;;  %v5565_v41 = vadd.f32 %v17691_v15, %v4449_v62  ;;  %v5570_v39 = vadd.f32 %v17691_v15, %v4804_v23  ;;  %vm20603_vm10 = vmmov %vm20590_vm0 }
 0x749   :  { %v4452_v50 = vpop.f32.mrb[55].mxu0  ;;  %v5730_v63 = vadd.f32 %v5729_v58, %v5728_v54  ;;  %v5629_v36 = vadd.f32 %v5628_v35, %v5627_v48  ;;  %v17749_v32 = vmax.f32 %v5567_v0, 0.0  ;;  %v5568_v44 = vadd.f32 %v13969_v25, %v17691_v15  ;;  %vm20607_vm8 = vmmov %vm20590_vm0 }
 0x74a   :  { %v17730_v17 = vmax.f32 %v5565_v41, 0.0  ;;  %v5566_v16 = vadd.f32 %v17691_v15, %v4452_v50  ;;  %v5704_v8 = vmul.f32 %v17762_v11, %v17762_v11  ;;  %v17774_v25 = vmax.f32 %v5570_v39, 0.0 }
 0x74b   :  { %v17713_v24 = vpop.f32.mrb[56].mxu1  ;;  %v5732_v1 = vadd.f32 %v5731_v22, %v5730_v63  ;;  %v5631_v45 = vadd.f32 %v5630_v3, %v5629_v36  ;;  %v5702_v5 = vmul.f32 %v17749_v32, %v17749_v32  ;;  %v17758_v47 = vmax.f32 %v5568_v44, 0.0 }
 0x74c   :  { %v4817_v31 = vpop.f32.mrb[57].mxu1  ;;  %v5700_v40 = vmul.f32 %v17730_v17, %v17730_v17  ;;  %v17740_v26 = vmax.f32 %v5566_v16, 0.0  ;;  %v5632_v49 = vsel %vm20593_vm15, %v17730_v17, 0.0  ;;  %v5636_v59 = vsel %vm20597_vm7, %v17749_v32, 0.0  ;;  %vm20608_vm15 = vmmov %vm20590_vm0 }
 0x74d   :  { %v17719_v60 = vpop.f32.mrb[58].mxu1  ;;  %v5734_v56 = vadd.f32 %v5733_v43, %v5732_v1  ;;  %v5633_v34 = vadd.f32 %v5632_v49, %v5631_v45  ;;  %v5739_v33 = vsel %vm20598_vm9, %v5702_v5, 0.0  ;;  %v5703_v57 = vmul.f32 %v17758_v47, %v17758_v47  ;;  %vm20612_vm7 = vmmov %vm20590_vm0 }
 0x74e   :  { %v17726_v61 = vpop.f32.mrb[59].mxu1  ;;  %v5735_v2 = vsel %vm20594_vm1, %v5700_v40, 0.0  ;;  %v5701_v30 = vmul.f32 %v17740_v26, %v17740_v26  ;;  %v5634_v27 = vsel %vm20595_vm5, %v17740_v26, 0.0  ;;  %v5638_v62 = vsel %vm20599_vm11, %v17758_v47, 0.0  ;;  %vm20609_vm1 = vmmov %vm20590_vm0 }
 0x74f   :  { %v5736_v21 = vadd.f32 %v5735_v2, %v5734_v56  ;;  %v5635_v12 = vadd.f32 %v5634_v27, %v5633_v34  ;;  %v5741_v50 = vsel %vm20600_vm4, %v5703_v57, 0.0  ;;  %v5640_v23 = vsel %vm20601_vm2, %v17762_v11, 0.0  ;;  %v15464_v27 = vld [vmem:[%s20400_s17 + $0x4] ss:$8 sps:$4 sm:$0xff]   ;;  %vm20610_vm5 = vmmov %vm20590_vm0 }
 0x750   :  { %v5737_v52 = vsel %vm20596_vm6, %v5701_v30, 0.0  ;;  %v17779_v41 = vmax.f32 %v5571_v38, 0.0  ;;  %v5743_v48 = vsel %vm20602_vm12, %v5704_v8, 0.0  ;;  %v5705_v13 = vmul.f32 %v17774_v25, %v17774_v25  ;;  %6185 = vmatprep.mubr.bf16.mxu0 %v15464_v27  ;;  %vm20611_vm6 = vmmov %vm20590_vm0 }
 0x751   :  { %v5738_v7 = vadd.f32 %v5737_v52, %v5736_v21  ;;  %v5637_v29 = vadd.f32 %v5636_v59, %v5635_v12  ;;  %v5642_v63 = vsel %vm20603_vm10, %v17774_v25, 0.0  ;;  %v17790_v36 = vmax.f32 %v5572_v9, 0.0  ;;  %vm20613_vm9 = vmmov %vm20590_vm0 }
 0x752   :  { %v5706_v16 = vmul.f32 %v17779_v41, %v17779_v41  ;;  %v5745_v22 = vsel %vm20604_vm3, %v5705_v13, 0.0  ;;  %v5573_v42 = vadd.f32 %v17691_v15, %v4817_v31  ;;  %v5644_v37 = vsel %vm20605_vm13, %v17779_v41, 0.0  ;;  %vm20614_vm11 = vmmov %vm20590_vm0 }
 0x753   :  { %v5740_v14 = vadd.f32 %v5739_v33, %v5738_v7  ;;  %v5639_v46 = vadd.f32 %v5638_v62, %v5637_v29  ;;  %v5707_v45 = vmul.f32 %v17790_v36, %v17790_v36  ;;  %v5574_v0 = vadd.f32 %v17691_v15, %v17726_v61  ;;  %vm20615_vm4 = vmmov %vm20590_vm0 }
 0x754   :  { %v5747_v40 = vsel %vm20590_vm0, %v5706_v16, 0.0  ;;  %v17799_v43 = vmax.f32 %v5573_v42, 0.0  ;;  %v5646_v56 = vsel %vm20606_vm14, %v17790_v36, 0.0  ;;  %v5575_v30 = vadd.f32 %v17713_v24, %v17691_v15  ;;  %vm20616_vm2 = vmmov %vm20590_vm0 }
 0x755   :  { %v5742_v51 = vadd.f32 %v5741_v50, %v5740_v14  ;;  %v5641_v58 = vadd.f32 %v5640_v23, %v5639_v46  ;;  %v5749_v2 = vsel %vm20607_vm8, %v5707_v45, 0.0  ;;  %v17810_v44 = vmax.f32 %v5574_v0, 0.0  ;;  %vm20617_vm12 = vmmov %vm20590_vm0 }
 0x756   :  { %v5708_v34 = vmul.f32 %v17799_v43, %v17799_v43  ;;  %v5648_v21 = vsel %vm20608_vm15, %v17799_v43, 0.0  ;;  %v17817_v12 = vmax.f32 %v5575_v30, 0.0  ;;  %v5576_v24 = vadd.f32 %v17719_v60, %v17691_v15  ;;  %vm20618_vm10 = vmmov %vm20590_vm0 }
 0x757   :  { %v5744_v54 = vadd.f32 %v5743_v48, %v5742_v51  ;;  %v5643_v35 = vadd.f32 %v5642_v63, %v5641_v58  ;;  %v5709_v5 = vmul.f32 %v17810_v44, %v17810_v44  ;;  %v5650_v59 = vsel %vm20610_vm5, %v17810_v44, 0.0  ;;  %vm20619_vm3 = vmmov %vm20590_vm0 }
 0x758   :  { %v5751_v19 = vsel %vm20609_vm1, %v5708_v34, 0.0  ;;  %v5710_v33 = vmul.f32 %v17817_v12, %v17817_v12  ;;  %v17828_v39 = vmax.f32 %v5576_v24, 0.0  ;;  %v5652_v62 = vsel %vm20612_vm7, %v17817_v12, 0.0  ;;  %vm20620_vm13 = vmmov %vm20590_vm0 }
 0x759   :  { %v5746_v1 = vadd.f32 %v5745_v22, %v5744_v54  ;;  %v5645_v3 = vadd.f32 %v5644_v37, %v5643_v35  ;;  %v5753_v57 = vsel %vm20611_vm6, %v5709_v5, 0.0  ;;  %vm20621_vm14 = vmmov %vm20590_vm0 }
 0x75a   :  { %v5755_v50 = vsel %vm20613_vm9, %v5710_v33, 0.0  ;;  %v5711_v51 = vmul.f32 %v17828_v39, %v17828_v39  ;;  %v5654_v63 = vsel %vm20614_vm11, %v17828_v39, 0.0  ;;  %vm20622_vm8 = vmmov %vm20590_vm0 }
 0x75b   :  { %v5748_v49 = vadd.f32 %v5747_v40, %v5746_v1  ;;  %v5647_v31 = vadd.f32 %v5646_v56, %v5645_v3  ;;  %vm20623_vm15 = vmmov %vm20590_vm0 }
 0x75c   :  { %v5757_v3 = vsel %vm20615_vm4, %v5711_v51, 0.0  ;;  %vm20624_vm1 = vmmov %vm20590_vm0 }
 0x75d   :  { %v5750_v61 = vadd.f32 %v5749_v2, %v5748_v49  ;;  %v5649_v52 = vadd.f32 %v5648_v21, %v5647_v31  ;;  %vm20625_vm5 = vmmov %vm20590_vm0 }
 0x75e   :  { %vm20626_vm6 = vmmov %vm20590_vm0 }
 0x75f   :  { %v5752_v7 = vadd.f32 %v5751_v19, %v5750_v61  ;;  %v5651_v29 = vadd.f32 %v5650_v59, %v5649_v52  ;;  %vm20627_vm7 = vmmov %vm20590_vm0 }
 0x760   :  { %vm20628_vm9 = vmmov %vm20590_vm0 }
 0x761   :  { %v5754_v14 = vadd.f32 %v5753_v57, %v5752_v7  ;;  %v5653_v46 = vadd.f32 %v5652_v62, %v5651_v29  ;;  %vm20629_vm11 = vmmov %vm20590_vm0 }
 0x762   :  { %vm20630_vm4 = vmmov %vm20590_vm0 }
 0x763   :  { %v5756_v48 = vadd.f32 %v5755_v50, %v5754_v14  ;;  %v5655_v1 = vadd.f32 %v5654_v63, %v5653_v46 }
 0x765   :  { %v5758_v31 = vadd.f32 %v5757_v3, %v5756_v48 }
 0x77e   :  { %v14060_v60 = vpop.f32.mrb[56].mxu0 }
 0x77f   :  { %v5579_v38 = vadd.f32 %v14060_v60, %v17691_v15  ;;  %v5160_v8 = vpop.f32.mrb[57].mxu0 }
 0x780   :  { %v5577_v23 = vadd.f32 %v17691_v15, %v5160_v8  ;;  %v14061_v58 = vpop.f32.mrb[58].mxu0 }
 0x781   :  { %v5580_v9 = vadd.f32 %v14061_v58, %v17691_v15  ;;  %v5163_v13 = vpop.f32.mrb[59].mxu0  ;;  %v17841_v35 = vmax.f32 %v5579_v38, 0.0 }
 0x782   :  { %v17843_v16 = vmax.f32 %v5577_v23, 0.0  ;;  %v5578_v22 = vadd.f32 %v17691_v15, %v5163_v13 }
 0x783   :  { %v14108_v54 = vpop.f32.mrb[60].mxu1  ;;  %v17853_v2 = vmax.f32 %v5580_v9, 0.0  ;;  %v5714_v30 = vmul.f32 %v17841_v35, %v17841_v35  ;;  %v5660_v5 = vsel %vm20619_vm3, %v17841_v35, 0.0  ;;  %vm20634_vm3 = vmmov %vm20590_vm0 }
 0x784   :  { %v5515_v42 = vpop.f32.mrb[61].mxu1  ;;  %v5656_v40 = vsel %vm20616_vm2, %v17843_v16, 0.0  ;;  %v5712_v45 = vmul.f32 %v17843_v16, %v17843_v16  ;;  %v17851_v0 = vmax.f32 %v5578_v22, 0.0  ;;  %vm20631_vm2 = vmmov %vm20590_vm0 }
 0x785   :  { %v14109_v37 = vpop.f32.mrb[62].mxu1  ;;  %v5657_v56 = vadd.f32 %v5656_v40, %v5655_v1  ;;  %v5715_v29 = vmul.f32 %v17853_v2, %v17853_v2  ;;  %v5763_v60 = vsel %vm20590_vm0, %v5714_v30, 0.0  ;;  %v5662_v46 = vsel %vm20621_vm14, %v17853_v2, 0.0  ;;  %vm20636_vm14 = vmmov %vm20590_vm0 }
 0x786   :  { %v5518_v49 = vpop.f32.mrb[63].mxu1  ;;  %v5759_v34 = vsel %vm20617_vm12, %v5712_v45, 0.0  ;;  %v5658_v27 = vsel %vm20618_vm10, %v17851_v0, 0.0  ;;  %v5713_v61 = vmul.f32 %v17851_v0, %v17851_v0  ;;  %v14064_v21 = vpop.f32.mrb[60].mxu0  ;;  %v5585_v3 = vadd.f32 %v17691_v15, %v5515_v42  ;;  %vm20632_vm12 = vmmov %vm20590_vm0 }
 0x787   :  { %v5760_v52 = vadd.f32 %v5759_v34, %v5758_v31  ;;  %v5659_v19 = vadd.f32 %v5658_v27, %v5657_v56  ;;  %v5176_v24 = vpop.f32.mrb[61].mxu0  ;;  %v5583_v50 = vadd.f32 %v14064_v21, %v17691_v15  ;;  %v5765_v9 = vsel %vm20622_vm8, %v5715_v29, 0.0  ;;  %vm20633_vm10 = vmmov %vm20590_vm0 }
 0x788   :  { %v5761_v7 = vsel %vm20620_vm13, %v5713_v61, 0.0  ;;  %v14065_v59 = vpop.f32.mrb[62].mxu0  ;;  %v5581_v51 = vadd.f32 %v17691_v15, %v5176_v24  ;;  %v5586_v34 = vadd.f32 %v17691_v15, %v5518_v49  ;;  %v5587_v21 = vadd.f32 %v14108_v54, %v17691_v15  ;;  %vm20635_vm13 = vmmov %vm20590_vm0 }
 0x789   :  { %v5661_v33 = vadd.f32 %v5660_v5, %v5659_v19  ;;  %v5762_v57 = vadd.f32 %v5761_v7, %v5760_v52  ;;  %v5179_v14 = vpop.f32.mrb[63].mxu0  ;;  %v5584_v22 = vadd.f32 %v14065_v59, %v17691_v15  ;;  %v17878_v40 = vmax.f32 %v5583_v50, 0.0  ;;  %vm20637_vm8 = vmmov %vm20590_vm0 }
 0x78a   :  { %v17873_v13 = vmax.f32 %v5581_v51, 0.0  ;;  %v5582_v1 = vadd.f32 %v17691_v15, %v5179_v14  ;;  %v17893_v19 = vmax.f32 %v5585_v3, 0.0  ;;  %v5588_v49 = vadd.f32 %v14109_v37, %v17691_v15 }
 0x78b   :  { %v14112_v62 = vpop.f32.mrb[64].mxu1  ;;  %v5764_v8 = vadd.f32 %v5763_v60, %v5762_v57  ;;  %v5663_v23 = vadd.f32 %v5662_v46, %v5661_v33  ;;  %v17888_v61 = vmax.f32 %v5584_v22, 0.0  ;;  %v5718_v24 = vmul.f32 %v17878_v40, %v17878_v40 }
 0x78c   :  { %v5531_v38 = vpop.f32.mrb[65].mxu1  ;;  %v5664_v45 = vsel %vm20623_vm15, %v17873_v13, 0.0  ;;  %v5716_v56 = vmul.f32 %v17873_v13, %v17873_v13  ;;  %v17884_v30 = vmax.f32 %v5582_v1, 0.0  ;;  %v5668_v59 = vsel %vm20626_vm6, %v17878_v40, 0.0  ;;  %vm20638_vm15 = vmmov %vm20590_vm0 }
 0x78d   :  { %v14113_v58 = vpop.f32.mrb[66].mxu1  ;;  %v5766_v63 = vadd.f32 %v5765_v9, %v5764_v8  ;;  %v5665_v31 = vadd.f32 %v5664_v45, %v5663_v23  ;;  %v17902_v29 = vmax.f32 %v5586_v34, 0.0  ;;  %v5719_v54 = vmul.f32 %v17888_v61, %v17888_v61  ;;  %vm20641_vm6 = vmmov %vm20590_vm0 }
 0x78e   :  { %v5534_v48 = vpop.f32.mrb[67].mxu1  ;;  %v5767_v27 = vsel %vm20624_vm1, %v5716_v56, 0.0  ;;  %v5666_v52 = vsel %vm20625_vm5, %v17884_v30, 0.0  ;;  %v5717_v7 = vmul.f32 %v17884_v30, %v17884_v30  ;;  %v17907_v14 = vmax.f32 %v5587_v21, 0.0  ;;  %vm20639_vm1 = vmmov %vm20590_vm0 }
 0x78f   :  { %v5768_v42 = vadd.f32 %v5767_v27, %v5766_v63  ;;  %v5667_v5 = vadd.f32 %v5666_v52, %v5665_v31  ;;  %v5670_v60 = vsel %vm20628_vm9, %v17888_v61, 0.0  ;;  %v5720_v37 = vmul.f32 %v17893_v19, %v17893_v19  ;;  %vm20640_vm5 = vmmov %vm20590_vm0 }
 0x790   :  { %v5769_v57 = vsel %vm20627_vm7, %v5717_v7, 0.0  ;;  %v5771_v8 = vsel %vm20629_vm11, %v5718_v24, 0.0  ;;  %v5589_v51 = vadd.f32 %v17691_v15, %v5531_v38  ;;  %v5672_v23 = vsel %vm20630_vm4, %v17893_v19, 0.0  ;;  %vm20642_vm7 = vmmov %vm20590_vm0 }
 0x791   :  { %v5669_v33 = vadd.f32 %v5668_v59, %v5667_v5  ;;  %v5770_v46 = vadd.f32 %v5769_v57, %v5768_v42  ;;  %v17917_v9 = vmax.f32 %v5588_v49, 0.0  ;;  %v5721_v22 = vmul.f32 %v17902_v29, %v17902_v29  ;;  %vm20643_vm9 = vmmov %vm20590_vm0 }
 0x792   :  { %v5773_v1 = vsel %vm20631_vm2, %v5719_v54, 0.0  ;;  %v5590_v45 = vadd.f32 %v17691_v15, %v5534_v48  ;;  %v5722_v56 = vmul.f32 %v17907_v14, %v17907_v14  ;;  %v5674_v38 = vsel %vm20632_vm12, %v17902_v29, 0.0  ;;  %vm20644_vm11 = vmmov %vm20590_vm0 }
 0x793   :  { %v5671_v50 = vadd.f32 %v5670_v60, %v5669_v33  ;;  %v5772_v63 = vadd.f32 %v5771_v8, %v5770_v46  ;;  %v5775_v34 = vsel %vm20633_vm10, %v5720_v37, 0.0  ;;  %v5591_v27 = vadd.f32 %v14112_v62, %v17691_v15  ;;  %vm20645_vm4 = vmmov %vm20590_vm0 }
 0x794   :  { %v17929_v21 = vmax.f32 %v5589_v51, 0.0  ;;  %v5676_v52 = vsel %vm20634_vm3, %v17907_v14, 0.0  ;;  %v5723_v48 = vmul.f32 %v17917_v9, %v17917_v9  ;;  %v5777_v5 = vsel %vm20635_vm13, %v5721_v22, 0.0  ;;  %vm20652_vm3 = vmmov %vm20590_vm0 }
 0x795   :  { %v5673_v3 = vadd.f32 %v5672_v23, %v5671_v50  ;;  %v5774_v31 = vadd.f32 %v5773_v1, %v5772_v63  ;;  %v5592_v49 = vadd.f32 %v14113_v58, %v17691_v15  ;;  %v5622_v59 = vmax.f32 %v5590_v45, 0.0 }
 0x796   :  { %v5678_v54 = vsel %vm20590_vm0, %v17917_v9, 0.0  ;;  %v5779_v33 = vsel %vm20636_vm14, %v5722_v56, 0.0  ;;  %v17940_v57 = vmax.f32 %v5591_v27, 0.0  ;;  %v5724_v46 = vmul.f32 %v17929_v21, %v17929_v21 }
 0x797   :  { %v5675_v42 = vadd.f32 %v5674_v38, %v5673_v3  ;;  %v5776_v24 = vadd.f32 %v5775_v34, %v5774_v31  ;;  %v5680_v37 = vsel %vm20637_vm8, %v17929_v21, 0.0  ;;  %v5781_v50 = vsel %vm20638_vm15, %v5723_v48, 0.0  ;;  %vm20660_vm8 = vmmov %vm20639_vm1 }
 0x798   :  { %v17947_v58 = vmax.f32 %v5592_v49, 0.0  ;;  %v5725_v51 = vmul.f32 %v5622_v59, %v5622_v59  ;;  %v5682_v63 = vsel %vm20639_vm1, %v5622_v59, 0.0  ;;  %v5726_v22 = vmul.f32 %v17940_v57, %v17940_v57 }
 0x799   :  { %v5677_v7 = vadd.f32 %v5676_v52, %v5675_v42  ;;  %v5778_v62 = vadd.f32 %v5777_v5, %v5776_v24  ;;  %v5783_v1 = vsel %vm20640_vm5, %v5724_v46, 0.0  ;;  %v5684_v45 = vsel %vm20641_vm6, %v17940_v57, 0.0 }
 0x79a   :  { %v5727_v38 = vmul.f32 %v17947_v58, %v17947_v58  ;;  %v5785_v34 = vsel %vm20642_vm7, %v5725_v51, 0.0  ;;  %v5686_v27 = vsel %vm20643_vm9, %v17947_v58, 0.0  ;;  %v5787_v52 = vsel %vm20644_vm11, %v5726_v22, 0.0  ;;  %vm20670_vm9 = vmmov %vm20652_vm3 }
 0x79b   :  { %v5679_v60 = vadd.f32 %v5678_v54, %v5677_v7  ;;  %v5780_v8 = vadd.f32 %v5779_v33, %v5778_v62  ;;  %vm20650_vm10 = vcmask 1040384   ;;  %vm20654_vm0 = vcmask 1046528  }
 0x79c   :  { %v5789_v5 = vsel %vm20645_vm4, %v5727_v38, 0.0  ;;  %vm20653_vm13 = vmmov %vm20650_vm10 }
 0x79d   :  { %v5681_v15 = vadd.f32 %v5680_v37, %v5679_v60  ;;  %v5782_v23 = vadd.f32 %v5781_v50, %v5780_v8  ;;  %vm20667_vm5 = vmmov %vm20650_vm10 }
 0x79e   :  { %vm20668_vm6 = vmmov %vm20654_vm0 }
 0x79f   :  { %v5683_v3 = vadd.f32 %v5682_v63, %v5681_v15  ;;  %v5784_v56 = vadd.f32 %v5783_v1, %v5782_v23  ;;  %vm20669_vm7 = vmmov %vm20667_vm5 }
 0x7a0   :  { %vm20671_vm11 = vmmov %vm20654_vm0 }
 0x7a1   :  { %v5685_v31 = vadd.f32 %v5684_v45, %v5683_v3  ;;  %v5786_v42 = vadd.f32 %v5785_v34, %v5784_v56  ;;  %v17970_v3 = vld [vmem:[%s20401_s15] ss:$0 sm:$0xff]  ;;  %vm20675_vm4 = vmmov %vm20652_vm3 }
 0x7a3   :  { %v5687_v48 = vadd.f32 %v5686_v27, %v5685_v31  ;;  %v5788_v24 = vadd.f32 %v5787_v52, %v5786_v42 }
 0x7a5   :  { %v5688_v7 = vrot.slane %v5687_v48, 4  ;;  %v5790_v49 = vadd.f32 %v5789_v5, %v5788_v24 }
 0x7a7   :  { %v5689_v54 = vadd.f32 %v5688_v7, %v5687_v48  ;;  %v5791_v62 = vrot.slane %v5790_v49, 4 }
 0x7a9   :  { %v5690_v33 = vrot.slane %v5689_v54, 2  ;;  %v5792_v60 = vadd.f32 %v5791_v62, %v5790_v49 }
 0x7ab   :  { %v5691_v46 = vadd.f32 %v5690_v33, %v5689_v54  ;;  %v5793_v37 = vrot.slane %v5792_v60, 2 }
 0x7ad   :  { %v5692_v8 = vrot.slane %v5691_v46, 1  ;;  %v5794_v50 = vadd.f32 %v5793_v37, %v5792_v60 }
 0x7af   :  { %v5693_v15 = vadd.f32 %v5692_v8, %v5691_v46  ;;  %v5795_v51 = vrot.slane %v5794_v50, 1 }
 0x7b1   :  { %v17962_v23 = vmul.f32 0.00390625, %v5693_v15  ;;  %v5796_v63 = vadd.f32 %v5795_v51, %v5794_v50 }
 0x7b3   :  { %v5798_v22 = vmul.f32 %v17962_v23, %v17962_v23  ;;  %v5831_v1 = vsub.f32 %v5622_v59, %v17962_v23  ;;  %v5797_v45 = vmul.f32 0.00390625, %v5796_v63  ;;  %v5802_v38 = vsub.f32 %v17700_v6, %v17962_v23 }
 0x7b4   :  { %v5803_v31 = vsub.f32 %v17702_v55, %v17962_v23  ;;  %v5804_v27 = vsub.f32 %v17706_v20, %v17962_v23  ;;  %v5805_v59 = vsub.f32 %v17724_v10, %v17962_v23  ;;  %v5806_v42 = vsub.f32 %v17730_v17, %v17962_v23 }
 0x7b5   :  { %v5799_v56 = vsub.f32 %v5797_v45, %v5798_v22  ;;  %v17977_v34 = vmul.f32 %v17970_v3, %v5831_v1  ;;  %v5807_v48 = vsub.f32 %v17740_v26, %v17962_v23  ;;  %v5818_v6 = vsub.f32 %v17843_v16, %v17962_v23 }
 0x7b6   :  { %v5819_v55 = vsub.f32 %v17851_v0, %v17962_v23  ;;  %v5820_v24 = vsub.f32 %v17841_v35, %v17962_v23  ;;  %v5821_v20 = vsub.f32 %v17853_v2, %v17962_v23  ;;  %v5822_v10 = vsub.f32 %v17873_v13, %v17962_v23 }
 0x7b7   :  { %v5800_v52 = vmax.f32 %v5799_v56, 0.0  ;;  %v5823_v17 = vsub.f32 %v17884_v30, %v17962_v23  ;;  %v5824_v26 = vsub.f32 %v17878_v40, %v17962_v23  ;;  %v5825_v16 = vsub.f32 %v17888_v61, %v17962_v23 }
 0x7b8   :  { %v5826_v0 = vsub.f32 %v17893_v19, %v17962_v23  ;;  %v5827_v35 = vsub.f32 %v17902_v29, %v17962_v23  ;;  %v5828_v2 = vsub.f32 %v17907_v14, %v17962_v23  ;;  %v5829_v13 = vsub.f32 %v17917_v9, %v17962_v23 }
 0x7b9   :  { %v5872_v5 = vadd.f32 1e-05, %v5800_v52  ;;  %v5830_v30 = vsub.f32 %v17929_v21, %v17962_v23  ;;  %v5808_v40 = vsub.f32 %v17749_v32, %v17962_v23  ;;  %v5832_v61 = vsub.f32 %v17940_v57, %v17962_v23 }
 0x7ba   :  { %v5833_v19 = vsub.f32 %v17947_v58, %v17962_v23  ;;  %v5809_v29 = vsub.f32 %v17758_v47, %v17962_v23  ;;  %v5810_v14 = vsub.f32 %v17762_v11, %v17962_v23  ;;  %v5811_v9 = vsub.f32 %v17774_v25, %v17962_v23 }
 0x7bb   :  { %15530 = vrsqrt.f32 %v5872_v5  ;;  %v5812_v21 = vsub.f32 %v17779_v41, %v17962_v23  ;;  %v5813_v32 = vsub.f32 %v17790_v36, %v17962_v23  ;;  %v5814_v57 = vsub.f32 %v17799_v43, %v17962_v23 }
 0x7bc   :  { %v5815_v58 = vsub.f32 %v17810_v44, %v17962_v23  ;;  %v5816_v47 = vsub.f32 %v17817_v12, %v17962_v23  ;;  %v5817_v11 = vsub.f32 %v17828_v39, %v17962_v23  ;;  %v5840_v25 = vmul.f32 %v17970_v3, %v5802_v38 }
 0x7bd   :  { %v5841_v7 = vmul.f32 %v17970_v3, %v5803_v31  ;;  %v5842_v41 = vmul.f32 %v17970_v3, %v5804_v27  ;;  %v5843_v36 = vmul.f32 %v17970_v3, %v5805_v59  ;;  %v5844_v49 = vmul.f32 %v17970_v3, %v5806_v42 }
 0x7be   :  { %v5845_v43 = vmul.f32 %v17970_v3, %v5807_v48  ;;  %v5846_v44 = vmul.f32 %v17970_v3, %v5808_v40  ;;  %v5847_v54 = vmul.f32 %v17970_v3, %v5809_v29  ;;  %v5848_v12 = vmul.f32 %v17970_v3, %v5810_v14 }
 0x7bf   :  { %v5849_v39 = vmul.f32 %v17970_v3, %v5811_v9  ;;  %v5850_v62 = vmul.f32 %v17970_v3, %v5812_v21  ;;  %v5851_v33 = vmul.f32 %v17970_v3, %v5813_v32  ;;  %v5852_v60 = vmul.f32 %v17970_v3, %v5814_v57 }
 0x7c0   :  { %v5853_v46 = vmul.f32 %v17970_v3, %v5815_v58  ;;  %v5854_v37 = vmul.f32 %v17970_v3, %v5816_v47  ;;  %v5855_v8 = vmul.f32 %v17970_v3, %v5817_v11  ;;  %v5856_v50 = vmul.f32 %v17970_v3, %v5818_v6 }
 0x7c1   :  { %v5857_v15 = vmul.f32 %v17970_v3, %v5819_v55  ;;  %v5858_v51 = vmul.f32 %v17970_v3, %v5820_v24  ;;  %v5859_v23 = vmul.f32 %v17970_v3, %v5821_v20  ;;  %v5860_v63 = vmul.f32 %v17970_v3, %v5822_v10 }
 0x7c2   :  { %v5861_v22 = vmul.f32 %v17970_v3, %v5823_v17  ;;  %v5862_v1 = vmul.f32 %v17970_v3, %v5824_v26  ;;  %v5863_v45 = vmul.f32 %v17970_v3, %v5825_v16  ;;  %v5864_v56 = vmul.f32 %v17970_v3, %v5826_v0 }
 0x7c3   :  { %v5865_v38 = vmul.f32 %v17970_v3, %v5827_v35  ;;  %v18064_v31 = vmul.f32 %v17970_v3, %v5828_v2  ;;  %v18069_v59 = vmul.f32 %v17970_v3, %v5829_v13  ;;  %v18072_v42 = vmul.f32 %v17970_v3, %v5830_v30 }
 0x7c4   :  { %v18075_v52 = vmul.f32 %v17970_v3, %v5832_v61  ;;  %v18078_v48 = vmul.f32 %v17970_v3, %v5833_v19  ;;  %v18091_v3 = vld [vmem:[%s20402_s16] ss:$0 sm:$0xff] }
 0x7c5   :  { %v18066_v27 = vpop.eup %15530 }
 0x7c6   :  { %v5874_v6 = vmul.f32 %v18066_v27, %v5840_v25  ;;  %v5875_v55 = vmul.f32 %v18066_v27, %v5841_v7  ;;  %v5876_v24 = vmul.f32 %v18066_v27, %v5842_v41  ;;  %v5877_v20 = vmul.f32 %v18066_v27, %v5843_v36 }
 0x7c7   :  { %v5878_v10 = vmul.f32 %v18066_v27, %v5844_v49  ;;  %v5879_v17 = vmul.f32 %v18066_v27, %v5845_v43  ;;  %v5880_v5 = vmul.f32 %v18066_v27, %v5846_v44  ;;  %v5881_v26 = vmul.f32 %v18066_v27, %v5847_v54 }
 0x7c8   :  { %v5882_v16 = vmul.f32 %v18066_v27, %v5848_v12  ;;  %v5883_v0 = vmul.f32 %v18066_v27, %v5849_v39  ;;  %v5884_v35 = vmul.f32 %v18066_v27, %v5850_v62  ;;  %v5885_v2 = vmul.f32 %v18066_v27, %v5851_v33 }
 0x7c9   :  { %v5886_v13 = vmul.f32 %v18066_v27, %v5852_v60  ;;  %v5887_v30 = vmul.f32 %v18066_v27, %v5853_v46  ;;  %v18100_v40 = vmul.f32 %v18066_v27, %v5854_v37  ;;  %v18103_v61 = vmul.f32 %v18066_v27, %v5855_v8 }
 0x7ca   :  { %v5890_v19 = vmul.f32 %v18066_v27, %v5856_v50  ;;  %v5891_v29 = vmul.f32 %v18066_v27, %v5857_v15  ;;  %v5913_v14 = vadd.f32 %v18091_v3, %v5874_v6  ;;  %v5914_v9 = vadd.f32 %v18091_v3, %v5875_v55 }
 0x7cb   :  { %v5892_v21 = vmul.f32 %v18066_v27, %v5858_v51  ;;  %v5893_v32 = vmul.f32 %v18066_v27, %v5859_v23  ;;  %v5915_v57 = vadd.f32 %v18091_v3, %v5876_v24  ;;  %v5916_v58 = vadd.f32 %v18091_v3, %v5877_v20 }
 0x7cc   :  { %v5929_v47 = vadd.f32 %v18091_v3, %v5890_v19  ;;  %v5930_v11 = vadd.f32 %v18091_v3, %v5891_v29  ;;  %v5977_v25 = vpack.c.bf16 %v5914_v9, %v5913_v14  ;;  %v5894_v7 = vmul.f32 %v18066_v27, %v5860_v63 }
 0x7cd   :  { %v5931_v41 = vadd.f32 %v18091_v3, %v5892_v21  ;;  %v5932_v36 = vadd.f32 %v18091_v3, %v5893_v32  ;;  %v5978_v49 = vpack.c.bf16 %v5916_v58, %v5915_v57  ;;  %v5895_v43 = vmul.f32 %v18066_v27, %v5861_v22 }
 0x7ce   :  { %v5985_v44 = vpack.c.bf16 %v5930_v11, %v5929_v47  ;;  %v5933_v54 = vadd.f32 %v18091_v3, %v5894_v7  ;;  %v5917_v12 = vadd.f32 %v18091_v3, %v5878_v10  ;;  %v5918_v39 = vadd.f32 %v18091_v3, %v5879_v17  ;;  %v15474_v7 = vld [vmem:[%s20400_s17 + $0x44] ss:$8 sps:$4 sm:$0xff]  }
 0x7cf   :  { %v5986_v62 = vpack.c.bf16 %v5932_v36, %v5931_v41  ;;  %v5934_v33 = vadd.f32 %v18091_v3, %v5895_v43  ;;  %v5896_v60 = vmul.f32 %v18066_v27, %v5862_v1  ;;  %v5897_v46 = vmul.f32 %v18066_v27, %v5863_v45  ;;  %v15476_v41 = vld [vmem:[%s20400_s17 + $0x40] ss:$8 sps:$4 sm:$0xff]   ;;  %v15477_v36 = vld [vmem:[%s20400_s17 + $0x54] ss:$8 sps:$4 sm:$0xff]   ;;  %v15480_v43 = vld [vmem:[%s20400_s17 + $0x64] ss:$8 sps:$4 sm:$0xff]  }
 0x7d0   :  { %13004 = vmatprep.subr.bf16.mxu0 %v5985_v44  ;;  %v5979_v37 = vpack.c.bf16 %v5918_v39, %v5917_v12  ;;  %v5919_v8 = vadd.f32 %v18091_v3, %v5880_v5  ;;  %v5920_v50 = vadd.f32 %v18091_v3, %v5881_v26  ;;  %v5898_v15 = vmul.f32 %v18066_v27, %v5864_v56  ;;  %v15482_v44 = vld [vmem:[%s20400_s17 + $0x60] ss:$8 sps:$4 sm:$0xff]   ;;  %v15485_v12 = vld [vmem:[%s20400_s17 + $0x70] ss:$8 sps:$4 sm:$0xff]   ;;  %v15486_v39 = vld [vmem:[%s20400_s17 + $0x84] ss:$8 sps:$4 sm:$0xff]  }
 0x7d1   :  { %13005 = vmatpush3.bf16.msra.mxu0 %v5977_v25  ;;  %v5987_v51 = vpack.c.bf16 %v5934_v33, %v5933_v54  ;;  %v5935_v23 = vadd.f32 %v18091_v3, %v5896_v60  ;;  %v5936_v63 = vadd.f32 %v18091_v3, %v5897_v46  ;;  %v5899_v22 = vmul.f32 %v18066_v27, %v5865_v38  ;;  %v15473_v25 = vld [vmem:[%s20400_s17 + $0x30] ss:$8 sps:$4 sm:$0xff]   ;;  %v15483_v54 = vld [vmem:[%s20400_s17 + $0x74] ss:$8 sps:$4 sm:$0xff]   ;;  %v15492_v46 = vld [vmem:[%s20400_s17 + $0xa4] ss:$8 sps:$4 sm:$0xff]  }
 0x7d2   :  { %13006 = vmatprep.subr.bf16.mxu0 %v5986_v62  ;;  %v5980_v1 = vpack.c.bf16 %v5920_v50, %v5919_v8  ;;  %v5937_v45 = vadd.f32 %v18091_v3, %v5898_v15  ;;  %v5921_v6 = vadd.f32 %v18091_v3, %v5882_v16  ;;  %v5922_v55 = vadd.f32 %v18091_v3, %v5883_v0  ;;  %v15488_v62 = vld [vmem:[%s20400_s17 + $0x80] ss:$8 sps:$4 sm:$0xff]   ;;  %v15489_v33 = vld [vmem:[%s20400_s17 + $0x94] ss:$8 sps:$4 sm:$0xff]   ;;  %v15491_v60 = vld [vmem:[%s20400_s17 + $0x90] ss:$8 sps:$4 sm:$0xff]  }
 0x7d3   :  { %v5988_v24 = vpack.c.bf16 %v5936_v63, %v5935_v23  ;;  %v5938_v20 = vadd.f32 %v18091_v3, %v5899_v22  ;;  %v5900_v56 = vmul.f32 %v18066_v27, %v18064_v31  ;;  %v5901_v10 = vmul.f32 %v18066_v27, %v18069_v59  ;;  %v15495_v8 = vld [vmem:[%s20400_s17 + $0xb4] ss:$8 sps:$4 sm:$0xff]   ;;  %v15497_v50 = vld [vmem:[%s20400_s17 + $0xb0] ss:$8 sps:$4 sm:$0xff]   ;;  %v15498_v15 = vld [vmem:[%s20400_s17 + $0xc4] ss:$8 sps:$4 sm:$0xff]  }
 0x7d4   :  { %v5981_v17 = vpack.c.bf16 %v5922_v55, %v5921_v6  ;;  %v5923_v38 = vadd.f32 %v18091_v3, %v5884_v35  ;;  %v5924_v5 = vadd.f32 %v18091_v3, %v5885_v2  ;;  %v5902_v26 = vmul.f32 %v18066_v27, %v18072_v42  ;;  %v15501_v23 = vld [vmem:[%s20400_s17 + $0xd4] ss:$8 sps:$4 sm:$0xff]   ;;  %v15503_v63 = vld [vmem:[%s20400_s17 + $0xd0] ss:$8 sps:$4 sm:$0xff]   ;;  %v15504_v22 = vld [vmem:[%s20400_s17 + $0xe4] ss:$8 sps:$4 sm:$0xff]  }
 0x7d5   :  { %13007 = vmatpush3.bf16.msra.mxu0 %v5978_v49  ;;  %v5989_v16 = vpack.c.bf16 %v5938_v20, %v5937_v45  ;;  %v5939_v0 = vadd.f32 %v18091_v3, %v5900_v56  ;;  %v5940_v19 = vadd.f32 %v18091_v3, %v5901_v10  ;;  %v5903_v31 = vmul.f32 %v18066_v27, %v17977_v34  ;;  %v15479_v49 = vld [vmem:[%s20400_s17 + $0x50] ss:$8 sps:$4 sm:$0xff]   ;;  %v15506_v6 = vld [vmem:[%s20400_s17 + $0xe0] ss:$8 sps:$4 sm:$0xff]   ;;  %v15507_v55 = vld [vmem:[%s20400_s17 + $0xf4] ss:$8 sps:$4 sm:$0xff]  }
 0x7d6   :  { %13008 = vmatprep.subr.bf16.mxu0 %v5987_v51  ;;  %v5982_v29 = vpack.c.bf16 %v5924_v5, %v5923_v38  ;;  %v5941_v59 = vadd.f32 %v18091_v3, %v5902_v26  ;;  %v5925_v35 = vadd.f32 %v18091_v3, %v5886_v13  ;;  %v5926_v2 = vadd.f32 %v18091_v3, %v5887_v30  ;;  %v15500_v51 = vld [vmem:[%s20400_s17 + $0xc0] ss:$8 sps:$4 sm:$0xff]   ;;  %v15511_v45 = vld [vmem:[%s20403_s18 + $0x38] sm:$0xff]  }
 0x7d7   :  { %v5990_v14 = vpack.c.bf16 %v5940_v19, %v5939_v0  ;;  %v5942_v42 = vadd.f32 %v18091_v3, %v5903_v31  ;;  %v5904_v9 = vmul.f32 %v18066_v27, %v18075_v52  ;;  %v5905_v21 = vmul.f32 %v18066_v27, %v18078_v48  ;;  %v15462_v27 = vld [vmem:[%s20400_s17] ss:$8 sps:$4 sm:$0xff]   ;;  %v15465_v52 = vld [vmem:[%s20400_s17 + $0x14] ss:$8 sps:$4 sm:$0xff]   ;;  %v15467_v48 = vld [vmem:[%s20400_s17 + $0x10] ss:$8 sps:$4 sm:$0xff]   ;;  %14114 = vmatprep.subr.bf16.mxu1 %v15511_v45 }
 0x7d8   :  { %v5983_v32 = vpack.c.bf16 %v5926_v2, %v5925_v35  ;;  %v5927_v34 = vadd.f32 %v18091_v3, %v18100_v40  ;;  %v5928_v57 = vadd.f32 %v18091_v3, %v18103_v61  ;;  %v15470_v40 = vld [vmem:[%s20400_s17 + $0x20] ss:$8 sps:$4 sm:$0xff]   ;;  %v15471_v61 = vld [vmem:[%s20400_s17 + $0x34] ss:$8 sps:$4 sm:$0xff]   ;;  %14115 = vmatpush3.bf16.msra.mxu1 %v15511_v45  ;;  %v6342_v10 = vand.u32 15, %v16058_v53 }
 0x7d9   :  { %13009 = vmatpush3.bf16.msra.mxu0 %v5979_v37  ;;  %v5991_v13 = vpack.c.bf16 %v5942_v42, %v5941_v59  ;;  %v5943_v30 = vadd.f32 %v18091_v3, %v5904_v9  ;;  %v5944_v58 = vadd.f32 %v18091_v3, %v5905_v21  ;;  %v15468_v3 = vld [vmem:[%s20400_s17 + $0x24] ss:$8 sps:$4 sm:$0xff]   ;;  %v15494_v37 = vld [vmem:[%s20400_s17 + $0xa0] ss:$8 sps:$4 sm:$0xff]   ;;  %v6349_v59 = vand.u32 15, %v16663_v28 }
 0x7da   :  { %13010 = vmatprep.subr.bf16.mxu0 %v5988_v24  ;;  %v5984_v47 = vpack.c.bf16 %v5928_v57, %v5927_v34  ;;  %v15509_v24 = vld [vmem:[%s20400_s17 + $0xf0] ss:$8 sps:$4 sm:$0xff]   ;;  %v18263_v20 = vld [vmem:[%s20403_s18 + $0x28] sm:$0xff]   ;;  %vm18271_vm2 = vcmp.ge.s32.totalorder %v6342_v10, 1  ;;  %s15795_s17 = smov 2  }
 0x7db   :  { %v5992_v11 = vpack.c.bf16 %v5944_v58, %v5943_v30  ;;  %14148 = vmatprep.subr.bf16.mxu1 %v18263_v20  ;;  %v20651_v57 = vld [vmem:[#allocation3_spill] sm:$0xff]  ;;  %vm18304_vm14 = vcmp.lt.s32.totalorder %v6349_v59, 15 }
 0x7dd   :  { %13011 = vmatpush3.bf16.msra.mxu0 %v5980_v1  ;;  %v15510_v1 = vld [vmem:[%s20403_s18 + $0x30] sm:$0xff]  }
 0x7de   :  { %13012 = vmatprep.subr.bf16.mxu0 %v5989_v16 }
 0x7e1   :  { %13013 = vmatpush3.bf16.msra.mxu0 %v5981_v17  ;;  %v6356_v17 = vand.u32 15, %v17129_v4  ;;  %v15513_v4 = vld [vmem:[%s20403_s18 + $0x70] sm:$0xff]  }
 0x7e2   :  { %13014 = vmatprep.subr.bf16.mxu0 %v5990_v14 }
 0x7e3   :  { %vm18275_vm12 = vcmp.ge.s32.totalorder %v6356_v17, 1 }
 0x7e5   :  { %13015 = vmatpush3.bf16.msra.mxu0 %v5982_v29 }
 0x7e6   :  { %13016 = vmatprep.subr.bf16.mxu0 %v5991_v13  ;;  %v6363_v13 = vand.u32 15, %v20651_v57 }
 0x7e8   :  { %vm18310_vm15 = vcmp.lt.s32.totalorder %v6363_v13, 15 }
 0x7e9   :  { %13017 = vmatpush3.bf16.msra.mxu0 %v5983_v32 }
 0x7ea   :  { %13018 = vmatprep.subr.bf16.mxu0 %v5992_v11 }
 0x7ed   :  { %13019 = vmatpush3.bf16.msra.mxu0 %v5984_v47 }
 0x7ee   :  { %14284 = vmatprep.subr.bf16.mxu0 %v15510_v1 }
 0x7f0   :  { %6186 = vmatmul.mubr.bf16.vlgmr.msra.gmra.mrb[64].mxu0 %v15462_v27  ;;  %v20657_v27 = vld [vmem:[#allocation4_spill] sm:$0xff] }
 0x7f1   :  { %6193 = vmatprep.mubr.bf16.mxu0 %v15465_v52  ;;  %14285 = vmatpush3.bf16.msra.mxu0 %v15510_v1  ;;  %v6370_v52 = vand.u32 15, %v20657_v27 }
 0x7f2   :  { %14318 = vmatprep.subr.bf16.mxu0 %v15513_v4 }
 0x7f3   :  { %vm18314_vm1 = vcmp.ge.s32.totalorder %v6370_v52, 1 }
 0x7f8   :  { %6194 = vmatmul.mubr.bf16.gmra.mrb[68].mxu0 %v15467_v48 }
 0x7f9   :  { %6201 = vmatprep.mubr.bf16.mxu0 %v15468_v3 }
 0x800   :  { %6202 = vmatmul.mubr.bf16.gmra.mrb[72].mxu0 %v15470_v40  ;;  %v15518_v40 = vld [vmem:[%s20403_s18 + $0x20] sm:$0xff]  }
 0x801   :  { %6209 = vmatprep.mubr.bf16.mxu0 %v15471_v61 }
 0x808   :  { %6210 = vmatmul.mubr.bf16.gmra.mrb[76].mxu0 %v15473_v25 }
 0x809   :  { %6217 = vmatprep.mubr.bf16.mxu0 %v15474_v7 }
 0x810   :  { %6218 = vmatmul.mubr.bf16.gmra.mrb[80].mxu0 %v15476_v41 }
 0x811   :  { %6225 = vmatprep.mubr.bf16.mxu0 %v15477_v36 }
 0x818   :  { %6226 = vmatmul.mubr.bf16.gmra.mrb[84].mxu0 %v15479_v49 }
 0x819   :  { %6233 = vmatprep.mubr.bf16.mxu0 %v15480_v43  ;;  %v20665_v43 = vld [vmem:[#allocation6_spill] sm:$0xff] }
 0x820   :  { %6234 = vmatmul.mubr.bf16.gmra.mrb[88].mxu0 %v15482_v44  ;;  %v6384_v44 = vand.u32 15, %v20665_v43 }
 0x821   :  { %6241 = vmatprep.mubr.bf16.mxu0 %v15483_v54  ;;  %v18320_v54 = vadd.s32 64, %v16058_v53 }
 0x828   :  { %6242 = vmatmul.mubr.bf16.gmra.mrb[92].mxu0 %v15485_v12  ;;  %v20666_v12 = vld [vmem:[#allocation5_spill] sm:$0xff] }
 0x829   :  { %6249 = vmatprep.mubr.bf16.mxu0 %v15486_v39  ;;  %v6377_v39 = vand.u32 15, %v20666_v12 }
 0x830   :  { %6250 = vmatmul.mubr.bf16.gmra.mrb[96].mxu0 %v15488_v62 }
 0x831   :  { %6257 = vmatprep.mubr.bf16.mxu0 %v15489_v33 }
 0x838   :  { %6258 = vmatmul.mubr.bf16.gmra.mrb[100].mxu0 %v15491_v60 }
 0x839   :  { %6265 = vmatprep.mubr.bf16.mxu0 %v15492_v46 }
 0x840   :  { %6266 = vmatmul.mubr.bf16.gmra.mrb[104].mxu0 %v15494_v37 }
 0x841   :  { %6273 = vmatprep.mubr.bf16.mxu0 %v15495_v8 }
 0x848   :  { %6274 = vmatmul.mubr.bf16.gmra.mrb[108].mxu0 %v15497_v50 }
 0x849   :  { %6281 = vmatprep.mubr.bf16.mxu0 %v15498_v15 }
 0x850   :  { %6282 = vmatmul.mubr.bf16.gmra.mrb[112].mxu0 %v15500_v51 }
 0x851   :  { %6289 = vmatprep.mubr.bf16.mxu0 %v15501_v23 }
 0x858   :  { %6290 = vmatmul.mubr.bf16.gmra.mrb[116].mxu0 %v15503_v63 }
 0x859   :  { %6297 = vmatprep.mubr.bf16.mxu0 %v15504_v22 }
 0x860   :  { %6298 = vmatmul.mubr.bf16.gmra.mrb[120].mxu0 %v15506_v6 }
 0x861   :  { %6305 = vmatprep.mubr.bf16.mxu0 %v15507_v55 }
 0x868   :  { %6306 = vmatmul.mubr.bf16.gmra.mrb[124].mxu0 %v15509_v24  ;;  %v18348_v24 = vld [vmem:[%s20403_s18 + $0x68] sm:$0xff]  }
 0x8c3   :  { %v13020_v56 = vpop.f32.mrb[64].mxu0 }
 0x8c4   :  { %v13021_v38 = vpop.f32.mrb[65].mxu0 }
 0x8c5   :  { %v18268_v5 = vadd.f32 %v13021_v38, %v13020_v56  ;;  %v13023_v26 = vpop.f32.mrb[66].mxu0 }
 0x8c6   :  { %v13024_v16 = vpop.f32.mrb[67].mxu0 }
 0x8c7   :  { %v6752_v0 = vrot.slane %v18268_v5, 7  ;;  %v13025_v29 = vadd.f32 %v13024_v16, %v13023_v26  ;;  %v20424_v9 = vrot.slane %v18268_v5, 1 }
 0x8c9   :  { %v6841_v35 = vsel %vm20650_vm10, 0.0, %v6752_v0  ;;  %v6753_v2 = vrot.slane %v13025_v29, 7  ;;  %v18285_v14 = vpack.c.bf16 %v13025_v29, %v18268_v5  ;;  %v7001_v32 = vrot.slane %v13025_v29, 1 }
 0x8ca   :  { %v6938_v42 = vsel %vm18275_vm12, %v6841_v35, 0.0  ;;  %v7243_v21 = vsel %vm18271_vm2, %v6841_v35, 0.0  ;;  %vm18358_vm10 = vcmp.ge.s32.totalorder %v6384_v44, 1  ;;  %v6398_v35 = vand.u32 15, %v18320_v54 }
 0x8cb   :  { %v13026_v34 = vpop.f32.mrb[68].mxu0  ;;  %14286 = vmatprep.mubr.msk.bf16.mxu0 %vm20652_vm3, %v18285_v14  ;;  %v6754_v28 = vsel %vm20653_vm13, %v6752_v0, %v6753_v2  ;;  %v7002_v30 = vsel %vm20654_vm0, %v20424_v9, %v7001_v32  ;;  %vm18363_vm3 = vcmp.lt.s32.totalorder %v6377_v39, 15  ;;  %vm20682_vm13 = vmmov %vm20654_vm0 }
 0x8cc   :  { %v13027_v58 = vpop.f32.mrb[69].mxu0  ;;  %v18299_v47 = vpack.c.bf16 %v6754_v28, %v6938_v42  ;;  %v18301_v11 = vpack.c.bf16 %v6754_v28, %v7243_v21  ;;  %v20680_v42 = vld [vmem:[#allocation7_spill] sm:$0xff] }
 0x8cd   :  { %v13028_v48 = vadd.f32 %v13027_v58, %v13026_v34  ;;  %v13029_v3 = vpop.f32.mrb[70].mxu0  ;;  %v6391_v21 = vand.u32 15, %v20680_v42 }
 0x8ce   :  { %20655 = vst [vmem:[#allocation3_spill] sm:$0xff] %v18299_v47  ;;  %20656 = vst [vmem:[#allocation8_spill] sm:$0xff] %v18301_v11  ;;  %v13030_v61 = vpop.f32.mrb[71].mxu0  ;;  %14116 = vmatprep.mubr.msk.bf16.mxu1 %vm20660_vm8, %v18301_v11 }
 0x8cf   :  { %v6755_v25 = vrot.slane %v13028_v48, 7  ;;  %v7003_v7 = vrot.slane %v13028_v48, 1  ;;  %v13031_v36 = vadd.f32 %v13030_v61, %v13029_v3  ;;  %vm20684_vm8 = vmmov %vm20675_vm4 }
 0x8d1   :  { %v6756_v62 = vsel %vm20667_vm5, %v6753_v2, %v6755_v25  ;;  %v7004_v33 = vsel %vm20668_vm6, %v7001_v32, %v7003_v7  ;;  %v6757_v60 = vrot.slane %v13031_v36, 7  ;;  %v18325_v46 = vpack.c.bf16 %v13031_v36, %v13028_v48 }
 0x8d2   :  { %v7191_v37 = vsel %vm18310_vm15, %v7004_v33, 0.0  ;;  %v7245_v8 = vsel %vm18275_vm12, %v6756_v62, 0.0  ;;  %v7005_v50 = vrot.slane %v13031_v36, 1  ;;  %v7298_v15 = vsel %vm18304_vm14, %v7004_v33, 0.0 }
 0x8d3   :  { %v18333_v51 = vpack.c.bf16 %v7191_v37, %v7002_v30  ;;  %v6758_v23 = vsel %vm20669_vm7, %v6755_v25, %v6757_v60  ;;  %v13032_v63 = vpop.f32.mrb[72].mxu0  ;;  %14287 = vmatmul.mubr.msk.bf16.vlgmr.msra.gmra.mrb[128].mxu0 %vm20670_vm9, %v18325_v46  ;;  %v18338_v22 = vpack.c.bf16 %v7298_v15, %v7002_v30  ;;  %v6940_v1 = vsel %vm18314_vm1, %v6756_v62, 0.0 }
 0x8d4   :  { %v7006_v45 = vsel %vm20671_vm11, %v7003_v7, %v7005_v50  ;;  %v18343_v6 = vpack.c.bf16 %v6758_v23, %v7245_v8  ;;  %v13033_v55 = vpop.f32.mrb[73].mxu0  ;;  %14319 = vmatpush3.bf16.msra.mxu0 %v15513_v4  ;;  %v18350_v56 = vpack.c.bf16 %v6758_v23, %v6940_v1  ;;  %v7347_v10 = vsel %vm18271_vm2, %v6756_v62, 0.0  ;;  %vm20681_vm2 = vmmov %vm20667_vm5 }
 0x8d5   :  { %v13034_v17 = vadd.f32 %v13033_v55, %v13032_v63  ;;  %v13035_v38 = vpop.f32.mrb[74].mxu0  ;;  %v18354_v26 = vpack.c.bf16 %v6758_v23, %v7347_v10  ;;  %v18369_v2 = vadd.s32 80, %v16058_v53  ;;  %v18374_v32 = vadd.s32 72, %v16058_v53  ;;  %vm20683_vm0 = vmmov %vm20681_vm2 }
 0x8d6   :  { %20672 = vst [vmem:[#allocation4_spill] sm:$0xff] %v18343_v6  ;;  %20673 = vst [vmem:[#allocation6_spill] sm:$0xff] %v18350_v56  ;;  %v13036_v16 = vpop.f32.mrb[75].mxu0  ;;  %14117 = vmatmul.mubr.msk.bf16.vlgmr.msra.gmra.mrb[68].mxu1 %vm20675_vm4, %v18343_v6  ;;  %vm18414_vm7 = vcmp.lt.s32.totalorder %v6391_v21, 15  ;;  %v18420_v1 = vadd.s32 96, %v16058_v53  ;;  %v18424_v10 = vadd.s32 88, %v16058_v53 }
 0x8d7   :  { %20674 = vst [vmem:[#allocation5_spill] sm:$0xff] %v18354_v26  ;;  %v6759_v29 = vrot.slane %v13034_v17, 7  ;;  %v7007_v4 = vrot.slane %v13034_v17, 1  ;;  %v13037_v59 = vadd.f32 %v13036_v16, %v13035_v38  ;;  %14149 = vmatpush3.bf16.msra.mxu1 %v18263_v20  ;;  %vm20685_vm5 = vmmov %vm20668_vm6  ;;  %vm18408_vm6 = vcmp.ge.s32.totalorder %v6398_v35, 1 }
 0x8d8   :  { %14182 = vmatprep.subr.bf16.mxu1 %v18348_v24  ;;  %v6412_v63 = vand.u32 15, %v18369_v2  ;;  %v6405_v55 = vand.u32 15, %v18374_v32  ;;  %vm20695_vm9 = vmmov %vm20683_vm0  ;;  %v6426_v49 = vand.u32 15, %v18420_v1 }
 0x8d9   :  { %v6760_v34 = vsel %vm20681_vm2, %v6757_v60, %v6759_v29  ;;  %v7008_v20 = vsel %vm20682_vm13, %v7005_v50, %v7007_v4  ;;  %v6761_v57 = vrot.slane %v13037_v59, 7  ;;  %v18378_v13 = vpack.c.bf16 %v13037_v59, %v13034_v17  ;;  %vm20696_vm11 = vmmov %vm20685_vm5 }
 0x8da   :  { %v7300_v28 = vsel %vm18310_vm15, %v7008_v20, 0.0  ;;  %v7349_v30 = vsel %vm18275_vm12, %v6760_v34, 0.0  ;;  %v7009_v58 = vrot.slane %v13037_v59, 1  ;;  %v7247_v27 = vsel %vm18314_vm1, %v6760_v34, 0.0  ;;  %vm20689_vm12 = vmmov %vm20675_vm4 }
 0x8db   :  { %v18386_v52 = vpack.c.bf16 %v7300_v28, %v7006_v45  ;;  %v6762_v48 = vsel %vm20683_vm0, %v6759_v29, %v6761_v57  ;;  %v13038_v3 = vpop.f32.mrb[76].mxu0  ;;  %14290 = vmatprep.mubr.msk.bf16.mxu0 %vm20684_vm8, %v18378_v13  ;;  %v7193_v61 = vsel %vm18363_vm3, %v7008_v20, 0.0  ;;  %v6942_v25 = vsel %vm18358_vm10, %v6760_v34, 0.0  ;;  %vm20698_vm4 = vmmov %vm20683_vm0 }
 0x8dc   :  { %v7010_v31 = vsel %vm20685_vm5, %v7007_v4, %v7009_v58  ;;  %v18396_v7 = vpack.c.bf16 %v6762_v48, %v7349_v30  ;;  %v13039_v36 = vpop.f32.mrb[77].mxu0  ;;  %v18398_v43 = vpack.c.bf16 %v6762_v48, %v7247_v27  ;;  %v18400_v44 = vpack.c.bf16 %v7193_v61, %v7006_v45  ;;  %vm20699_vm2 = vmmov %vm20684_vm8 }
 0x8dd   :  { %v13040_v54 = vadd.f32 %v13039_v36, %v13038_v3  ;;  %v13041_v12 = vpop.f32.mrb[78].mxu0  ;;  %v18402_v39 = vpack.c.bf16 %v6762_v48, %v6942_v25  ;;  %v7395_v62 = vsel %vm18304_vm14, %v7008_v20, 0.0  ;;  %vm20704_vm13 = vmmov %vm20699_vm2  ;;  %vm18458_vm0 = vcmp.ge.s32.totalorder %v6412_v63, 1 }
 0x8de   :  { %20686 = vst [vmem:[#allocation7_spill] sm:$0xff] %v18396_v7  ;;  %20687 = vst [vmem:[#allocation9_spill] sm:$0xff] %v18398_v43  ;;  %v13042_v33 = vpop.f32.mrb[79].mxu0  ;;  %14120 = vmatprep.mubr.msk.bf16.mxu1 %vm20689_vm12, %v18398_v43  ;;  %v18412_v37 = vpack.c.bf16 %v7395_v62, %v7006_v45  ;;  %vm18464_vm8 = vcmp.lt.s32.totalorder %v6405_v55, 15 }
 0x8df   :  { %20688 = vst [vmem:[#allocation10_spill] sm:$0xff] %v18402_v39  ;;  %v6763_v8 = vrot.slane %v13040_v54, 7  ;;  %v7011_v50 = vrot.slane %v13040_v54, 1  ;;  %v13043_v15 = vadd.f32 %v13042_v33, %v13041_v12  ;;  %v18470_v33 = vadd.s32 112, %v16058_v53 }
 0x8e0   :  { %20692 = vst [vmem:[#allocation11_spill] sm:$0xff] %v18412_v37 }
 0x8e1   :  { %v6764_v45 = vsel %vm20695_vm9, %v6761_v57, %v6763_v8  ;;  %v7012_v17 = vsel %vm20696_vm11, %v7009_v58, %v7011_v50  ;;  %v6765_v38 = vrot.slane %v13043_v15, 7  ;;  %v18428_v16 = vpack.c.bf16 %v13043_v15, %v13040_v54  ;;  %vm20712_vm9 = vmmov %vm20699_vm2 }
 0x8e2   :  { %v7397_v29 = vsel %vm18310_vm15, %v7012_v17, 0.0  ;;  %v7013_v4 = vrot.slane %v13043_v15, 1  ;;  %v7249_v59 = vsel %vm18358_vm10, %v6764_v45, 0.0  ;;  %v7195_v35 = vsel %vm18414_vm7, %v7012_v17, 0.0  ;;  %vm20700_vm15 = vmmov %vm20685_vm5 }
 0x8e3   :  { %v18436_v2 = vpack.c.bf16 %v7397_v29, %v7010_v31  ;;  %v6766_v42 = vsel %vm20698_vm4, %v6763_v8, %v6765_v38  ;;  %v13044_v21 = vpop.f32.mrb[80].mxu0  ;;  %14291 = vmatmul.mubr.msk.bf16.gmra.mrb[132].mxu0 %vm20699_vm2, %v18428_v16  ;;  %v18441_v32 = vpack.c.bf16 %v7195_v35, %v7010_v31  ;;  %v7302_v41 = vsel %vm18363_vm3, %v7012_v17, 0.0  ;;  %vm20714_vm11 = vmmov %vm20685_vm5 }
 0x8e4   :  { %v7014_v34 = vsel %vm20700_vm15, %v7011_v50, %v7013_v4  ;;  %v13045_v20 = vpop.f32.mrb[81].mxu0  ;;  %v18446_v57 = vpack.c.bf16 %v6766_v42, %v7249_v59  ;;  %v18448_v28 = vpack.c.bf16 %v7302_v41, %v7010_v31  ;;  %v6944_v30 = vsel %vm18408_vm6, %v6764_v45, 0.0  ;;  %vm20725_vm15 = vmmov %vm20685_vm5 }
 0x8e5   :  { %20697 = vst [vmem:[#allocation12_spill] sm:$0xff] %v18436_v2  ;;  %v13046_v58 = vadd.f32 %v13045_v20, %v13044_v21  ;;  %v13047_v27 = vpop.f32.mrb[82].mxu0  ;;  %v18452_v48 = vpack.c.bf16 %v6766_v42, %v6944_v30  ;;  %v7351_v3 = vsel %vm18314_vm1, %v6764_v45, 0.0  ;;  %v6419_v8 = vand.u32 15, %v18424_v10  ;;  %vm20710_vm1 = vmmov %vm20698_vm4 }
 0x8e6   :  { %20701 = vst [vmem:[#allocation13_spill] sm:$0xff] %v18446_v57  ;;  %20702 = vst [vmem:[#allocation14_spill] sm:$0xff] %v18448_v28  ;;  %v13048_v61 = vpop.f32.mrb[83].mxu0  ;;  %14121 = vmatmul.mubr.msk.bf16.gmra.mrb[72].mxu1 %vm20704_vm13, %v18446_v57  ;;  %v18462_v31 = vpack.c.bf16 %v6766_v42, %v7351_v3  ;;  %v18474_v50 = vadd.s32 104, %v16058_v53  ;;  %v6440_v0 = vand.u32 15, %v18470_v33 }
 0x8e7   :  { %20703 = vst [vmem:[#allocation15_spill] sm:$0xff] %v18452_v48  ;;  %v6767_v36 = vrot.slane %v13046_v58, 7  ;;  %v7015_v54 = vrot.slane %v13046_v58, 1  ;;  %v13049_v12 = vadd.f32 %v13048_v61, %v13047_v27  ;;  %vm20711_vm12 = vmmov %vm20710_vm1 }
 0x8e8   :  { %20707 = vst [vmem:[#allocation16_spill] sm:$0xff] %v18462_v31  ;;  %vm20718_vm4 = vmmov %vm20699_vm2  ;;  %vm18508_vm2 = vcmp.ge.s32.totalorder %v6426_v49, 1  ;;  %v18524_v49 = vadd.s32 120, %v16058_v53 }
 0x8e9   :  { %v6768_v15 = vsel %vm20710_vm1, %v6765_v38, %v6767_v36  ;;  %v7016_v63 = vsel %vm20685_vm5, %v7013_v4, %v7015_v54  ;;  %v6769_v45 = vrot.slane %v13049_v12, 7  ;;  %v18478_v17 = vpack.c.bf16 %v13049_v12, %v13046_v58  ;;  %vm20726_vm13 = vmmov %vm20710_vm1 }
 0x8ea   :  { %v7017_v55 = vrot.slane %v13049_v12, 1  ;;  %v7251_v29 = vsel %vm18408_vm6, %v6768_v15, 0.0  ;;  %v7197_v1 = vsel %vm18464_vm8, %v7016_v63, 0.0  ;;  %v7304_v10 = vsel %vm18414_vm7, %v7016_v63, 0.0 }
 0x8eb   :  { %v6770_v59 = vsel %vm20711_vm12, %v6767_v36, %v6769_v45  ;;  %v13050_v35 = vpop.f32.mrb[84].mxu0  ;;  %14294 = vmatprep.mubr.msk.bf16.mxu0 %vm20712_vm9, %v18478_v17  ;;  %v18489_v38 = vpack.c.bf16 %v7197_v1, %v7014_v34  ;;  %v18491_v4 = vpack.c.bf16 %v7304_v10, %v7014_v34  ;;  %v6946_v42 = vsel %vm18458_vm0, %v6768_v15, 0.0  ;;  %v18665_v10 = vld [vmem:[%s20403_s18 + $0x60] sm:$0xff]  }
 0x8ec   :  { %v7018_v21 = vsel %vm20714_vm11, %v7015_v54, %v7017_v55  ;;  %v13051_v41 = vpop.f32.mrb[85].mxu0  ;;  %v18496_v20 = vpack.c.bf16 %v6770_v59, %v7251_v29  ;;  %v18498_v30 = vpack.c.bf16 %v6770_v59, %v6946_v42  ;;  %v7399_v58 = vsel %vm18363_vm3, %v7016_v63, 0.0  ;;  %vm20739_vm11 = vmmov %vm20685_vm5  ;;  %14352 = vmatprep.subr.bf16.mxu0 %v18665_v10 }
 0x8ed   :  { %20713 = vst [vmem:[#allocation17_spill] sm:$0xff] %v18491_v4  ;;  %v13052_v27 = vadd.f32 %v13051_v41, %v13050_v35  ;;  %v13053_v3 = vpop.f32.mrb[86].mxu0  ;;  %v18502_v61 = vpack.c.bf16 %v7399_v58, %v7014_v34  ;;  %v7353_v36 = vsel %vm18358_vm10, %v6768_v15, 0.0  ;;  %vm18514_vm3 = vcmp.lt.s32.totalorder %v6419_v8, 15  ;;  %vm20724_vm10 = vmmov %vm20710_vm1 }
 0x8ee   :  { %20715 = vst [vmem:[#allocation18_spill] sm:$0xff] %v18496_v20  ;;  %20716 = vst [vmem:[#allocation19_spill] sm:$0xff] %v18498_v30  ;;  %v13054_v12 = vpop.f32.mrb[87].mxu0  ;;  %14124 = vmatprep.mubr.msk.bf16.mxu1 %vm20718_vm4, %v18496_v20  ;;  %v18512_v29 = vpack.c.bf16 %v6770_v59, %v7353_v36  ;;  %v18520_v34 = vadd.s32 128, %v16058_v53  ;;  %v6433_v15 = vand.u32 15, %v18474_v50  ;;  %vm18558_vm9 = vcmp.ge.s32.totalorder %v6440_v0, 1 }
 0x8ef   :  { %20717 = vst [vmem:[#allocation20_spill] sm:$0xff] %v18502_v61  ;;  %v6771_v1 = vrot.slane %v13052_v27, 7  ;;  %v7019_v19 = vrot.slane %v13052_v27, 1  ;;  %v13055_v63 = vadd.f32 %v13054_v12, %v13053_v3  ;;  %vm20727_vm1 = vmmov %vm20718_vm4  ;;  %v18574_v0 = vadd.s32 136, %v16058_v53 }
 0x8f0   :  { %20721 = vst [vmem:[#allocation21_spill] sm:$0xff] %v18512_v29  ;;  %vm20732_vm12 = vmmov %vm20727_vm1  ;;  %v6454_v60 = vand.u32 15, %v18520_v34 }
 0x8f1   :  { %v6772_v59 = vsel %vm20724_vm10, %v6769_v45, %v6771_v1  ;;  %v7020_v35 = vsel %vm20725_vm15, %v7017_v55, %v7019_v19  ;;  %v6773_v42 = vrot.slane %v13055_v63, 7  ;;  %v18528_v41 = vpack.c.bf16 %v13055_v63, %v13052_v27  ;;  %vm20743_vm15 = vmmov %vm20685_vm5 }
 0x8f2   :  { %v7021_v8 = vrot.slane %v13055_v63, 1  ;;  %v7253_v58 = vsel %vm18458_vm0, %v6772_v59, 0.0  ;;  %v7199_v33 = vsel %vm18514_vm3, %v7020_v35, 0.0  ;;  %v7306_v50 = vsel %vm18464_vm8, %v7020_v35, 0.0 }
 0x8f3   :  { %v6774_v3 = vsel %vm20726_vm13, %v6771_v1, %v6773_v42  ;;  %v13056_v36 = vpop.f32.mrb[88].mxu0  ;;  %14295 = vmatmul.mubr.msk.bf16.gmra.mrb[136].mxu0 %vm20727_vm1, %v18528_v41  ;;  %v18539_v45 = vpack.c.bf16 %v7199_v33, %v7018_v21  ;;  %v18541_v55 = vpack.c.bf16 %v7306_v50, %v7018_v21  ;;  %v6948_v27 = vsel %vm18508_vm2, %v6772_v59, 0.0  ;;  %vm20747_vm13 = vmmov %vm20727_vm1 }
 0x8f4   :  { %v7022_v12 = vsel %vm20685_vm5, %v7019_v19, %v7021_v8  ;;  %v13057_v63 = vpop.f32.mrb[89].mxu0  ;;  %v18546_v9 = vpack.c.bf16 %v6774_v3, %v7253_v58  ;;  %v18548_v29 = vpack.c.bf16 %v6774_v3, %v6948_v27  ;;  %v7401_v1 = vsel %vm18414_vm7, %v7020_v35, 0.0 }
 0x8f5   :  { %20728 = vst [vmem:[#allocation22_spill] sm:$0xff] %v18541_v55  ;;  %v13058_v31 = vadd.f32 %v13057_v63, %v13056_v36  ;;  %v13059_v7 = vpop.f32.mrb[90].mxu0  ;;  %v18552_v26 = vpack.c.bf16 %v7401_v1, %v7018_v21  ;;  %v7355_v33 = vsel %vm18408_vm6, %v6772_v59, 0.0  ;;  %vm18564_vm7 = vcmp.lt.s32.totalorder %v6433_v15, 15  ;;  %vm20738_vm6 = vmmov %vm20724_vm10 }
 0x8f6   :  { %20729 = vst [vmem:[#allocation23_spill] sm:$0xff] %v18546_v9  ;;  %20730 = vst [vmem:[#allocation24_spill] sm:$0xff] %v18548_v29  ;;  %v13060_v50 = vpop.f32.mrb[91].mxu0  ;;  %14125 = vmatmul.mubr.msk.bf16.gmra.mrb[76].mxu1 %vm20732_vm12, %v18546_v9  ;;  %v18562_v58 = vpack.c.bf16 %v6774_v3, %v7355_v33  ;;  %v18570_v21 = vadd.s32 144, %v16058_v53  ;;  %v6447_v59 = vand.u32 15, %v18524_v49  ;;  %v18726_v19 = vadd.s32 192, %v16058_v53 }
 0x8f7   :  { %20731 = vst [vmem:[#allocation25_spill] sm:$0xff] %v18552_v26  ;;  %v6775_v27 = vrot.slane %v13058_v31, 7  ;;  %v7023_v23 = vrot.slane %v13058_v31, 1  ;;  %v13061_v35 = vadd.f32 %v13060_v50, %v13059_v7  ;;  %vm20740_vm4 = vmmov %vm20738_vm6 }
 0x8f8   :  { %20735 = vst [vmem:[#allocation26_spill] sm:$0xff] %v18562_v58  ;;  %vm20741_vm10 = vmmov %vm20727_vm1  ;;  %vm18608_vm1 = vcmp.ge.s32.totalorder %v6454_v60, 1  ;;  %v6468_v25 = vand.u32 15, %v18570_v21  ;;  %v18624_v60 = vadd.s32 152, %v16058_v53 }
 0x8f9   :  { %v6776_v3 = vsel %vm20738_vm6, %v6773_v42, %v6775_v27  ;;  %v7024_v63 = vsel %vm20739_vm11, %v7021_v8, %v7023_v23  ;;  %v6777_v1 = vrot.slane %v13061_v35, 7  ;;  %v18578_v7 = vpack.c.bf16 %v13061_v35, %v13058_v31  ;;  %vm20755_vm6 = vmmov %vm20741_vm10 }
 0x8fa   :  { %v7025_v15 = vrot.slane %v13061_v35, 1  ;;  %v7255_v33 = vsel %vm18508_vm2, %v6776_v3, 0.0  ;;  %v7201_v34 = vsel %vm18564_vm7, %v7024_v63, 0.0  ;;  %v7308_v49 = vsel %vm18514_vm3, %v7024_v63, 0.0  ;;  %vm20757_vm11 = vmmov %vm20685_vm5 }
 0x8fb   :  { %v6778_v50 = vsel %vm20740_vm4, %v6775_v27, %v6777_v1  ;;  %v13062_v58 = vpop.f32.mrb[92].mxu0  ;;  %14298 = vmatprep.mubr.msk.bf16.mxu0 %vm20741_vm10, %v18578_v7  ;;  %v18589_v42 = vpack.c.bf16 %v7201_v34, %v7022_v12  ;;  %v18591_v31 = vpack.c.bf16 %v7308_v49, %v7022_v12  ;;  %v6950_v8 = vsel %vm18558_vm9, %v6776_v3, 0.0 }
 0x8fc   :  { %v7026_v35 = vsel %vm20743_vm15, %v7023_v23, %v7025_v15  ;;  %v13063_v26 = vpop.f32.mrb[93].mxu0  ;;  %v18596_v61 = vpack.c.bf16 %v6778_v50, %v7255_v33  ;;  %v18598_v2 = vpack.c.bf16 %v6778_v50, %v6950_v8  ;;  %v7403_v27 = vsel %vm18464_vm8, %v7024_v63, 0.0  ;;  %vm20768_vm15 = vmmov %vm20685_vm5 }
 0x8fd   :  { %20742 = vst [vmem:[#allocation27_spill] sm:$0xff] %v18591_v31  ;;  %v13064_v37 = vadd.f32 %v13063_v26, %v13062_v58  ;;  %v13065_v9 = vpop.f32.mrb[94].mxu0  ;;  %v18602_v20 = vpack.c.bf16 %v7403_v27, %v7022_v12  ;;  %v7357_v34 = vsel %vm18458_vm0, %v6776_v3, 0.0  ;;  %vm18614_vm8 = vcmp.lt.s32.totalorder %v6447_v59, 15  ;;  %vm20753_vm0 = vmmov %vm20740_vm4 }
 0x8fe   :  { %20744 = vst [vmem:[#allocation28_spill] sm:$0xff] %v18596_v61  ;;  %20745 = vst [vmem:[#allocation29_spill] sm:$0xff] %v18598_v2  ;;  %v13066_v49 = vpop.f32.mrb[95].mxu0  ;;  %14128 = vmatprep.mubr.msk.bf16.mxu1 %vm20747_vm13, %v18596_v61  ;;  %v18612_v33 = vpack.c.bf16 %v6778_v50, %v7357_v34  ;;  %v18620_v12 = vadd.s32 160, %v16058_v53  ;;  %v6461_v58 = vand.u32 15, %v18574_v0  ;;  %vm18658_vm10 = vcmp.ge.s32.totalorder %v6468_v25, 1 }
 0x8ff   :  { %20746 = vst [vmem:[#allocation30_spill] sm:$0xff] %v18602_v20  ;;  %v6779_v8 = vrot.slane %v13064_v37, 7  ;;  %v7027_v62 = vrot.slane %v13064_v37, 1  ;;  %v13067_v63 = vadd.f32 %v13066_v49, %v13065_v9  ;;  %vm20754_vm12 = vmmov %vm20753_vm0  ;;  %v18675_v25 = vadd.s32 176, %v16058_v53 }
 0x900   :  { %20750 = vst [vmem:[#allocation31_spill] sm:$0xff] %v18612_v33  ;;  %vm20761_vm4 = vmmov %vm20755_vm6  ;;  %v6510_v23 = vand.u32 15, %v18726_v19 }
 0x901   :  { %v6780_v3 = vsel %vm20753_vm0, %v6777_v1, %v6779_v8  ;;  %v7028_v50 = vsel %vm20685_vm5, %v7025_v15, %v7027_v62  ;;  %v6781_v27 = vrot.slane %v13067_v63, 7  ;;  %v18628_v9 = vpack.c.bf16 %v13067_v63, %v13064_v37  ;;  %vm20769_vm13 = vmmov %vm20753_vm0 }
 0x902   :  { %v7029_v59 = vrot.slane %v13067_v63, 1  ;;  %v7257_v34 = vsel %vm18558_vm9, %v6780_v3, 0.0  ;;  %v7203_v21 = vsel %vm18614_vm8, %v7028_v50, 0.0  ;;  %v7310_v0 = vsel %vm18564_vm7, %v7028_v50, 0.0 }
 0x903   :  { %v6782_v49 = vsel %vm20754_vm12, %v6779_v8, %v6781_v27  ;;  %v13068_v33 = vpop.f32.mrb[96].mxu0  ;;  %14299 = vmatmul.mubr.msk.bf16.gmra.mrb[140].mxu0 %vm20755_vm6, %v18628_v9  ;;  %v18639_v1 = vpack.c.bf16 %v7203_v21, %v7026_v35  ;;  %v18641_v37 = vpack.c.bf16 %v7310_v0, %v7026_v35  ;;  %v6952_v15 = vsel %vm18608_vm1, %v6780_v3, 0.0 }
 0x904   :  { %v7030_v63 = vsel %vm20757_vm11, %v7027_v62, %v7029_v59  ;;  %v13069_v20 = vpop.f32.mrb[97].mxu0  ;;  %v18646_v61 = vpack.c.bf16 %v6782_v49, %v7257_v34  ;;  %v18648_v57 = vpack.c.bf16 %v6782_v49, %v6952_v15  ;;  %v7405_v8 = vsel %vm18514_vm3, %v7028_v50, 0.0  ;;  %vm20782_vm11 = vmmov %vm20685_vm5 }
 0x905   :  { %20756 = vst [vmem:[#allocation32_spill] sm:$0xff] %v18641_v37  ;;  %v13070_v43 = vadd.f32 %v13069_v20, %v13068_v33  ;;  %v13071_v6 = vpop.f32.mrb[98].mxu0  ;;  %v18652_v11 = vpack.c.bf16 %v7405_v8, %v7026_v35  ;;  %v7359_v21 = vsel %vm18508_vm2, %v6780_v3, 0.0  ;;  %vm18669_vm3 = vcmp.lt.s32.totalorder %v6461_v58, 15  ;;  %vm20767_vm2 = vmmov %vm20753_vm0 }
 0x906   :  { %20758 = vst [vmem:[#allocation33_spill] sm:$0xff] %v18646_v61  ;;  %20759 = vst [vmem:[#allocation34_spill] sm:$0xff] %v18648_v57  ;;  %v13072_v0 = vpop.f32.mrb[99].mxu0  ;;  %14129 = vmatmul.mubr.msk.bf16.gmra.mrb[80].mxu1 %vm20761_vm4, %v18646_v61  ;;  %v18667_v20 = vpack.c.bf16 %v6782_v49, %v7359_v21  ;;  %v6482_v3 = vand.u32 15, %v18620_v12  ;;  %v6475_v34 = vand.u32 15, %v18624_v60  ;;  %v18680_v15 = vadd.s32 168, %v16058_v53 }
 0x907   :  { %20760 = vst [vmem:[#allocation35_spill] sm:$0xff] %v18652_v11  ;;  %v6783_v35 = vrot.slane %v13070_v43, 7  ;;  %v7031_v33 = vrot.slane %v13070_v43, 1  ;;  %v13073_v50 = vadd.f32 %v13072_v0, %v13071_v6  ;;  %vm20770_vm0 = vmmov %vm20761_vm4 }
 0x908   :  { %20764 = vst [vmem:[#allocation36_spill] sm:$0xff] %v18667_v20  ;;  %vm20775_vm12 = vmmov %vm20770_vm0  ;;  %vm18714_vm6 = vcmp.ge.s32.totalorder %v6482_v3, 1  ;;  %v18730_v3 = vadd.s32 184, %v16058_v53 }
 0x909   :  { %v6784_v49 = vsel %vm20767_vm2, %v6781_v27, %v6783_v35  ;;  %v7032_v6 = vsel %vm20768_vm15, %v7029_v59, %v7031_v33  ;;  %v6785_v58 = vrot.slane %v13073_v50, 7  ;;  %v18684_v8 = vpack.c.bf16 %v13073_v50, %v13070_v43  ;;  %vm20783_vm4 = vmmov %vm20767_vm2 }
 0x90a   :  { %v7033_v21 = vrot.slane %v13073_v50, 1  ;;  %v7259_v12 = vsel %vm18608_vm1, %v6784_v49, 0.0  ;;  %v7205_v0 = vsel %vm18669_vm3, %v7032_v6, 0.0  ;;  %v7312_v60 = vsel %vm18614_vm8, %v7032_v6, 0.0  ;;  %vm20786_vm15 = vmmov %vm20685_vm5 }
 0x90b   :  { %v6786_v20 = vsel %vm20769_vm13, %v6783_v35, %v6785_v58  ;;  %v13074_v11 = vpop.f32.mrb[100].mxu0  ;;  %14302 = vmatprep.mubr.msk.bf16.mxu0 %vm20770_vm0, %v18684_v8  ;;  %v18695_v27 = vpack.c.bf16 %v7205_v0, %v7030_v63  ;;  %v18697_v43 = vpack.c.bf16 %v7312_v60, %v7030_v63  ;;  %v6954_v59 = vsel %vm18658_vm10, %v6784_v49, 0.0  ;;  %vm20790_vm13 = vmmov %vm20770_vm0 }
 0x90c   :  { %v7034_v50 = vsel %vm20685_vm5, %v7031_v33, %v7033_v21  ;;  %v13075_v61 = vpop.f32.mrb[101].mxu0  ;;  %v18702_v57 = vpack.c.bf16 %v6786_v20, %v7259_v12  ;;  %v18704_v2 = vpack.c.bf16 %v6786_v20, %v6954_v59  ;;  %v7407_v35 = vsel %vm18564_vm7, %v7032_v6, 0.0 }
 0x90d   :  { %20771 = vst [vmem:[#allocation37_spill] sm:$0xff] %v18697_v43  ;;  %v13076_v29 = vadd.f32 %v13075_v61, %v13074_v11  ;;  %v13077_v30 = vpop.f32.mrb[102].mxu0  ;;  %v18708_v37 = vpack.c.bf16 %v7407_v35, %v7030_v63  ;;  %v7361_v0 = vsel %vm18558_vm9, %v6784_v49, 0.0  ;;  %vm18720_vm7 = vcmp.lt.s32.totalorder %v6475_v34, 15  ;;  %vm20781_vm9 = vmmov %vm20767_vm2 }
 0x90e   :  { %20772 = vst [vmem:[#allocation38_spill] sm:$0xff] %v18702_v57  ;;  %20773 = vst [vmem:[#allocation39_spill] sm:$0xff] %v18704_v2  ;;  %v13078_v60 = vpop.f32.mrb[103].mxu0  ;;  %14132 = vmatprep.mubr.msk.bf16.mxu1 %vm20775_vm12, %v18702_v57  ;;  %v18718_v12 = vpack.c.bf16 %v6786_v20, %v7361_v0  ;;  %v6496_v61 = vand.u32 15, %v18675_v25  ;;  %v6489_v63 = vand.u32 15, %v18680_v15  ;;  %v18875_v33 = vadd.s32 232, %v16058_v53 }
 0x90f   :  { %20774 = vst [vmem:[#allocation40_spill] sm:$0xff] %v18708_v37  ;;  %v6787_v59 = vrot.slane %v13076_v29, 7  ;;  %v7035_v36 = vrot.slane %v13076_v29, 1  ;;  %v13079_v6 = vadd.f32 %v13078_v60, %v13077_v30  ;;  %vm20784_vm2 = vmmov %vm20770_vm0 }
 0x910   :  { %20778 = vst [vmem:[#allocation41_spill] sm:$0xff] %v18718_v12  ;;  %vm18764_vm0 = vcmp.ge.s32.totalorder %v6496_v61, 1  ;;  %v18780_v61 = vadd.s32 200, %v16058_v53 }
 0x911   :  { %v6788_v20 = vsel %vm20781_vm9, %v6785_v58, %v6787_v59  ;;  %v7036_v49 = vsel %vm20782_vm11, %v7033_v21, %v7035_v36  ;;  %v6789_v35 = vrot.slane %v13079_v6, 7  ;;  %v18734_v30 = vpack.c.bf16 %v13079_v6, %v13076_v29  ;;  %vm20798_vm9 = vmmov %vm20784_vm2 }
 0x912   :  { %v7037_v34 = vrot.slane %v13079_v6, 1  ;;  %v7261_v0 = vsel %vm18658_vm10, %v6788_v20, 0.0  ;;  %v7207_v25 = vsel %vm18720_vm7, %v7036_v49, 0.0  ;;  %v7314_v15 = vsel %vm18669_vm3, %v7036_v49, 0.0  ;;  %vm20800_vm11 = vmmov %vm20685_vm5 }
 0x913   :  { %v6790_v60 = vsel %vm20783_vm4, %v6787_v59, %v6789_v35  ;;  %v13080_v12 = vpop.f32.mrb[104].mxu0  ;;  %14303 = vmatmul.mubr.msk.bf16.gmra.mrb[144].mxu0 %vm20784_vm2, %v18734_v30  ;;  %v18745_v58 = vpack.c.bf16 %v7207_v25, %v7034_v50  ;;  %v18747_v29 = vpack.c.bf16 %v7314_v15, %v7034_v50  ;;  %v6956_v21 = vsel %vm18714_vm6, %v6788_v20, 0.0 }
 0x914   :  { %v7038_v6 = vsel %vm20786_vm15, %v7035_v36, %v7037_v34  ;;  %v13081_v37 = vpop.f32.mrb[105].mxu0  ;;  %v18752_v57 = vpack.c.bf16 %v6790_v60, %v7261_v0  ;;  %v18754_v2 = vpack.c.bf16 %v6790_v60, %v6956_v21  ;;  %v7409_v59 = vsel %vm18614_vm8, %v7036_v49, 0.0  ;;  %vm20811_vm15 = vmmov %vm20685_vm5 }
 0x915   :  { %20785 = vst [vmem:[#allocation42_spill] sm:$0xff] %v18747_v29  ;;  %v13082_v43 = vadd.f32 %v13081_v37, %v13080_v12  ;;  %v13083_v31 = vpop.f32.mrb[106].mxu0  ;;  %v18758_v48 = vpack.c.bf16 %v7409_v59, %v7034_v50  ;;  %v7363_v25 = vsel %vm18608_vm1, %v6788_v20, 0.0  ;;  %vm18770_vm8 = vcmp.lt.s32.totalorder %v6489_v63, 15  ;;  %vm20796_vm1 = vmmov %vm20783_vm4 }
 0x916   :  { %20787 = vst [vmem:[#allocation43_spill] sm:$0xff] %v18752_v57  ;;  %20788 = vst [vmem:[#allocation44_spill] sm:$0xff] %v18754_v2  ;;  %v13084_v15 = vpop.f32.mrb[107].mxu0  ;;  %14133 = vmatmul.mubr.msk.bf16.gmra.mrb[84].mxu1 %vm20790_vm13, %v18752_v57  ;;  %v18768_v0 = vpack.c.bf16 %v6790_v60, %v7363_v25  ;;  %v18776_v50 = vadd.s32 208, %v16058_v53  ;;  %v6503_v12 = vand.u32 15, %v18730_v3  ;;  %v6545_v37 = vand.u32 15, %v18875_v33 }
 0x917   :  { %20789 = vst [vmem:[#allocation45_spill] sm:$0xff] %v18758_v48  ;;  %v6791_v21 = vrot.slane %v13082_v43, 7  ;;  %v7039_v26 = vrot.slane %v13082_v43, 1  ;;  %v13085_v49 = vadd.f32 %v13084_v15, %v13083_v31  ;;  %vm20797_vm12 = vmmov %vm20796_vm1 }
 0x918   :  { %20793 = vst [vmem:[#allocation46_spill] sm:$0xff] %v18768_v0  ;;  %vm20804_vm4 = vmmov %vm20784_vm2  ;;  %vm18814_vm2 = vcmp.ge.s32.totalorder %v6510_v23, 1  ;;  %v6524_v62 = vand.u32 15, %v18776_v50  ;;  %v18830_v23 = vadd.s32 216, %v16058_v53 }
 0x919   :  { %v6792_v20 = vsel %vm20796_vm1, %v6789_v35, %v6791_v21  ;;  %v7040_v60 = vsel %vm20685_vm5, %v7037_v34, %v7039_v26  ;;  %v6793_v59 = vrot.slane %v13085_v49, 7  ;;  %v18784_v31 = vpack.c.bf16 %v13085_v49, %v13082_v43  ;;  %vm20812_vm13 = vmmov %vm20796_vm1 }
 0x91a   :  { %v7041_v63 = vrot.slane %v13085_v49, 1  ;;  %v7263_v25 = vsel %vm18714_vm6, %v6792_v20, 0.0  ;;  %v7209_v19 = vsel %vm18770_vm8, %v7040_v60, 0.0  ;;  %v7316_v3 = vsel %vm18720_vm7, %v7040_v60, 0.0 }
 0x91b   :  { %v6794_v15 = vsel %vm20797_vm12, %v6791_v21, %v6793_v59  ;;  %v13086_v0 = vpop.f32.mrb[108].mxu0  ;;  %14306 = vmatprep.mubr.msk.bf16.mxu0 %vm20798_vm9, %v18784_v31  ;;  %v18795_v35 = vpack.c.bf16 %v7209_v19, %v7038_v6  ;;  %v18797_v43 = vpack.c.bf16 %v7316_v3, %v7038_v6  ;;  %v6958_v34 = vsel %vm18764_vm0, %v6792_v20, 0.0 }
 0x91c   :  { %v7042_v49 = vsel %vm20800_vm11, %v7039_v26, %v7041_v63  ;;  %v13087_v48 = vpop.f32.mrb[109].mxu0  ;;  %v18802_v57 = vpack.c.bf16 %v6794_v15, %v7263_v25  ;;  %v18804_v2 = vpack.c.bf16 %v6794_v15, %v6958_v34  ;;  %v7411_v21 = vsel %vm18669_vm3, %v7040_v60, 0.0  ;;  %vm20825_vm11 = vmmov %vm20685_vm5 }
 0x91d   :  { %20799 = vst [vmem:[#allocation47_spill] sm:$0xff] %v18797_v43  ;;  %v13088_v29 = vadd.f32 %v13087_v48, %v13086_v0  ;;  %v13089_v39 = vpop.f32.mrb[110].mxu0  ;;  %v18808_v55 = vpack.c.bf16 %v7411_v21, %v7038_v6  ;;  %v7365_v19 = vsel %vm18658_vm10, %v6792_v20, 0.0  ;;  %vm18820_vm3 = vcmp.lt.s32.totalorder %v6503_v12, 15  ;;  %vm20810_vm10 = vmmov %vm20796_vm1 }
 0x91e   :  { %20801 = vst [vmem:[#allocation48_spill] sm:$0xff] %v18802_v57  ;;  %20802 = vst [vmem:[#allocation49_spill] sm:$0xff] %v18804_v2  ;;  %v13090_v3 = vpop.f32.mrb[111].mxu0  ;;  %14136 = vmatprep.mubr.msk.bf16.mxu1 %vm20804_vm4, %v18802_v57  ;;  %v18818_v25 = vpack.c.bf16 %v6794_v15, %v7365_v19  ;;  %v18826_v6 = vadd.s32 224, %v16058_v53  ;;  %v6517_v0 = vand.u32 15, %v18780_v61  ;;  %vm18864_vm9 = vcmp.ge.s32.totalorder %v6524_v62, 1 }
 0x91f   :  { %20803 = vst [vmem:[#allocation50_spill] sm:$0xff] %v18808_v55  ;;  %v6795_v34 = vrot.slane %v13088_v29, 7  ;;  %v7043_v54 = vrot.slane %v13088_v29, 1  ;;  %v13091_v60 = vadd.f32 %v13090_v3, %v13089_v39  ;;  %vm20813_vm1 = vmmov %vm20804_vm4  ;;  %v6531_v62 = vand.u32 15, %v18830_v23 }
 0x920   :  { %20807 = vst [vmem:[#allocation51_spill] sm:$0xff] %v18818_v25  ;;  %vm20818_vm12 = vmmov %vm20813_vm1 }
 0x921   :  { %v6796_v20 = vsel %vm20810_vm10, %v6793_v59, %v6795_v34  ;;  %v7044_v15 = vsel %vm20811_vm15, %v7041_v63, %v7043_v54  ;;  %v6797_v21 = vrot.slane %v13091_v60, 7  ;;  %v18834_v39 = vpack.c.bf16 %v13091_v60, %v13088_v29  ;;  %vm20829_vm15 = vmmov %vm20685_vm5 }
 0x922   :  { %v7045_v12 = vrot.slane %v13091_v60, 1  ;;  %v7265_v19 = vsel %vm18764_vm0, %v6796_v20, 0.0  ;;  %v7211_v50 = vsel %vm18820_vm3, %v7044_v15, 0.0  ;;  %v7318_v61 = vsel %vm18770_vm8, %v7044_v15, 0.0 }
 0x923   :  { %v6798_v3 = vsel %vm20812_vm13, %v6795_v34, %v6797_v21  ;;  %v13092_v25 = vpop.f32.mrb[112].mxu0  ;;  %14307 = vmatmul.mubr.msk.bf16.gmra.mrb[148].mxu0 %vm20813_vm1, %v18834_v39  ;;  %v18845_v59 = vpack.c.bf16 %v7211_v50, %v7042_v49  ;;  %v18847_v29 = vpack.c.bf16 %v7318_v61, %v7042_v49  ;;  %v6960_v63 = vsel %vm18814_vm2, %v6796_v20, 0.0  ;;  %vm20833_vm13 = vmmov %vm20813_vm1 }
 0x924   :  { %v7046_v60 = vsel %vm20685_vm5, %v7043_v54, %v7045_v12  ;;  %v13093_v55 = vpop.f32.mrb[113].mxu0  ;;  %v18852_v57 = vpack.c.bf16 %v6798_v3, %v7265_v19  ;;  %v18854_v2 = vpack.c.bf16 %v6798_v3, %v6960_v63  ;;  %v7413_v34 = vsel %vm18720_vm7, %v7044_v15, 0.0 }
 0x925   :  { %20814 = vst [vmem:[#allocation52_spill] sm:$0xff] %v18847_v29  ;;  %v13094_v43 = vadd.f32 %v13093_v55, %v13092_v25  ;;  %v13095_v4 = vpop.f32.mrb[114].mxu0  ;;  %v18858_v56 = vpack.c.bf16 %v7413_v34, %v7042_v49  ;;  %v7367_v50 = vsel %vm18714_vm6, %v6796_v20, 0.0  ;;  %vm18870_vm7 = vcmp.lt.s32.totalorder %v6517_v0, 15  ;;  %vm20824_vm6 = vmmov %vm20810_vm10 }
 0x926   :  { %20815 = vst [vmem:[#allocation53_spill] sm:$0xff] %v18852_v57  ;;  %20816 = vst [vmem:[#allocation54_spill] sm:$0xff] %v18854_v2  ;;  %v13096_v61 = vpop.f32.mrb[115].mxu0  ;;  %14137 = vmatmul.mubr.msk.bf16.gmra.mrb[88].mxu1 %vm20818_vm12, %v18852_v57  ;;  %v18868_v19 = vpack.c.bf16 %v6798_v3, %v7367_v50  ;;  %v18878_v49 = vadd.s32 240, %v16058_v53  ;;  %v6538_v25 = vand.u32 15, %v18826_v6 }
 0x927   :  { %20817 = vst [vmem:[#allocation55_spill] sm:$0xff] %v18858_v56  ;;  %v6799_v63 = vrot.slane %v13094_v43, 7  ;;  %v7047_v11 = vrot.slane %v13094_v43, 1  ;;  %v13097_v15 = vadd.f32 %v13096_v61, %v13095_v4  ;;  %vm20826_vm4 = vmmov %vm20824_vm6 }
 0x928   :  { %20821 = vst [vmem:[#allocation56_spill] sm:$0xff] %v18868_v19  ;;  %vm20827_vm10 = vmmov %vm20813_vm1  ;;  %vm18916_vm1 = vcmp.lt.s32.totalorder %v6531_v62, 15  ;;  %v6552_v36 = vand.u32 15, %v18878_v49 }
 0x929   :  { %v6800_v20 = vsel %vm20824_vm6, %v6797_v21, %v6799_v63  ;;  %v7048_v3 = vsel %vm20825_vm11, %v7045_v12, %v7047_v11  ;;  %v6801_v34 = vrot.slane %v13097_v15, 7  ;;  %v18884_v4 = vpack.c.bf16 %v13097_v15, %v13094_v43  ;;  %vm20840_vm12 = vmmov %vm20826_vm4 }
 0x92a   :  { %v7049_v0 = vrot.slane %v13097_v15, 1  ;;  %v7267_v50 = vsel %vm18814_vm2, %v6800_v20, 0.0  ;;  %v7213_v61 = vsel %vm18870_vm7, %v7048_v3, 0.0  ;;  %v7320_v19 = vsel %vm18820_vm3, %v7048_v3, 0.0  ;;  %vm20841_vm6 = vmmov %vm20827_vm10 }
 0x92b   :  { %v6802_v6 = vsel %vm20826_vm4, %v6799_v63, %v6801_v34  ;;  %v13098_v23 = vpop.f32.mrb[116].mxu0  ;;  %14310 = vmatprep.mubr.msk.bf16.mxu0 %vm20827_vm10, %v18884_v4  ;;  %v18895_v21 = vpack.c.bf16 %v7213_v61, %v7046_v60  ;;  %v18897_v43 = vpack.c.bf16 %v7320_v19, %v7046_v60  ;;  %v6962_v12 = vsel %vm18864_vm9, %v6800_v20, 0.0  ;;  %vm20843_vm11 = vmmov %vm20685_vm5 }
 0x92c   :  { %v7050_v15 = vsel %vm20829_vm15, %v7047_v11, %v7049_v0  ;;  %v13099_v56 = vpop.f32.mrb[117].mxu0  ;;  %v18902_v57 = vpack.c.bf16 %v6802_v6, %v7267_v50  ;;  %v18904_v2 = vpack.c.bf16 %v6802_v6, %v6962_v12  ;;  %v7415_v63 = vsel %vm18770_vm8, %v7048_v3, 0.0  ;;  %vm20839_vm8 = vmmov %vm20826_vm4 }
 0x92d   :  { %20828 = vst [vmem:[#allocation57_spill] sm:$0xff] %v18897_v43  ;;  %v13100_v29 = vadd.f32 %v13099_v56, %v13098_v23  ;;  %v13101_v47 = vpop.f32.mrb[118].mxu0  ;;  %v18908_v28 = vpack.c.bf16 %v7415_v63, %v7046_v60  ;;  %v7369_v19 = vsel %vm18764_vm0, %v6800_v20, 0.0  ;;  %v18921_v56 = vadd.s32 248, %v16058_v53  ;;  %vm20847_vm4 = vmmov %vm20841_vm6  ;;  %v15516_v60 = vld [vmem:[%s20403_s18 + $0x78] sm:$0xff]  }
 0x92e   :  { %20830 = vst [vmem:[#allocation58_spill] sm:$0xff] %v18902_v57  ;;  %20831 = vst [vmem:[#allocation59_spill] sm:$0xff] %v18904_v2  ;;  %v13102_v61 = vpop.f32.mrb[119].mxu0  ;;  %14140 = vmatprep.mubr.msk.bf16.mxu1 %vm20833_vm13, %v18902_v57  ;;  %v18914_v11 = vpack.c.bf16 %v6802_v6, %v7369_v19  ;;  %vm18925_vm0 = vcmp.ge.s32.totalorder %v6538_v25, 1  ;;  %vm18963_vm10 = vcmp.lt.s32.totalorder %v6545_v37, 15 }
 0x92f   :  { %20832 = vst [vmem:[#allocation60_spill] sm:$0xff] %v18908_v28  ;;  %v6803_v50 = vrot.slane %v13100_v29, 7  ;;  %v7051_v43 = vrot.slane %v13100_v29, 1  ;;  %v13103_v12 = vadd.f32 %v13102_v61, %v13101_v47  ;;  %v6559_v48 = vand.u32 15, %v18921_v56  ;;  %vm20854_vm15 = vmmov %vm20685_vm5 }
 0x930   :  { %20834 = vst [vmem:[#allocation61_spill] sm:$0xff] %v18914_v11 }
 0x931   :  { %v6804_v20 = vsel %vm20839_vm8, %v6801_v34, %v6803_v50  ;;  %v7052_v3 = vsel %vm20685_vm5, %v7049_v0, %v7051_v43  ;;  %v6805_v47 = vrot.slane %v13103_v12, 7  ;;  %v18931_v62 = vpack.c.bf16 %v13103_v12, %v13100_v29 }
 0x932   :  { %v7053_v6 = vrot.slane %v13103_v12, 1  ;;  %v7269_v53 = vsel %vm18864_vm9, %v6804_v20, 0.0  ;;  %v7215_v33 = vsel %vm18916_vm1, %v7052_v3, 0.0  ;;  %v7322_v49 = vsel %vm18870_vm7, %v7052_v3, 0.0 }
 0x933   :  { %v6806_v25 = vsel %vm20840_vm12, %v6803_v50, %v6805_v47  ;;  %v13104_v23 = vpop.f32.mrb[120].mxu0  ;;  %14311 = vmatmul.mubr.msk.bf16.gmra.mrb[152].mxu0 %vm20841_vm6, %v18931_v62  ;;  %v18942_v34 = vpack.c.bf16 %v7215_v33, %v7050_v15  ;;  %v18944_v29 = vpack.c.bf16 %v7322_v49, %v7050_v15  ;;  %v6964_v0 = vsel %vm18925_vm0, %v6804_v20, 0.0  ;;  %vm20859_vm12 = vmmov %vm20847_vm4 }
 0x934   :  { %v7054_v63 = vsel %vm20843_vm11, %v7051_v43, %v7053_v6  ;;  %v13105_v19 = vpop.f32.mrb[121].mxu0  ;;  %v18949_v61 = vpack.c.bf16 %v6806_v25, %v7269_v53  ;;  %v18951_v12 = vpack.c.bf16 %v6806_v25, %v6964_v0  ;;  %v7417_v50 = vsel %vm18820_vm3, %v7052_v3, 0.0  ;;  %vm20864_vm11 = vmmov %vm20685_vm5 }
 0x935   :  { %20842 = vst [vmem:[#allocation62_spill] sm:$0xff] %v18944_v29  ;;  %v13106_v11 = vadd.f32 %v13105_v19, %v13104_v23  ;;  %v13107_v28 = vpop.f32.mrb[122].mxu0  ;;  %v18955_v57 = vpack.c.bf16 %v7417_v50, %v7050_v15  ;;  %v7371_v33 = vsel %vm18814_vm2, %v6804_v20, 0.0  ;;  %vm18968_vm3 = vcmp.ge.s32.totalorder %v6552_v36, 1  ;;  %vm20853_vm2 = vmmov %vm20839_vm8 }
 0x936   :  { %20844 = vst [vmem:[#allocation63_spill] sm:$0xff] %v18949_v61  ;;  %20845 = vst [vmem:[#allocation64_spill] sm:$0xff] %v18951_v12  ;;  %v13108_v49 = vpop.f32.mrb[123].mxu0  ;;  %14141 = vmatmul.mubr.msk.bf16.gmra.mrb[92].mxu1 %vm20847_vm4, %v18949_v61  ;;  %v18961_v43 = vpack.c.bf16 %v6806_v25, %v7371_v33  ;;  %vm19006_vm6 = vcmp.lt.s32.totalorder %v6559_v48, 15 }
 0x937   :  { %20846 = vst [vmem:[#allocation65_spill] sm:$0xff] %v18955_v57  ;;  %v6807_v53 = vrot.slane %v13106_v11, 7  ;;  %v7055_v29 = vrot.slane %v13106_v11, 1  ;;  %v13109_v0 = vadd.f32 %v13108_v49, %v13107_v28  ;;  %vm20855_vm13 = vmmov %vm20853_vm2 }
 0x938   :  { %20848 = vst [vmem:[#allocation66_spill] sm:$0xff] %v18961_v43  ;;  %vm20856_vm8 = vmmov %vm20847_vm4 }
 0x939   :  { %v6808_v26 = vsel %vm20853_vm2, %v6805_v47, %v6807_v53  ;;  %v7056_v20 = vsel %vm20854_vm15, %v7053_v6, %v7055_v29  ;;  %v6809_v3 = vrot.slane %v13109_v0, 7  ;;  %v18974_v25 = vpack.c.bf16 %v13109_v0, %v13106_v11  ;;  %vm20865_vm4 = vmmov %vm20853_vm2 }
 0x93a   :  { %v7057_v23 = vrot.slane %v13109_v0, 1  ;;  %v7271_v28 = vsel %vm18925_vm0, %v6808_v26, 0.0  ;;  %v7217_v37 = vsel %vm18963_vm10, %v7056_v20, 0.0  ;;  %v7324_v56 = vsel %vm18916_vm1, %v7056_v20, 0.0  ;;  %vm20867_vm15 = vmmov %vm20865_vm4 }
 0x93b   :  { %v6810_v36 = vsel %vm20855_vm13, %v6807_v53, %v6809_v3  ;;  %v13110_v19 = vpop.f32.mrb[124].mxu0  ;;  %14314 = vmatprep.mubr.msk.bf16.mxu0 %vm20856_vm8, %v18974_v25  ;;  %v18985_v47 = vpack.c.bf16 %v7217_v37, %v7054_v63  ;;  %v18987_v11 = vpack.c.bf16 %v7324_v56, %v7054_v63  ;;  %v6966_v6 = vsel %vm18968_vm3, %v6808_v26, 0.0 }
 0x93c   :  { %v7058_v50 = vsel %vm20685_vm5, %v7055_v29, %v7057_v23  ;;  %v13111_v33 = vpop.f32.mrb[125].mxu0  ;;  %v18992_v49 = vpack.c.bf16 %v6810_v36, %v7271_v28  ;;  %v18994_v0 = vpack.c.bf16 %v6810_v36, %v6966_v6  ;;  %v7419_v53 = vsel %vm18870_vm7, %v7056_v20, 0.0  ;;  %vm20862_vm7 = vmmov %vm20685_vm5 }
 0x93d   :  { %20857 = vst [vmem:[#allocation67_spill] sm:$0xff] %v18987_v11  ;;  %v13112_v43 = vadd.f32 %v13111_v33, %v13110_v19  ;;  %v13113_v57 = vpop.f32.mrb[126].mxu0  ;;  %v18998_v61 = vpack.c.bf16 %v7419_v53, %v7054_v63  ;;  %v7373_v37 = vsel %vm18864_vm9, %v6808_v26, 0.0  ;;  %vm20863_vm9 = vmmov %vm20853_vm2 }
 0x93e   :  { %20858 = vst [vmem:[#allocation68_spill] sm:$0xff] %v18994_v0  ;;  %v13114_v56 = vpop.f32.mrb[127].mxu0  ;;  %14144 = vmatprep.mubr.msk.bf16.mxu1 %vm20859_vm12, %v18992_v49  ;;  %v19004_v29 = vpack.c.bf16 %v6810_v36, %v7373_v37  ;;  %vm20866_vm2 = vmmov %vm20856_vm8 }
 0x93f   :  { %v7059_v28 = vrot.slane %v13112_v43, 1  ;;  %v7237_v11 = vrot.slane %v13112_v43, 7  ;;  %v13115_v6 = vadd.f32 %v13114_v56, %v13113_v57  ;;  %v20451_v56 = vmov 0.0|0.0   ;;  %vm20869_vm13 = vmmov %vm20866_vm2 }
 0x940   :  { %vm20871_vm8 = vmmov %vm20866_vm2 }
 0x941   :  { %v7060_v55 = vsel %vm20862_vm7, %v7057_v23, %v7059_v28  ;;  %v7239_v63 = vrot.slane %v13115_v6, 7  ;;  %v19011_v20 = vpack.c.bf16 %v13115_v6, %v13112_v43  ;;  %v7292_v54 = vrot.slane %v13115_v6, 1 }
 0x942   :  { %v7238_v26 = vsel %vm20863_vm9, %v6809_v3, %v7237_v11  ;;  %v7219_v19 = vsel %vm19006_vm6, %v7060_v55, 0.0  ;;  %v7326_v36 = vsel %vm18963_vm10, %v7060_v55, 0.0  ;;  %v7421_v57 = vsel %vm18916_vm1, %v7060_v55, 0.0  ;;  %vm20868_vm1 = vmmov %vm20685_vm5 }
 0x943   :  { %v7296_v48 = vsel %vm20864_vm11, %v7292_v54, 0.0  ;;  %v19022_v33 = vsel %vm20865_vm4, %v7239_v63, 0.0  ;;  %14315 = vmatmul.mubr.msk.bf16.gmra.mrb[156].mxu0 %vm20866_vm2, %v19011_v20  ;;  %v7240_v43 = vsel %vm20867_vm15, %v7237_v11, %v7239_v63  ;;  %v7273_v3 = vsel %vm18968_vm3, %v7238_v26, 0.0  ;;  %vm20872_vm5 = vmmov %vm20866_vm2 }
 0x944   :  { %v7328_v23 = vsel %vm19006_vm6, %v7296_v48, 0.0  ;;  %v7423_v53 = vsel %vm18963_vm10, %v7296_v48, 0.0  ;;  %v19036_v37 = vpack.c.bf16 %v7240_v43, %v7273_v3  ;;  %14320 = vmatprep.mubr.bf16.mxu0 %v20451_v56  ;;  %v19039_v6 = vpack.c.bf16 %v7219_v19, %v7058_v50  ;;  %vm20870_vm10 = vmmov %vm20866_vm2  ;;  %v20963_v3 = vld [vmem:[#allocation52_spill] sm:$0xff] }
 0x945   :  { %v19041_v11 = vpack.c.bf16 %v7326_v36, %v7058_v50  ;;  %v7293_v55 = vsel %vm20868_vm1, %v7059_v28, %v7292_v54  ;;  %v19044_v0 = vpack.c.bf16 %v7421_v57, %v7058_v50  ;;  %v7375_v48 = vsel %vm18925_vm0, %v7238_v26, 0.0  ;;  %v15517_v50 = vld [vmem:[%s20403_s18 + $0x40] sm:$0xff]   ;;  %vm20873_vm0 = vmmov %vm20866_vm2  ;;  %v20957_v36 = vld [vmem:[#allocation29_spill] sm:$0xff] }
 0x946   :  { %14145 = vmatmul.mubr.msk.bf16.gmra.mrb[96].mxu1 %vm20869_vm13, %v19036_v37  ;;  %v19048_v63 = vpack.c.bf16 %v7328_v23, %v7293_v55  ;;  %v19050_v12 = vpack.c.bf16 %v7423_v53, %v7293_v55  ;;  %v19056_v19 = vpack.c.bf16 %v7240_v43, %v7375_v48  ;;  %vm20874_vm12 = vmmov %vm20873_vm0  ;;  %v20955_v26 = vld [vmem:[#allocation42_spill] sm:$0xff]  ;;  %v20961_v43 = vld [vmem:[#allocation47_spill] sm:$0xff] }
 0x947   :  { %14150 = vmatprep.mubr.msk.bf16.mxu1 %vm20870_vm10, %v18285_v14  ;;  %vm20875_vm6 = vmmov %vm20873_vm0  ;;  %v20959_v57 = vld [vmem:[#allocation34_spill] sm:$0xff]  ;;  %v20965_v23 = vld [vmem:[#allocation39_spill] sm:$0xff] }
 0x948   :  { %vm20876_vm7 = vmmov %vm20873_vm0  ;;  %v20967_v53 = vld [vmem:[#allocation44_spill] sm:$0xff]  ;;  %v20971_v55 = vld [vmem:[#allocation62_spill] sm:$0xff] }
 0x949   :  { %vm20877_vm9 = vmmov %vm20873_vm0  ;;  %v20973_v48 = vld [vmem:[#allocation49_spill] sm:$0xff] }
 0x94a   :  { %vm20878_vm11 = vmmov %vm20873_vm0 }
 0x94b   :  { %14321 = vmatmul.mubr.msk.bf16.vlgmr.msra.gmra.mrb[128].mxu0 %vm20871_vm8, %v18285_v14  ;;  %vm20879_vm4 = vmmov %vm20873_vm0 }
 0x94c   :  { %14324 = vmatprep.mubr.msk.bf16.mxu0 %vm20872_vm5, %v18325_v46  ;;  %14353 = vmatpush3.bf16.msra.mxu0 %v18665_v10  ;;  %vm20880_vm2 = vmmov %vm20873_vm0 }
 0x94d   :  { %14522 = vmatprep.subr.bf16.mxu0 %v15517_v50  ;;  %vm20881_vm15 = vmmov %vm20873_vm0 }
 0x94e   :  { %14151 = vmatmul.mubr.msk.bf16.vlgmr.msra.gmra.mrb[68].mxu1 %vm20873_vm0, %v18325_v46  ;;  %vm20882_vm1 = vmmov %vm20873_vm0 }
 0x94f   :  { %14154 = vmatprep.mubr.msk.bf16.mxu1 %vm20874_vm12, %v18378_v13  ;;  %14183 = vmatpush3.bf16.msra.mxu1 %v18348_v24  ;;  %vm20883_vm13 = vmmov %vm20873_vm0  ;;  %v20895_v24 = vrot.slane %v18268_v5, 1  ;;  %v15519_v5 = vld [vmem:[%s20403_s18 + $0x50] sm:$0xff]  }
 0x950   :  { %14216 = vmatprep.subr.bf16.mxu1 %v15516_v60  ;;  %vm20884_vm10 = vmmov %vm20873_vm0 }
 0x951   :  { %vm20885_vm8 = vmmov %vm20873_vm0 }
 0x952   :  { %vm20886_vm5 = vmmov %vm20873_vm0 }
 0x953   :  { %14325 = vmatmul.mubr.msk.bf16.gmra.mrb[132].mxu0 %vm20875_vm6, %v18378_v13  ;;  %vm20887_vm12 = vmmov %vm20873_vm0 }
 0x954   :  { %14328 = vmatprep.mubr.msk.bf16.mxu0 %vm20876_vm7, %v18428_v16  ;;  %vm20888_vm6 = vmmov %vm20873_vm0 }
 0x955   :  { %vm20889_vm7 = vmmov %vm20873_vm0 }
 0x956   :  { %14155 = vmatmul.mubr.msk.bf16.gmra.mrb[72].mxu1 %vm20877_vm9, %v18428_v16  ;;  %vm20890_vm9 = vmmov %vm20873_vm0 }
 0x957   :  { %14158 = vmatprep.mubr.msk.bf16.mxu1 %vm20878_vm11, %v18478_v17  ;;  %vm20891_vm11 = vmmov %vm20873_vm0 }
 0x95b   :  { %14329 = vmatmul.mubr.msk.bf16.gmra.mrb[136].mxu0 %vm20879_vm4, %v18478_v17  ;;  %vm20892_vm4 = vmmov %vm20873_vm0 }
 0x95c   :  { %14332 = vmatprep.mubr.msk.bf16.mxu0 %vm20880_vm2, %v18528_v41  ;;  %vm20893_vm2 = vmmov %vm20873_vm0 }
 0x95e   :  { %14159 = vmatmul.mubr.msk.bf16.gmra.mrb[76].mxu1 %vm20881_vm15, %v18528_v41  ;;  %vm20894_vm15 = vmmov %vm20873_vm0 }
 0x95f   :  { %14162 = vmatprep.mubr.msk.bf16.mxu1 %vm20882_vm1, %v18578_v7  ;;  %vm20896_vm1 = vcmask 1046528  }
 0x960   :  { %v7092_v10 = vsel %vm20896_vm1, 0.0, %v20895_v24  ;;  %vm20910_vm1 = vmmov %vm20873_vm0  ;;  %v20980_v24 = vld [vmem:[#allocation59_spill] sm:$0xff] }
 0x961   :  { %v7189_v28 = vsel %vm18304_vm14, %v7092_v10, 0.0  ;;  %vm20902_vm14 = vmmov %vm20873_vm0  ;;  %v20982_v10 = vld [vmem:[#allocation64_spill] sm:$0xff] }
 0x962   :  { %v7220_v54 = vpack.c.bf16 %v7189_v28, %v20537_v18  ;;  %v20985_v28 = vld [vmem:[#allocation68_spill] sm:$0xff] }
 0x963   :  { %14333 = vmatmul.mubr.msk.bf16.gmra.mrb[140].mxu0 %vm20883_vm13, %v18578_v7  ;;  %vm20897_vm13 = vmmov %vm20873_vm0 }
 0x964   :  { %14336 = vmatprep.mubr.msk.bf16.mxu0 %vm20884_vm10, %v18628_v9  ;;  %vm20898_vm10 = vmmov %vm20873_vm0 }
 0x966   :  { %14163 = vmatmul.mubr.msk.bf16.gmra.mrb[80].mxu1 %vm20885_vm8, %v18628_v9  ;;  %vm20899_vm8 = vmmov %vm20873_vm0 }
 0x967   :  { %14166 = vmatprep.mubr.msk.bf16.mxu1 %vm20886_vm5, %v18684_v8  ;;  %vm20900_vm5 = vmmov %vm20873_vm0 }
 0x96b   :  { %14337 = vmatmul.mubr.msk.bf16.gmra.mrb[144].mxu0 %vm20873_vm0, %v18684_v8 }
 0x96c   :  { %14340 = vmatprep.mubr.msk.bf16.mxu0 %vm20887_vm12, %v18734_v30  ;;  %vm20901_vm12 = vmmov %vm20873_vm0 }
 0x96e   :  { %14167 = vmatmul.mubr.msk.bf16.gmra.mrb[84].mxu1 %vm20888_vm6, %v18734_v30  ;;  %vm20903_vm6 = vmmov %vm20873_vm0 }
 0x96f   :  { %14170 = vmatprep.mubr.msk.bf16.mxu1 %vm20889_vm7, %v18784_v31  ;;  %vm20904_vm7 = vmmov %vm20873_vm0 }
 0x973   :  { %14341 = vmatmul.mubr.msk.bf16.gmra.mrb[148].mxu0 %vm20890_vm9, %v18784_v31  ;;  %vm20905_vm9 = vmmov %vm20873_vm0 }
 0x974   :  { %14344 = vmatprep.mubr.msk.bf16.mxu0 %vm20891_vm11, %v18834_v39  ;;  %vm20906_vm11 = vmmov %vm20873_vm0 }
 0x976   :  { %14171 = vmatmul.mubr.msk.bf16.gmra.mrb[88].mxu1 %vm20892_vm4, %v18834_v39  ;;  %vm20907_vm4 = vmmov %vm20873_vm0 }
 0x977   :  { %14174 = vmatprep.mubr.msk.bf16.mxu1 %vm20893_vm2, %v18884_v4  ;;  %vm20908_vm2 = vmmov %vm20873_vm0 }
 0x97b   :  { %14345 = vmatmul.mubr.msk.bf16.gmra.mrb[152].mxu0 %vm20894_vm15, %v18884_v4  ;;  %vm20909_vm15 = vmmov %vm20873_vm0 }
 0x97c   :  { %14348 = vmatprep.mubr.msk.bf16.mxu0 %vm20897_vm13, %v18931_v62  ;;  %vm20911_vm13 = vmmov %vm20873_vm0 }
 0x97e   :  { %14175 = vmatmul.mubr.msk.bf16.gmra.mrb[92].mxu1 %vm20898_vm10, %v18931_v62  ;;  %vm20912_vm10 = vmmov %vm20873_vm0 }
 0x97f   :  { %14178 = vmatprep.mubr.msk.bf16.mxu1 %vm20899_vm8, %v18974_v25  ;;  %vm20913_vm8 = vmmov %vm20873_vm0 }
 0x983   :  { %14349 = vmatmul.mubr.msk.bf16.gmra.mrb[156].mxu0 %vm20900_vm5, %v18974_v25  ;;  %vm20914_vm5 = vmmov %vm20873_vm0 }
 0x984   :  { %14354 = vmatprep.mubr.msk.bf16.mxu0 %vm20873_vm0, %v7220_v54  ;;  %v15523_v54 = vld [vmem:[%s20403_s18] sm:$0xff]  }
 0x986   :  { %14179 = vmatmul.mubr.msk.bf16.gmra.mrb[96].mxu1 %vm20901_vm12, %v19011_v20  ;;  %vm20915_vm12 = vmmov %vm20873_vm0 }
 0x987   :  { %14184 = vmatprep.mubr.bf16.mxu1 %v20451_v56 }
 0x98b   :  { %14355 = vmatmul.mubr.msk.bf16.vlgmr.msra.gmra.mrb[128].mxu0 %vm20902_vm14, %v18333_v51  ;;  %vm20916_vm14 = vmmov %vm20873_vm0  ;;  %v15521_v51 = vld [vmem:[%s20403_s18 + $0x10] sm:$0xff]  }
 0x98c   :  { %14358 = vmatprep.mubr.msk.bf16.mxu0 %vm20903_vm6, %v18400_v44  ;;  %14523 = vmatpush3.bf16.msra.mxu0 %v15517_v50  ;;  %vm20917_vm6 = vmmov %vm20873_vm0  ;;  %v20932_v44 = vld [vmem:[#allocation14_spill] sm:$0xff] }
 0x98d   :  { %14556 = vmatprep.subr.bf16.mxu0 %v15519_v5  ;;  %v20975_v50 = vld [vmem:[#allocation54_spill] sm:$0xff] }
 0x98e   :  { %14185 = vmatmul.mubr.msk.bf16.vlgmr.msra.gmra.mrb[68].mxu1 %vm20904_vm7, %v18285_v14  ;;  %vm20918_vm7 = vmmov %vm20873_vm0 }
 0x98f   :  { %14188 = vmatprep.mubr.msk.bf16.mxu1 %vm20905_vm9, %v18325_v46  ;;  %14217 = vmatpush3.bf16.msra.mxu1 %v15516_v60  ;;  %vm20919_vm9 = vmmov %vm20873_vm0  ;;  %v20977_v60 = vld [vmem:[#allocation67_spill] sm:$0xff] }
 0x990   :  { %14250 = vmatprep.subr.bf16.mxu1 %v15518_v40 }
 0x993   :  { %14359 = vmatmul.mubr.msk.bf16.gmra.mrb[132].mxu0 %vm20906_vm11, %v18441_v32  ;;  %vm20920_vm11 = vmmov %vm20873_vm0  ;;  %v15520_v32 = vld [vmem:[%s20403_s18 + $0x58] sm:$0xff]  }
 0x994   :  { %14362 = vmatprep.mubr.msk.bf16.mxu0 %vm20907_vm4, %v18489_v38  ;;  %vm20921_vm4 = vmmov %vm20873_vm0  ;;  %v20934_v38 = vld [vmem:[#allocation3_spill] sm:$0xff] }
 0x996   :  { %14189 = vmatmul.mubr.msk.bf16.gmra.mrb[72].mxu1 %vm20908_vm2, %v18378_v13  ;;  %vm20922_vm2 = vmmov %vm20873_vm0 }
 0x997   :  { %14192 = vmatprep.mubr.msk.bf16.mxu1 %vm20909_vm15, %v18428_v16  ;;  %vm20923_vm15 = vmmov %vm20873_vm0 }
 0x99b   :  { %14363 = vmatmul.mubr.msk.bf16.gmra.mrb[136].mxu0 %vm20910_vm1, %v18539_v45  ;;  %vm20924_vm1 = vmmov %vm20873_vm0  ;;  %v20936_v45 = vld [vmem:[#allocation6_spill] sm:$0xff] }
 0x99c   :  { %14366 = vmatprep.mubr.msk.bf16.mxu0 %vm20911_vm13, %v18589_v42  ;;  %vm20925_vm13 = vmmov %vm20873_vm0  ;;  %v20938_v42 = vld [vmem:[#allocation17_spill] sm:$0xff] }
 0x99e   :  { %14193 = vmatmul.mubr.msk.bf16.gmra.mrb[76].mxu1 %vm20912_vm10, %v18478_v17  ;;  %vm20926_vm10 = vmmov %vm20873_vm0 }
 0x99f   :  { %14196 = vmatprep.mubr.msk.bf16.mxu1 %vm20913_vm8, %v18528_v41  ;;  %vm20927_vm8 = vmmov %vm20873_vm0 }
 0x9a3   :  { %14367 = vmatmul.mubr.msk.bf16.gmra.mrb[140].mxu0 %vm20914_vm5, %v18639_v1  ;;  %vm20928_vm5 = vmmov %vm20873_vm0  ;;  %v20940_v1 = vld [vmem:[#allocation22_spill] sm:$0xff] }
 0x9a4   :  { %14370 = vmatprep.mubr.msk.bf16.mxu0 %vm20873_vm0, %v18695_v27  ;;  %v20942_v27 = vld [vmem:[#allocation10_spill] sm:$0xff] }
 0x9a6   :  { %14197 = vmatmul.mubr.msk.bf16.gmra.mrb[80].mxu1 %vm20915_vm12, %v18578_v7  ;;  %vm20929_vm12 = vmmov %vm20873_vm0 }
 0x9a7   :  { %14200 = vmatprep.mubr.msk.bf16.mxu1 %vm20916_vm14, %v18628_v9  ;;  %vm20930_vm14 = vmmov %vm20873_vm0 }
 0x9ab   :  { %14371 = vmatmul.mubr.msk.bf16.gmra.mrb[144].mxu0 %vm20917_vm6, %v18745_v58  ;;  %vm20931_vm6 = vmmov %vm20873_vm0  ;;  %v20944_v58 = vld [vmem:[#allocation15_spill] sm:$0xff] }
 0x9ac   :  { %14374 = vmatprep.mubr.msk.bf16.mxu0 %vm20918_vm7, %v18795_v35  ;;  %vm20933_vm7 = vmmov %vm20873_vm0  ;;  %v20946_v35 = vld [vmem:[#allocation27_spill] sm:$0xff] }
 0x9ae   :  { %14201 = vmatmul.mubr.msk.bf16.gmra.mrb[84].mxu1 %vm20919_vm9, %v18684_v8  ;;  %vm20935_vm9 = vmmov %vm20873_vm0 }
 0x9af   :  { %14204 = vmatprep.mubr.msk.bf16.mxu1 %vm20920_vm11, %v18734_v30  ;;  %vm20937_vm11 = vmmov %vm20873_vm0 }
 0x9b3   :  { %14375 = vmatmul.mubr.msk.bf16.gmra.mrb[148].mxu0 %vm20921_vm4, %v18845_v59  ;;  %vm20939_vm4 = vmmov %vm20873_vm0  ;;  %v20948_v59 = vld [vmem:[#allocation32_spill] sm:$0xff] }
 0x9b4   :  { %14378 = vmatprep.mubr.msk.bf16.mxu0 %vm20922_vm2, %v18895_v21  ;;  %vm20941_vm2 = vmmov %vm20873_vm0  ;;  %v20950_v21 = vld [vmem:[#allocation19_spill] sm:$0xff] }
 0x9b6   :  { %14205 = vmatmul.mubr.msk.bf16.gmra.mrb[88].mxu1 %vm20923_vm15, %v18784_v31  ;;  %vm20943_vm15 = vmmov %vm20873_vm0 }
 0x9b7   :  { %14208 = vmatprep.mubr.msk.bf16.mxu1 %vm20924_vm1, %v18834_v39  ;;  %vm20945_vm1 = vmmov %vm20873_vm0 }
 0x9bb   :  { %14379 = vmatmul.mubr.msk.bf16.gmra.mrb[152].mxu0 %vm20925_vm13, %v18942_v34  ;;  %vm20947_vm13 = vmmov %vm20873_vm0  ;;  %v20952_v34 = vld [vmem:[#allocation24_spill] sm:$0xff] }
 0x9bc   :  { %14382 = vmatprep.mubr.msk.bf16.mxu0 %vm20926_vm10, %v18985_v47  ;;  %vm20949_vm10 = vmmov %vm20873_vm0  ;;  %v20954_v47 = vld [vmem:[#allocation37_spill] sm:$0xff] }
 0x9be   :  { %14209 = vmatmul.mubr.msk.bf16.gmra.mrb[92].mxu1 %vm20927_vm8, %v18884_v4  ;;  %vm20951_vm8 = vmmov %vm20873_vm0 }
 0x9bf   :  { %14212 = vmatprep.mubr.msk.bf16.mxu1 %vm20928_vm5, %v18931_v62  ;;  %vm20953_vm5 = vmmov %vm20873_vm0 }
 0x9c3   :  { %14383 = vmatmul.mubr.msk.bf16.gmra.mrb[156].mxu0 %vm20873_vm0, %v19039_v6  ;;  %v20969_v6 = vld [vmem:[#allocation57_spill] sm:$0xff] }
 0x9c4   :  { %14524 = vmatprep.mubr.msk.bf16.mxu0 %vm20929_vm12, %v18338_v22  ;;  %vm20956_vm12 = vmmov %vm20873_vm0 }
 0x9c6   :  { %14213 = vmatmul.mubr.msk.bf16.gmra.mrb[96].mxu1 %vm20930_vm14, %v18974_v25  ;;  %vm20958_vm14 = vmmov %vm20873_vm0 }
 0x9c7   :  { %14218 = vmatprep.mubr.bf16.mxu1 %v20451_v56 }
 0x9cb   :  { %14525 = vmatmul.mubr.msk.bf16.vlgmr.msra.gmra.mrb[160].mxu0 %vm20931_vm6, %v18386_v52  ;;  %vm20960_vm6 = vmmov %vm20873_vm0 }
 0x9cc   :  { %14528 = vmatprep.mubr.msk.bf16.mxu0 %vm20933_vm7, %v20932_v44  ;;  %14557 = vmatpush3.bf16.msra.mxu0 %v15519_v5  ;;  %vm20962_vm7 = vmmov %vm20873_vm0  ;;  %v15522_v5 = vld [vmem:[%s20403_s18 + $0x48] sm:$0xff]  }
 0x9cd   :  { %14590 = vmatprep.subr.bf16.mxu0 %v15521_v51 }
 0x9ce   :  { %14219 = vmatmul.mubr.msk.bf16.vlgmr.msra.gmra.mrb[68].mxu1 %vm20935_vm9, %v20934_v38  ;;  %vm20964_vm9 = vmmov %vm20873_vm0  ;;  %v21032_v38 = vld [vmem:[#allocation23_spill] sm:$0xff] }
 0x9cf   :  { %14222 = vmatprep.mubr.msk.bf16.mxu1 %vm20937_vm11, %v20936_v45  ;;  %14251 = vmatpush3.bf16.msra.mxu1 %v15518_v40  ;;  %vm20966_vm11 = vmmov %vm20873_vm0  ;;  %v21021_v40 = vld [vmem:[#allocation4_spill] sm:$0xff] }
 0x9d0   :  { %14386 = vmatprep.subr.bf16.mxu1 %v15520_v32 }
 0x9d3   :  { %14529 = vmatmul.mubr.msk.bf16.gmra.mrb[164].mxu0 %vm20939_vm4, %v20938_v42  ;;  %vm20968_vm4 = vmmov %vm20873_vm0 }
 0x9d4   :  { %14532 = vmatprep.mubr.msk.bf16.mxu0 %vm20941_vm2, %v20940_v1  ;;  %vm20970_vm2 = vmmov %vm20873_vm0 }
 0x9d6   :  { %14223 = vmatmul.mubr.msk.bf16.gmra.mrb[72].mxu1 %vm20943_vm15, %v20942_v27  ;;  %vm20972_vm15 = vmmov %vm20873_vm0 }
 0x9d7   :  { %14226 = vmatprep.mubr.msk.bf16.mxu1 %vm20945_vm1, %v20944_v58  ;;  %vm20974_vm1 = vmmov %vm20873_vm0 }
 0x9db   :  { %14533 = vmatmul.mubr.msk.bf16.gmra.mrb[168].mxu0 %vm20947_vm13, %v20946_v35  ;;  %vm20976_vm13 = vmmov %vm20873_vm0 }
 0x9dc   :  { %14536 = vmatprep.mubr.msk.bf16.mxu0 %vm20949_vm10, %v20948_v59  ;;  %vm20978_vm10 = vmmov %vm20873_vm0 }
 0x9de   :  { %14227 = vmatmul.mubr.msk.bf16.gmra.mrb[76].mxu1 %vm20951_vm8, %v20950_v21  ;;  %vm20979_vm8 = vmmov %vm20873_vm0  ;;  %v21040_v21 = vld [vmem:[#allocation38_spill] sm:$0xff] }
 0x9df   :  { %14230 = vmatprep.mubr.msk.bf16.mxu1 %vm20953_vm5, %v20952_v34  ;;  %vm20981_vm5 = vmmov %vm20873_vm0 }
 0x9e3   :  { %14537 = vmatmul.mubr.msk.bf16.gmra.mrb[172].mxu0 %vm20873_vm0, %v20954_v47 }
 0x9e4   :  { %14540 = vmatprep.mubr.msk.bf16.mxu0 %vm20956_vm12, %v20955_v26  ;;  %vm20983_vm12 = vmmov %vm20873_vm0 }
 0x9e6   :  { %14231 = vmatmul.mubr.msk.bf16.gmra.mrb[80].mxu1 %vm20958_vm14, %v20957_v36  ;;  %vm20984_vm14 = vmmov %vm20873_vm0  ;;  %v21044_v36 = vld [vmem:[#allocation43_spill] sm:$0xff] }
 0x9e7   :  { %14234 = vmatprep.mubr.msk.bf16.mxu1 %vm20960_vm6, %v20959_v57  ;;  %vm20986_vm6 = vmmov %vm20873_vm0 }
 0x9eb   :  { %14541 = vmatmul.mubr.msk.bf16.gmra.mrb[176].mxu0 %vm20962_vm7, %v20961_v43  ;;  %vm20987_vm7 = vmmov %vm20873_vm0 }
 0x9ec   :  { %14544 = vmatprep.mubr.msk.bf16.mxu0 %vm20964_vm9, %v20963_v3  ;;  %vm20988_vm9 = vmmov %vm20873_vm0 }
 0x9ee   :  { %14235 = vmatmul.mubr.msk.bf16.gmra.mrb[84].mxu1 %vm20966_vm11, %v20965_v23  ;;  %vm20989_vm11 = vmmov %vm20873_vm0 }
 0x9ef   :  { %14238 = vmatprep.mubr.msk.bf16.mxu1 %vm20968_vm4, %v20967_v53  ;;  %vm20990_vm4 = vmmov %vm20873_vm0 }
 0x9f3   :  { %14545 = vmatmul.mubr.msk.bf16.gmra.mrb[180].mxu0 %vm20970_vm2, %v20969_v6  ;;  %vm20991_vm2 = vmmov %vm20873_vm0 }
 0x9f4   :  { %14548 = vmatprep.mubr.msk.bf16.mxu0 %vm20972_vm15, %v20971_v55  ;;  %vm20992_vm15 = vmmov %vm20873_vm0 }
 0x9f6   :  { %14239 = vmatmul.mubr.msk.bf16.gmra.mrb[88].mxu1 %vm20974_vm1, %v20973_v48  ;;  %vm20993_vm1 = vmmov %vm20873_vm0  ;;  %v21052_v48 = vld [vmem:[#allocation58_spill] sm:$0xff] }
 0x9f7   :  { %14242 = vmatprep.mubr.msk.bf16.mxu1 %vm20976_vm13, %v20975_v50  ;;  %vm20994_vm13 = vmmov %vm20873_vm0 }
 0x9fb   :  { %14549 = vmatmul.mubr.msk.bf16.gmra.mrb[184].mxu0 %vm20978_vm10, %v20977_v60  ;;  %vm20995_vm10 = vmmov %vm20873_vm0 }
 0x9fc   :  { %14552 = vmatprep.mubr.msk.bf16.mxu0 %vm20979_vm8, %v19041_v11  ;;  %vm20996_vm8 = vmmov %vm20873_vm0 }
 0x9fe   :  { %14243 = vmatmul.mubr.msk.bf16.gmra.mrb[92].mxu1 %vm20981_vm5, %v20980_v24  ;;  %vm20997_vm5 = vmmov %vm20873_vm0 }
 0x9ff   :  { %14246 = vmatprep.mubr.msk.bf16.mxu1 %vm20873_vm0, %v20982_v10  ;;  %v21055_v10 = vld [vmem:[#allocation63_spill] sm:$0xff] }
 0xa03   :  { %14553 = vmatmul.mubr.msk.bf16.gmra.mrb[188].mxu0 %vm20983_vm12, %v19048_v63  ;;  %vm20998_vm12 = vmmov %vm20873_vm0 }
 0xa04   :  { %14558 = vmatprep.mubr.msk.bf16.mxu0 %vm20984_vm14, %v18285_v14  ;;  %vm20999_vm14 = vmmov %vm20873_vm0 }
 0xa06   :  { %14247 = vmatmul.mubr.msk.bf16.gmra.mrb[96].mxu1 %vm20986_vm6, %v20985_v28  ;;  %vm21000_vm6 = vmmov %vm20873_vm0 }
 0xa07   :  { %14252 = vmatprep.mubr.msk.bf16.mxu1 %vm20987_vm7, %v18338_v22  ;;  %v25_v22 = vstv %s20404_s19  ;;  %vm21001_vm7 = vmmov %vm20873_vm0 }
 0xa08   :  { %26 = vst [vmem:[#allocation2] sm:$0x1] %v25_v22  ;;  %v21058_v22 = vld [vmem:[#allocation11_spill] sm:$0xff] }
 0xa0b   :  { %14559 = vmatmul.mubr.msk.bf16.vlgmr.msra.gmra.mrb[160].mxu0 %vm20988_vm9, %v18325_v46  ;;  %vm21002_vm9 = vmmov %vm20873_vm0 }
 0xa0c   :  { %14562 = vmatprep.mubr.msk.bf16.mxu0 %vm20989_vm11, %v18378_v13  ;;  %14591 = vmatpush3.bf16.msra.mxu0 %v15521_v51  ;;  %vm21003_vm11 = vmmov %vm20873_vm0  ;;  %v21023_v51 = vld [vmem:[#allocation9_spill] sm:$0xff] }
 0xa0d   :  { %14624 = vmatprep.subr.bf16.mxu0 %v15523_v54 }
 0xa0e   :  { %14253 = vmatmul.mubr.msk.bf16.vlgmr.msra.gmra.mrb[100].mxu1 %vm20990_vm4, %v18386_v52  ;;  %vm21004_vm4 = vmmov %vm20873_vm0  ;;  %v21017_v52 = vld [vmem:[#allocation8_spill] sm:$0xff] }
 0xa0f   :  { %14256 = vmatprep.mubr.msk.bf16.mxu1 %vm20991_vm2, %v20932_v44  ;;  %14387 = vmatpush3.bf16.msra.mxu1 %v15520_v32  ;;  %vm21005_vm2 = vmmov %vm20873_vm0  ;;  %v21029_v44 = vld [vmem:[#allocation18_spill] sm:$0xff] }
 0xa10   :  { %14420 = vmatprep.subr.bf16.mxu1 %v15522_v5 }
 0xa13   :  { %14563 = vmatmul.mubr.msk.bf16.gmra.mrb[164].mxu0 %vm20992_vm15, %v18428_v16  ;;  %vm21006_vm15 = vmmov %vm20873_vm0 }
 0xa14   :  { %14566 = vmatprep.mubr.msk.bf16.mxu0 %vm20993_vm1, %v18478_v17  ;;  %vm21007_vm1 = vmmov %vm20873_vm0 }
 0xa16   :  { %14257 = vmatmul.mubr.msk.bf16.gmra.mrb[104].mxu1 %vm20994_vm13, %v20938_v42  ;;  %vm21008_vm13 = vmmov %vm20873_vm0  ;;  %v21034_v42 = vld [vmem:[#allocation28_spill] sm:$0xff] }
 0xa17   :  { %14260 = vmatprep.mubr.msk.bf16.mxu1 %vm20995_vm10, %v20940_v1  ;;  %vm21009_vm10 = vmmov %vm20873_vm0 }
 0xa1b   :  { %14567 = vmatmul.mubr.msk.bf16.gmra.mrb[168].mxu0 %vm20996_vm8, %v18528_v41  ;;  %vm21010_vm8 = vmmov %vm20873_vm0 }
 0xa1c   :  { %14570 = vmatprep.mubr.msk.bf16.mxu0 %vm20997_vm5, %v18578_v7  ;;  %vm21011_vm5 = vmmov %vm20873_vm0 }
 0xa1e   :  { %14261 = vmatmul.mubr.msk.bf16.gmra.mrb[108].mxu1 %vm20873_vm0, %v20946_v35  ;;  %v21038_v35 = vld [vmem:[#allocation33_spill] sm:$0xff] }
 0xa1f   :  { %14264 = vmatprep.mubr.msk.bf16.mxu1 %vm20998_vm12, %v20948_v59  ;;  %vm21012_vm12 = vmmov %vm20873_vm0 }
 0xa23   :  { %14571 = vmatmul.mubr.msk.bf16.gmra.mrb[172].mxu0 %vm20999_vm14, %v18628_v9  ;;  %vm21013_vm14 = vmmov %vm20873_vm0 }
 0xa24   :  { %14574 = vmatprep.mubr.msk.bf16.mxu0 %vm21000_vm6, %v18684_v8  ;;  %vm21014_vm6 = vmmov %vm20873_vm0 }
 0xa26   :  { %14265 = vmatmul.mubr.msk.bf16.gmra.mrb[112].mxu1 %vm21001_vm7, %v20954_v47  ;;  %vm21015_vm7 = vmmov %vm20873_vm0 }
 0xa27   :  { %14268 = vmatprep.mubr.msk.bf16.mxu1 %vm21002_vm9, %v20955_v26  ;;  %vm21016_vm9 = vmmov %vm20873_vm0 }
 0xa2b   :  { %14575 = vmatmul.mubr.msk.bf16.gmra.mrb[176].mxu0 %vm21003_vm11, %v18734_v30  ;;  %vm21018_vm11 = vmmov %vm20873_vm0 }
 0xa2c   :  { %14578 = vmatprep.mubr.msk.bf16.mxu0 %vm21004_vm4, %v18784_v31  ;;  %vm21019_vm4 = vmmov %vm20873_vm0 }
 0xa2e   :  { %14269 = vmatmul.mubr.msk.bf16.gmra.mrb[116].mxu1 %vm21005_vm2, %v20961_v43  ;;  %vm21020_vm2 = vmmov %vm20873_vm0  ;;  %v21046_v43 = vld [vmem:[#allocation48_spill] sm:$0xff] }
 0xa2f   :  { %14272 = vmatprep.mubr.msk.bf16.mxu1 %vm21006_vm15, %v20963_v3  ;;  %vm21022_vm15 = vmmov %vm20873_vm0 }
 0xa33   :  { %14579 = vmatmul.mubr.msk.bf16.gmra.mrb[180].mxu0 %vm21007_vm1, %v18834_v39  ;;  %vm21024_vm1 = vmmov %vm20873_vm0 }
 0xa34   :  { %14582 = vmatprep.mubr.msk.bf16.mxu0 %vm21008_vm13, %v18884_v4  ;;  %vm21025_vm13 = vmmov %vm20873_vm0 }
 0xa36   :  { %14273 = vmatmul.mubr.msk.bf16.gmra.mrb[120].mxu1 %vm21009_vm10, %v20969_v6  ;;  %vm21026_vm10 = vmmov %vm20873_vm0  ;;  %v21050_v6 = vld [vmem:[#allocation53_spill] sm:$0xff] }
 0xa37   :  { %14276 = vmatprep.mubr.msk.bf16.mxu1 %vm21010_vm8, %v20971_v55  ;;  %vm21028_vm8 = vmmov %vm20873_vm0 }
 0xa3b   :  { %14583 = vmatmul.mubr.msk.bf16.gmra.mrb[184].mxu0 %vm21011_vm5, %v18931_v62  ;;  %vm21030_vm5 = vmmov %vm20873_vm0 }
 0xa3c   :  { %14586 = vmatprep.mubr.msk.bf16.mxu0 %vm20873_vm0, %v18974_v25 }
 0xa3e   :  { %14277 = vmatmul.mubr.msk.bf16.gmra.mrb[124].mxu1 %vm21012_vm12, %v20977_v60  ;;  %vm21031_vm12 = vmmov %vm20873_vm0 }
 0xa3f   :  { %14280 = vmatprep.mubr.msk.bf16.mxu1 %vm21013_vm14, %v19041_v11  ;;  %v19353_v11 = vld [vmem:[%s20403_s18 + $0x8] sm:$0xff]   ;;  %vm21033_vm14 = vmmov %vm20873_vm0 }
 0xa43   :  { %14587 = vmatmul.mubr.msk.bf16.gmra.mrb[188].mxu0 %vm21014_vm6, %v19011_v20  ;;  %vm21035_vm6 = vmmov %vm20873_vm0 }
 0xa44   :  { %14592 = vmatprep.mubr.msk.bf16.mxu0 %vm21015_vm7, %v18325_v46  ;;  %vm21036_vm7 = vmmov %vm20873_vm0 }
 0xa46   :  { %14281 = vmatmul.mubr.msk.bf16.gmra.mrb[128].mxu1 %vm21016_vm9, %v19048_v63  ;;  %v21027_v63 = vld [vmem:[#allocation13_spill] sm:$0xff]  ;;  %vm21037_vm9 = vmmov %vm20873_vm0 }
 0xa47   :  { %14388 = vmatprep.mubr.msk.bf16.mxu1 %vm21018_vm11, %v21017_v52  ;;  %vm21039_vm11 = vmmov %vm20873_vm0 }
 0xa4b   :  { %14593 = vmatmul.mubr.msk.bf16.vlgmr.msra.gmra.mrb[160].mxu0 %vm21019_vm4, %v18378_v13  ;;  %vm21041_vm4 = vmmov %vm20873_vm0 }
 0xa4c   :  { %14596 = vmatprep.mubr.msk.bf16.mxu0 %vm21020_vm2, %v18428_v16  ;;  %14625 = vmatpush3.bf16.msra.mxu0 %v15523_v54  ;;  %vm21042_vm2 = vmmov %vm20873_vm0 }
 0xa4e   :  { %14389 = vmatmul.mubr.msk.bf16.vlgmr.msra.gmra.mrb[132].mxu1 %vm21022_vm15, %v21021_v40  ;;  %vm21043_vm15 = vmmov %vm20873_vm0 }
 0xa4f   :  { %14392 = vmatprep.mubr.msk.bf16.mxu1 %vm21024_vm1, %v21023_v51  ;;  %14421 = vmatpush3.bf16.msra.mxu1 %v15522_v5  ;;  %vm21045_vm1 = vmmov %vm20873_vm0 }
 0xa50   :  { %14454 = vmatprep.subr.bf16.mxu1 %v19353_v11 }
 0xa53   :  { %14597 = vmatmul.mubr.msk.bf16.gmra.mrb[164].mxu0 %vm21025_vm13, %v18478_v17  ;;  %vm21047_vm13 = vmmov %vm20873_vm0 }
 0xa54   :  { %14600 = vmatprep.mubr.msk.bf16.mxu0 %vm21026_vm10, %v18528_v41  ;;  %vm21048_vm10 = vmmov %vm20873_vm0 }
 0xa56   :  { %14393 = vmatmul.mubr.msk.bf16.gmra.mrb[136].mxu1 %vm21028_vm8, %v21027_v63  ;;  %vm21049_vm8 = vmmov %vm20873_vm0  ;;  %v21062_v63 = vld [vmem:[#allocation12_spill] sm:$0xff] }
 0xa57   :  { %14396 = vmatprep.mubr.msk.bf16.mxu1 %vm21030_vm5, %v21029_v44  ;;  %vm21051_vm5 = vmmov %vm20873_vm0  ;;  %v21064_v44 = vld [vmem:[#allocation20_spill] sm:$0xff] }
 0xa5b   :  { %14601 = vmatmul.mubr.msk.bf16.gmra.mrb[168].mxu0 %vm20873_vm0, %v18578_v7 }
 0xa5c   :  { %14604 = vmatprep.mubr.msk.bf16.mxu0 %vm21031_vm12, %v18628_v9  ;;  %vm21053_vm12 = vmmov %vm20873_vm0 }
 0xa5e   :  { %v19372_v32 = vpop.f32.mrb[128].mxu0  ;;  %14397 = vmatmul.mubr.msk.bf16.gmra.mrb[140].mxu1 %vm21033_vm14, %v21032_v38  ;;  %vm21054_vm14 = vmmov %vm20873_vm0  ;;  %v19470_v38 = vld [vmem:[%s20403_s18 + $0x18] sm:$0xff]   ;;  %s15793_s18 = smov 1  }
 0xa5f   :  { %v19376_v45 = vpop.f32.mrb[129].mxu0  ;;  %14400 = vmatprep.mubr.msk.bf16.mxu1 %vm21035_vm6, %v21034_v42  ;;  %vm21056_vm6 = vmmov %vm20873_vm0 }
 0xa60   :  { %v19380_v1 = vpop.f32.mrb[130].mxu0 }
 0xa61   :  { %v19382_v27 = vpop.f32.mrb[131].mxu0 }
 0xa63   :  { %14605 = vmatmul.mubr.msk.bf16.gmra.mrb[172].mxu0 %vm21036_vm7, %v18684_v8  ;;  %vm21057_vm7 = vmmov %vm20873_vm0 }
 0xa64   :  { %14608 = vmatprep.mubr.msk.bf16.mxu0 %vm21037_vm9, %v18734_v30  ;;  %vm21059_vm9 = vmmov %vm20873_vm0 }
 0xa66   :  { %v19388_v58 = vpop.f32.mrb[132].mxu0  ;;  %14401 = vmatmul.mubr.msk.bf16.gmra.mrb[144].mxu1 %vm21039_vm11, %v21038_v35  ;;  %vm21060_vm11 = vmmov %vm20873_vm0 }
 0xa67   :  { %v19392_v59 = vpop.f32.mrb[133].mxu0  ;;  %14404 = vmatprep.mubr.msk.bf16.mxu1 %vm21041_vm4, %v21040_v21  ;;  %vm21061_vm4 = vmmov %vm20873_vm0  ;;  %v21068_v21 = vld [vmem:[#allocation25_spill] sm:$0xff] }
 0xa68   :  { %v19396_v34 = vpop.f32.mrb[134].mxu0 }
 0xa69   :  { %v19398_v47 = vpop.f32.mrb[135].mxu0 }
 0xa6b   :  { %14609 = vmatmul.mubr.msk.bf16.gmra.mrb[176].mxu0 %vm21042_vm2, %v18784_v31  ;;  %vm21063_vm2 = vmmov %vm20873_vm0 }
 0xa6c   :  { %14612 = vmatprep.mubr.msk.bf16.mxu0 %vm21043_vm15, %v18834_v39  ;;  %vm21065_vm15 = vmmov %vm20873_vm0 }
 0xa6e   :  { %v19404_v26 = vpop.f32.mrb[136].mxu0  ;;  %14405 = vmatmul.mubr.msk.bf16.gmra.mrb[148].mxu1 %vm21045_vm1, %v21044_v36  ;;  %vm21066_vm1 = vmmov %vm20873_vm0  ;;  %v21070_v36 = vld [vmem:[#allocation30_spill] sm:$0xff] }
 0xa6f   :  { %v19408_v57 = vpop.f32.mrb[137].mxu0  ;;  %14408 = vmatprep.mubr.msk.bf16.mxu1 %vm21047_vm13, %v21046_v43  ;;  %vm21067_vm13 = vmmov %vm20873_vm0 }
 0xa70   :  { %v19412_v3 = vpop.f32.mrb[138].mxu0 }
 0xa71   :  { %v19414_v23 = vpop.f32.mrb[139].mxu0 }
 0xa73   :  { %14613 = vmatmul.mubr.msk.bf16.gmra.mrb[180].mxu0 %vm21048_vm10, %v18884_v4  ;;  %vm21069_vm10 = vmmov %vm20873_vm0 }
 0xa74   :  { %14616 = vmatprep.mubr.msk.bf16.mxu0 %vm21049_vm8, %v18931_v62  ;;  %vm21071_vm8 = vmmov %vm20873_vm0 }
 0xa76   :  { %v19420_v53 = vpop.f32.mrb[140].mxu0  ;;  %14409 = vmatmul.mubr.msk.bf16.gmra.mrb[152].mxu1 %vm21051_vm5, %v21050_v6  ;;  %vm21072_vm5 = vmmov %vm20873_vm0 }
 0xa77   :  { %v19424_v55 = vpop.f32.mrb[141].mxu0  ;;  %14412 = vmatprep.mubr.msk.bf16.mxu1 %vm20873_vm0, %v21052_v48 }
 0xa78   :  { %v19428_v50 = vpop.f32.mrb[142].mxu0 }
 0xa79   :  { %v19430_v60 = vpop.f32.mrb[143].mxu0 }
 0xa7b   :  { %14617 = vmatmul.mubr.msk.bf16.gmra.mrb[184].mxu0 %vm21053_vm12, %v18974_v25  ;;  %vm21074_vm12 = vmmov %vm20873_vm0 }
 0xa7c   :  { %14620 = vmatprep.mubr.msk.bf16.mxu0 %vm21054_vm14, %v19011_v20  ;;  %vm21076_vm14 = vmmov %vm20873_vm0 }
 0xa7e   :  { %v19436_v24 = vpop.f32.mrb[144].mxu0  ;;  %14413 = vmatmul.mubr.msk.bf16.gmra.mrb[156].mxu1 %vm21056_vm6, %v21055_v10  ;;  %v21073_v10 = vld [vmem:[#allocation35_spill] sm:$0xff]  ;;  %vm21077_vm6 = vmmov %vm20873_vm0 }
 0xa7f   :  { %v19440_v28 = vpop.f32.mrb[145].mxu0  ;;  %14416 = vmatprep.mubr.msk.bf16.mxu1 %vm21057_vm7, %v18992_v49  ;;  %vm21078_vm7 = vmmov %vm20873_vm0 }
 0xa80   :  { %v19444_v54 = vpop.f32.mrb[146].mxu0 }
 0xa81   :  { %v19446_v5 = vpop.f32.mrb[147].mxu0 }
 0xa83   :  { %14621 = vmatmul.mubr.bf16.gmra.mrb[188].mxu0 %v20451_v56 }
 0xa84   :  { %14626 = vmatprep.mubr.msk.bf16.mxu0 %vm21059_vm9, %v21058_v22  ;;  %v21075_v22 = vld [vmem:[#allocation40_spill] sm:$0xff]  ;;  %vm21082_vm9 = vmmov %vm20873_vm0 }
 0xa86   :  { %v19451_v52 = vpop.f32.mrb[148].mxu0  ;;  %14417 = vmatmul.mubr.msk.bf16.gmra.mrb[160].mxu1 %vm21060_vm11, %v19036_v37  ;;  %vm21085_vm11 = vmmov %vm20873_vm0 }
 0xa87   :  { %v19455_v40 = vpop.f32.mrb[149].mxu0  ;;  %14422 = vmatprep.mubr.msk.bf16.mxu1 %vm21061_vm4, %v18285_v14  ;;  %vm21086_vm4 = vmmov %vm20873_vm0 }
 0xa88   :  { %v19459_v49 = vpop.f32.mrb[150].mxu0 }
 0xa89   :  { %v19461_v51 = vpop.f32.mrb[151].mxu0 }
 0xa8b   :  { %14627 = vmatmul.mubr.msk.bf16.vlgmr.msra.gmra.mrb[160].mxu0 %vm21063_vm2, %v21062_v63  ;;  %vm21087_vm2 = vmmov %vm20873_vm0 }
 0xa8c   :  { %14630 = vmatprep.mubr.msk.bf16.mxu0 %vm21065_vm15, %v21064_v44  ;;  %vm21092_vm15 = vmmov %vm20873_vm0 }
 0xa8e   :  { %v19472_v37 = vpop.f32.mrb[152].mxu0  ;;  %14423 = vmatmul.mubr.msk.bf16.vlgmr.msra.gmra.mrb[132].mxu1 %vm21066_vm1, %v18325_v46  ;;  %vm21094_vm1 = vmmov %vm20873_vm0 }
 0xa8f   :  { %v19476_v14 = vpop.f32.mrb[153].mxu0  ;;  %14426 = vmatprep.mubr.msk.bf16.mxu1 %vm21067_vm13, %v18378_v13  ;;  %14455 = vmatpush3.bf16.msra.mxu1 %v19353_v11  ;;  %vm21095_vm13 = vmmov %vm20873_vm0 }
 0xa90   :  { %v19481_v42 = vpop.f32.mrb[154].mxu0  ;;  %14488 = vmatprep.subr.bf16.mxu1 %v19470_v38 }
 0xa91   :  { %v19484_v35 = vpop.f32.mrb[155].mxu0 }
 0xa93   :  { %14631 = vmatmul.mubr.msk.bf16.gmra.mrb[164].mxu0 %vm21069_vm10, %v21068_v21  ;;  %vm21096_vm10 = vmmov %vm20873_vm0 }
 0xa94   :  { %14634 = vmatprep.mubr.msk.bf16.mxu0 %vm21071_vm8, %v21070_v36  ;;  %v21081_v36 = vld [vmem:[#allocation45_spill] sm:$0xff]  ;;  %vm21100_vm8 = vmmov %vm20873_vm0 }
 0xa96   :  { %v19490_v43 = vpop.f32.mrb[156].mxu0  ;;  %14427 = vmatmul.mubr.msk.bf16.gmra.mrb[136].mxu1 %vm21072_vm5, %v18428_v16  ;;  %vm21102_vm5 = vmmov %vm20873_vm0 }
 0xa97   :  { %v19494_v6 = vpop.f32.mrb[157].mxu0  ;;  %14430 = vmatprep.mubr.msk.bf16.mxu1 %vm20873_vm0, %v18478_v17 }
 0xa98   :  { %v19498_v11 = vpop.f32.mrb[158].mxu0 }
 0xa99   :  { %v19500_v48 = vpop.f32.mrb[159].mxu0 }
 0xa9b   :  { %14635 = vmatmul.mubr.msk.bf16.gmra.mrb[168].mxu0 %vm21074_vm12, %v21073_v10  ;;  %v21084_v10 = vld [vmem:[#allocation50_spill] sm:$0xff]  ;;  %vm21103_vm12 = vmmov %vm20873_vm0 }
 0xa9c   :  { %14638 = vmatprep.mubr.msk.bf16.mxu0 %vm21076_vm14, %v21075_v22  ;;  %vm21107_vm14 = vmmov %vm20873_vm0 }
 0xa9e   :  { %14431 = vmatmul.mubr.msk.bf16.gmra.mrb[140].mxu1 %vm21077_vm6, %v18528_v41  ;;  %vm21109_vm6 = vmmov %vm20873_vm0 }
 0xa9f   :  { %14434 = vmatprep.mubr.msk.bf16.mxu1 %vm21078_vm7, %v18578_v7  ;;  %vm21110_vm7 = vmmov %vm20873_vm0 }
 0xaa1   :  { %v19510_v63 = vpop.f32.mrb[68].mxu1 }
 0xaa2   :  { %v19512_v44 = vpop.f32.mrb[69].mxu1 }
 0xaa3   :  { %21079 = vst [vmem:[#allocation14_spill] sm:$0xff] %v19512_v44  ;;  %v19514_v21 = vpop.f32.mrb[70].mxu1  ;;  %14639 = vmatmul.mubr.msk.bf16.gmra.mrb[172].mxu0 %vm21082_vm9, %v21081_v36  ;;  %vm21111_vm9 = vmmov %vm20873_vm0 }
 0xaa4   :  { %21080 = vst [vmem:[#allocation3_spill] sm:$0xff] %v19514_v21  ;;  %v19518_v2 = vpop.f32.mrb[71].mxu1  ;;  %14642 = vmatprep.mubr.msk.bf16.mxu0 %vm21085_vm11, %v21084_v10  ;;  %v21091_v21 = vld [vmem:[#allocation55_spill] sm:$0xff]  ;;  %vm21116_vm11 = vmmov %vm20873_vm0 }
 0xaa5   :  { %21083 = vst [vmem:[#allocation6_spill] sm:$0xff] %v19518_v2  ;;  %v21093_v2 = vld [vmem:[#allocation60_spill] sm:$0xff] }
 0xaa6   :  { %14435 = vmatmul.mubr.msk.bf16.gmra.mrb[144].mxu1 %vm21086_vm4, %v18628_v9  ;;  %vm21117_vm4 = vmmov %vm20873_vm0 }
 0xaa7   :  { %14438 = vmatprep.mubr.msk.bf16.mxu1 %vm21087_vm2, %v18684_v8  ;;  %vm21120_vm2 = vmmov %vm20873_vm0 }
 0xaa9   :  { %v19526_v22 = vpop.f32.mrb[72].mxu1 }
 0xaaa   :  { %21088 = vst [vmem:[#allocation17_spill] sm:$0xff] %v19526_v22  ;;  %v19528_v56 = vpop.f32.mrb[73].mxu1 }
 0xaab   :  { %21089 = vst [vmem:[#allocation22_spill] sm:$0xff] %v19528_v56  ;;  %v19530_v44 = vpop.f32.mrb[74].mxu1  ;;  %14643 = vmatmul.mubr.msk.bf16.gmra.mrb[176].mxu0 %vm21092_vm15, %v21091_v21  ;;  %vm21121_vm15 = vmmov %vm20873_vm0 }
 0xaac   :  { %21090 = vst [vmem:[#allocation10_spill] sm:$0xff] %v19530_v44  ;;  %v19534_v36 = vpop.f32.mrb[75].mxu1  ;;  %14646 = vmatprep.mubr.msk.bf16.mxu0 %vm21094_vm1, %v21093_v2  ;;  %v21099_v44 = vld [vmem:[#allocation65_spill] sm:$0xff]  ;;  %vm21126_vm1 = vmmov %vm20873_vm0 }
 0xaae   :  { %14439 = vmatmul.mubr.msk.bf16.gmra.mrb[148].mxu1 %vm21095_vm13, %v18734_v30  ;;  %vm21127_vm13 = vmmov %vm20873_vm0 }
 0xaaf   :  { %14442 = vmatprep.mubr.msk.bf16.mxu1 %vm21096_vm10, %v18784_v31  ;;  %vm21132_vm10 = vmmov %vm20873_vm0 }
 0xab1   :  { %v19542_v10 = vpop.f32.mrb[76].mxu1 }
 0xab2   :  { %21097 = vst [vmem:[#allocation15_spill] sm:$0xff] %v19542_v10  ;;  %v19544_v22 = vpop.f32.mrb[77].mxu1 }
 0xab3   :  { %21098 = vst [vmem:[#allocation27_spill] sm:$0xff] %v19544_v22  ;;  %v19546_v56 = vpop.f32.mrb[78].mxu1  ;;  %14647 = vmatmul.mubr.msk.bf16.gmra.mrb[180].mxu0 %vm21100_vm8, %v21099_v44  ;;  %vm21133_vm8 = vmmov %vm20873_vm0 }
 0xab4   :  { %v19550_v21 = vpop.f32.mrb[79].mxu1  ;;  %14650 = vmatprep.mubr.msk.bf16.mxu0 %vm21102_vm5, %v18998_v61  ;;  %vm21134_vm5 = vmmov %vm20873_vm0 }
 0xab5   :  { %21101 = vst [vmem:[#allocation32_spill] sm:$0xff] %v19550_v21 }
 0xab6   :  { %14443 = vmatmul.mubr.msk.bf16.gmra.mrb[152].mxu1 %vm20873_vm0, %v18834_v39 }
 0xab7   :  { %14446 = vmatprep.mubr.msk.bf16.mxu1 %vm21103_vm12, %v18884_v4  ;;  %vm21135_vm12 = vmmov %vm20873_vm0 }
 0xab9   :  { %v19558_v2 = vpop.f32.mrb[80].mxu1 }
 0xaba   :  { %21104 = vst [vmem:[#allocation19_spill] sm:$0xff] %v19558_v2  ;;  %v19560_v10 = vpop.f32.mrb[81].mxu1 }
 0xabb   :  { %21105 = vst [vmem:[#allocation24_spill] sm:$0xff] %v19560_v10  ;;  %v19562_v22 = vpop.f32.mrb[82].mxu1  ;;  %14651 = vmatmul.mubr.msk.bf16.gmra.mrb[184].mxu0 %vm21107_vm14, %v19044_v0  ;;  %vm21136_vm14 = vmmov %vm20873_vm0 }
 0xabc   :  { %21106 = vst [vmem:[#allocation37_spill] sm:$0xff] %v19562_v22  ;;  %v19566_v44 = vpop.f32.mrb[83].mxu1  ;;  %14654 = vmatprep.mubr.msk.bf16.mxu0 %vm21109_vm6, %v19050_v12  ;;  %v21114_v22 = vmov 0.0|0.0   ;;  %vm21137_vm6 = vmmov %vm20873_vm0 }
 0xabd   :  { %21108 = vst [vmem:[#allocation42_spill] sm:$0xff] %v19566_v44 }
 0xabe   :  { %14447 = vmatmul.mubr.msk.bf16.gmra.mrb[156].mxu1 %vm21110_vm7, %v18931_v62  ;;  %vm21138_vm7 = vmmov %vm20873_vm0 }
 0xabf   :  { %14450 = vmatprep.mubr.msk.bf16.mxu1 %vm21111_vm9, %v18974_v25  ;;  %vm21139_vm9 = vmmov %vm20873_vm0 }
 0xac1   :  { %v19574_v61 = vpop.f32.mrb[84].mxu1 }
 0xac2   :  { %21112 = vst [vmem:[#allocation29_spill] sm:$0xff] %v19574_v61  ;;  %v19576_v2 = vpop.f32.mrb[85].mxu1 }
 0xac3   :  { %21113 = vst [vmem:[#allocation34_spill] sm:$0xff] %v19576_v2  ;;  %v19578_v10 = vpop.f32.mrb[86].mxu1  ;;  %14655 = vmatmul.mubr.bf16.gmra.mrb[188].mxu0 %v21114_v22 }
 0xac4   :  { %v19581_v0 = vpop.f32.mrb[87].mxu1 }
 0xac5   :  { %21115 = vst [vmem:[#allocation47_spill] sm:$0xff] %v19581_v0 }
 0xac6   :  { %14451 = vmatmul.mubr.msk.bf16.gmra.mrb[160].mxu1 %vm21116_vm11, %v19011_v20  ;;  %vm21140_vm11 = vmmov %vm20873_vm0 }
 0xac7   :  { %14456 = vmatprep.mubr.msk.bf16.mxu1 %vm21117_vm4, %v18325_v46  ;;  %vm21142_vm4 = vmmov %vm20873_vm0 }
 0xac9   :  { %v19587_v12 = vpop.f32.mrb[88].mxu1 }
 0xaca   :  { %21118 = vst [vmem:[#allocation52_spill] sm:$0xff] %v19587_v12  ;;  %v19589_v44 = vpop.f32.mrb[89].mxu1 }
 0xacb   :  { %v19591_v21 = vpop.f32.mrb[90].mxu1 }
 0xacc   :  { %v19593_v61 = vpop.f32.mrb[91].mxu1 }
 0xacd   :  { %21119 = vst [vmem:[#allocation39_spill] sm:$0xff] %v19593_v61 }
 0xace   :  { %14457 = vmatmul.mubr.msk.bf16.vlgmr.msra.gmra.mrb[132].mxu1 %vm21120_vm2, %v18378_v13  ;;  %vm21144_vm2 = vmmov %vm20873_vm0 }
 0xacf   :  { %14460 = vmatprep.mubr.msk.bf16.mxu1 %vm21121_vm15, %v18428_v16  ;;  %14489 = vmatpush3.bf16.msra.mxu1 %v19470_v38  ;;  %vm21146_vm15 = vmmov %vm20873_vm0 }
 0xad1   :  { %v19600_v0 = vpop.f32.mrb[92].mxu1 }
 0xad2   :  { %21122 = vst [vmem:[#allocation44_spill] sm:$0xff] %v19600_v0  ;;  %v19602_v2 = vpop.f32.mrb[93].mxu1 }
 0xad3   :  { %21123 = vst [vmem:[#allocation57_spill] sm:$0xff] %v19602_v2  ;;  %v19604_v46 = vpop.f32.mrb[94].mxu1 }
 0xad4   :  { %21124 = vst [vmem:[#allocation62_spill] sm:$0xff] %v19604_v46  ;;  %v19606_v12 = vpop.f32.mrb[95].mxu1  ;;  %v19625_v46 = vld [vmem:[#allocation2] ss:$0 sm:$0xff] }
 0xad5   :  { %21125 = vst [vmem:[#allocation49_spill] sm:$0xff] %v19606_v12 }
 0xad6   :  { %14461 = vmatmul.mubr.msk.bf16.gmra.mrb[136].mxu1 %vm21126_vm1, %v18478_v17  ;;  %vm21148_vm1 = vmmov %vm20873_vm0 }
 0xad7   :  { %14464 = vmatprep.mubr.msk.bf16.mxu1 %vm21127_vm13, %v18528_v41  ;;  %vm21150_vm13 = vmmov %vm20873_vm0 }
 0xad9   :  { %v19612_v13 = vpop.f32.mrb[96].mxu1 }
 0xada   :  { %21128 = vst [vmem:[#allocation54_spill] sm:$0xff] %v19612_v13  ;;  %v19614_v61 = vpop.f32.mrb[97].mxu1 }
 0xadb   :  { %21129 = vst [vmem:[#allocation67_spill] sm:$0xff] %v19614_v61  ;;  %v19616_v16 = vpop.f32.mrb[98].mxu1 }
 0xadc   :  { %21130 = vst [vmem:[#allocation59_spill] sm:$0xff] %v19616_v16  ;;  %v19618_v38 = vpop.f32.mrb[99].mxu1 }
 0xadd   :  { %21131 = vst [vmem:[#allocation64_spill] sm:$0xff] %v19618_v38 }
 0xade   :  { %14465 = vmatmul.mubr.msk.bf16.gmra.mrb[140].mxu1 %vm21132_vm10, %v18578_v7  ;;  %vm21152_vm10 = vmmov %vm20873_vm0 }
 0xadf   :  { %14468 = vmatprep.mubr.msk.bf16.mxu1 %vm21133_vm8, %v18628_v9  ;;  %vm21154_vm8 = vmmov %vm20873_vm0 }
 0xae1   :  { %v14254_v12 = vpop.f32.mrb[100].mxu1 }
 0xae2   :  { %v14658_v17 = vadd.f32 %v19372_v32, %v14254_v12  ;;  %v8421_v2 = vpop.f32.mrb[101].mxu1 }
 0xae3   :  { %v14659_v41 = vadd.f32 %v19376_v45, %v8421_v2  ;;  %v14255_v13 = vpop.f32.mrb[102].mxu1 }
 0xae4   :  { %v10820_v61 = vadd.f32 %v14658_v17, %v19625_v46  ;;  %v14660_v16 = vadd.f32 %v19380_v1, %v14255_v13  ;;  %v8424_v38 = vpop.f32.mrb[103].mxu1 }
 0xae5   :  { %v10818_v0 = vadd.f32 %v14659_v41, %v19625_v46  ;;  %v14661_v7 = vadd.f32 %v19382_v27, %v8424_v38 }
 0xae6   :  { %15532 = vtanh.f32 %v10820_v61  ;;  %v10821_v9 = vadd.f32 %v14660_v16, %v19625_v46  ;;  %14469 = vmatmul.mubr.msk.bf16.gmra.mrb[144].mxu1 %vm21134_vm5, %v18684_v8  ;;  %vm21156_vm5 = vmmov %vm20873_vm0 }
 0xae7   :  { %15534 = vtanh.f32 %v10818_v0  ;;  %v10819_v32 = vadd.f32 %v14661_v7, %v19625_v46  ;;  %14472 = vmatprep.mubr.msk.bf16.mxu1 %vm20873_vm0, %v18734_v30 }
 0xae8   :  { %15536 = vtanh.f32 %v10821_v9 }
 0xae9   :  { %v14258_v45 = vpop.f32.mrb[104].mxu1  ;;  %15538 = vtanh.f32 %v10819_v32 }
 0xaea   :  { %v14662_v1 = vadd.f32 %v19388_v58, %v14258_v45  ;;  %v8437_v2 = vpop.f32.mrb[105].mxu1 }
 0xaeb   :  { %v14663_v27 = vadd.f32 %v19392_v59, %v8437_v2  ;;  %v14259_v61 = vpop.f32.mrb[106].mxu1 }
 0xaec   :  { %v10824_v12 = vadd.f32 %v14662_v1, %v19625_v46  ;;  %v14664_v13 = vadd.f32 %v19396_v34, %v14259_v61  ;;  %v8440_v8 = vpop.f32.mrb[107].mxu1 }
 0xaed   :  { %v14665_v0 = vadd.f32 %v19398_v47, %v8440_v8  ;;  %v10822_v30 = vadd.f32 %v14663_v27, %v19625_v46 }
 0xaee   :  { %15540 = vtanh.f32 %v10824_v12  ;;  %v10825_v16 = vadd.f32 %v14664_v13, %v19625_v46  ;;  %14473 = vmatmul.mubr.msk.bf16.gmra.mrb[148].mxu1 %vm21135_vm12, %v18784_v31  ;;  %vm21159_vm12 = vmmov %vm20873_vm0 }
 0xaef   :  { %14476 = vmatprep.mubr.msk.bf16.mxu1 %vm21136_vm14, %v18834_v39  ;;  %v10823_v59 = vadd.f32 %v14665_v0, %v19625_v46  ;;  %vm21161_vm14 = vmmov %vm20873_vm0 }
 0xaf0   :  { %v15533_v58 = vpop.eup %15532  ;;  %15542 = vtanh.f32 %v10825_v16 }
 0xaf1   :  { %v15535_v38 = vpop.eup %15534  ;;  %11046 = vrot.lane.b32.xlu1 %v15533_v58, %s15793_s18  ;;  %v14262_v34 = vpop.f32.mrb[108].mxu1  ;;  %15544 = vtanh.f32 %v10822_v30 }
 0xaf2   :  { %v14666_v47 = vadd.f32 %v19404_v26, %v14262_v34  ;;  %11042 = vrot.lane.b32.xlu0 %v15535_v38, %s15793_s18  ;;  %v8453_v17 = vpop.f32.mrb[109].mxu1  ;;  %v15537_v7 = vpop.eup %15536  ;;  %15546 = vtanh.f32 %v10823_v59 }
 0xaf3   :  { %v14667_v31 = vadd.f32 %v19408_v57, %v8453_v17  ;;  %v14263_v41 = vpop.f32.mrb[110].mxu1  ;;  %v15539_v45 = vpop.eup %15538 }
 0xaf4   :  { %v10828_v39 = vadd.f32 %v14666_v47, %v19625_v46  ;;  %v14668_v9 = vadd.f32 %v19412_v3, %v14263_v41  ;;  %v8456_v32 = vpop.f32.mrb[111].mxu1 }
 0xaf5   :  { %v14669_v1 = vadd.f32 %v19414_v23, %v8456_v32  ;;  %11048 = vrot.lane.b32.xlu1 %v15537_v7, %s15793_s18  ;;  %v10826_v57 = vadd.f32 %v14667_v31, %v19625_v46  ;;  %v21141_v32 = vld [vmem:[#allocation5_spill] sm:$0xff] }
 0xaf6   :  { %15548 = vtanh.f32 %v10828_v39  ;;  %v10829_v26 = vadd.f32 %v14668_v9, %v19625_v46  ;;  %14477 = vmatmul.mubr.msk.bf16.gmra.mrb[152].mxu1 %vm21137_vm6, %v18884_v4  ;;  %11044 = vrot.lane.b32.xlu0 %v15539_v45, %s15793_s18  ;;  %vm21163_vm6 = vmmov %vm20873_vm0 }
 0xaf7   :  { %14480 = vmatprep.mubr.msk.bf16.mxu1 %vm21138_vm7, %v18931_v62  ;;  %v10827_v2 = vadd.f32 %v14669_v1, %v19625_v46  ;;  %vm21165_vm7 = vmmov %vm20873_vm0 }
 0xaf8   :  { %v15541_v3 = vpop.eup %15540  ;;  %15550 = vtanh.f32 %v10829_v26 }
 0xaf9   :  { %v14266_v23 = vpop.f32.mrb[112].mxu1  ;;  %15552 = vtanh.f32 %v10826_v57 }
 0xafa   :  { %v15543_v27 = vpop.eup %15542  ;;  %v14670_v61 = vadd.f32 %v19420_v53, %v14266_v23  ;;  %11054 = vrot.lane.b32.xlu0 %v15541_v3, %s15793_s18  ;;  %v8469_v12 = vpop.f32.mrb[113].mxu1  ;;  %15554 = vtanh.f32 %v10827_v2 }
 0xafb   :  { %v14671_v4 = vadd.f32 %v19424_v55, %v8469_v12  ;;  %11056 = vrot.lane.b32.xlu1 %v15543_v27, %s15793_s18  ;;  %v14267_v13 = vpop.f32.mrb[114].mxu1  ;;  %v15545_v16 = vpop.eup %15544 }
 0xafc   :  { %v10832_v62 = vadd.f32 %v14670_v61, %v19625_v46  ;;  %v14672_v8 = vadd.f32 %v19428_v50, %v14267_v13  ;;  %v8472_v0 = vpop.f32.mrb[115].mxu1  ;;  %v15547_v58 = vpop.eup %15546  ;;  %v21143_v13 = vld [vmem:[#allocation7_spill] sm:$0xff] }
 0xafd   :  { %v14673_v30 = vadd.f32 %v19430_v60, %v8472_v0  ;;  %v10830_v55 = vadd.f32 %v14671_v4, %v19625_v46 }
 0xafe   :  { %15556 = vtanh.f32 %v10832_v62  ;;  %v10833_v53 = vadd.f32 %v14672_v8, %v19625_v46  ;;  %14481 = vmatmul.mubr.msk.bf16.gmra.mrb[156].mxu1 %vm21139_vm9, %v18974_v25  ;;  %11050 = vrot.lane.b32.xlu0 %v15545_v16, %s15793_s18  ;;  %v21145_v62 = vld [vmem:[#allocation16_spill] sm:$0xff]  ;;  %vm21166_vm9 = vmmov %vm20873_vm0 }
 0xaff   :  { %14484 = vmatprep.mubr.msk.bf16.mxu1 %vm21140_vm11, %v19011_v20  ;;  %11052 = vrot.lane.b32.xlu1 %v15547_v58, %s15793_s18  ;;  %v10831_v60 = vadd.f32 %v14673_v30, %v19625_v46  ;;  %vm21167_vm11 = vmmov %vm20873_vm0 }
 0xb00   :  { %v15549_v50 = vpop.eup %15548  ;;  %15558 = vtanh.f32 %v10833_v53 }
 0xb01   :  { %v14270_v59 = vpop.f32.mrb[116].mxu1  ;;  %15560 = vtanh.f32 %v10830_v55 }
 0xb02   :  { %v15551_v38 = vpop.eup %15550  ;;  %v14674_v34 = vadd.f32 %v19436_v24, %v14270_v59  ;;  %11062 = vrot.lane.b32.xlu0 %v15549_v50, %s15793_s18  ;;  %v8485_v25 = vpop.f32.mrb[117].mxu1  ;;  %15562 = vtanh.f32 %v10831_v60 }
 0xb03   :  { %v14675_v47 = vadd.f32 %v19440_v28, %v8485_v25  ;;  %11064 = vrot.lane.b32.xlu1 %v15551_v38, %s15793_s18  ;;  %v14271_v17 = vpop.f32.mrb[118].mxu1  ;;  %v15553_v7 = vpop.eup %15552  ;;  %v21147_v25 = vld [vmem:[#allocation21_spill] sm:$0xff] }
 0xb04   :  { %v10836_v20 = vadd.f32 %v14674_v34, %v19625_v46  ;;  %v14676_v31 = vadd.f32 %v19444_v54, %v14271_v17  ;;  %v8488_v41 = vpop.f32.mrb[119].mxu1  ;;  %v15555_v9 = vpop.eup %15554 }
 0xb05   :  { %v14677_v39 = vadd.f32 %v19446_v5, %v8488_v41  ;;  %v10834_v28 = vadd.f32 %v14675_v47, %v19625_v46  ;;  %v21149_v47 = vld [vmem:[#allocation26_spill] sm:$0xff] }
 0xb06   :  { %15564 = vtanh.f32 %v10836_v20  ;;  %v10837_v24 = vadd.f32 %v14676_v31, %v19625_v46  ;;  %14485 = vmatmul.mubr.bf16.gmra.mrb[160].mxu1 %v21114_v22  ;;  %11058 = vrot.lane.b32.xlu0 %v15553_v7, %s15793_s18 }
 0xb07   :  { %14490 = vmatprep.mubr.msk.bf16.mxu1 %vm21142_vm4, %v21141_v32  ;;  %11060 = vrot.lane.b32.xlu1 %v15555_v9, %s15793_s18  ;;  %v10835_v45 = vadd.f32 %v14677_v39, %v19625_v46  ;;  %vm21169_vm4 = vmmov %vm20873_vm0 }
 0xb08   :  { %v15557_v54 = vpop.eup %15556  ;;  %15566 = vtanh.f32 %v10837_v24 }
 0xb09   :  { %v14274_v5 = vpop.f32.mrb[120].mxu1  ;;  %15568 = vtanh.f32 %v10834_v28 }
 0xb0a   :  { %v15559_v1 = vpop.eup %15558  ;;  %v14678_v26 = vadd.f32 %v19451_v52, %v14274_v5  ;;  %11070 = vrot.lane.b32.xlu0 %v15557_v54, %s15793_s18  ;;  %v8501_v22 = vpop.f32.mrb[121].mxu1  ;;  %15570 = vtanh.f32 %v10835_v45  ;;  %v21151_v5 = vld [vmem:[#allocation31_spill] sm:$0xff] }
 0xb0b   :  { %v14679_v57 = vadd.f32 %v19455_v40, %v8501_v22  ;;  %11072 = vrot.lane.b32.xlu1 %v15559_v1, %s15793_s18  ;;  %v14275_v3 = vpop.f32.mrb[122].mxu1  ;;  %v15561_v61 = vpop.eup %15560  ;;  %v21153_v1 = vld [vmem:[#allocation36_spill] sm:$0xff] }
 0xb0c   :  { %v10840_v2 = vadd.f32 %v14678_v26, %v19625_v46  ;;  %v14680_v23 = vadd.f32 %v19459_v49, %v14275_v3  ;;  %v8504_v27 = vpop.f32.mrb[123].mxu1  ;;  %v15563_v4 = vpop.eup %15562  ;;  %v21155_v3 = vld [vmem:[#allocation41_spill] sm:$0xff] }
 0xb0d   :  { %v14681_v12 = vadd.f32 %v19461_v51, %v8504_v27  ;;  %v10838_v40 = vadd.f32 %v14679_v57, %v19625_v46 }
 0xb0e   :  { %15572 = vtanh.f32 %v10840_v2  ;;  %v10841_v52 = vadd.f32 %v14680_v23, %v19625_v46  ;;  %14491 = vmatmul.mubr.msk.bf16.vlgmr.msra.gmra.mrb[132].mxu1 %vm21144_vm2, %v21143_v13  ;;  %11066 = vrot.lane.b32.xlu0 %v15561_v61, %s15793_s18  ;;  %v21157_v2 = vld [vmem:[#allocation46_spill] sm:$0xff]  ;;  %v21162_v13 = vld [vmem:[#allocation61_spill] sm:$0xff]  ;;  %vm11427_vm2 = vcmask 15360  }
 0xb0f   :  { %14494 = vmatprep.mubr.msk.bf16.mxu1 %vm21146_vm15, %v21145_v62  ;;  %11068 = vrot.lane.b32.xlu1 %v15563_v4, %s15793_s18  ;;  %v10839_v51 = vadd.f32 %v14681_v12, %v19625_v46  ;;  %v21158_v4 = vld [vmem:[#allocation51_spill] sm:$0xff]  ;;  %v21168_v62 = vsel %vm18968_vm3, %v19022_v33, 0.0  ;;  %v21173_v33 = vld [vmem:[#allocation17_spill] sm:$0xff]  ;;  %vm11394_vm3 = vcmask 7168   ;;  %vm11460_vm15 = vcmask 23552  }
 0xb10   :  { %v15565_v49 = vpop.eup %15564  ;;  %15574 = vtanh.f32 %v10841_v52  ;;  %v21160_v52 = vld [vmem:[#allocation56_spill] sm:$0xff] }
 0xb11   :  { %v14278_v8 = vpop.f32.mrb[124].mxu1  ;;  %15576 = vtanh.f32 %v10838_v40  ;;  %v21164_v40 = vld [vmem:[#allocation66_spill] sm:$0xff] }
 0xb12   :  { %v15567_v0 = vpop.eup %15566  ;;  %v14682_v16 = vadd.f32 %v19472_v37, %v14278_v8  ;;  %11078 = vrot.lane.b32.xlu0 %v15565_v49, %s15793_s18  ;;  %v8517_v30 = vpop.f32.mrb[125].mxu1  ;;  %15578 = vtanh.f32 %v10839_v51  ;;  %v7393_v49 = vpack.c.bf16 %v20537_v18, %v21168_v62  ;;  %v10756_v51 = vadd.f32 %v19510_v63, %v19625_v46  ;;  %v21170_v8 = vld [vmem:[#allocation14_spill] sm:$0xff] }
 0xb13   :  { %v14683_v58 = vadd.f32 %v19476_v14, %v8517_v30  ;;  %11080 = vrot.lane.b32.xlu1 %v15567_v0, %s15793_s18  ;;  %v14279_v53 = vpop.f32.mrb[126].mxu1  ;;  %v15569_v59 = vpop.eup %15568  ;;  %v10754_v0 = vadd.f32 %v19625_v46, %v21170_v8  ;;  %v10760_v30 = vadd.f32 %v21173_v33, %v19625_v46  ;;  %v21174_v18 = vld [vmem:[#allocation10_spill] sm:$0xff]  ;;  %v21181_v33 = vld [vmem:[#allocation24_spill] sm:$0xff] }
 0xb14   :  { %v10844_v55 = vadd.f32 %v14682_v16, %v19625_v46  ;;  %v14684_v50 = vadd.f32 %v19481_v42, %v14279_v53  ;;  %v8520_v60 = vpop.f32.mrb[127].mxu1  ;;  %v15571_v34 = vpop.eup %15570 }
 0xb15   :  { %v14685_v38 = vadd.f32 %v19484_v35, %v8520_v60  ;;  %v10842_v14 = vadd.f32 %v14683_v58, %v19625_v46  ;;  %v10761_v58 = vadd.f32 %v21174_v18, %v19625_v46 }
 0xb16   :  { %15580 = vtanh.f32 %v10844_v55  ;;  %v10845_v37 = vadd.f32 %v14684_v50, %v19625_v46  ;;  %14495 = vmatmul.mubr.msk.bf16.gmra.mrb[136].mxu1 %vm21148_vm1, %v21147_v25  ;;  %11074 = vrot.lane.b32.xlu0 %v15569_v59, %s15793_s18  ;;  %v21175_v50 = vld [vmem:[#allocation22_spill] sm:$0xff]  ;;  %v10759_v25 = vadd.f32 %v19625_v46, %v19534_v36  ;;  %v10765_v36 = vadd.f32 %v19546_v56, %v19625_v46 }
 0xb17   :  { %14498 = vmatprep.mubr.msk.bf16.mxu1 %vm21150_vm13, %v21149_v47  ;;  %11076 = vrot.lane.b32.xlu1 %v15571_v34, %s15793_s18  ;;  %v10843_v35 = vadd.f32 %v14685_v38, %v19625_v46  ;;  %v10758_v60 = vadd.f32 %v19625_v46, %v21175_v50  ;;  %vm11493_vm1 = vcmask 31744  }
 0xb18   :  { %v15573_v42 = vpop.eup %15572  ;;  %15582 = vtanh.f32 %v10845_v37 }
 0xb19   :  { %v14282_v17 = vpop.f32.mrb[128].mxu1  ;;  %15584 = vtanh.f32 %v10842_v14 }
 0xb1a   :  { %v15575_v20 = vpop.eup %15574  ;;  %v14686_v31 = vadd.f32 %v19490_v43, %v14282_v17  ;;  %11086 = vrot.lane.b32.xlu0 %v15573_v42, %s15793_s18  ;;  %v8533_v41 = vpop.f32.mrb[129].mxu1  ;;  %15586 = vtanh.f32 %v10843_v35  ;;  %v21176_v17 = vld [vmem:[#allocation15_spill] sm:$0xff] }
 0xb1b   :  { %v14687_v7 = vadd.f32 %v19494_v6, %v8533_v41  ;;  %11088 = vrot.lane.b32.xlu1 %v15575_v20, %s15793_s18  ;;  %v14283_v39 = vpop.f32.mrb[130].mxu1  ;;  %v15577_v32 = vpop.eup %15576  ;;  %v10764_v20 = vadd.f32 %v21176_v17, %v19625_v46 }
 0xb1c   :  { %v10848_v9 = vadd.f32 %v14686_v31, %v19625_v46  ;;  %v14688_v24 = vadd.f32 %v19498_v11, %v14283_v39  ;;  %v8536_v28 = vpop.f32.mrb[131].mxu1  ;;  %v15579_v45 = vpop.eup %15578 }
 0xb1d   :  { %v14689_v54 = vadd.f32 %v19500_v48, %v8536_v28  ;;  %v10846_v6 = vadd.f32 %v14687_v7, %v19625_v46 }
 0xb1e   :  { %15588 = vtanh.f32 %v10848_v9  ;;  %v10849_v43 = vadd.f32 %v14688_v24, %v19625_v46  ;;  %14499 = vmatmul.mubr.msk.bf16.gmra.mrb[140].mxu1 %vm21152_vm10, %v21151_v5  ;;  %11082 = vrot.lane.b32.xlu0 %v15577_v32, %s15793_s18 }
 0xb1f   :  { %14502 = vmatprep.mubr.msk.bf16.mxu1 %vm21154_vm8, %v21153_v1  ;;  %11084 = vrot.lane.b32.xlu1 %v15579_v45, %s15793_s18  ;;  %v10847_v48 = vadd.f32 %v14689_v54, %v19625_v46  ;;  %v21177_v45 = vld [vmem:[#allocation27_spill] sm:$0xff] }
 0xb20   :  { %v15581_v11 = vpop.eup %15580  ;;  %15590 = vtanh.f32 %v10849_v43  ;;  %v10762_v43 = vadd.f32 %v19625_v46, %v21177_v45 }
 0xb21   :  { %15592 = vtanh.f32 %v10846_v6 }
 0xb22   :  { %v15583_v26 = vpop.eup %15582  ;;  %11094 = vrot.lane.b32.xlu0 %v15581_v11, %s15793_s18  ;;  %15594 = vtanh.f32 %v10847_v48 }
 0xb23   :  { %11096 = vrot.lane.b32.xlu1 %v15583_v26, %s15793_s18  ;;  %v15585_v22 = vpop.eup %15584  ;;  %15596 = vtanh.f32 %v10756_v51 }
 0xb24   :  { %v15587_v57 = vpop.eup %15586  ;;  %15598 = vtanh.f32 %v10754_v0 }
 0xb26   :  { %14503 = vmatmul.mubr.msk.bf16.gmra.mrb[144].mxu1 %vm21156_vm5, %v21155_v3  ;;  %11090 = vrot.lane.b32.xlu0 %v15585_v22, %s15793_s18 }
 0xb27   :  { %14506 = vmatprep.mubr.msk.bf16.mxu1 %vm20873_vm0, %v21157_v2  ;;  %11092 = vrot.lane.b32.xlu1 %v15587_v57, %s15793_s18  ;;  %v21178_v57 = vld [vmem:[#allocation32_spill] sm:$0xff] }
 0xb28   :  { %v15589_v23 = vpop.eup %15588  ;;  %v10763_v3 = vadd.f32 %v19625_v46, %v21178_v57 }
 0xb2a   :  { %v15591_v27 = vpop.eup %15590  ;;  %11102 = vrot.lane.b32.xlu0 %v15589_v23, %s15793_s18 }
 0xb2b   :  { %11104 = vrot.lane.b32.xlu1 %v15591_v27, %s15793_s18  ;;  %v15593_v61 = vpop.eup %15592 }
 0xb2c   :  { %v15595_v12 = vpop.eup %15594 }
 0xb2d   :  { %v15597_v14 = vpop.eup %15596 }
 0xb2e   :  { %14507 = vmatmul.mubr.msk.bf16.gmra.mrb[148].mxu1 %vm21159_vm12, %v21158_v4  ;;  %11098 = vrot.lane.b32.xlu0 %v15593_v61, %s15793_s18  ;;  %v15599_v35 = vpop.eup %15598  ;;  %v21179_v61 = vld [vmem:[#allocation19_spill] sm:$0xff] }
 0xb2f   :  { %14510 = vmatprep.mubr.msk.bf16.mxu1 %vm21161_vm14, %v21160_v52  ;;  %11100 = vrot.lane.b32.xlu1 %v15595_v12, %s15793_s18  ;;  %v10768_v12 = vadd.f32 %v21179_v61, %v19625_v46  ;;  %v21185_v61 = vld [vmem:[#allocation47_spill] sm:$0xff] }
 0xb36   :  { %14511 = vmatmul.mubr.msk.bf16.gmra.mrb[152].mxu1 %vm21163_vm6, %v21162_v13 }
 0xb37   :  { %14514 = vmatprep.mubr.msk.bf16.mxu1 %vm21165_vm7, %v21164_v40 }
 0xb3e   :  { %14515 = vmatmul.mubr.msk.bf16.gmra.mrb[156].mxu1 %vm21166_vm9, %v19004_v29  ;;  %v21171_v29 = vld [vmem:[#allocation3_spill] sm:$0xff] }
 0xb3f   :  { %14518 = vmatprep.mubr.msk.bf16.mxu1 %vm21167_vm11, %v19056_v19  ;;  %v10757_v16 = vadd.f32 %v21171_v29, %v19625_v46  ;;  %v21172_v19 = vld [vmem:[#allocation6_spill] sm:$0xff] }
 0xb40   :  { %v10755_v15 = vadd.f32 %v19625_v46, %v21172_v19 }
 0xb41   :  { %15600 = vtanh.f32 %v10757_v16 }
 0xb42   :  { %15602 = vtanh.f32 %v10755_v15 }
 0xb43   :  { %15604 = vtanh.f32 %v10760_v30  ;;  %v10766_v30 = vadd.f32 %v19625_v46, %v21181_v33  ;;  %v10777_v33 = vadd.f32 %v19591_v21, %v19625_v46 }
 0xb46   :  { %14519 = vmatmul.mubr.msk.bf16.gmra.mrb[160].mxu1 %vm21169_vm4, %v7393_v49  ;;  %v21180_v49 = vld [vmem:[#allocation37_spill] sm:$0xff] }
 0xb47   :  { %v10769_v51 = vadd.f32 %v21180_v49, %v19625_v46  ;;  %v21186_v49 = vld [vmem:[#allocation52_spill] sm:$0xff] }
 0xb4b   :  { %v15601_v9 = vpop.eup %15600 }
 0xb4c   :  { %v15603_v54 = vpop.eup %15602 }
 0xb4d   :  { %v15605_v22 = vpop.eup %15604 }
 0xb5e   :  { %v14628_v63 = vpop.f32.mrb[160].mxu0 }
 0xb5f   :  { %v10948_v53 = vadd.f32 %v14628_v63, %v19625_v46  ;;  %v10588_v55 = vpop.f32.mrb[161].mxu0 }
 0xb60   :  { %v14629_v59 = vpop.f32.mrb[162].mxu0  ;;  %v10946_v38 = vadd.f32 %v19625_v46, %v10588_v55 }
 0xb61   :  { %15606 = vtanh.f32 %v10948_v53  ;;  %v10949_v34 = vadd.f32 %v14629_v59, %v19625_v46  ;;  %v10591_v37 = vpop.f32.mrb[163].mxu0 }
 0xb62   :  { %15608 = vtanh.f32 %v10761_v58  ;;  %v10947_v47 = vadd.f32 %v19625_v46, %v10591_v37 }
 0xb63   :  { %15610 = vtanh.f32 %v10949_v34  ;;  %v11047_v42 = vpop.permute.xlu1 %11046  ;;  %v21182_v34 = vld [vmem:[#allocation42_spill] sm:$0xff] }
 0xb64   :  { %15612 = vtanh.f32 %v10758_v60  ;;  %v19798_v31 = vsel %vm11394_vm3, %v15597_v14, %v11047_v42  ;;  %v11043_v41 = vpop.permute.xlu0 %11042  ;;  %v10767_v37 = vadd.f32 %v19625_v46, %v21182_v34 }
 0xb65   :  { %15614 = vtanh.f32 %v10946_v38  ;;  %v19801_v7 = vsel %vm11394_vm3, %v15599_v35, %v11043_v41  ;;  %v21183_v35 = vld [vmem:[#allocation29_spill] sm:$0xff] }
 0xb66   :  { %15616 = vtanh.f32 %v10759_v25  ;;  %v14632_v39 = vpop.f32.mrb[164].mxu0  ;;  %v10772_v17 = vadd.f32 %v21183_v35, %v19625_v46 }
 0xb67   :  { %15618 = vtanh.f32 %v10947_v47  ;;  %v10952_v24 = vadd.f32 %v14632_v39, %v19625_v46  ;;  %v10604_v28 = vpop.f32.mrb[165].mxu0  ;;  %v11049_v32 = vpop.permute.xlu1 %11048 }
 0xb68   :  { %15620 = vtanh.f32 %v10764_v20  ;;  %v19809_v5 = vsel %vm11394_vm3, %v15601_v9, %v11049_v32  ;;  %v14633_v6 = vpop.f32.mrb[166].mxu0  ;;  %v11045_v1 = vpop.permute.xlu0 %11044  ;;  %v10950_v56 = vadd.f32 %v19625_v46, %v10604_v28 }
 0xb69   :  { %15622 = vtanh.f32 %v10952_v24  ;;  %v10953_v11 = vadd.f32 %v14633_v6, %v19625_v46  ;;  %v19814_v48 = vsel %vm11394_vm3, %v15603_v54, %v11045_v1  ;;  %v10607_v26 = vpop.f32.mrb[167].mxu0  ;;  %v10773_v24 = vadd.f32 %v19578_v10, %v19625_v46  ;;  %v21184_v1 = vld [vmem:[#allocation34_spill] sm:$0xff] }
 0xb6a   :  { %15624 = vtanh.f32 %v10765_v36  ;;  %v10951_v23 = vadd.f32 %v19625_v46, %v10607_v26 }
 0xb6b   :  { %v15607_v2 = vpop.eup %15606  ;;  %15626 = vtanh.f32 %v10953_v11 }
 0xb6c   :  { %v15609_v27 = vpop.eup %15608  ;;  %15628 = vtanh.f32 %v10762_v43  ;;  %v11055_v4 = vpop.permute.xlu0 %11054  ;;  %11302 = vrot.lane.b32.xlu0 %v15607_v2, %s15794_s24 }
 0xb6d   :  { %v15611_v52 = vpop.eup %15610  ;;  %15630 = vtanh.f32 %v10950_v56  ;;  %v19823_v13 = vsel %vm11394_vm3, %v15605_v22, %v11055_v4  ;;  %v11057_v40 = vpop.permute.xlu1 %11056  ;;  %v10770_v56 = vadd.f32 %v19625_v46, %v21184_v1 }
 0xb6e   :  { %v15613_v62 = vpop.eup %15612  ;;  %15632 = vtanh.f32 %v10763_v3  ;;  %v19828_v8 = vsel %vm11394_vm3, %v15609_v27, %v11057_v40  ;;  %v14636_v0 = vpop.f32.mrb[168].mxu0  ;;  %11304 = vrot.lane.b32.xlu1 %v15611_v52, %s15794_s24 }
 0xb6f   :  { %v15615_v29 = vpop.eup %15614  ;;  %15634 = vtanh.f32 %v10951_v23  ;;  %v10956_v16 = vadd.f32 %v14636_v0, %v19625_v46  ;;  %v10620_v19 = vpop.f32.mrb[169].mxu0 }
 0xb70   :  { %v15617_v15 = vpop.eup %15616  ;;  %15636 = vtanh.f32 %v10768_v12  ;;  %v14637_v18 = vpop.f32.mrb[170].mxu0  ;;  %11298 = vrot.lane.b32.xlu0 %v15615_v29, %s15794_s24  ;;  %v10954_v53 = vadd.f32 %v19625_v46, %v10620_v19  ;;  %v10771_v12 = vadd.f32 %v19625_v46, %v21185_v61 }
 0xb71   :  { %v11051_v58 = vpop.permute.xlu0 %11050  ;;  %v15619_v63 = vpop.eup %15618  ;;  %15638 = vtanh.f32 %v10956_v16  ;;  %v10957_v55 = vadd.f32 %v14637_v18, %v19625_v46 }
 0xb72   :  { %v19838_v50 = vsel %vm11394_vm3, %v15613_v62, %v11051_v58  ;;  %v10623_v60 = vpop.f32.mrb[171].mxu0  ;;  %v11053_v59 = vpop.permute.xlu1 %11052  ;;  %15640 = vtanh.f32 %v10769_v51  ;;  %11300 = vrot.lane.b32.xlu1 %v15619_v63, %s15794_s24  ;;  %v10776_v51 = vadd.f32 %v21186_v49, %v19625_v46 }
 0xb73   :  { %v15621_v38 = vpop.eup %15620  ;;  %v19843_v25 = vsel %vm11394_vm3, %v15617_v15, %v11053_v59  ;;  %15642 = vtanh.f32 %v10957_v55  ;;  %v10955_v47 = vadd.f32 %v19625_v46, %v10623_v60  ;;  %v10774_v60 = vadd.f32 %v19625_v46, %v19589_v44 }
 0xb74   :  { %v15623_v14 = vpop.eup %15622  ;;  %15644 = vtanh.f32 %v10766_v30 }
 0xb75   :  { %v15625_v42 = vpop.eup %15624  ;;  %v11063_v20 = vpop.permute.xlu0 %11062  ;;  %11310 = vrot.lane.b32.xlu0 %v15623_v14, %s15794_s24  ;;  %15646 = vtanh.f32 %v10954_v53 }
 0xb76   :  { %v15627_v41 = vpop.eup %15626  ;;  %v19851_v36 = vsel %vm11394_vm3, %v15621_v38, %v11063_v20  ;;  %v11065_v39 = vpop.permute.xlu1 %11064  ;;  %15648 = vtanh.f32 %v10767_v37 }
 0xb77   :  { %v15629_v9 = vpop.eup %15628  ;;  %v19856_v28 = vsel %vm11394_vm3, %v15625_v42, %v11065_v39  ;;  %v14640_v32 = vpop.f32.mrb[172].mxu0  ;;  %11312 = vrot.lane.b32.xlu1 %v15627_v41, %s15794_s24  ;;  %15650 = vtanh.f32 %v10955_v47 }
 0xb78   :  { %v15631_v54 = vpop.eup %15630  ;;  %v10960_v45 = vadd.f32 %v14640_v32, %v19625_v46  ;;  %v10636_v43 = vpop.f32.mrb[173].mxu0  ;;  %15652 = vtanh.f32 %v10772_v17  ;;  %v21187_v17 = vld [vmem:[#allocation39_spill] sm:$0xff] }
 0xb79   :  { %v15633_v6 = vpop.eup %15632  ;;  %v14641_v11 = vpop.f32.mrb[174].mxu0  ;;  %11306 = vrot.lane.b32.xlu0 %v15631_v54, %s15794_s24  ;;  %v10958_v22 = vadd.f32 %v19625_v46, %v10636_v43  ;;  %v10775_v44 = vadd.f32 %v19625_v46, %v21187_v17 }
 0xb7a   :  { %v11059_v26 = vpop.permute.xlu0 %11058  ;;  %v15635_v10 = vpop.eup %15634  ;;  %15654 = vtanh.f32 %v10960_v45  ;;  %v10961_v57 = vadd.f32 %v14641_v11, %v19625_v46 }
 0xb7b   :  { %v19866_v3 = vsel %vm11394_vm3, %v15629_v9, %v11059_v26  ;;  %v10639_v2 = vpop.f32.mrb[175].mxu0  ;;  %v11061_v23 = vpop.permute.xlu1 %11060  ;;  %15656 = vtanh.f32 %v10773_v24  ;;  %11308 = vrot.lane.b32.xlu1 %v15635_v10, %s15794_s24  ;;  %v21188_v24 = vld [vmem:[#allocation44_spill] sm:$0xff] }
 0xb7c   :  { %v15637_v27 = vpop.eup %15636  ;;  %v19871_v4 = vsel %vm11394_vm3, %v15633_v6, %v11061_v23  ;;  %15658 = vtanh.f32 %v10961_v57  ;;  %v10959_v40 = vadd.f32 %v19625_v46, %v10639_v2  ;;  %v10780_v32 = vadd.f32 %v21188_v24, %v19625_v46  ;;  %v21194_v24 = vld [vmem:[#allocation67_spill] sm:$0xff] }
 0xb7d   :  { %v15639_v52 = vpop.eup %15638  ;;  %15660 = vtanh.f32 %v10770_v56  ;;  %v21189_v56 = vld [vmem:[#allocation62_spill] sm:$0xff] }
 0xb7e   :  { %v15641_v62 = vpop.eup %15640  ;;  %v11071_v0 = vpop.permute.xlu0 %11070  ;;  %11318 = vrot.lane.b32.xlu0 %v15639_v52, %s15794_s24  ;;  %15662 = vtanh.f32 %v10958_v22  ;;  %v10781_v11 = vadd.f32 %v21189_v56, %v19625_v46 }
 0xb7f   :  { %v15643_v29 = vpop.eup %15642  ;;  %v19879_v16 = vsel %vm11394_vm3, %v15637_v27, %v11071_v0  ;;  %v11073_v19 = vpop.permute.xlu1 %11072  ;;  %15664 = vtanh.f32 %v10771_v12  ;;  %v21190_v27 = vld [vmem:[#allocation57_spill] sm:$0xff] }
 0xb80   :  { %v15645_v15 = vpop.eup %15644  ;;  %v19884_v30 = vsel %vm11394_vm3, %v15641_v62, %v11073_v19  ;;  %v14644_v18 = vpop.f32.mrb[176].mxu0  ;;  %11320 = vrot.lane.b32.xlu1 %v15643_v29, %s15794_s24  ;;  %15666 = vtanh.f32 %v10959_v40  ;;  %v10778_v61 = vadd.f32 %v19625_v46, %v21190_v27 }
 0xb81   :  { %v15647_v58 = vpop.eup %15646  ;;  %v10964_v63 = vadd.f32 %v14644_v18, %v19625_v46  ;;  %v10652_v53 = vpop.f32.mrb[177].mxu0  ;;  %15668 = vtanh.f32 %v10776_v51 }
 0xb82   :  { %v15649_v55 = vpop.eup %15648  ;;  %v14645_v59 = vpop.f32.mrb[178].mxu0  ;;  %11314 = vrot.lane.b32.xlu0 %v15647_v58, %s15794_s24  ;;  %v10962_v34 = vadd.f32 %v19625_v46, %v10652_v53 }
 0xb83   :  { %v11067_v38 = vpop.permute.xlu0 %11066  ;;  %v15651_v21 = vpop.eup %15650  ;;  %15670 = vtanh.f32 %v10964_v63  ;;  %v10965_v37 = vadd.f32 %v14645_v59, %v19625_v46 }
 0xb84   :  { %v19894_v14 = vsel %vm11394_vm3, %v15645_v15, %v11067_v38  ;;  %v10655_v47 = vpop.f32.mrb[179].mxu0  ;;  %v11069_v42 = vpop.permute.xlu1 %11068  ;;  %15672 = vtanh.f32 %v10777_v33  ;;  %11316 = vrot.lane.b32.xlu1 %v15651_v21, %s15794_s24  ;;  %v21191_v15 = vld [vmem:[#allocation49_spill] sm:$0xff] }
 0xb85   :  { %v15653_v35 = vpop.eup %15652  ;;  %v19899_v20 = vsel %vm11394_vm3, %v15649_v55, %v11069_v42  ;;  %15674 = vtanh.f32 %v10965_v37  ;;  %v10963_v39 = vadd.f32 %v19625_v46, %v10655_v47  ;;  %v10779_v33 = vadd.f32 %v19625_v46, %v21191_v15  ;;  %v21192_v55 = vld [vmem:[#allocation54_spill] sm:$0xff]  ;;  %v21193_v47 = vld [vmem:[#allocation59_spill] sm:$0xff] }
 0xb86   :  { %v15655_v41 = vpop.eup %15654  ;;  %15676 = vtanh.f32 %v10774_v60  ;;  %v14648_v10 = vpop.f32.mrb[180].mxu0  ;;  %v10784_v60 = vadd.f32 %v21192_v55, %v19625_v46  ;;  %v10785_v42 = vadd.f32 %v21193_v47, %v19625_v46 }
 0xb87   :  { %v15657_v9 = vpop.eup %15656  ;;  %v11079_v54 = vpop.permute.xlu0 %11078  ;;  %11326 = vrot.lane.b32.xlu0 %v15655_v41, %s15794_s24  ;;  %15678 = vtanh.f32 %v10962_v34  ;;  %v10968_v57 = vadd.f32 %v14648_v10, %v19625_v46 }
 0xb88   :  { %v15659_v45 = vpop.eup %15658  ;;  %v19907_v43 = vsel %vm11394_vm3, %v15653_v35, %v11079_v54  ;;  %v11081_v6 = vpop.permute.xlu1 %11080  ;;  %15680 = vtanh.f32 %v10775_v44 }
 0xb89   :  { %v15661_v1 = vpop.eup %15660  ;;  %v19912_v26 = vsel %vm11394_vm3, %v15657_v9, %v11081_v6  ;;  %11328 = vrot.lane.b32.xlu1 %v15659_v45, %s15794_s24  ;;  %15682 = vtanh.f32 %v10963_v39  ;;  %v10668_v2 = vpop.f32.mrb[181].mxu0 }
 0xb8a   :  { %v15663_v22 = vpop.eup %15662  ;;  %15684 = vtanh.f32 %v10780_v32  ;;  %v14649_v12 = vpop.f32.mrb[182].mxu0  ;;  %v10966_v62 = vadd.f32 %v19625_v46, %v10668_v2  ;;  %v10782_v32 = vadd.f32 %v19625_v46, %v21194_v24  ;;  %v21195_v2 = vld [vmem:[#allocation64_spill] sm:$0xff] }
 0xb8b   :  { %v15665_v23 = vpop.eup %15664  ;;  %v11075_v52 = vpop.permute.xlu0 %11074  ;;  %11322 = vrot.lane.b32.xlu0 %v15663_v22, %s15794_s24  ;;  %15686 = vtanh.f32 %v10968_v57  ;;  %v10969_v49 = vadd.f32 %v14649_v12, %v19625_v46 }
 0xb8c   :  { %v15667_v40 = vpop.eup %15666  ;;  %v19922_v51 = vsel %vm11394_vm3, %v15661_v1, %v11075_v52  ;;  %v10671_v0 = vpop.f32.mrb[183].mxu0  ;;  %15688 = vtanh.f32 %v10781_v11 }
 0xb8d   :  { %v11077_v29 = vpop.permute.xlu1 %11076  ;;  %v15669_v19 = vpop.eup %15668  ;;  %11324 = vrot.lane.b32.xlu1 %v15667_v40, %s15794_s24  ;;  %15690 = vtanh.f32 %v10969_v49  ;;  %v10967_v63 = vadd.f32 %v19625_v46, %v10671_v0 }
 0xb8e   :  { %v19927_v18 = vsel %vm11394_vm3, %v15665_v23, %v11077_v29  ;;  %v15671_v58 = vpop.eup %15670  ;;  %15692 = vtanh.f32 %v10778_v61  ;;  %v14652_v17 = vpop.f32.mrb[184].mxu0  ;;  %v10783_v23 = vadd.f32 %v19625_v46, %v21195_v2 }
 0xb8f   :  { %v15673_v53 = vpop.eup %15672  ;;  %v11087_v59 = vpop.permute.xlu0 %11086  ;;  %11334 = vrot.lane.b32.xlu0 %v15671_v58, %s15794_s24  ;;  %15694 = vtanh.f32 %v10966_v62  ;;  %v10972_v41 = vadd.f32 %v14652_v17, %v19625_v46 }
 0xb90   :  { %v15675_v38 = vpop.eup %15674  ;;  %v19935_v21 = vsel %vm11394_vm3, %v15669_v19, %v11087_v59  ;;  %15696 = vtanh.f32 %v10779_v33  ;;  %v10684_v39 = vpop.f32.mrb[185].mxu0 }
 0xb91   :  { %v11089_v34 = vpop.permute.xlu1 %11088  ;;  %v15677_v37 = vpop.eup %15676  ;;  %11336 = vrot.lane.b32.xlu1 %v15675_v38, %s15794_s24  ;;  %15698 = vtanh.f32 %v10967_v63  ;;  %v10970_v1 = vadd.f32 %v19625_v46, %v10684_v39 }
 0xb92   :  { %v19940_v35 = vsel %vm11394_vm3, %v15673_v53, %v11089_v34  ;;  %v15679_v44 = vpop.eup %15678  ;;  %15700 = vtanh.f32 %v10784_v60  ;;  %v14653_v54 = vpop.f32.mrb[186].mxu0 }
 0xb93   :  { %v15681_v9 = vpop.eup %15680  ;;  %v11083_v45 = vpop.permute.xlu0 %11082  ;;  %11330 = vrot.lane.b32.xlu0 %v15679_v44, %s15794_s24  ;;  %15702 = vtanh.f32 %v10972_v41  ;;  %v10973_v56 = vadd.f32 %v14653_v54, %v19625_v46 }
 0xb94   :  { %v15683_v6 = vpop.eup %15682  ;;  %v19950_v11 = vsel %vm11394_vm3, %v15677_v37, %v11083_v45  ;;  %v10687_v10 = vpop.f32.mrb[187].mxu0  ;;  %15704 = vtanh.f32 %v10785_v42 }
 0xb95   :  { %v11085_v22 = vpop.permute.xlu1 %11084  ;;  %v15685_v57 = vpop.eup %15684  ;;  %11332 = vrot.lane.b32.xlu1 %v15683_v6, %s15794_s24  ;;  %15706 = vtanh.f32 %v10973_v56  ;;  %v10971_v12 = vadd.f32 %v19625_v46, %v10687_v10 }
 0xb96   :  { %v19955_v27 = vsel %vm11394_vm3, %v15681_v9, %v11085_v22  ;;  %v15687_v61 = vpop.eup %15686  ;;  %15708 = vtanh.f32 %v10782_v32  ;;  %v19966_v15 = vpop.f32.mrb[188].mxu0 }
 0xb97   :  { %v15689_v52 = vpop.eup %15688  ;;  %v11095_v40 = vpop.permute.xlu0 %11094  ;;  %11342 = vrot.lane.b32.xlu0 %v15687_v61, %s15794_s24  ;;  %15710 = vtanh.f32 %v10970_v1 }
 0xb98   :  { %v15691_v62 = vpop.eup %15690  ;;  %v19961_v49 = vsel %vm11394_vm3, %v15685_v57, %v11095_v40  ;;  %15712 = vtanh.f32 %v10783_v23  ;;  %v10700_v58 = vpop.f32.mrb[189].mxu0 }
 0xb99   :  { %v11097_v0 = vpop.permute.xlu1 %11096  ;;  %v15693_v29 = vpop.eup %15692  ;;  %11344 = vrot.lane.b32.xlu1 %v15691_v62, %s15794_s24  ;;  %15714 = vtanh.f32 %v10971_v12  ;;  %v10974_v53 = vadd.f32 %v19625_v46, %v10700_v58  ;;  %v19999_v12 = vld [vmem:[#allocation2] ss:$0 sm:$0xff] }
 0xb9a   :  { %v19964_v19 = vsel %vm11394_vm3, %v15689_v52, %v11097_v0  ;;  %v15695_v33 = vpop.eup %15694  ;;  %v19970_v55 = vpop.f32.mrb[190].mxu0 }
 0xb9b   :  { %v15697_v63 = vpop.eup %15696  ;;  %v11091_v60 = vpop.permute.xlu0 %11090  ;;  %11338 = vrot.lane.b32.xlu0 %v15695_v33, %s15794_s24  ;;  %15716 = vtanh.f32 %v10974_v53 }
 0xb9c   :  { %v15699_v59 = vpop.eup %15698  ;;  %v19974_v38 = vsel %vm11394_vm3, %v15693_v29, %v11091_v60  ;;  %v10703_v34 = vpop.f32.mrb[191].mxu0 }
 0xb9d   :  { %v11093_v37 = vpop.permute.xlu1 %11092  ;;  %v15701_v47 = vpop.eup %15700  ;;  %v10975_v42 = vadd.f32 %v19625_v46, %v10703_v34  ;;  %11340 = vrot.lane.b32.xlu1 %v15699_v59, %s15794_s24 }
 0xb9e   :  { %v19978_v17 = vsel %vm11394_vm3, %v15697_v63, %v11093_v37  ;;  %v15703_v44 = vpop.eup %15702 }
 0xb9f   :  { %v15705_v41 = vpop.eup %15704  ;;  %15718 = vtanh.f32 %v10975_v42  ;;  %v11103_v39 = vpop.permute.xlu0 %11102  ;;  %11350 = vrot.lane.b32.xlu0 %v15703_v44, %s15794_s24 }
 0xba0   :  { %v15707_v9 = vpop.eup %15706  ;;  %v19983_v24 = vsel %vm11394_vm3, %v15701_v47, %v11103_v39 }
 0xba1   :  { %21196 = vst [vmem:[#allocation68_spill] sm:$0xff] %v19983_v24  ;;  %v11105_v32 = vpop.permute.xlu1 %11104  ;;  %v15709_v54 = vpop.eup %15708  ;;  %11352 = vrot.lane.b32.xlu1 %v15707_v9, %s15794_s24 }
 0xba2   :  { %v19986_v45 = vsel %vm11394_vm3, %v15705_v41, %v11105_v32  ;;  %v15711_v46 = vpop.eup %15710 }
 0xba3   :  { %v15713_v6 = vpop.eup %15712  ;;  %11346 = vrot.lane.b32.xlu0 %v15711_v46, %s15794_s24  ;;  %v11099_v1 = vpop.permute.xlu0 %11098 }
 0xba4   :  { %v15715_v56 = vpop.eup %15714  ;;  %v19991_v10 = vsel %vm11394_vm3, %v15709_v54, %v11099_v1 }
 0xba5   :  { %21197 = vst [vmem:[#allocation8_spill] sm:$0xff] %v19991_v10  ;;  %v11101_v22 = vpop.permute.xlu1 %11100  ;;  %11348 = vrot.lane.b32.xlu1 %v15715_v56, %s15794_s24  ;;  %v15717_v2 = vpop.eup %15716 }
 0xba6   :  { %v19994_v57 = vsel %vm11394_vm3, %v15713_v6, %v11101_v22 }
 0xba7   :  { %21198 = vst [vmem:[#allocation4_spill] sm:$0xff] %v19994_v57  ;;  %11354 = vrot.lane.b32.xlu0 %v15717_v2, %s15794_s24 }
 0xba9   :  { %v15719_v23 = vpop.eup %15718 }
 0xbaa   :  { %11356 = vrot.lane.b32.xlu1 %v15719_v23, %s15794_s24 }
 0xbe1   :  { %v14492_v61 = vpop.f32.mrb[132].mxu1 }
 0xbe2   :  { %v10884_v52 = vadd.f32 %v19999_v12, %v14492_v61  ;;  %v9800_v40 = vpop.f32.mrb[133].mxu1 }
 0xbe3   :  { %v14493_v62 = vpop.f32.mrb[134].mxu1  ;;  %v10882_v0 = vadd.f32 %v19999_v12, %v9800_v40 }
 0xbe4   :  { %15720 = vtanh.f32 %v10884_v52  ;;  %v10885_v29 = vadd.f32 %v19999_v12, %v14493_v62  ;;  %v9803_v33 = vpop.f32.mrb[135].mxu1 }
 0xbe5   :  { %v10883_v58 = vadd.f32 %v19999_v12, %v9803_v33 }
 0xbe6   :  { %15722 = vtanh.f32 %v10885_v29 }
 0xbe7   :  { %15724 = vtanh.f32 %v10882_v0 }
 0xbe8   :  { %15726 = vtanh.f32 %v10883_v58 }
 0xbe9   :  { %v14496_v63 = vpop.f32.mrb[136].mxu1 }
 0xbea   :  { %v10888_v53 = vadd.f32 %v19999_v12, %v14496_v63  ;;  %v9816_v60 = vpop.f32.mrb[137].mxu1 }
 0xbeb   :  { %v14497_v59 = vpop.f32.mrb[138].mxu1  ;;  %v10886_v34 = vadd.f32 %v19999_v12, %v9816_v60 }
 0xbec   :  { %15728 = vtanh.f32 %v10888_v53  ;;  %v10889_v37 = vadd.f32 %v19999_v12, %v14497_v59  ;;  %v9819_v47 = vpop.f32.mrb[139].mxu1 }
 0xbed   :  { %v10887_v44 = vadd.f32 %v19999_v12, %v9819_v47 }
 0xbee   :  { %v15721_v42 = vpop.eup %15720  ;;  %15730 = vtanh.f32 %v10889_v37 }
 0xbef   :  { %11174 = vrot.lane.b32.xlu0 %v15721_v42, %s15795_s17  ;;  %15732 = vtanh.f32 %v10886_v34 }
 0xbf0   :  { %v15723_v41 = vpop.eup %15722  ;;  %15734 = vtanh.f32 %v10887_v44 }
 0xbf1   :  { %v14500_v39 = vpop.f32.mrb[140].mxu1  ;;  %11176 = vrot.lane.b32.xlu1 %v15723_v41, %s15795_s17  ;;  %v15725_v9 = vpop.eup %15724 }
 0xbf2   :  { %v10892_v32 = vadd.f32 %v19999_v12, %v14500_v39  ;;  %v9832_v54 = vpop.f32.mrb[141].mxu1  ;;  %v15727_v6 = vpop.eup %15726 }
 0xbf3   :  { %11170 = vrot.lane.b32.xlu0 %v15725_v9, %s15795_s17  ;;  %v14501_v46 = vpop.f32.mrb[142].mxu1  ;;  %v10890_v1 = vadd.f32 %v19999_v12, %v9832_v54 }
 0xbf4   :  { %15736 = vtanh.f32 %v10892_v32  ;;  %v10893_v56 = vadd.f32 %v19999_v12, %v14501_v46  ;;  %v9835_v22 = vpop.f32.mrb[143].mxu1 }
 0xbf5   :  { %11172 = vrot.lane.b32.xlu1 %v15727_v6, %s15795_s17  ;;  %v10891_v23 = vadd.f32 %v19999_v12, %v9835_v22 }
 0xbf6   :  { %v15729_v2 = vpop.eup %15728  ;;  %15738 = vtanh.f32 %v10893_v56  ;;  %v20034_v56 = vpop.permute.xlu0 %11302 }
 0xbf7   :  { %11182 = vrot.lane.b32.xlu0 %v15729_v2, %s15795_s17  ;;  %15740 = vtanh.f32 %v10890_v1 }
 0xbf8   :  { %v15731_v61 = vpop.eup %15730  ;;  %15742 = vtanh.f32 %v10891_v23 }
 0xbf9   :  { %v14504_v52 = vpop.f32.mrb[144].mxu1  ;;  %11184 = vrot.lane.b32.xlu1 %v15731_v61, %s15795_s17  ;;  %v15733_v40 = vpop.eup %15732 }
 0xbfa   :  { %v10896_v62 = vadd.f32 %v19999_v12, %v14504_v52  ;;  %v9848_v0 = vpop.f32.mrb[145].mxu1  ;;  %v15735_v33 = vpop.eup %15734 }
 0xbfb   :  { %11178 = vrot.lane.b32.xlu0 %v15733_v40, %s15795_s17  ;;  %v14505_v29 = vpop.f32.mrb[146].mxu1  ;;  %v10894_v58 = vadd.f32 %v19999_v12, %v9848_v0  ;;  %v20038_v52 = vpop.permute.xlu1 %11304 }
 0xbfc   :  { %15744 = vtanh.f32 %v10896_v62  ;;  %v10897_v63 = vadd.f32 %v19999_v12, %v14505_v29  ;;  %v9851_v53 = vpop.f32.mrb[147].mxu1 }
 0xbfd   :  { %11180 = vrot.lane.b32.xlu1 %v15735_v33, %s15795_s17  ;;  %v10895_v59 = vadd.f32 %v19999_v12, %v9851_v53  ;;  %v20045_v53 = vpop.permute.xlu0 %11298 }
 0xbfe   :  { %v15737_v60 = vpop.eup %15736  ;;  %15746 = vtanh.f32 %v10897_v63 }
 0xbff   :  { %11190 = vrot.lane.b32.xlu0 %v15737_v60, %s15795_s17  ;;  %15748 = vtanh.f32 %v10894_v58 }
 0xc00   :  { %v15739_v34 = vpop.eup %15738  ;;  %15750 = vtanh.f32 %v10895_v59  ;;  %v20048_v59 = vpop.permute.xlu1 %11300 }
 0xc01   :  { %v14508_v37 = vpop.f32.mrb[148].mxu1  ;;  %11192 = vrot.lane.b32.xlu1 %v15739_v34, %s15795_s17  ;;  %v15741_v47 = vpop.eup %15740 }
 0xc02   :  { %v10900_v42 = vadd.f32 %v19999_v12, %v14508_v37  ;;  %v9864_v44 = vpop.f32.mrb[149].mxu1  ;;  %v15743_v39 = vpop.eup %15742 }
 0xc03   :  { %11186 = vrot.lane.b32.xlu0 %v15741_v47, %s15795_s17  ;;  %v14509_v41 = vpop.f32.mrb[150].mxu1  ;;  %v10898_v9 = vadd.f32 %v19999_v12, %v9864_v44 }
 0xc04   :  { %15752 = vtanh.f32 %v10900_v42  ;;  %v10901_v32 = vadd.f32 %v19999_v12, %v14509_v41  ;;  %v9867_v54 = vpop.f32.mrb[151].mxu1 }
 0xc05   :  { %11188 = vrot.lane.b32.xlu1 %v15743_v39, %s15795_s17  ;;  %v10899_v6 = vadd.f32 %v19999_v12, %v9867_v54  ;;  %v20055_v54 = vpop.permute.xlu0 %11310 }
 0xc06   :  { %v15745_v46 = vpop.eup %15744  ;;  %15754 = vtanh.f32 %v10901_v32 }
 0xc07   :  { %11198 = vrot.lane.b32.xlu0 %v15745_v46, %s15795_s17  ;;  %15756 = vtanh.f32 %v10898_v9 }
 0xc08   :  { %v15747_v1 = vpop.eup %15746  ;;  %15758 = vtanh.f32 %v10899_v6 }
 0xc09   :  { %v14512_v22 = vpop.f32.mrb[152].mxu1  ;;  %11200 = vrot.lane.b32.xlu1 %v15747_v1, %s15795_s17  ;;  %v15749_v2 = vpop.eup %15748 }
 0xc0a   :  { %v10904_v23 = vadd.f32 %v19999_v12, %v14512_v22  ;;  %v9880_v61 = vpop.f32.mrb[153].mxu1  ;;  %v15751_v62 = vpop.eup %15750 }
 0xc0b   :  { %11194 = vrot.lane.b32.xlu0 %v15749_v2, %s15795_s17  ;;  %v14513_v40 = vpop.f32.mrb[154].mxu1  ;;  %v10902_v0 = vadd.f32 %v19999_v12, %v9880_v61  ;;  %v20059_v1 = vpop.permute.xlu1 %11312 }
 0xc0c   :  { %15760 = vtanh.f32 %v10904_v23  ;;  %v10905_v29 = vadd.f32 %v19999_v12, %v14513_v40  ;;  %v9883_v33 = vpop.f32.mrb[155].mxu1 }
 0xc0d   :  { %11196 = vrot.lane.b32.xlu1 %v15751_v62, %s15795_s17  ;;  %v10903_v63 = vadd.f32 %v19999_v12, %v9883_v33  ;;  %v20064_v62 = vpop.permute.xlu0 %11306 }
 0xc0e   :  { %v15753_v58 = vpop.eup %15752  ;;  %15762 = vtanh.f32 %v10905_v29 }
 0xc0f   :  { %11206 = vrot.lane.b32.xlu0 %v15753_v58, %s15795_s17  ;;  %15764 = vtanh.f32 %v10902_v0 }
 0xc10   :  { %v15755_v60 = vpop.eup %15754  ;;  %15766 = vtanh.f32 %v10903_v63 }
 0xc11   :  { %v14516_v34 = vpop.f32.mrb[156].mxu1  ;;  %11208 = vrot.lane.b32.xlu1 %v15755_v60, %s15795_s17  ;;  %v15757_v37 = vpop.eup %15756 }
 0xc12   :  { %v10908_v47 = vadd.f32 %v19999_v12, %v14516_v34  ;;  %v9896_v42 = vpop.f32.mrb[157].mxu1  ;;  %v15759_v41 = vpop.eup %15758 }
 0xc13   :  { %11202 = vrot.lane.b32.xlu0 %v15757_v37, %s15795_s17  ;;  %v14517_v44 = vpop.f32.mrb[158].mxu1  ;;  %v10906_v39 = vadd.f32 %v19999_v12, %v9896_v42  ;;  %v20069_v60 = vpop.permute.xlu1 %11308  ;;  %v10976_v42 = vadd.f32 %v19999_v12, %v19966_v15 }
 0xc14   :  { %15768 = vtanh.f32 %v10908_v47  ;;  %v10909_v9 = vadd.f32 %v19999_v12, %v14517_v44  ;;  %v9899_v32 = vpop.f32.mrb[159].mxu1  ;;  %v20076_v44 = vpop.permute.xlu0 %11318 }
 0xc15   :  { %11204 = vrot.lane.b32.xlu1 %v15759_v41, %s15795_s17  ;;  %v10907_v6 = vadd.f32 %v19999_v12, %v9899_v32 }
 0xc16   :  { %v15761_v46 = vpop.eup %15760  ;;  %15770 = vtanh.f32 %v10909_v9 }
 0xc17   :  { %11214 = vrot.lane.b32.xlu0 %v15761_v46, %s15795_s17  ;;  %15772 = vtanh.f32 %v10906_v39  ;;  %v10977_v39 = vadd.f32 %v19999_v12, %v19970_v55  ;;  %v20081_v9 = vpop.permute.xlu1 %11320 }
 0xc18   :  { %v15763_v22 = vpop.eup %15762  ;;  %15774 = vtanh.f32 %v10907_v6  ;;  %v20085_v15 = vpop.permute.xlu0 %11314 }
 0xc19   :  { %v14520_v2 = vpop.f32.mrb[160].mxu1  ;;  %11216 = vrot.lane.b32.xlu1 %v15763_v22, %s15795_s17  ;;  %v15765_v23 = vpop.eup %15764 }
 0xc1a   :  { %v10912_v61 = vadd.f32 %v19999_v12, %v14520_v2  ;;  %v9912_v40 = vpop.f32.mrb[161].mxu1  ;;  %v15767_v29 = vpop.eup %15766 }
 0xc1b   :  { %11210 = vrot.lane.b32.xlu0 %v15765_v23, %s15795_s17  ;;  %v14521_v0 = vpop.f32.mrb[162].mxu1  ;;  %v10910_v33 = vadd.f32 %v19999_v12, %v9912_v40  ;;  %v20088_v22 = vpop.permute.xlu1 %11316 }
 0xc1c   :  { %15776 = vtanh.f32 %v10912_v61  ;;  %v10913_v58 = vadd.f32 %v19999_v12, %v14521_v0  ;;  %v9915_v63 = vpop.f32.mrb[163].mxu1  ;;  %v20092_v2 = vpop.permute.xlu0 %11326 }
 0xc1d   :  { %11212 = vrot.lane.b32.xlu1 %v15767_v29, %s15795_s17  ;;  %v10911_v37 = vadd.f32 %v19999_v12, %v9915_v63 }
 0xc1e   :  { %v15769_v34 = vpop.eup %15768  ;;  %15778 = vtanh.f32 %v10913_v58 }
 0xc1f   :  { %11222 = vrot.lane.b32.xlu0 %v15769_v34, %s15795_s17  ;;  %15780 = vtanh.f32 %v10910_v33  ;;  %v20095_v61 = vpop.permute.xlu1 %11328 }
 0xc20   :  { %v15771_v47 = vpop.eup %15770  ;;  %15782 = vtanh.f32 %v10911_v37  ;;  %v20099_v0 = vpop.permute.xlu0 %11322 }
 0xc21   :  { %11224 = vrot.lane.b32.xlu1 %v15771_v47, %s15795_s17  ;;  %v15773_v41 = vpop.eup %15772  ;;  %15784 = vtanh.f32 %v10976_v42 }
 0xc22   :  { %v15775_v32 = vpop.eup %15774  ;;  %15786 = vtanh.f32 %v10977_v39 }
 0xc23   :  { %11218 = vrot.lane.b32.xlu0 %v15773_v41, %s15795_s17  ;;  %v20101_v29 = vpop.permute.xlu1 %11324 }
 0xc24   :  { %v20103_v33 = vpop.permute.xlu0 %11334 }
 0xc25   :  { %11220 = vrot.lane.b32.xlu1 %v15775_v32, %s15795_s17 }
 0xc26   :  { %v15777_v46 = vpop.eup %15776 }
 0xc27   :  { %11230 = vrot.lane.b32.xlu0 %v15777_v46, %s15795_s17  ;;  %v20105_v58 = vpop.permute.xlu1 %11336 }
 0xc28   :  { %v15779_v6 = vpop.eup %15778  ;;  %v20107_v63 = vpop.permute.xlu0 %11330 }
 0xc29   :  { %11232 = vrot.lane.b32.xlu1 %v15779_v6, %s15795_s17  ;;  %v15781_v55 = vpop.eup %15780 }
 0xc2a   :  { %v15783_v12 = vpop.eup %15782 }
 0xc2b   :  { %11226 = vrot.lane.b32.xlu0 %v15781_v55, %s15795_s17  ;;  %v15785_v23 = vpop.eup %15784  ;;  %v20109_v34 = vpop.permute.xlu1 %11332 }
 0xc2c   :  { %v15787_v40 = vpop.eup %15786  ;;  %v20111_v37 = vpop.permute.xlu0 %11342 }
 0xc2d   :  { %11228 = vrot.lane.b32.xlu1 %v15783_v12, %s15795_s17 }
 0xc2f   :  { %11358 = vrot.lane.b32.xlu0 %v15785_v23, %s15794_s24  ;;  %v20113_v47 = vpop.permute.xlu1 %11344 }
 0xc30   :  { %v20115_v42 = vpop.permute.xlu0 %11338 }
 0xc31   :  { %11360 = vrot.lane.b32.xlu1 %v15787_v40, %s15794_s24 }
 0xc33   :  { %v20117_v41 = vpop.permute.xlu1 %11340 }
 0xc34   :  { %v20119_v39 = vpop.permute.xlu0 %11350 }
 0xc37   :  { %v20121_v32 = vpop.permute.xlu1 %11352 }
 0xc38   :  { %v20123_v46 = vpop.permute.xlu0 %11346 }
 0xc3b   :  { %v20125_v6 = vpop.permute.xlu1 %11348 }
 0xc3c   :  { %v20127_v55 = vpop.permute.xlu0 %11354 }
 0xc3d   :  { %21199 = vst [vmem:[#allocation9_spill] sm:$0xff] %v20127_v55 }
 0xc3f   :  { %v20129_v12 = vpop.permute.xlu1 %11356 }
 0xc40   :  { %21200 = vst [vmem:[#allocation13_spill] sm:$0xff] %v20129_v12 }
 0xc61   :  { %v11175_v23 = vpop.permute.xlu0 %11174 }
 0xc62   :  { %v11430_v40 = vsel %vm11427_vm2, %v19798_v31, %v11175_v23 }
 0xc63   :  { %v11463_v24 = vsel %vm11460_vm15, %v11430_v40, %v20034_v56  ;;  %v11177_v57 = vpop.permute.xlu1 %11176 }
 0xc64   :  { %11496 = vst.msk [vmem:[%s20405_s20 + $0x10] sm:$0xff] %vm11493_vm1, %v11463_v24  ;;  %v11431_v55 = vsel %vm11427_vm2, %v19809_v5, %v11177_v57 }
 0xc65   :  { %v11464_v12 = vsel %vm11460_vm15, %v11431_v55, %v20038_v52  ;;  %v11171_v10 = vpop.permute.xlu0 %11170 }
 0xc66   :  { %11497 = vst.msk [vmem:[%s20405_s20 + $0x18] sm:$0xff] %vm11493_vm1, %v11464_v12  ;;  %v11428_v31 = vsel %vm11427_vm2, %v19801_v7, %v11171_v10 }
 0xc67   :  { %v11461_v56 = vsel %vm11460_vm15, %v11428_v31, %v20045_v53  ;;  %v11173_v23 = vpop.permute.xlu1 %11172 }
 0xc68   :  { %11494 = vst.msk [vmem:[%s20405_s20] sm:$0xff] %vm11493_vm1, %v11461_v56  ;;  %v11429_v5 = vsel %vm11427_vm2, %v19814_v48, %v11173_v23 }
 0xc69   :  { %v11462_v24 = vsel %vm11460_vm15, %v11429_v5, %v20048_v59  ;;  %v11183_v57 = vpop.permute.xlu0 %11182 }
 0xc6a   :  { %11495 = vst.msk [vmem:[%s20405_s20 + $0x8] sm:$0xff] %vm11493_vm1, %v11462_v24  ;;  %v11434_v7 = vsel %vm11427_vm2, %v19823_v13, %v11183_v57 }
 0xc6b   :  { %v11467_v10 = vsel %vm11460_vm15, %v11434_v7, %v20055_v54  ;;  %v11185_v52 = vpop.permute.xlu1 %11184 }
 0xc6c   :  { %11500 = vst.msk [vmem:[%s20405_s20 + $0x30] sm:$0xff] %vm11493_vm1, %v11467_v10  ;;  %v11435_v48 = vsel %vm11427_vm2, %v19828_v8, %v11185_v52 }
 0xc6d   :  { %v11468_v53 = vsel %vm11460_vm15, %v11435_v48, %v20059_v1  ;;  %v11179_v59 = vpop.permute.xlu0 %11178 }
 0xc6e   :  { %11501 = vst.msk [vmem:[%s20405_s20 + $0x38] sm:$0xff] %vm11493_vm1, %v11468_v53  ;;  %v11432_v13 = vsel %vm11427_vm2, %v19838_v50, %v11179_v59 }
 0xc6f   :  { %v11465_v54 = vsel %vm11460_vm15, %v11432_v13, %v20064_v62  ;;  %v11181_v55 = vpop.permute.xlu1 %11180 }
 0xc70   :  { %11498 = vst.msk [vmem:[%s20405_s20 + $0x20] sm:$0xff] %vm11493_vm1, %v11465_v54  ;;  %v11433_v8 = vsel %vm11427_vm2, %v19843_v25, %v11181_v55 }
 0xc71   :  { %v11466_v1 = vsel %vm11460_vm15, %v11433_v8, %v20069_v60  ;;  %v11191_v12 = vpop.permute.xlu0 %11190 }
 0xc72   :  { %11499 = vst.msk [vmem:[%s20405_s20 + $0x28] sm:$0xff] %vm11493_vm1, %v11466_v1  ;;  %v11438_v50 = vsel %vm11427_vm2, %v19851_v36, %v11191_v12 }
 0xc73   :  { %v11471_v62 = vsel %vm11460_vm15, %v11438_v50, %v20076_v44  ;;  %v11193_v40 = vpop.permute.xlu1 %11192 }
 0xc74   :  { %11504 = vst.msk [vmem:[%s20405_s20 + $0x50] sm:$0xff] %vm11493_vm1, %v11471_v62  ;;  %v11439_v25 = vsel %vm11427_vm2, %v19856_v28, %v11193_v40  ;;  %v21201_v40 = vld [vmem:[#allocation8_spill] sm:$0xff] }
 0xc75   :  { %v11472_v60 = vsel %vm11460_vm15, %v11439_v25, %v20081_v9  ;;  %v11187_v31 = vpop.permute.xlu0 %11186 }
 0xc76   :  { %11505 = vst.msk [vmem:[%s20405_s20 + $0x58] sm:$0xff] %vm11493_vm1, %v11472_v60  ;;  %v11436_v36 = vsel %vm11427_vm2, %v19866_v3, %v11187_v31  ;;  %v21202_v60 = vld [vmem:[#allocation9_spill] sm:$0xff] }
 0xc77   :  { %v11469_v44 = vsel %vm11460_vm15, %v11436_v36, %v20085_v15  ;;  %v11189_v56 = vpop.permute.xlu1 %11188 }
 0xc78   :  { %11502 = vst.msk [vmem:[%s20405_s20 + $0x40] sm:$0xff] %vm11493_vm1, %v11469_v44  ;;  %v11437_v28 = vsel %vm11427_vm2, %v19871_v4, %v11189_v56  ;;  %v21204_v44 = vld [vmem:[#allocation68_spill] sm:$0xff] }
 0xc79   :  { %v11470_v9 = vsel %vm11460_vm15, %v11437_v28, %v20088_v22  ;;  %v11199_v23 = vpop.permute.xlu0 %11198 }
 0xc7a   :  { %11503 = vst.msk [vmem:[%s20405_s20 + $0x48] sm:$0xff] %vm11493_vm1, %v11470_v9  ;;  %v11442_v3 = vsel %vm11427_vm2, %v19879_v16, %v11199_v23 }
 0xc7b   :  { %v11475_v15 = vsel %vm11460_vm15, %v11442_v3, %v20092_v2  ;;  %v11201_v5 = vpop.permute.xlu1 %11200 }
 0xc7c   :  { %11508 = vst.msk [vmem:[%s20405_s20 + $0x70] sm:$0xff] %vm11493_vm1, %v11475_v15  ;;  %v11443_v4 = vsel %vm11427_vm2, %v19884_v30, %v11201_v5 }
 0xc7d   :  { %v11476_v22 = vsel %vm11460_vm15, %v11443_v4, %v20095_v61  ;;  %v11195_v24 = vpop.permute.xlu0 %11194 }
 0xc7e   :  { %11509 = vst.msk [vmem:[%s20405_s20 + $0x78] sm:$0xff] %vm11493_vm1, %v11476_v22  ;;  %v11440_v16 = vsel %vm11427_vm2, %v19894_v14, %v11195_v24 }
 0xc7f   :  { %v11473_v2 = vsel %vm11460_vm15, %v11440_v16, %v20099_v0  ;;  %v11197_v57 = vpop.permute.xlu1 %11196 }
 0xc80   :  { %11506 = vst.msk [vmem:[%s20405_s20 + $0x60] sm:$0xff] %vm11493_vm1, %v11473_v2  ;;  %v11441_v30 = vsel %vm11427_vm2, %v19899_v20, %v11197_v57 }
 0xc81   :  { %v11474_v61 = vsel %vm11460_vm15, %v11441_v30, %v20101_v29  ;;  %v11207_v7 = vpop.permute.xlu0 %11206 }
 0xc82   :  { %11507 = vst.msk [vmem:[%s20405_s20 + $0x68] sm:$0xff] %vm11493_vm1, %v11474_v61  ;;  %v11446_v14 = vsel %vm11427_vm2, %v19907_v43, %v11207_v7 }
 0xc83   :  { %v11479_v0 = vsel %vm11460_vm15, %v11446_v14, %v20103_v33  ;;  %v11209_v10 = vpop.permute.xlu1 %11208 }
 0xc84   :  { %11512 = vst.msk [vmem:[%s20405_s20 + $0x90] sm:$0xff] %vm11493_vm1, %v11479_v0  ;;  %v11447_v20 = vsel %vm11427_vm2, %v19912_v26, %v11209_v10 }
 0xc85   :  { %v11480_v29 = vsel %vm11460_vm15, %v11447_v20, %v20105_v58  ;;  %v11203_v52 = vpop.permute.xlu0 %11202 }
 0xc86   :  { %11513 = vst.msk [vmem:[%s20405_s20 + $0x98] sm:$0xff] %vm11493_vm1, %v11480_v29  ;;  %v11444_v43 = vsel %vm11427_vm2, %v19922_v51, %v11203_v52 }
 0xc87   :  { %v11477_v33 = vsel %vm11460_vm15, %v11444_v43, %v20107_v63  ;;  %v11205_v48 = vpop.permute.xlu1 %11204 }
 0xc88   :  { %11510 = vst.msk [vmem:[%s20405_s20 + $0x80] sm:$0xff] %vm11493_vm1, %v11477_v33  ;;  %v11445_v26 = vsel %vm11427_vm2, %v19927_v18, %v11205_v48 }
 0xc89   :  { %v11478_v58 = vsel %vm11460_vm15, %v11445_v26, %v20109_v34  ;;  %v11215_v53 = vpop.permute.xlu0 %11214 }
 0xc8a   :  { %11511 = vst.msk [vmem:[%s20405_s20 + $0x88] sm:$0xff] %vm11493_vm1, %v11478_v58  ;;  %v11450_v51 = vsel %vm11427_vm2, %v19935_v21, %v11215_v53 }
 0xc8b   :  { %v11483_v63 = vsel %vm11460_vm15, %v11450_v51, %v20111_v37  ;;  %v11217_v59 = vpop.permute.xlu1 %11216 }
 0xc8c   :  { %11516 = vst.msk [vmem:[%s20405_s20 + $0xb0] sm:$0xff] %vm11493_vm1, %v11483_v63  ;;  %v11451_v18 = vsel %vm11427_vm2, %v19940_v35, %v11217_v59 }
 0xc8d   :  { %v11484_v34 = vsel %vm11460_vm15, %v11451_v18, %v20113_v47  ;;  %v11211_v13 = vpop.permute.xlu0 %11210 }
 0xc8e   :  { %11517 = vst.msk [vmem:[%s20405_s20 + $0xb8] sm:$0xff] %vm11493_vm1, %v11484_v34  ;;  %v11448_v21 = vsel %vm11427_vm2, %v19950_v11, %v11211_v13 }
 0xc8f   :  { %v11481_v37 = vsel %vm11460_vm15, %v11448_v21, %v20115_v42  ;;  %v11213_v54 = vpop.permute.xlu1 %11212 }
 0xc90   :  { %11514 = vst.msk [vmem:[%s20405_s20 + $0xa0] sm:$0xff] %vm11493_vm1, %v11481_v37  ;;  %v11449_v35 = vsel %vm11427_vm2, %v19955_v27, %v11213_v54 }
 0xc91   :  { %v11482_v47 = vsel %vm11460_vm15, %v11449_v35, %v20117_v41  ;;  %v11223_v55 = vpop.permute.xlu0 %11222 }
 0xc92   :  { %11515 = vst.msk [vmem:[%s20405_s20 + $0xa8] sm:$0xff] %vm11493_vm1, %v11482_v47  ;;  %v11454_v11 = vsel %vm11427_vm2, %v19961_v49, %v11223_v55 }
 0xc93   :  { %v11487_v42 = vsel %vm11460_vm15, %v11454_v11, %v20119_v39  ;;  %v11225_v8 = vpop.permute.xlu1 %11224 }
 0xc94   :  { %11520 = vst.msk [vmem:[%s20405_s20 + $0xd0] sm:$0xff] %vm11493_vm1, %v11487_v42  ;;  %v11455_v27 = vsel %vm11427_vm2, %v19964_v19, %v11225_v8 }
 0xc95   :  { %v11488_v41 = vsel %vm11460_vm15, %v11455_v27, %v20121_v32  ;;  %v11219_v1 = vpop.permute.xlu0 %11218 }
 0xc96   :  { %11521 = vst.msk [vmem:[%s20405_s20 + $0xd8] sm:$0xff] %vm11493_vm1, %v11488_v41  ;;  %v11452_v49 = vsel %vm11427_vm2, %v19974_v38, %v11219_v1 }
 0xc97   :  { %v11485_v39 = vsel %vm11460_vm15, %v11452_v49, %v20123_v46  ;;  %v11221_v12 = vpop.permute.xlu1 %11220 }
 0xc98   :  { %11518 = vst.msk [vmem:[%s20405_s20 + $0xc0] sm:$0xff] %vm11493_vm1, %v11485_v39  ;;  %v11453_v19 = vsel %vm11427_vm2, %v19978_v17, %v11221_v12 }
 0xc99   :  { %v11486_v32 = vsel %vm11460_vm15, %v11453_v19, %v20125_v6  ;;  %v11231_v50 = vpop.permute.xlu0 %11230  ;;  %v21203_v6 = vld [vmem:[#allocation4_spill] sm:$0xff] }
 0xc9a   :  { %11519 = vst.msk [vmem:[%s20405_s20 + $0xc8] sm:$0xff] %vm11493_vm1, %v11486_v32  ;;  %v11458_v56 = vsel %vm11427_vm2, %v21204_v44, %v11231_v50 }
 0xc9b   :  { %v11233_v38 = vpop.permute.xlu1 %11232 }
 0xc9c   :  { %v11459_v46 = vsel %vm11427_vm2, %v19986_v45, %v11233_v38  ;;  %v21205_v45 = vld [vmem:[#allocation13_spill] sm:$0xff] }
 0xc9d   :  { %v11227_v62 = vpop.permute.xlu0 %11226 }
 0xc9e   :  { %v11456_v25 = vsel %vm11427_vm2, %v21201_v40, %v11227_v62 }
 0xc9f   :  { %v11489_v17 = vsel %vm11460_vm15, %v11456_v25, %v21202_v60  ;;  %v11229_v31 = vpop.permute.xlu1 %11228 }
 0xca0   :  { %11522 = vst.msk [vmem:[%s20405_s20 + $0xe0] sm:$0xff] %vm11493_vm1, %v11489_v17  ;;  %v11457_v36 = vsel %vm11427_vm2, %v21203_v6, %v11229_v31 }
 0xca1   :  { %v11490_v28 = vsel %vm11460_vm15, %v11457_v36, %v21205_v45  ;;  %v11359_v9 = vpop.permute.xlu0 %11358 }
 0xca2   :  { %11523 = vst.msk [vmem:[%s20405_s20 + $0xe8] sm:$0xff] %vm11493_vm1, %v11490_v28  ;;  %v11491_v23 = vsel %vm11460_vm15, %v11458_v56, %v11359_v9 }
 0xca3   :  { %11524 = vst.msk [vmem:[%s20405_s20 + $0xf0] sm:$0xff] %vm11493_vm1, %v11491_v23  ;;  %v11361_v3 = vpop.permute.xlu1 %11360 }
 0xca4   :  { %v11492_v15 = vsel %vm11460_vm15, %v11459_v46, %v11361_v3 }
 0xca5   :  { %11525 = vst.msk [vmem:[%s20405_s20 + $0xf8] sm:$0xff] %vm11493_vm1, %v11492_v15 }

</bundles_post_ra>
